<compile_context>
chip_gen: v5e
topology: v5e:2x2
jax: 0.10.0
libtpu: 0.0.40
codegen_flags: <defaults>
</compile_context>

<pallas_src>
import jax
import jax.numpy as jnp
from jax import lax
from jax.experimental import pallas as pl
from jax.experimental.pallas import tpu as pltpu


_POOL_OFFS = [(0, 0), (0, 1), (1, 0), (1, 1)]                     # 2x2 pool window
_KOFFS = [(dy, dx) for dy in range(3) for dx in range(3)]         # 3x3 conv taps


def _fused_cnn_kernel(p1_ref, w1_ref, b1_ref, w2_ref, b2_ref,
                      wfc_ref, bfc_ref, out_ref, pf_ref, p2_ref):
    """Whole SimpleCNN forward for one image, all intermediates in VMEM.

    p1_ref : (1, 784, 9)   conv1 im2col patches, pool position folded into rows,
                           pooled positions in parity-plane order (see wrapper)
    w1_ref : (9, 16)       conv1 weights (dy, dx) x Cout
    b1_ref : (1, 16)
    w2_ref : (144, 32)     conv2 weights (dy, dx, cin) x Cout
    b2_ref : (1, 32)
    wfc_ref: (32, 56, nc)  fc weights laid out [cout, i*8+j, nc], zero at j == 7
    bfc_ref: (1, nc)
    out_ref: (1, 1, nc)    logits
    pf_ref : (4, 72, 16)   scratch: zero-padded parity planes of pooled conv1 out
    p2_ref : (224, 144)    scratch: on-chip conv2 im2col patch matrix
    """
    # ---- conv1: ONE (784,9)x(9,16) MXU matmul + bias + ReLU, then 2x2 max-pool
    # (the 4 pool positions are the 4 contiguous 196-row blocks).
    z1 = jnp.dot(p1_ref[0], w1_ref[...], preferred_element_type=jnp.float32)
    z1 = jnp.maximum(z1 + b1_ref[...], 0.0)                       # (784, 16)
    y1 = jnp.maximum(jnp.maximum(z1[0:196], z1[196:392]),
                     jnp.maximum(z1[392:588], z1[588:784]))       # (196, 16)

    # ---- scatter pooled conv1 output into 4 zero-padded parity planes.
    # Plane k=2a+b holds Y1p[2u+a, 2v+b, :] of the zero-padded (16,16,16)
    # conv2 input, stored row-major 8-wide, so every pool-folded conv2 patch
    # block below is a contiguous 56-row slice (no strided reads needed).
    pf_ref[...] = jnp.zeros_like(pf_ref)
    for k in range(4):
        a, b = k // 2, k % 2
        for u in range(7):
            rs = (u + (1 - a)) * 8 + (1 - b)
            src = k * 49 + u * 7
            pf_ref[k, rs:rs + 7, :] = y1[src:src + 7, :]

    # ---- build the conv2 im2col patch matrix fully inside VMEM.
    # Rows: 4 pool positions x 56 (= 7x8, last column is ignored garbage);
    # lanes: 9 conv taps x 16 input channels.
    for p, (py, px) in enumerate(_POOL_OFFS):
        for idx, (dy, dx) in enumerate(_KOFFS):
            sy, sx = py + dy, px + dx
            k = 2 * (sy % 2) + (sx % 2)
            off = (sy // 2) * 8 + (sx // 2)
            p2_ref[p * 56:(p + 1) * 56, idx * 16:(idx + 1) * 16] = \
                pf_ref[k, off:off + 56, :]

    # ---- conv2: ONE (224,144)x(144,32) MXU matmul + bias + ReLU, then max-pool
    z2 = jnp.dot(p2_ref[...], w2_ref[...], preferred_element_type=jnp.float32)
    z2 = jnp.maximum(z2 + b2_ref[...], 0.0)                       # (224, 32)
    y2 = jnp.maximum(jnp.maximum(z2[0:56], z2[56:112]),
                     jnp.maximum(z2[112:168], z2[168:224]))       # (56, 32)

    # ---- fc, fused: out[n] = sum_{t,c} y2[t, c] * wfc[c, t, n].
    # 32-step VPU multiply-accumulate; garbage rows (j == 7) are killed by the
    # zero rows baked into wfc, so no masking is needed.
    nc = wfc_ref.shape[2]
    h = jnp.zeros((56, nc), jnp.float32)
    for c in range(32):
        h = h + y2[:, c:c + 1] * wfc_ref[c]
    out = jnp.sum(h, axis=0, keepdims=True) + bfc_ref[...]        # (1, nc)
    out_ref[0] = out


def _conv1_pool_patches(x):
    """(B, 28, 28) -> (B, 784, 9) pool-folded im2col for conv1.

    Row layout: [pool position P (4)] x [pooled output position in parity-plane
    order (196)].  Position index k*49 + u*7 + v (k = 2a + b) maps to the pooled
    conv1 output at (m, n) = (2u + 1 - a, 2v + 1 - b), which is exactly the
    ordering the kernel's parity-plane scatter expects.  Pure XLA glue.
    """
    B = x.shape[0]
    xpad = jnp.pad(x, ((0, 0), (1, 1), (1, 1)))                   # (B, 30, 30)

    ak = jnp.array([0, 0, 1, 1]); bk = jnp.array([0, 1, 0, 1])
    uu = jnp.arange(7); vv = jnp.arange(7)
    m = 2 * uu[None, :, None] + (1 - ak)[:, None, None]           # (4, 7, 1)
    n = 2 * vv[None, None, :] + (1 - bk)[:, None, None]           # (4, 1, 7)
    m = jnp.broadcast_to(m, (4, 7, 7)).reshape(196)
    n = jnp.broadcast_to(n, (4, 7, 7)).reshape(196)

    py = jnp.array([0, 0, 1, 1]); px = jnp.array([0, 1, 0, 1])    # pool offsets
    dy = jnp.repeat(jnp.arange(3), 3); dx = jnp.tile(jnp.arange(3), 3)

    rows = 2 * m[None, :, None] + py[:, None, None] + dy[None, None, :]  # (4,196,9)
    cols = 2 * n[None, :, None] + px[:, None, None] + dx[None, None, :]
    patches = xpad[:, rows, cols]                                 # (B, 4, 196, 9)
    return patches.reshape(B, 784, 9)


def _fc_weight_kernel_layout(wfc):
    """(32*7*7, nc) PyTorch-flatten-order fc weight -> (32, 56, nc) for the kernel.

    Kernel spatial index is t = i*8 + j (8-wide raster); j == 7 rows are zero so
    the kernel's garbage columns contribute nothing.
    """
    nc = wfc.shape[1]
    w = wfc.reshape(32, 7, 7, nc)
    w = jnp.pad(w, ((0, 0), (0, 0), (0, 1), (0, 0)))
    return w.reshape(32, 56, nc)


@jax.jit
def simple_cnn_forward(x_nchw, params):
    w1, b1, w2, b2, wfc, bfc = params
    B = x_nchw.shape[0]
    nc = wfc.shape[1]
    assert x_nchw.shape[1:] == (1, 28, 28)

    x = x_nchw.reshape(B, 28, 28)                                 # single channel
    p1 = _conv1_pool_patches(x)                                   # (B, 784, 9)
    w1_2d = w1.reshape(9, 16)                                     # (dy,dx) x Cout
    w2_2d = w2.reshape(144, 32)                                   # (dy,dx,cin) x Cout
    wfc_k = _fc_weight_kernel_layout(wfc)                         # (32, 56, nc)

    out = pl.pallas_call(
        _fused_cnn_kernel,
        out_shape=jax.ShapeDtypeStruct((B, 1, nc), jnp.float32),
        grid_spec=pltpu.PrefetchScalarGridSpec(
            num_scalar_prefetch=0,
            grid=(B,),
            in_specs=[
                pl.BlockSpec((1, 784, 9), lambda i: (i, 0, 0)),
                pl.BlockSpec((9, 16), lambda i: (0, 0)),
                pl.BlockSpec((1, 16), lambda i: (0, 0)),
                pl.BlockSpec((144, 32), lambda i: (0, 0)),
                pl.BlockSpec((1, 32), lambda i: (0, 0)),
                pl.BlockSpec((32, 56, nc), lambda i: (0, 0, 0)),
                pl.BlockSpec((1, nc), lambda i: (0, 0)),
            ],
            out_specs=pl.BlockSpec((1, 1, nc), lambda i: (i, 0, 0)),
            scratch_shapes=[
                pltpu.VMEM((4, 72, 16), jnp.float32),   # parity planes of pooled conv1
                pltpu.VMEM((224, 144), jnp.float32),    # on-chip conv2 im2col patches
            ],
        ),
        compiler_params=pltpu.CompilerParams(dimension_semantics=("parallel",)),
    )(p1, w1_2d, b1.reshape(1, 16), w2_2d, b2.reshape(1, 32),
      wfc_k, bfc.reshape(1, nc))
    return out.reshape(B, nc)


def ref_forward(x_nchw, params):
    """Pure-JAX reference (PyTorch semantics: NCHW conv, channel-major flatten)."""
    w1, b1, w2, b2, wfc, bfc = params
    x = jnp.transpose(x_nchw, (0, 2, 3, 1))
    dn = ("NHWC", "HWIO", "NHWC")

    def block(x, w, b):
        y = lax.conv_general_dilated(x, w, (1, 1), "SAME", dimension_numbers=dn,
                                     precision=lax.Precision.HIGHEST) + b
        y = jnp.maximum(y, 0.0)
        return lax.reduce_window(y, -jnp.inf, lax.max,
                                 (1, 2, 2, 1), (1, 2, 2, 1), "VALID")

    y = block(block(x, w1, b1), w2, b2)
    B = y.shape[0]
    flat = jnp.transpose(y, (0, 3, 1, 2)).reshape(B, -1)          # (C,H,W) flatten
    return jnp.dot(flat, wfc, precision=lax.Precision.HIGHEST) + bfc


def init_params(key, num_classes=10):
    ks = jax.random.split(key, 6)
    w1 = jax.random.normal(ks[0], (3, 3, 1, 16), jnp.float32) * 0.2    # conv1 (HWIO)
    b1 = jax.random.normal(ks[1], (16,), jnp.float32) * 0.05
    w2 = jax.random.normal(ks[2], (3, 3, 16, 32), jnp.float32) * 0.05  # conv2 (HWIO)
    b2 = jax.random.normal(ks[3], (32,), jnp.float32) * 0.05
    wfc = jax.random.normal(ks[4], (32 * 7 * 7, num_classes), jnp.float32) * 0.02
    bfc = jax.random.normal(ks[5], (num_classes,), jnp.float32) * 0.05
    return (w1, b1, w2, b2, wfc, bfc)


if __name__ == "__main__":
    num_classes = 10
    root = jax.random.PRNGKey(0)
    kx, kp = jax.random.split(root)
    # The fc layer (32*7*7 inputs) implies a 28x28 single-channel input.
    x = jax.random.normal(kx, (2, 1, 28, 28), jnp.float32)
    params = init_params(kp, num_classes)

    out = jax.block_until_ready(simple_cnn_forward(x, params))
    assert out.shape == (2, num_classes) and out.dtype == jnp.float32

    ref = jax.block_until_ready(ref_forward(x, params))
    err = float(jnp.max(jnp.abs(out - ref)))
    assert jnp.allclose(out, ref, atol=2e-3, rtol=2e-3), f"max abs err {err}"
    print("KERNEL_OK")
</pallas_src>

<mosaic_0001>
module attributes {stable_mosaic.version = 11 : i64} {
  func.func @_fused_cnn_kernel(%arg0: i32, %arg1: memref<1x784x9xf32, #tpu.memory_space<vmem>>, %arg2: memref<9x16xf32, #tpu.memory_space<vmem>>, %arg3: memref<1x16xf32, #tpu.memory_space<vmem>>, %arg4: memref<144x32xf32, #tpu.memory_space<vmem>>, %arg5: memref<1x32xf32, #tpu.memory_space<vmem>>, %arg6: memref<32x56x10xf32, #tpu.memory_space<vmem>>, %arg7: memref<1x10xf32, #tpu.memory_space<vmem>>, %arg8: memref<1x1x10xf32, #tpu.memory_space<vmem>>, %arg9: memref<4x72x16xf32, #tpu.memory_space<vmem>>, %arg10: memref<224x144xf32, #tpu.memory_space<vmem>>) attributes {dimension_semantics = [#tpu.dimension_semantics<parallel>], iteration_bounds = array<i64: 2>, scalar_prefetch = 0 : i64, scratch_operands = 2 : i64, tpu.core_type = #tpu.core_type<tc>, window_params = [{transform_indices = @transform_0, window_bounds = array<i64: 1, 784, 9>}, {pipeline_mode = #tpu.pipeline_mode<synchronous>, transform_indices = @transform_1, window_bounds = array<i64: 9, 16>}, {pipeline_mode = #tpu.pipeline_mode<synchronous>, transform_indices = @transform_2, window_bounds = array<i64: 1, 16>}, {pipeline_mode = #tpu.pipeline_mode<synchronous>, transform_indices = @transform_3, window_bounds = array<i64: 144, 32>}, {pipeline_mode = #tpu.pipeline_mode<synchronous>, transform_indices = @transform_4, window_bounds = array<i64: 1, 32>}, {pipeline_mode = #tpu.pipeline_mode<synchronous>, transform_indices = @transform_5, window_bounds = array<i64: 32, 56, 10>}, {pipeline_mode = #tpu.pipeline_mode<synchronous>, transform_indices = @transform_6, window_bounds = array<i64: 1, 10>}, {transform_indices = @transform_7, window_bounds = array<i64: 1, 1, 10>}]} {
    %c0 = arith.constant 0 : index
    %c0_0 = arith.constant 0 : index
    %c0_1 = arith.constant 0 : index
    %0 = vector.load %arg1[%c0, %c0_0, %c0_1] : memref<1x784x9xf32, #tpu.memory_space<vmem>>, vector<1x784x9xf32>
    %1 = vector.shape_cast %0 : vector<1x784x9xf32> to vector<784x9xf32>
    %c0_2 = arith.constant 0 : index
    %c0_3 = arith.constant 0 : index
    %2 = vector.load %arg2[%c0_2, %c0_3] : memref<9x16xf32, #tpu.memory_space<vmem>>, vector<9x16xf32>
    %cst = arith.constant dense<0.000000e+00> : vector<784x16xf32>
    %3 = tpu.matmul %1, %2, %cst {dimension_numbers = #tpu.dot_dimension_numbers<[1], [0], [0], [1], [0, 0, 1, 1], [], []>} : vector<784x9xf32>, vector<9x16xf32>, vector<784x16xf32> -> vector<784x16xf32>
    %c0_4 = arith.constant 0 : index
    %c0_5 = arith.constant 0 : index
    %4 = vector.load %arg3[%c0_4, %c0_5] : memref<1x16xf32, #tpu.memory_space<vmem>>, vector<1x16xf32>
    %5 = vector.broadcast %4 : vector<1x16xf32> to vector<784x16xf32>
    %6 = arith.addf %3, %5 : vector<784x16xf32>
    %cst_6 = arith.constant 0.000000e+00 : f32
    %7 = vector.broadcast %cst_6 : f32 to vector<784x16xf32>
    %8 = arith.maximumf %6, %7 : vector<784x16xf32>
    %9 = vector.extract_strided_slice %8 {offsets = [0, 0], sizes = [196, 16], strides = [1, 1]} : vector<784x16xf32> to vector<196x16xf32>
    %10 = vector.extract_strided_slice %8 {offsets = [196, 0], sizes = [196, 16], strides = [1, 1]} : vector<784x16xf32> to vector<196x16xf32>
    %11 = arith.maximumf %9, %10 : vector<196x16xf32>
    %12 = vector.extract_strided_slice %8 {offsets = [392, 0], sizes = [196, 16], strides = [1, 1]} : vector<784x16xf32> to vector<196x16xf32>
    %13 = vector.extract_strided_slice %8 {offsets = [588, 0], sizes = [196, 16], strides = [1, 1]} : vector<784x16xf32> to vector<196x16xf32>
    %14 = arith.maximumf %12, %13 : vector<196x16xf32>
    %15 = arith.maximumf %11, %14 : vector<196x16xf32>
    %cst_7 = arith.constant 0.000000e+00 : f32
    %16 = vector.broadcast %cst_7 : f32 to vector<4x72x16xf32>
    %c0_8 = arith.constant 0 : index
    %c0_9 = arith.constant 0 : index
    %c0_10 = arith.constant 0 : index
    %17 = vector.load %arg9[%c0_8, %c0_9, %c0_10] : memref<4x72x16xf32, #tpu.memory_space<vmem>>, vector<4x72x16xf32>
    tpu.vector_store %arg9[%c0_8, %c0_9, %c0_10], %16 {strides = array<i32>} : memref<4x72x16xf32, #tpu.memory_space<vmem>>, vector<4x72x16xf32>,
    %18 = vector.extract_strided_slice %15 {offsets = [0, 0], sizes = [7, 16], strides = [1, 1]} : vector<196x16xf32> to vector<7x16xf32>
    %c0_11 = arith.constant 0 : index
    %c9 = arith.constant 9 : index
    %c0_12 = arith.constant 0 : index
    %19 = vector.load %arg9[%c0_11, %c9, %c0_12] : memref<4x72x16xf32, #tpu.memory_space<vmem>>, vector<1x7x16xf32>
    %20 = vector.shape_cast %19 : vector<1x7x16xf32> to vector<7x16xf32>
    %21 = vector.shape_cast %18 : vector<7x16xf32> to vector<1x7x16xf32>
    tpu.vector_store %arg9[%c0_11, %c9, %c0_12], %21 {strides = array<i32>} : memref<4x72x16xf32, #tpu.memory_space<vmem>>, vector<1x7x16xf32>,
    %22 = vector.extract_strided_slice %15 {offsets = [7, 0], sizes = [7, 16], strides = [1, 1]} : vector<196x16xf32> to vector<7x16xf32>
    %c0_13 = arith.constant 0 : index
    %c17 = arith.constant 17 : index
    %c0_14 = arith.constant 0 : index
    %23 = vector.load %arg9[%c0_13, %c17, %c0_14] : memref<4x72x16xf32, #tpu.memory_space<vmem>>, vector<1x7x16xf32>
    %24 = vector.shape_cast %23 : vector<1x7x16xf32> to vector<7x16xf32>
    %25 = vector.shape_cast %22 : vector<7x16xf32> to vector<1x7x16xf32>
    tpu.vector_store %arg9[%c0_13, %c17, %c0_14], %25 {strides = array<i32>} : memref<4x72x16xf32, #tpu.memory_space<vmem>>, vector<1x7x16xf32>,
    %26 = vector.extract_strided_slice %15 {offsets = [14, 0], sizes = [7, 16], strides = [1, 1]} : vector<196x16xf32> to vector<7x16xf32>
    %c0_15 = arith.constant 0 : index
    %c25 = arith.constant 25 : index
    %c0_16 = arith.constant 0 : index
    %27 = vector.load %arg9[%c0_15, %c25, %c0_16] : memref<4x72x16xf32, #tpu.memory_space<vmem>>, vector<1x7x16xf32>
    %28 = vector.shape_cast %27 : vector<1x7x16xf32> to vector<7x16xf32>
    %29 = vector.shape_cast %26 : vector<7x16xf32> to vector<1x7x16xf32>
    tpu.vector_store %arg9[%c0_15, %c25, %c0_16], %29 {strides = array<i32>} : memref<4x72x16xf32, #tpu.memory_space<vmem>>, vector<1x7x16xf32>,
    %30 = vector.extract_strided_slice %15 {offsets = [21, 0], sizes = [7, 16], strides = [1, 1]} : vector<196x16xf32> to vector<7x16xf32>
    %c0_17 = arith.constant 0 : index
    %c33 = arith.constant 33 : index
    %c0_18 = arith.constant 0 : index
    %31 = vector.load %arg9[%c0_17, %c33, %c0_18] : memref<4x72x16xf32, #tpu.memory_space<vmem>>, vector<1x7x16xf32>
    %32 = vector.shape_cast %31 : vector<1x7x16xf32> to vector<7x16xf32>
    %33 = vector.shape_cast %30 : vector<7x16xf32> to vector<1x7x16xf32>
    tpu.vector_store %arg9[%c0_17, %c33, %c0_18], %33 {strides = array<i32>} : memref<4x72x16xf32, #tpu.memory_space<vmem>>, vector<1x7x16xf32>,
    %34 = vector.extract_strided_slice %15 {offsets = [28, 0], sizes = [7, 16], strides = [1, 1]} : vector<196x16xf32> to vector<7x16xf32>
    %c0_19 = arith.constant 0 : index
    %c41 = arith.constant 41 : index
    %c0_20 = arith.constant 0 : index
    %35 = vector.load %arg9[%c0_19, %c41, %c0_20] : memref<4x72x16xf32, #tpu.memory_space<vmem>>, vector<1x7x16xf32>
    %36 = vector.shape_cast %35 : vector<1x7x16xf32> to vector<7x16xf32>
    %37 = vector.shape_cast %34 : vector<7x16xf32> to vector<1x7x16xf32>
    tpu.vector_store %arg9[%c0_19, %c41, %c0_20], %37 {strides = array<i32>} : memref<4x72x16xf32, #tpu.memory_space<vmem>>, vector<1x7x16xf32>,
    %38 = vector.extract_strided_slice %15 {offsets = [35, 0], sizes = [7, 16], strides = [1, 1]} : vector<196x16xf32> to vector<7x16xf32>
    %c0_21 = arith.constant 0 : index
    %c49 = arith.constant 49 : index
    %c0_22 = arith.constant 0 : index
    %39 = vector.load %arg9[%c0_21, %c49, %c0_22] : memref<4x72x16xf32, #tpu.memory_space<vmem>>, vector<1x7x16xf32>
    %40 = vector.shape_cast %39 : vector<1x7x16xf32> to vector<7x16xf32>
    %41 = vector.shape_cast %38 : vector<7x16xf32> to vector<1x7x16xf32>
    tpu.vector_store %arg9[%c0_21, %c49, %c0_22], %41 {strides = array<i32>} : memref<4x72x16xf32, #tpu.memory_space<vmem>>, vector<1x7x16xf32>,
    %42 = vector.extract_strided_slice %15 {offsets = [42, 0], sizes = [7, 16], strides = [1, 1]} : vector<196x16xf32> to vector<7x16xf32>
    %c0_23 = arith.constant 0 : index
    %c57 = arith.constant 57 : index
    %c0_24 = arith.constant 0 : index
    %43 = vector.load %arg9[%c0_23, %c57, %c0_24] : memref<4x72x16xf32, #tpu.memory_space<vmem>>, vector<1x7x16xf32>
    %44 = vector.shape_cast %43 : vector<1x7x16xf32> to vector<7x16xf32>
    %45 = vector.shape_cast %42 : vector<7x16xf32> to vector<1x7x16xf32>
    tpu.vector_store %arg9[%c0_23, %c57, %c0_24], %45 {strides = array<i32>} : memref<4x72x16xf32, #tpu.memory_space<vmem>>, vector<1x7x16xf32>,
    %46 = vector.extract_strided_slice %15 {offsets = [49, 0], sizes = [7, 16], strides = [1, 1]} : vector<196x16xf32> to vector<7x16xf32>
    %c1 = arith.constant 1 : index
    %c8 = arith.constant 8 : index
    %c0_25 = arith.constant 0 : index
    %47 = vector.load %arg9[%c1, %c8, %c0_25] : memref<4x72x16xf32, #tpu.memory_space<vmem>>, vector<1x7x16xf32>
    %48 = vector.shape_cast %47 : vector<1x7x16xf32> to vector<7x16xf32>
    %49 = vector.shape_cast %46 : vector<7x16xf32> to vector<1x7x16xf32>
    tpu.vector_store %arg9[%c1, %c8, %c0_25], %49 {strides = array<i32>} : memref<4x72x16xf32, #tpu.memory_space<vmem>>, vector<1x7x16xf32>,
    %50 = vector.extract_strided_slice %15 {offsets = [56, 0], sizes = [7, 16], strides = [1, 1]} : vector<196x16xf32> to vector<7x16xf32>
    %c1_26 = arith.constant 1 : index
    %c16 = arith.constant 16 : index
    %c0_27 = arith.constant 0 : index
    %51 = vector.load %arg9[%c1_26, %c16, %c0_27] : memref<4x72x16xf32, #tpu.memory_space<vmem>>, vector<1x7x16xf32>
    %52 = vector.shape_cast %51 : vector<1x7x16xf32> to vector<7x16xf32>
    %53 = vector.shape_cast %50 : vector<7x16xf32> to vector<1x7x16xf32>
    tpu.vector_store %arg9[%c1_26, %c16, %c0_27], %53 {strides = array<i32>} : memref<4x72x16xf32, #tpu.memory_space<vmem>>, vector<1x7x16xf32>,
    %54 = vector.extract_strided_slice %15 {offsets = [63, 0], sizes = [7, 16], strides = [1, 1]} : vector<196x16xf32> to vector<7x16xf32>
    %c1_28 = arith.constant 1 : index
    %c24 = arith.constant 24 : index
    %c0_29 = arith.constant 0 : index
    %55 = vector.load %arg9[%c1_28, %c24, %c0_29] : memref<4x72x16xf32, #tpu.memory_space<vmem>>, vector<1x7x16xf32>
    %56 = vector.shape_cast %55 : vector<1x7x16xf32> to vector<7x16xf32>
    %57 = vector.shape_cast %54 : vector<7x16xf32> to vector<1x7x16xf32>
    tpu.vector_store %arg9[%c1_28, %c24, %c0_29], %57 {strides = array<i32>} : memref<4x72x16xf32, #tpu.memory_space<vmem>>, vector<1x7x16xf32>,
    %58 = vector.extract_strided_slice %15 {offsets = [70, 0], sizes = [7, 16], strides = [1, 1]} : vector<196x16xf32> to vector<7x16xf32>
    %c1_30 = arith.constant 1 : index
    %c32 = arith.constant 32 : index
    %c0_31 = arith.constant 0 : index
    %59 = vector.load %arg9[%c1_30, %c32, %c0_31] : memref<4x72x16xf32, #tpu.memory_space<vmem>>, vector<1x7x16xf32>
    %60 = vector.shape_cast %59 : vector<1x7x16xf32> to vector<7x16xf32>
    %61 = vector.shape_cast %58 : vector<7x16xf32> to vector<1x7x16xf32>
    tpu.vector_store %arg9[%c1_30, %c32, %c0_31], %61 {strides = array<i32>} : memref<4x72x16xf32, #tpu.memory_space<vmem>>, vector<1x7x16xf32>,
    %62 = vector.extract_strided_slice %15 {offsets = [77, 0], sizes = [7, 16], strides = [1, 1]} : vector<196x16xf32> to vector<7x16xf32>
    %c1_32 = arith.constant 1 : index
    %c40 = arith.constant 40 : index
    %c0_33 = arith.constant 0 : index
    %63 = vector.load %arg9[%c1_32, %c40, %c0_33] : memref<4x72x16xf32, #tpu.memory_space<vmem>>, vector<1x7x16xf32>
    %64 = vector.shape_cast %63 : vector<1x7x16xf32> to vector<7x16xf32>
    %65 = vector.shape_cast %62 : vector<7x16xf32> to vector<1x7x16xf32>
    tpu.vector_store %arg9[%c1_32, %c40, %c0_33], %65 {strides = array<i32>} : memref<4x72x16xf32, #tpu.memory_space<vmem>>, vector<1x7x16xf32>,
    %66 = vector.extract_strided_slice %15 {offsets = [84, 0], sizes = [7, 16], strides = [1, 1]} : vector<196x16xf32> to vector<7x16xf32>
    %c1_34 = arith.constant 1 : index
    %c48 = arith.constant 48 : index
    %c0_35 = arith.constant 0 : index
    %67 = vector.load %arg9[%c1_34, %c48, %c0_35] : memref<4x72x16xf32, #tpu.memory_space<vmem>>, vector<1x7x16xf32>
    %68 = vector.shape_cast %67 : vector<1x7x16xf32> to vector<7x16xf32>
    %69 = vector.shape_cast %66 : vector<7x16xf32> to vector<1x7x16xf32>
    tpu.vector_store %arg9[%c1_34, %c48, %c0_35], %69 {strides = array<i32>} : memref<4x72x16xf32, #tpu.memory_space<vmem>>, vector<1x7x16xf32>,
    %70 = vector.extract_strided_slice %15 {offsets = [91, 0], sizes = [7, 16], strides = [1, 1]} : vector<196x16xf32> to vector<7x16xf32>
    %c1_36 = arith.constant 1 : index
    %c56 = arith.constant 56 : index
    %c0_37 = arith.constant 0 : index
    %71 = vector.load %arg9[%c1_36, %c56, %c0_37] : memref<4x72x16xf32, #tpu.memory_space<vmem>>, vector<1x7x16xf32>
    %72 = vector.shape_cast %71 : vector<1x7x16xf32> to vector<7x16xf32>
    %73 = vector.shape_cast %70 : vector<7x16xf32> to vector<1x7x16xf32>
    tpu.vector_store %arg9[%c1_36, %c56, %c0_37], %73 {strides = array<i32>} : memref<4x72x16xf32, #tpu.memory_space<vmem>>, vector<1x7x16xf32>,
    %74 = vector.extract_strided_slice %15 {offsets = [98, 0], sizes = [7, 16], strides = [1, 1]} : vector<196x16xf32> to vector<7x16xf32>
    %c2 = arith.constant 2 : index
    %c1_38 = arith.constant 1 : index
    %c0_39 = arith.constant 0 : index
    %75 = vector.load %arg9[%c2, %c1_38, %c0_39] : memref<4x72x16xf32, #tpu.memory_space<vmem>>, vector<1x7x16xf32>
    %76 = vector.shape_cast %75 : vector<1x7x16xf32> to vector<7x16xf32>
    %77 = vector.shape_cast %74 : vector<7x16xf32> to vector<1x7x16xf32>
    tpu.vector_store %arg9[%c2, %c1_38, %c0_39], %77 {strides = array<i32>} : memref<4x72x16xf32, #tpu.memory_space<vmem>>, vector<1x7x16xf32>,
    %78 = vector.extract_strided_slice %15 {offsets = [105, 0], sizes = [7, 16], strides = [1, 1]} : vector<196x16xf32> to vector<7x16xf32>
    %c2_40 = arith.constant 2 : index
    %c9_41 = arith.constant 9 : index
    %c0_42 = arith.constant 0 : index
    %79 = vector.load %arg9[%c2_40, %c9_41, %c0_42] : memref<4x72x16xf32, #tpu.memory_space<vmem>>, vector<1x7x16xf32>
    %80 = vector.shape_cast %79 : vector<1x7x16xf32> to vector<7x16xf32>
    %81 = vector.shape_cast %78 : vector<7x16xf32> to vector<1x7x16xf32>
    tpu.vector_store %arg9[%c2_40, %c9_41, %c0_42], %81 {strides = array<i32>} : memref<4x72x16xf32, #tpu.memory_space<vmem>>, vector<1x7x16xf32>,
    %82 = vector.extract_strided_slice %15 {offsets = [112, 0], sizes = [7, 16], strides = [1, 1]} : vector<196x16xf32> to vector<7x16xf32>
    %c2_43 = arith.constant 2 : index
    %c17_44 = arith.constant 17 : index
    %c0_45 = arith.constant 0 : index
    %83 = vector.load %arg9[%c2_43, %c17_44, %c0_45] : memref<4x72x16xf32, #tpu.memory_space<vmem>>, vector<1x7x16xf32>
    %84 = vector.shape_cast %83 : vector<1x7x16xf32> to vector<7x16xf32>
    %85 = vector.shape_cast %82 : vector<7x16xf32> to vector<1x7x16xf32>
    tpu.vector_store %arg9[%c2_43, %c17_44, %c0_45], %85 {strides = array<i32>} : memref<4x72x16xf32, #tpu.memory_space<vmem>>, vector<1x7x16xf32>,
    %86 = vector.extract_strided_slice %15 {offsets = [119, 0], sizes = [7, 16], strides = [1, 1]} : vector<196x16xf32> to vector<7x16xf32>
    %c2_46 = arith.constant 2 : index
    %c25_47 = arith.constant 25 : index
    %c0_48 = arith.constant 0 : index
    %87 = vector.load %arg9[%c2_46, %c25_47, %c0_48] : memref<4x72x16xf32, #tpu.memory_space<vmem>>, vector<1x7x16xf32>
    %88 = vector.shape_cast %87 : vector<1x7x16xf32> to vector<7x16xf32>
    %89 = vector.shape_cast %86 : vector<7x16xf32> to vector<1x7x16xf32>
    tpu.vector_store %arg9[%c2_46, %c25_47, %c0_48], %89 {strides = array<i32>} : memref<4x72x16xf32, #tpu.memory_space<vmem>>, vector<1x7x16xf32>,
    %90 = vector.extract_strided_slice %15 {offsets = [126, 0], sizes = [7, 16], strides = [1, 1]} : vector<196x16xf32> to vector<7x16xf32>
    %c2_49 = arith.constant 2 : index
    %c33_50 = arith.constant 33 : index
    %c0_51 = arith.constant 0 : index
    %91 = vector.load %arg9[%c2_49, %c33_50, %c0_51] : memref<4x72x16xf32, #tpu.memory_space<vmem>>, vector<1x7x16xf32>
    %92 = vector.shape_cast %91 : vector<1x7x16xf32> to vector<7x16xf32>
    %93 = vector.shape_cast %90 : vector<7x16xf32> to vector<1x7x16xf32>
    tpu.vector_store %arg9[%c2_49, %c33_50, %c0_51], %93 {strides = array<i32>} : memref<4x72x16xf32, #tpu.memory_space<vmem>>, vector<1x7x16xf32>,
    %94 = vector.extract_strided_slice %15 {offsets = [133, 0], sizes = [7, 16], strides = [1, 1]} : vector<196x16xf32> to vector<7x16xf32>
    %c2_52 = arith.constant 2 : index
    %c41_53 = arith.constant 41 : index
    %c0_54 = arith.constant 0 : index
    %95 = vector.load %arg9[%c2_52, %c41_53, %c0_54] : memref<4x72x16xf32, #tpu.memory_space<vmem>>, vector<1x7x16xf32>
    %96 = vector.shape_cast %95 : vector<1x7x16xf32> to vector<7x16xf32>
    %97 = vector.shape_cast %94 : vector<7x16xf32> to vector<1x7x16xf32>
    tpu.vector_store %arg9[%c2_52, %c41_53, %c0_54], %97 {strides = array<i32>} : memref<4x72x16xf32, #tpu.memory_space<vmem>>, vector<1x7x16xf32>,
    %98 = vector.extract_strided_slice %15 {offsets = [140, 0], sizes = [7, 16], strides = [1, 1]} : vector<196x16xf32> to vector<7x16xf32>
    %c2_55 = arith.constant 2 : index
    %c49_56 = arith.constant 49 : index
    %c0_57 = arith.constant 0 : index
    %99 = vector.load %arg9[%c2_55, %c49_56, %c0_57] : memref<4x72x16xf32, #tpu.memory_space<vmem>>, vector<1x7x16xf32>
    %100 = vector.shape_cast %99 : vector<1x7x16xf32> to vector<7x16xf32>
    %101 = vector.shape_cast %98 : vector<7x16xf32> to vector<1x7x16xf32>
    tpu.vector_store %arg9[%c2_55, %c49_56, %c0_57], %101 {strides = array<i32>} : memref<4x72x16xf32, #tpu.memory_space<vmem>>, vector<1x7x16xf32>,
    %102 = vector.extract_strided_slice %15 {offsets = [147, 0], sizes = [7, 16], strides = [1, 1]} : vector<196x16xf32> to vector<7x16xf32>
    %c3 = arith.constant 3 : index
    %c0_58 = arith.constant 0 : index
    %c0_59 = arith.constant 0 : index
    %103 = vector.load %arg9[%c3, %c0_58, %c0_59] : memref<4x72x16xf32, #tpu.memory_space<vmem>>, vector<1x7x16xf32>
    %104 = vector.shape_cast %103 : vector<1x7x16xf32> to vector<7x16xf32>
    %105 = vector.shape_cast %102 : vector<7x16xf32> to vector<1x7x16xf32>
    tpu.vector_store %arg9[%c3, %c0_58, %c0_59], %105 {strides = array<i32>} : memref<4x72x16xf32, #tpu.memory_space<vmem>>, vector<1x7x16xf32>,
    %106 = vector.extract_strided_slice %15 {offsets = [154, 0], sizes = [7, 16], strides = [1, 1]} : vector<196x16xf32> to vector<7x16xf32>
    %c3_60 = arith.constant 3 : index
    %c8_61 = arith.constant 8 : index
    %c0_62 = arith.constant 0 : index
    %107 = vector.load %arg9[%c3_60, %c8_61, %c0_62] : memref<4x72x16xf32, #tpu.memory_space<vmem>>, vector<1x7x16xf32>
    %108 = vector.shape_cast %107 : vector<1x7x16xf32> to vector<7x16xf32>
    %109 = vector.shape_cast %106 : vector<7x16xf32> to vector<1x7x16xf32>
    tpu.vector_store %arg9[%c3_60, %c8_61, %c0_62], %109 {strides = array<i32>} : memref<4x72x16xf32, #tpu.memory_space<vmem>>, vector<1x7x16xf32>,
    %110 = vector.extract_strided_slice %15 {offsets = [161, 0], sizes = [7, 16], strides = [1, 1]} : vector<196x16xf32> to vector<7x16xf32>
    %c3_63 = arith.constant 3 : index
    %c16_64 = arith.constant 16 : index
    %c0_65 = arith.constant 0 : index
    %111 = vector.load %arg9[%c3_63, %c16_64, %c0_65] : memref<4x72x16xf32, #tpu.memory_space<vmem>>, vector<1x7x16xf32>
    %112 = vector.shape_cast %111 : vector<1x7x16xf32> to vector<7x16xf32>
    %113 = vector.shape_cast %110 : vector<7x16xf32> to vector<1x7x16xf32>
    tpu.vector_store %arg9[%c3_63, %c16_64, %c0_65], %113 {strides = array<i32>} : memref<4x72x16xf32, #tpu.memory_space<vmem>>, vector<1x7x16xf32>,
    %114 = vector.extract_strided_slice %15 {offsets = [168, 0], sizes = [7, 16], strides = [1, 1]} : vector<196x16xf32> to vector<7x16xf32>
    %c3_66 = arith.constant 3 : index
    %c24_67 = arith.constant 24 : index
    %c0_68 = arith.constant 0 : index
    %115 = vector.load %arg9[%c3_66, %c24_67, %c0_68] : memref<4x72x16xf32, #tpu.memory_space<vmem>>, vector<1x7x16xf32>
    %116 = vector.shape_cast %115 : vector<1x7x16xf32> to vector<7x16xf32>
    %117 = vector.shape_cast %114 : vector<7x16xf32> to vector<1x7x16xf32>
    tpu.vector_store %arg9[%c3_66, %c24_67, %c0_68], %117 {strides = array<i32>} : memref<4x72x16xf32, #tpu.memory_space<vmem>>, vector<1x7x16xf32>,
    %118 = vector.extract_strided_slice %15 {offsets = [175, 0], sizes = [7, 16], strides = [1, 1]} : vector<196x16xf32> to vector<7x16xf32>
    %c3_69 = arith.constant 3 : index
    %c32_70 = arith.constant 32 : index
    %c0_71 = arith.constant 0 : index
    %119 = vector.load %arg9[%c3_69, %c32_70, %c0_71] : memref<4x72x16xf32, #tpu.memory_space<vmem>>, vector<1x7x16xf32>
    %120 = vector.shape_cast %119 : vector<1x7x16xf32> to vector<7x16xf32>
    %121 = vector.shape_cast %118 : vector<7x16xf32> to vector<1x7x16xf32>
    tpu.vector_store %arg9[%c3_69, %c32_70, %c0_71], %121 {strides = array<i32>} : memref<4x72x16xf32, #tpu.memory_space<vmem>>, vector<1x7x16xf32>,
    %122 = vector.extract_strided_slice %15 {offsets = [182, 0], sizes = [7, 16], strides = [1, 1]} : vector<196x16xf32> to vector<7x16xf32>
    %c3_72 = arith.constant 3 : index
    %c40_73 = arith.constant 40 : index
    %c0_74 = arith.constant 0 : index
    %123 = vector.load %arg9[%c3_72, %c40_73, %c0_74] : memref<4x72x16xf32, #tpu.memory_space<vmem>>, vector<1x7x16xf32>
    %124 = vector.shape_cast %123 : vector<1x7x16xf32> to vector<7x16xf32>
    %125 = vector.shape_cast %122 : vector<7x16xf32> to vector<1x7x16xf32>
    tpu.vector_store %arg9[%c3_72, %c40_73, %c0_74], %125 {strides = array<i32>} : memref<4x72x16xf32, #tpu.memory_space<vmem>>, vector<1x7x16xf32>,
    %126 = vector.extract_strided_slice %15 {offsets = [189, 0], sizes = [7, 16], strides = [1, 1]} : vector<196x16xf32> to vector<7x16xf32>
    %c3_75 = arith.constant 3 : index
    %c48_76 = arith.constant 48 : index
    %c0_77 = arith.constant 0 : index
    %127 = vector.load %arg9[%c3_75, %c48_76, %c0_77] : memref<4x72x16xf32, #tpu.memory_space<vmem>>, vector<1x7x16xf32>
    %128 = vector.shape_cast %127 : vector<1x7x16xf32> to vector<7x16xf32>
    %129 = vector.shape_cast %126 : vector<7x16xf32> to vector<1x7x16xf32>
    tpu.vector_store %arg9[%c3_75, %c48_76, %c0_77], %129 {strides = array<i32>} : memref<4x72x16xf32, #tpu.memory_space<vmem>>, vector<1x7x16xf32>,
    %c0_78 = arith.constant 0 : index
    %c0_79 = arith.constant 0 : index
    %c0_80 = arith.constant 0 : index
    %130 = vector.load %arg9[%c0_78, %c0_79, %c0_80] : memref<4x72x16xf32, #tpu.memory_space<vmem>>, vector<1x56x16xf32>
    %131 = vector.shape_cast %130 : vector<1x56x16xf32> to vector<56x16xf32>
    %c0_81 = arith.constant 0 : index
    %c0_82 = arith.constant 0 : index
    %132 = vector.load %arg10[%c0_81, %c0_82] : memref<224x144xf32, #tpu.memory_space<vmem>>, vector<56x16xf32>
    tpu.vector_store %arg10[%c0_81, %c0_82], %131 {strides = array<i32>} : memref<224x144xf32, #tpu.memory_space<vmem>>, vector<56x16xf32>,
    %c1_83 = arith.constant 1 : index
    %c0_84 = arith.constant 0 : index
    %c0_85 = arith.constant 0 : index
    %133 = vector.load %arg9[%c1_83, %c0_84, %c0_85] : memref<4x72x16xf32, #tpu.memory_space<vmem>>, vector<1x56x16xf32>
    %134 = vector.shape_cast %133 : vector<1x56x16xf32> to vector<56x16xf32>
    %c0_86 = arith.constant 0 : index
    %c16_87 = arith.constant 16 : index
    %135 = vector.load %arg10[%c0_86, %c16_87] : memref<224x144xf32, #tpu.memory_space<vmem>>, vector<56x16xf32>
    tpu.vector_store %arg10[%c0_86, %c16_87], %134 {strides = array<i32>} : memref<224x144xf32, #tpu.memory_space<vmem>>, vector<56x16xf32>,
    %c0_88 = arith.constant 0 : index
    %c1_89 = arith.constant 1 : index
    %c0_90 = arith.constant 0 : index
    %136 = vector.load %arg9[%c0_88, %c1_89, %c0_90] : memref<4x72x16xf32, #tpu.memory_space<vmem>>, vector<1x56x16xf32>
    %137 = vector.shape_cast %136 : vector<1x56x16xf32> to vector<56x16xf32>
    %c0_91 = arith.constant 0 : index
    %c32_92 = arith.constant 32 : index
    %138 = vector.load %arg10[%c0_91, %c32_92] : memref<224x144xf32, #tpu.memory_space<vmem>>, vector<56x16xf32>
    tpu.vector_store %arg10[%c0_91, %c32_92], %137 {strides = array<i32>} : memref<224x144xf32, #tpu.memory_space<vmem>>, vector<56x16xf32>,
    %c2_93 = arith.constant 2 : index
    %c0_94 = arith.constant 0 : index
    %c0_95 = arith.constant 0 : index
    %139 = vector.load %arg9[%c2_93, %c0_94, %c0_95] : memref<4x72x16xf32, #tpu.memory_space<vmem>>, vector<1x56x16xf32>
    %140 = vector.shape_cast %139 : vector<1x56x16xf32> to vector<56x16xf32>
    %c0_96 = arith.constant 0 : index
    %c48_97 = arith.constant 48 : index
    %141 = vector.load %arg10[%c0_96, %c48_97] : memref<224x144xf32, #tpu.memory_space<vmem>>, vector<56x16xf32>
    tpu.vector_store %arg10[%c0_96, %c48_97], %140 {strides = array<i32>} : memref<224x144xf32, #tpu.memory_space<vmem>>, vector<56x16xf32>,
    %c3_98 = arith.constant 3 : index
    %c0_99 = arith.constant 0 : index
    %c0_100 = arith.constant 0 : index
    %142 = vector.load %arg9[%c3_98, %c0_99, %c0_100] : memref<4x72x16xf32, #tpu.memory_space<vmem>>, vector<1x56x16xf32>
    %143 = vector.shape_cast %142 : vector<1x56x16xf32> to vector<56x16xf32>
    %c0_101 = arith.constant 0 : index
    %c64 = arith.constant 64 : index
    %144 = vector.load %arg10[%c0_101, %c64] : memref<224x144xf32, #tpu.memory_space<vmem>>, vector<56x16xf32>
    tpu.vector_store %arg10[%c0_101, %c64], %143 {strides = array<i32>} : memref<224x144xf32, #tpu.memory_space<vmem>>, vector<56x16xf32>,
    %c2_102 = arith.constant 2 : index
    %c1_103 = arith.constant 1 : index
    %c0_104 = arith.constant 0 : index
    %145 = vector.load %arg9[%c2_102, %c1_103, %c0_104] : memref<4x72x16xf32, #tpu.memory_space<vmem>>, vector<1x56x16xf32>
    %146 = vector.shape_cast %145 : vector<1x56x16xf32> to vector<56x16xf32>
    %c0_105 = arith.constant 0 : index
    %c80 = arith.constant 80 : index
    %147 = vector.load %arg10[%c0_105, %c80] : memref<224x144xf32, #tpu.memory_space<vmem>>, vector<56x16xf32>
    tpu.vector_store %arg10[%c0_105, %c80], %146 {strides = array<i32>} : memref<224x144xf32, #tpu.memory_space<vmem>>, vector<56x16xf32>,
    %c0_106 = arith.constant 0 : index
    %c8_107 = arith.constant 8 : index
    %c0_108 = arith.constant 0 : index
    %148 = vector.load %arg9[%c0_106, %c8_107, %c0_108] : memref<4x72x16xf32, #tpu.memory_space<vmem>>, vector<1x56x16xf32>
    %149 = vector.shape_cast %148 : vector<1x56x16xf32> to vector<56x16xf32>
    %c0_109 = arith.constant 0 : index
    %c96 = arith.constant 96 : index
    %150 = vector.load %arg10[%c0_109, %c96] : memref<224x144xf32, #tpu.memory_space<vmem>>, vector<56x16xf32>
    tpu.vector_store %arg10[%c0_109, %c96], %149 {strides = array<i32>} : memref<224x144xf32, #tpu.memory_space<vmem>>, vector<56x16xf32>,
    %c1_110 = arith.constant 1 : index
    %c8_111 = arith.constant 8 : index
    %c0_112 = arith.constant 0 : index
    %151 = vector.load %arg9[%c1_110, %c8_111, %c0_112] : memref<4x72x16xf32, #tpu.memory_space<vmem>>, vector<1x56x16xf32>
    %152 = vector.shape_cast %151 : vector<1x56x16xf32> to vector<56x16xf32>
    %c0_113 = arith.constant 0 : index
    %c112 = arith.constant 112 : index
    %153 = vector.load %arg10[%c0_113, %c112] : memref<224x144xf32, #tpu.memory_space<vmem>>, vector<56x16xf32>
    tpu.vector_store %arg10[%c0_113, %c112], %152 {strides = array<i32>} : memref<224x144xf32, #tpu.memory_space<vmem>>, vector<56x16xf32>,
    %c0_114 = arith.constant 0 : index
    %c9_115 = arith.constant 9 : index
    %c0_116 = arith.constant 0 : index
    %154 = vector.load %arg9[%c0_114, %c9_115, %c0_116] : memref<4x72x16xf32, #tpu.memory_space<vmem>>, vector<1x56x16xf32>
    %155 = vector.shape_cast %154 : vector<1x56x16xf32> to vector<56x16xf32>
    %c0_117 = arith.constant 0 : index
    %c128 = arith.constant 128 : index
    %156 = vector.load %arg10[%c0_117, %c128] : memref<224x144xf32, #tpu.memory_space<vmem>>, vector<56x16xf32>
    tpu.vector_store %arg10[%c0_117, %c128], %155 {strides = array<i32>} : memref<224x144xf32, #tpu.memory_space<vmem>>, vector<56x16xf32>,
    %c1_118 = arith.constant 1 : index
    %c0_119 = arith.constant 0 : index
    %c0_120 = arith.constant 0 : index
    %157 = vector.load %arg9[%c1_118, %c0_119, %c0_120] : memref<4x72x16xf32, #tpu.memory_space<vmem>>, vector<1x56x16xf32>
    %158 = vector.shape_cast %157 : vector<1x56x16xf32> to vector<56x16xf32>
    %c56_121 = arith.constant 56 : index
    %c0_122 = arith.constant 0 : index
    %159 = vector.load %arg10[%c56_121, %c0_122] : memref<224x144xf32, #tpu.memory_space<vmem>>, vector<56x16xf32>
    tpu.vector_store %arg10[%c56_121, %c0_122], %158 {strides = array<i32>} : memref<224x144xf32, #tpu.memory_space<vmem>>, vector<56x16xf32>,
    %c0_123 = arith.constant 0 : index
    %c1_124 = arith.constant 1 : index
    %c0_125 = arith.constant 0 : index
    %160 = vector.load %arg9[%c0_123, %c1_124, %c0_125] : memref<4x72x16xf32, #tpu.memory_space<vmem>>, vector<1x56x16xf32>
    %161 = vector.shape_cast %160 : vector<1x56x16xf32> to vector<56x16xf32>
    %c56_126 = arith.constant 56 : index
    %c16_127 = arith.constant 16 : index
    %162 = vector.load %arg10[%c56_126, %c16_127] : memref<224x144xf32, #tpu.memory_space<vmem>>, vector<56x16xf32>
    tpu.vector_store %arg10[%c56_126, %c16_127], %161 {strides = array<i32>} : memref<224x144xf32, #tpu.memory_space<vmem>>, vector<56x16xf32>,
    %c1_128 = arith.constant 1 : index
    %c1_129 = arith.constant 1 : index
    %c0_130 = arith.constant 0 : index
    %163 = vector.load %arg9[%c1_128, %c1_129, %c0_130] : memref<4x72x16xf32, #tpu.memory_space<vmem>>, vector<1x56x16xf32>
    %164 = vector.shape_cast %163 : vector<1x56x16xf32> to vector<56x16xf32>
    %c56_131 = arith.constant 56 : index
    %c32_132 = arith.constant 32 : index
    %165 = vector.load %arg10[%c56_131, %c32_132] : memref<224x144xf32, #tpu.memory_space<vmem>>, vector<56x16xf32>
    tpu.vector_store %arg10[%c56_131, %c32_132], %164 {strides = array<i32>} : memref<224x144xf32, #tpu.memory_space<vmem>>, vector<56x16xf32>,
    %c3_133 = arith.constant 3 : index
    %c0_134 = arith.constant 0 : index
    %c0_135 = arith.constant 0 : index
    %166 = vector.load %arg9[%c3_133, %c0_134, %c0_135] : memref<4x72x16xf32, #tpu.memory_space<vmem>>, vector<1x56x16xf32>
    %167 = vector.shape_cast %166 : vector<1x56x16xf32> to vector<56x16xf32>
    %c56_136 = arith.constant 56 : index
    %c48_137 = arith.constant 48 : index
    %168 = vector.load %arg10[%c56_136, %c48_137] : memref<224x144xf32, #tpu.memory_space<vmem>>, vector<56x16xf32>
    tpu.vector_store %arg10[%c56_136, %c48_137], %167 {strides = array<i32>} : memref<224x144xf32, #tpu.memory_space<vmem>>, vector<56x16xf32>,
    %c2_138 = arith.constant 2 : index
    %c1_139 = arith.constant 1 : index
    %c0_140 = arith.constant 0 : index
    %169 = vector.load %arg9[%c2_138, %c1_139, %c0_140] : memref<4x72x16xf32, #tpu.memory_space<vmem>>, vector<1x56x16xf32>
    %170 = vector.shape_cast %169 : vector<1x56x16xf32> to vector<56x16xf32>
    %c56_141 = arith.constant 56 : index
    %c64_142 = arith.constant 64 : index
    %171 = vector.load %arg10[%c56_141, %c64_142] : memref<224x144xf32, #tpu.memory_space<vmem>>, vector<56x16xf32>
    tpu.vector_store %arg10[%c56_141, %c64_142], %170 {strides = array<i32>} : memref<224x144xf32, #tpu.memory_space<vmem>>, vector<56x16xf32>,
    %c3_143 = arith.constant 3 : index
    %c1_144 = arith.constant 1 : index
    %c0_145 = arith.constant 0 : index
    %172 = vector.load %arg9[%c3_143, %c1_144, %c0_145] : memref<4x72x16xf32, #tpu.memory_space<vmem>>, vector<1x56x16xf32>
    %173 = vector.shape_cast %172 : vector<1x56x16xf32> to vector<56x16xf32>
    %c56_146 = arith.constant 56 : index
    %c80_147 = arith.constant 80 : index
    %174 = vector.load %arg10[%c56_146, %c80_147] : memref<224x144xf32, #tpu.memory_space<vmem>>, vector<56x16xf32>
    tpu.vector_store %arg10[%c56_146, %c80_147], %173 {strides = array<i32>} : memref<224x144xf32, #tpu.memory_space<vmem>>, vector<56x16xf32>,
    %c1_148 = arith.constant 1 : index
    %c8_149 = arith.constant 8 : index
    %c0_150 = arith.constant 0 : index
    %175 = vector.load %arg9[%c1_148, %c8_149, %c0_150] : memref<4x72x16xf32, #tpu.memory_space<vmem>>, vector<1x56x16xf32>
    %176 = vector.shape_cast %175 : vector<1x56x16xf32> to vector<56x16xf32>
    %c56_151 = arith.constant 56 : index
    %c96_152 = arith.constant 96 : index
    %177 = vector.load %arg10[%c56_151, %c96_152] : memref<224x144xf32, #tpu.memory_space<vmem>>, vector<56x16xf32>
    tpu.vector_store %arg10[%c56_151, %c96_152], %176 {strides = array<i32>} : memref<224x144xf32, #tpu.memory_space<vmem>>, vector<56x16xf32>,
    %c0_153 = arith.constant 0 : index
    %c9_154 = arith.constant 9 : index
    %c0_155 = arith.constant 0 : index
    %178 = vector.load %arg9[%c0_153, %c9_154, %c0_155] : memref<4x72x16xf32, #tpu.memory_space<vmem>>, vector<1x56x16xf32>
    %179 = vector.shape_cast %178 : vector<1x56x16xf32> to vector<56x16xf32>
    %c56_156 = arith.constant 56 : index
    %c112_157 = arith.constant 112 : index
    %180 = vector.load %arg10[%c56_156, %c112_157] : memref<224x144xf32, #tpu.memory_space<vmem>>, vector<56x16xf32>
    tpu.vector_store %arg10[%c56_156, %c112_157], %179 {strides = array<i32>} : memref<224x144xf32, #tpu.memory_space<vmem>>, vector<56x16xf32>,
    %c1_158 = arith.constant 1 : index
    %c9_159 = arith.constant 9 : index
    %c0_160 = arith.constant 0 : index
    %181 = vector.load %arg9[%c1_158, %c9_159, %c0_160] : memref<4x72x16xf32, #tpu.memory_space<vmem>>, vector<1x56x16xf32>
    %182 = vector.shape_cast %181 : vector<1x56x16xf32> to vector<56x16xf32>
    %c56_161 = arith.constant 56 : index
    %c128_162 = arith.constant 128 : index
    %183 = vector.load %arg10[%c56_161, %c128_162] : memref<224x144xf32, #tpu.memory_space<vmem>>, vector<56x16xf32>
    tpu.vector_store %arg10[%c56_161, %c128_162], %182 {strides = array<i32>} : memref<224x144xf32, #tpu.memory_space<vmem>>, vector<56x16xf32>,
    %c2_163 = arith.constant 2 : index
    %c0_164 = arith.constant 0 : index
    %c0_165 = arith.constant 0 : index
    %184 = vector.load %arg9[%c2_163, %c0_164, %c0_165] : memref<4x72x16xf32, #tpu.memory_space<vmem>>, vector<1x56x16xf32>
    %185 = vector.shape_cast %184 : vector<1x56x16xf32> to vector<56x16xf32>
    %c112_166 = arith.constant 112 : index
    %c0_167 = arith.constant 0 : index
    %186 = vector.load %arg10[%c112_166, %c0_167] : memref<224x144xf32, #tpu.memory_space<vmem>>, vector<56x16xf32>
    tpu.vector_store %arg10[%c112_166, %c0_167], %185 {strides = array<i32>} : memref<224x144xf32, #tpu.memory_space<vmem>>, vector<56x16xf32>,
    %c3_168 = arith.constant 3 : index
    %c0_169 = arith.constant 0 : index
    %c0_170 = arith.constant 0 : index
    %187 = vector.load %arg9[%c3_168, %c0_169, %c0_170] : memref<4x72x16xf32, #tpu.memory_space<vmem>>, vector<1x56x16xf32>
    %188 = vector.shape_cast %187 : vector<1x56x16xf32> to vector<56x16xf32>
    %c112_171 = arith.constant 112 : index
    %c16_172 = arith.constant 16 : index
    %189 = vector.load %arg10[%c112_171, %c16_172] : memref<224x144xf32, #tpu.memory_space<vmem>>, vector<56x16xf32>
    tpu.vector_store %arg10[%c112_171, %c16_172], %188 {strides = array<i32>} : memref<224x144xf32, #tpu.memory_space<vmem>>, vector<56x16xf32>,
    %c2_173 = arith.constant 2 : index
    %c1_174 = arith.constant 1 : index
    %c0_175 = arith.constant 0 : index
    %190 = vector.load %arg9[%c2_173, %c1_174, %c0_175] : memref<4x72x16xf32, #tpu.memory_space<vmem>>, vector<1x56x16xf32>
    %191 = vector.shape_cast %190 : vector<1x56x16xf32> to vector<56x16xf32>
    %c112_176 = arith.constant 112 : index
    %c32_177 = arith.constant 32 : index
    %192 = vector.load %arg10[%c112_176, %c32_177] : memref<224x144xf32, #tpu.memory_space<vmem>>, vector<56x16xf32>
    tpu.vector_store %arg10[%c112_176, %c32_177], %191 {strides = array<i32>} : memref<224x144xf32, #tpu.memory_space<vmem>>, vector<56x16xf32>,
    %c0_178 = arith.constant 0 : index
    %c8_179 = arith.constant 8 : index
    %c0_180 = arith.constant 0 : index
    %193 = vector.load %arg9[%c0_178, %c8_179, %c0_180] : memref<4x72x16xf32, #tpu.memory_space<vmem>>, vector<1x56x16xf32>
    %194 = vector.shape_cast %193 : vector<1x56x16xf32> to vector<56x16xf32>
    %c112_181 = arith.constant 112 : index
    %c48_182 = arith.constant 48 : index
    %195 = vector.load %arg10[%c112_181, %c48_182] : memref<224x144xf32, #tpu.memory_space<vmem>>, vector<56x16xf32>
    tpu.vector_store %arg10[%c112_181, %c48_182], %194 {strides = array<i32>} : memref<224x144xf32, #tpu.memory_space<vmem>>, vector<56x16xf32>,
    %c1_183 = arith.constant 1 : index
    %c8_184 = arith.constant 8 : index
    %c0_185 = arith.constant 0 : index
    %196 = vector.load %arg9[%c1_183, %c8_184, %c0_185] : memref<4x72x16xf32, #tpu.memory_space<vmem>>, vector<1x56x16xf32>
    %197 = vector.shape_cast %196 : vector<1x56x16xf32> to vector<56x16xf32>
    %c112_186 = arith.constant 112 : index
    %c64_187 = arith.constant 64 : index
    %198 = vector.load %arg10[%c112_186, %c64_187] : memref<224x144xf32, #tpu.memory_space<vmem>>, vector<56x16xf32>
    tpu.vector_store %arg10[%c112_186, %c64_187], %197 {strides = array<i32>} : memref<224x144xf32, #tpu.memory_space<vmem>>, vector<56x16xf32>,
    %c0_188 = arith.constant 0 : index
    %c9_189 = arith.constant 9 : index
    %c0_190 = arith.constant 0 : index
    %199 = vector.load %arg9[%c0_188, %c9_189, %c0_190] : memref<4x72x16xf32, #tpu.memory_space<vmem>>, vector<1x56x16xf32>
    %200 = vector.shape_cast %199 : vector<1x56x16xf32> to vector<56x16xf32>
    %c112_191 = arith.constant 112 : index
    %c80_192 = arith.constant 80 : index
    %201 = vector.load %arg10[%c112_191, %c80_192] : memref<224x144xf32, #tpu.memory_space<vmem>>, vector<56x16xf32>
    tpu.vector_store %arg10[%c112_191, %c80_192], %200 {strides = array<i32>} : memref<224x144xf32, #tpu.memory_space<vmem>>, vector<56x16xf32>,
    %c2_193 = arith.constant 2 : index
    %c8_194 = arith.constant 8 : index
    %c0_195 = arith.constant 0 : index
    %202 = vector.load %arg9[%c2_193, %c8_194, %c0_195] : memref<4x72x16xf32, #tpu.memory_space<vmem>>, vector<1x56x16xf32>
    %203 = vector.shape_cast %202 : vector<1x56x16xf32> to vector<56x16xf32>
    %c112_196 = arith.constant 112 : index
    %c96_197 = arith.constant 96 : index
    %204 = vector.load %arg10[%c112_196, %c96_197] : memref<224x144xf32, #tpu.memory_space<vmem>>, vector<56x16xf32>
    tpu.vector_store %arg10[%c112_196, %c96_197], %203 {strides = array<i32>} : memref<224x144xf32, #tpu.memory_space<vmem>>, vector<56x16xf32>,
    %c3_198 = arith.constant 3 : index
    %c8_199 = arith.constant 8 : index
    %c0_200 = arith.constant 0 : index
    %205 = vector.load %arg9[%c3_198, %c8_199, %c0_200] : memref<4x72x16xf32, #tpu.memory_space<vmem>>, vector<1x56x16xf32>
    %206 = vector.shape_cast %205 : vector<1x56x16xf32> to vector<56x16xf32>
    %c112_201 = arith.constant 112 : index
    %c112_202 = arith.constant 112 : index
    %207 = vector.load %arg10[%c112_201, %c112_202] : memref<224x144xf32, #tpu.memory_space<vmem>>, vector<56x16xf32>
    tpu.vector_store %arg10[%c112_201, %c112_202], %206 {strides = array<i32>} : memref<224x144xf32, #tpu.memory_space<vmem>>, vector<56x16xf32>,
    %c2_203 = arith.constant 2 : index
    %c9_204 = arith.constant 9 : index
    %c0_205 = arith.constant 0 : index
    %208 = vector.load %arg9[%c2_203, %c9_204, %c0_205] : memref<4x72x16xf32, #tpu.memory_space<vmem>>, vector<1x56x16xf32>
    %209 = vector.shape_cast %208 : vector<1x56x16xf32> to vector<56x16xf32>
    %c112_206 = arith.constant 112 : index
    %c128_207 = arith.constant 128 : index
    %210 = vector.load %arg10[%c112_206, %c128_207] : memref<224x144xf32, #tpu.memory_space<vmem>>, vector<56x16xf32>
    tpu.vector_store %arg10[%c112_206, %c128_207], %209 {strides = array<i32>} : memref<224x144xf32, #tpu.memory_space<vmem>>, vector<56x16xf32>,
    %c3_208 = arith.constant 3 : index
    %c0_209 = arith.constant 0 : index
    %c0_210 = arith.constant 0 : index
    %211 = vector.load %arg9[%c3_208, %c0_209, %c0_210] : memref<4x72x16xf32, #tpu.memory_space<vmem>>, vector<1x56x16xf32>
    %212 = vector.shape_cast %211 : vector<1x56x16xf32> to vector<56x16xf32>
    %c168 = arith.constant 168 : index
    %c0_211 = arith.constant 0 : index
    %213 = vector.load %arg10[%c168, %c0_211] : memref<224x144xf32, #tpu.memory_space<vmem>>, vector<56x16xf32>
    tpu.vector_store %arg10[%c168, %c0_211], %212 {strides = array<i32>} : memref<224x144xf32, #tpu.memory_space<vmem>>, vector<56x16xf32>,
    %c2_212 = arith.constant 2 : index
    %c1_213 = arith.constant 1 : index
    %c0_214 = arith.constant 0 : index
    %214 = vector.load %arg9[%c2_212, %c1_213, %c0_214] : memref<4x72x16xf32, #tpu.memory_space<vmem>>, vector<1x56x16xf32>
    %215 = vector.shape_cast %214 : vector<1x56x16xf32> to vector<56x16xf32>
    %c168_215 = arith.constant 168 : index
    %c16_216 = arith.constant 16 : index
    %216 = vector.load %arg10[%c168_215, %c16_216] : memref<224x144xf32, #tpu.memory_space<vmem>>, vector<56x16xf32>
    tpu.vector_store %arg10[%c168_215, %c16_216], %215 {strides = array<i32>} : memref<224x144xf32, #tpu.memory_space<vmem>>, vector<56x16xf32>,
    %c3_217 = arith.constant 3 : index
    %c1_218 = arith.constant 1 : index
    %c0_219 = arith.constant 0 : index
    %217 = vector.load %arg9[%c3_217, %c1_218, %c0_219] : memref<4x72x16xf32, #tpu.memory_space<vmem>>, vector<1x56x16xf32>
    %218 = vector.shape_cast %217 : vector<1x56x16xf32> to vector<56x16xf32>
    %c168_220 = arith.constant 168 : index
    %c32_221 = arith.constant 32 : index
    %219 = vector.load %arg10[%c168_220, %c32_221] : memref<224x144xf32, #tpu.memory_space<vmem>>, vector<56x16xf32>
    tpu.vector_store %arg10[%c168_220, %c32_221], %218 {strides = array<i32>} : memref<224x144xf32, #tpu.memory_space<vmem>>, vector<56x16xf32>,
    %c1_222 = arith.constant 1 : index
    %c8_223 = arith.constant 8 : index
    %c0_224 = arith.constant 0 : index
    %220 = vector.load %arg9[%c1_222, %c8_223, %c0_224] : memref<4x72x16xf32, #tpu.memory_space<vmem>>, vector<1x56x16xf32>
    %221 = vector.shape_cast %220 : vector<1x56x16xf32> to vector<56x16xf32>
    %c168_225 = arith.constant 168 : index
    %c48_226 = arith.constant 48 : index
    %222 = vector.load %arg10[%c168_225, %c48_226] : memref<224x144xf32, #tpu.memory_space<vmem>>, vector<56x16xf32>
    tpu.vector_store %arg10[%c168_225, %c48_226], %221 {strides = array<i32>} : memref<224x144xf32, #tpu.memory_space<vmem>>, vector<56x16xf32>,
    %c0_227 = arith.constant 0 : index
    %c9_228 = arith.constant 9 : index
    %c0_229 = arith.constant 0 : index
    %223 = vector.load %arg9[%c0_227, %c9_228, %c0_229] : memref<4x72x16xf32, #tpu.memory_space<vmem>>, vector<1x56x16xf32>
    %224 = vector.shape_cast %223 : vector<1x56x16xf32> to vector<56x16xf32>
    %c168_230 = arith.constant 168 : index
    %c64_231 = arith.constant 64 : index
    %225 = vector.load %arg10[%c168_230, %c64_231] : memref<224x144xf32, #tpu.memory_space<vmem>>, vector<56x16xf32>
    tpu.vector_store %arg10[%c168_230, %c64_231], %224 {strides = array<i32>} : memref<224x144xf32, #tpu.memory_space<vmem>>, vector<56x16xf32>,
    %c1_232 = arith.constant 1 : index
    %c9_233 = arith.constant 9 : index
    %c0_234 = arith.constant 0 : index
    %226 = vector.load %arg9[%c1_232, %c9_233, %c0_234] : memref<4x72x16xf32, #tpu.memory_space<vmem>>, vector<1x56x16xf32>
    %227 = vector.shape_cast %226 : vector<1x56x16xf32> to vector<56x16xf32>
    %c168_235 = arith.constant 168 : index
    %c80_236 = arith.constant 80 : index
    %228 = vector.load %arg10[%c168_235, %c80_236] : memref<224x144xf32, #tpu.memory_space<vmem>>, vector<56x16xf32>
    tpu.vector_store %arg10[%c168_235, %c80_236], %227 {strides = array<i32>} : memref<224x144xf32, #tpu.memory_space<vmem>>, vector<56x16xf32>,
    %c3_237 = arith.constant 3 : index
    %c8_238 = arith.constant 8 : index
    %c0_239 = arith.constant 0 : index
    %229 = vector.load %arg9[%c3_237, %c8_238, %c0_239] : memref<4x72x16xf32, #tpu.memory_space<vmem>>, vector<1x56x16xf32>
    %230 = vector.shape_cast %229 : vector<1x56x16xf32> to vector<56x16xf32>
    %c168_240 = arith.constant 168 : index
    %c96_241 = arith.constant 96 : index
    %231 = vector.load %arg10[%c168_240, %c96_241] : memref<224x144xf32, #tpu.memory_space<vmem>>, vector<56x16xf32>
    tpu.vector_store %arg10[%c168_240, %c96_241], %230 {strides = array<i32>} : memref<224x144xf32, #tpu.memory_space<vmem>>, vector<56x16xf32>,
    %c2_242 = arith.constant 2 : index
    %c9_243 = arith.constant 9 : index
    %c0_244 = arith.constant 0 : index
    %232 = vector.load %arg9[%c2_242, %c9_243, %c0_244] : memref<4x72x16xf32, #tpu.memory_space<vmem>>, vector<1x56x16xf32>
    %233 = vector.shape_cast %232 : vector<1x56x16xf32> to vector<56x16xf32>
    %c168_245 = arith.constant 168 : index
    %c112_246 = arith.constant 112 : index
    %234 = vector.load %arg10[%c168_245, %c112_246] : memref<224x144xf32, #tpu.memory_space<vmem>>, vector<56x16xf32>
    tpu.vector_store %arg10[%c168_245, %c112_246], %233 {strides = array<i32>} : memref<224x144xf32, #tpu.memory_space<vmem>>, vector<56x16xf32>,
    %c3_247 = arith.constant 3 : index
    %c9_248 = arith.constant 9 : index
    %c0_249 = arith.constant 0 : index
    %235 = vector.load %arg9[%c3_247, %c9_248, %c0_249] : memref<4x72x16xf32, #tpu.memory_space<vmem>>, vector<1x56x16xf32>
    %236 = vector.shape_cast %235 : vector<1x56x16xf32> to vector<56x16xf32>
    %c168_250 = arith.constant 168 : index
    %c128_251 = arith.constant 128 : index
    %237 = vector.load %arg10[%c168_250, %c128_251] : memref<224x144xf32, #tpu.memory_space<vmem>>, vector<56x16xf32>
    tpu.vector_store %arg10[%c168_250, %c128_251], %236 {strides = array<i32>} : memref<224x144xf32, #tpu.memory_space<vmem>>, vector<56x16xf32>,
    %c0_252 = arith.constant 0 : index
    %c0_253 = arith.constant 0 : index
    %238 = vector.load %arg10[%c0_252, %c0_253] : memref<224x144xf32, #tpu.memory_space<vmem>>, vector<224x144xf32>
    %c0_254 = arith.constant 0 : index
    %c0_255 = arith.constant 0 : index
    %239 = vector.load %arg4[%c0_254, %c0_255] : memref<144x32xf32, #tpu.memory_space<vmem>>, vector<144x32xf32>
    %cst_256 = arith.constant dense<0.000000e+00> : vector<224x32xf32>
    %240 = tpu.matmul %238, %239, %cst_256 {dimension_numbers = #tpu.dot_dimension_numbers<[1], [0], [0], [1], [0, 0, 1, 1], [], []>} : vector<224x144xf32>, vector<144x32xf32>, vector<224x32xf32> -> vector<224x32xf32>
    %c0_257 = arith.constant 0 : index
    %c0_258 = arith.constant 0 : index
    %241 = vector.load %arg5[%c0_257, %c0_258] : memref<1x32xf32, #tpu.memory_space<vmem>>, vector<1x32xf32>
    %242 = vector.broadcast %241 : vector<1x32xf32> to vector<224x32xf32>
    %243 = arith.addf %240, %242 : vector<224x32xf32>
    %cst_259 = arith.constant 0.000000e+00 : f32
    %244 = vector.broadcast %cst_259 : f32 to vector<224x32xf32>
    %245 = arith.maximumf %243, %244 : vector<224x32xf32>
    %246 = vector.extract_strided_slice %245 {offsets = [0, 0], sizes = [56, 32], strides = [1, 1]} : vector<224x32xf32> to vector<56x32xf32>
    %247 = vector.extract_strided_slice %245 {offsets = [56, 0], sizes = [56, 32], strides = [1, 1]} : vector<224x32xf32> to vector<56x32xf32>
    %248 = arith.maximumf %246, %247 : vector<56x32xf32>
    %249 = vector.extract_strided_slice %245 {offsets = [112, 0], sizes = [56, 32], strides = [1, 1]} : vector<224x32xf32> to vector<56x32xf32>
    %250 = vector.extract_strided_slice %245 {offsets = [168, 0], sizes = [56, 32], strides = [1, 1]} : vector<224x32xf32> to vector<56x32xf32>
    %251 = arith.maximumf %249, %250 : vector<56x32xf32>
    %252 = arith.maximumf %248, %251 : vector<56x32xf32>
    %cst_260 = arith.constant 0.000000e+00 : f32
    %253 = vector.broadcast %cst_260 : f32 to vector<56x10xf32>
    %254 = vector.extract_strided_slice %252 {offsets = [0, 0], sizes = [56, 1], strides = [1, 1]} : vector<56x32xf32> to vector<56x1xf32>
    %c0_261 = arith.constant 0 : index
    %c0_262 = arith.constant 0 : index
    %c0_263 = arith.constant 0 : index
    %255 = vector.load %arg6[%c0_261, %c0_262, %c0_263] : memref<32x56x10xf32, #tpu.memory_space<vmem>>, vector<1x56x10xf32>
    %256 = vector.shape_cast %255 : vector<1x56x10xf32> to vector<56x10xf32>
    %257 = vector.broadcast %254 : vector<56x1xf32> to vector<56x10xf32>
    %258 = arith.mulf %257, %256 : vector<56x10xf32>
    %259 = arith.addf %253, %258 : vector<56x10xf32>
    %260 = vector.extract_strided_slice %252 {offsets = [0, 1], sizes = [56, 1], strides = [1, 1]} : vector<56x32xf32> to vector<56x1xf32>
    %c1_264 = arith.constant 1 : index
    %c0_265 = arith.constant 0 : index
    %c0_266 = arith.constant 0 : index
    %261 = vector.load %arg6[%c1_264, %c0_265, %c0_266] : memref<32x56x10xf32, #tpu.memory_space<vmem>>, vector<1x56x10xf32>
    %262 = vector.shape_cast %261 : vector<1x56x10xf32> to vector<56x10xf32>
    %263 = vector.broadcast %260 : vector<56x1xf32> to vector<56x10xf32>
    %264 = arith.mulf %263, %262 : vector<56x10xf32>
    %265 = arith.addf %259, %264 : vector<56x10xf32>
    %266 = vector.extract_strided_slice %252 {offsets = [0, 2], sizes = [56, 1], strides = [1, 1]} : vector<56x32xf32> to vector<56x1xf32>
    %c2_267 = arith.constant 2 : index
    %c0_268 = arith.constant 0 : index
    %c0_269 = arith.constant 0 : index
    %267 = vector.load %arg6[%c2_267, %c0_268, %c0_269] : memref<32x56x10xf32, #tpu.memory_space<vmem>>, vector<1x56x10xf32>
    %268 = vector.shape_cast %267 : vector<1x56x10xf32> to vector<56x10xf32>
    %269 = vector.broadcast %266 : vector<56x1xf32> to vector<56x10xf32>
    %270 = arith.mulf %269, %268 : vector<56x10xf32>
    %271 = arith.addf %265, %270 : vector<56x10xf32>
    %272 = vector.extract_strided_slice %252 {offsets = [0, 3], sizes = [56, 1], strides = [1, 1]} : vector<56x32xf32> to vector<56x1xf32>
    %c3_270 = arith.constant 3 : index
    %c0_271 = arith.constant 0 : index
    %c0_272 = arith.constant 0 : index
    %273 = vector.load %arg6[%c3_270, %c0_271, %c0_272] : memref<32x56x10xf32, #tpu.memory_space<vmem>>, vector<1x56x10xf32>
    %274 = vector.shape_cast %273 : vector<1x56x10xf32> to vector<56x10xf32>
    %275 = vector.broadcast %272 : vector<56x1xf32> to vector<56x10xf32>
    %276 = arith.mulf %275, %274 : vector<56x10xf32>
    %277 = arith.addf %271, %276 : vector<56x10xf32>
    %278 = vector.extract_strided_slice %252 {offsets = [0, 4], sizes = [56, 1], strides = [1, 1]} : vector<56x32xf32> to vector<56x1xf32>
    %c4 = arith.constant 4 : index
    %c0_273 = arith.constant 0 : index
    %c0_274 = arith.constant 0 : index
    %279 = vector.load %arg6[%c4, %c0_273, %c0_274] : memref<32x56x10xf32, #tpu.memory_space<vmem>>, vector<1x56x10xf32>
    %280 = vector.shape_cast %279 : vector<1x56x10xf32> to vector<56x10xf32>
    %281 = vector.broadcast %278 : vector<56x1xf32> to vector<56x10xf32>
    %282 = arith.mulf %281, %280 : vector<56x10xf32>
    %283 = arith.addf %277, %282 : vector<56x10xf32>
    %284 = vector.extract_strided_slice %252 {offsets = [0, 5], sizes = [56, 1], strides = [1, 1]} : vector<56x32xf32> to vector<56x1xf32>
    %c5 = arith.constant 5 : index
    %c0_275 = arith.constant 0 : index
    %c0_276 = arith.constant 0 : index
    %285 = vector.load %arg6[%c5, %c0_275, %c0_276] : memref<32x56x10xf32, #tpu.memory_space<vmem>>, vector<1x56x10xf32>
    %286 = vector.shape_cast %285 : vector<1x56x10xf32> to vector<56x10xf32>
    %287 = vector.broadcast %284 : vector<56x1xf32> to vector<56x10xf32>
    %288 = arith.mulf %287, %286 : vector<56x10xf32>
    %289 = arith.addf %283, %288 : vector<56x10xf32>
    %290 = vector.extract_strided_slice %252 {offsets = [0, 6], sizes = [56, 1], strides = [1, 1]} : vector<56x32xf32> to vector<56x1xf32>
    %c6 = arith.constant 6 : index
    %c0_277 = arith.constant 0 : index
    %c0_278 = arith.constant 0 : index
    %291 = vector.load %arg6[%c6, %c0_277, %c0_278] : memref<32x56x10xf32, #tpu.memory_space<vmem>>, vector<1x56x10xf32>
    %292 = vector.shape_cast %291 : vector<1x56x10xf32> to vector<56x10xf32>
    %293 = vector.broadcast %290 : vector<56x1xf32> to vector<56x10xf32>
    %294 = arith.mulf %293, %292 : vector<56x10xf32>
    %295 = arith.addf %289, %294 : vector<56x10xf32>
    %296 = vector.extract_strided_slice %252 {offsets = [0, 7], sizes = [56, 1], strides = [1, 1]} : vector<56x32xf32> to vector<56x1xf32>
    %c7 = arith.constant 7 : index
    %c0_279 = arith.constant 0 : index
    %c0_280 = arith.constant 0 : index
    %297 = vector.load %arg6[%c7, %c0_279, %c0_280] : memref<32x56x10xf32, #tpu.memory_space<vmem>>, vector<1x56x10xf32>
    %298 = vector.shape_cast %297 : vector<1x56x10xf32> to vector<56x10xf32>
    %299 = vector.broadcast %296 : vector<56x1xf32> to vector<56x10xf32>
    %300 = arith.mulf %299, %298 : vector<56x10xf32>
    %301 = arith.addf %295, %300 : vector<56x10xf32>
    %302 = vector.extract_strided_slice %252 {offsets = [0, 8], sizes = [56, 1], strides = [1, 1]} : vector<56x32xf32> to vector<56x1xf32>
    %c8_281 = arith.constant 8 : index
    %c0_282 = arith.constant 0 : index
    %c0_283 = arith.constant 0 : index
    %303 = vector.load %arg6[%c8_281, %c0_282, %c0_283] : memref<32x56x10xf32, #tpu.memory_space<vmem>>, vector<1x56x10xf32>
    %304 = vector.shape_cast %303 : vector<1x56x10xf32> to vector<56x10xf32>
    %305 = vector.broadcast %302 : vector<56x1xf32> to vector<56x10xf32>
    %306 = arith.mulf %305, %304 : vector<56x10xf32>
    %307 = arith.addf %301, %306 : vector<56x10xf32>
    %308 = vector.extract_strided_slice %252 {offsets = [0, 9], sizes = [56, 1], strides = [1, 1]} : vector<56x32xf32> to vector<56x1xf32>
    %c9_284 = arith.constant 9 : index
    %c0_285 = arith.constant 0 : index
    %c0_286 = arith.constant 0 : index
    %309 = vector.load %arg6[%c9_284, %c0_285, %c0_286] : memref<32x56x10xf32, #tpu.memory_space<vmem>>, vector<1x56x10xf32>
    %310 = vector.shape_cast %309 : vector<1x56x10xf32> to vector<56x10xf32>
    %311 = vector.broadcast %308 : vector<56x1xf32> to vector<56x10xf32>
    %312 = arith.mulf %311, %310 : vector<56x10xf32>
    %313 = arith.addf %307, %312 : vector<56x10xf32>
    %314 = vector.extract_strided_slice %252 {offsets = [0, 10], sizes = [56, 1], strides = [1, 1]} : vector<56x32xf32> to vector<56x1xf32>
    %c10 = arith.constant 10 : index
    %c0_287 = arith.constant 0 : index
    %c0_288 = arith.constant 0 : index
    %315 = vector.load %arg6[%c10, %c0_287, %c0_288] : memref<32x56x10xf32, #tpu.memory_space<vmem>>, vector<1x56x10xf32>
    %316 = vector.shape_cast %315 : vector<1x56x10xf32> to vector<56x10xf32>
    %317 = vector.broadcast %314 : vector<56x1xf32> to vector<56x10xf32>
    %318 = arith.mulf %317, %316 : vector<56x10xf32>
    %319 = arith.addf %313, %318 : vector<56x10xf32>
    %320 = vector.extract_strided_slice %252 {offsets = [0, 11], sizes = [56, 1], strides = [1, 1]} : vector<56x32xf32> to vector<56x1xf32>
    %c11 = arith.constant 11 : index
    %c0_289 = arith.constant 0 : index
    %c0_290 = arith.constant 0 : index
    %321 = vector.load %arg6[%c11, %c0_289, %c0_290] : memref<32x56x10xf32, #tpu.memory_space<vmem>>, vector<1x56x10xf32>
    %322 = vector.shape_cast %321 : vector<1x56x10xf32> to vector<56x10xf32>
    %323 = vector.broadcast %320 : vector<56x1xf32> to vector<56x10xf32>
    %324 = arith.mulf %323, %322 : vector<56x10xf32>
    %325 = arith.addf %319, %324 : vector<56x10xf32>
    %326 = vector.extract_strided_slice %252 {offsets = [0, 12], sizes = [56, 1], strides = [1, 1]} : vector<56x32xf32> to vector<56x1xf32>
    %c12 = arith.constant 12 : index
    %c0_291 = arith.constant 0 : index
    %c0_292 = arith.constant 0 : index
    %327 = vector.load %arg6[%c12, %c0_291, %c0_292] : memref<32x56x10xf32, #tpu.memory_space<vmem>>, vector<1x56x10xf32>
    %328 = vector.shape_cast %327 : vector<1x56x10xf32> to vector<56x10xf32>
    %329 = vector.broadcast %326 : vector<56x1xf32> to vector<56x10xf32>
    %330 = arith.mulf %329, %328 : vector<56x10xf32>
    %331 = arith.addf %325, %330 : vector<56x10xf32>
    %332 = vector.extract_strided_slice %252 {offsets = [0, 13], sizes = [56, 1], strides = [1, 1]} : vector<56x32xf32> to vector<56x1xf32>
    %c13 = arith.constant 13 : index
    %c0_293 = arith.constant 0 : index
    %c0_294 = arith.constant 0 : index
    %333 = vector.load %arg6[%c13, %c0_293, %c0_294] : memref<32x56x10xf32, #tpu.memory_space<vmem>>, vector<1x56x10xf32>
    %334 = vector.shape_cast %333 : vector<1x56x10xf32> to vector<56x10xf32>
    %335 = vector.broadcast %332 : vector<56x1xf32> to vector<56x10xf32>
    %336 = arith.mulf %335, %334 : vector<56x10xf32>
    %337 = arith.addf %331, %336 : vector<56x10xf32>
    %338 = vector.extract_strided_slice %252 {offsets = [0, 14], sizes = [56, 1], strides = [1, 1]} : vector<56x32xf32> to vector<56x1xf32>
    %c14 = arith.constant 14 : index
    %c0_295 = arith.constant 0 : index
    %c0_296 = arith.constant 0 : index
    %339 = vector.load %arg6[%c14, %c0_295, %c0_296] : memref<32x56x10xf32, #tpu.memory_space<vmem>>, vector<1x56x10xf32>
    %340 = vector.shape_cast %339 : vector<1x56x10xf32> to vector<56x10xf32>
    %341 = vector.broadcast %338 : vector<56x1xf32> to vector<56x10xf32>
    %342 = arith.mulf %341, %340 : vector<56x10xf32>
    %343 = arith.addf %337, %342 : vector<56x10xf32>
    %344 = vector.extract_strided_slice %252 {offsets = [0, 15], sizes = [56, 1], strides = [1, 1]} : vector<56x32xf32> to vector<56x1xf32>
    %c15 = arith.constant 15 : index
    %c0_297 = arith.constant 0 : index
    %c0_298 = arith.constant 0 : index
    %345 = vector.load %arg6[%c15, %c0_297, %c0_298] : memref<32x56x10xf32, #tpu.memory_space<vmem>>, vector<1x56x10xf32>
    %346 = vector.shape_cast %345 : vector<1x56x10xf32> to vector<56x10xf32>
    %347 = vector.broadcast %344 : vector<56x1xf32> to vector<56x10xf32>
    %348 = arith.mulf %347, %346 : vector<56x10xf32>
    %349 = arith.addf %343, %348 : vector<56x10xf32>
    %350 = vector.extract_strided_slice %252 {offsets = [0, 16], sizes = [56, 1], strides = [1, 1]} : vector<56x32xf32> to vector<56x1xf32>
    %c16_299 = arith.constant 16 : index
    %c0_300 = arith.constant 0 : index
    %c0_301 = arith.constant 0 : index
    %351 = vector.load %arg6[%c16_299, %c0_300, %c0_301] : memref<32x56x10xf32, #tpu.memory_space<vmem>>, vector<1x56x10xf32>
    %352 = vector.shape_cast %351 : vector<1x56x10xf32> to vector<56x10xf32>
    %353 = vector.broadcast %350 : vector<56x1xf32> to vector<56x10xf32>
    %354 = arith.mulf %353, %352 : vector<56x10xf32>
    %355 = arith.addf %349, %354 : vector<56x10xf32>
    %356 = vector.extract_strided_slice %252 {offsets = [0, 17], sizes = [56, 1], strides = [1, 1]} : vector<56x32xf32> to vector<56x1xf32>
    %c17_302 = arith.constant 17 : index
    %c0_303 = arith.constant 0 : index
    %c0_304 = arith.constant 0 : index
    %357 = vector.load %arg6[%c17_302, %c0_303, %c0_304] : memref<32x56x10xf32, #tpu.memory_space<vmem>>, vector<1x56x10xf32>
    %358 = vector.shape_cast %357 : vector<1x56x10xf32> to vector<56x10xf32>
    %359 = vector.broadcast %356 : vector<56x1xf32> to vector<56x10xf32>
    %360 = arith.mulf %359, %358 : vector<56x10xf32>
    %361 = arith.addf %355, %360 : vector<56x10xf32>
    %362 = vector.extract_strided_slice %252 {offsets = [0, 18], sizes = [56, 1], strides = [1, 1]} : vector<56x32xf32> to vector<56x1xf32>
    %c18 = arith.constant 18 : index
    %c0_305 = arith.constant 0 : index
    %c0_306 = arith.constant 0 : index
    %363 = vector.load %arg6[%c18, %c0_305, %c0_306] : memref<32x56x10xf32, #tpu.memory_space<vmem>>, vector<1x56x10xf32>
    %364 = vector.shape_cast %363 : vector<1x56x10xf32> to vector<56x10xf32>
    %365 = vector.broadcast %362 : vector<56x1xf32> to vector<56x10xf32>
    %366 = arith.mulf %365, %364 : vector<56x10xf32>
    %367 = arith.addf %361, %366 : vector<56x10xf32>
    %368 = vector.extract_strided_slice %252 {offsets = [0, 19], sizes = [56, 1], strides = [1, 1]} : vector<56x32xf32> to vector<56x1xf32>
    %c19 = arith.constant 19 : index
    %c0_307 = arith.constant 0 : index
    %c0_308 = arith.constant 0 : index
    %369 = vector.load %arg6[%c19, %c0_307, %c0_308] : memref<32x56x10xf32, #tpu.memory_space<vmem>>, vector<1x56x10xf32>
    %370 = vector.shape_cast %369 : vector<1x56x10xf32> to vector<56x10xf32>
    %371 = vector.broadcast %368 : vector<56x1xf32> to vector<56x10xf32>
    %372 = arith.mulf %371, %370 : vector<56x10xf32>
    %373 = arith.addf %367, %372 : vector<56x10xf32>
    %374 = vector.extract_strided_slice %252 {offsets = [0, 20], sizes = [56, 1], strides = [1, 1]} : vector<56x32xf32> to vector<56x1xf32>
    %c20 = arith.constant 20 : index
    %c0_309 = arith.constant 0 : index
    %c0_310 = arith.constant 0 : index
    %375 = vector.load %arg6[%c20, %c0_309, %c0_310] : memref<32x56x10xf32, #tpu.memory_space<vmem>>, vector<1x56x10xf32>
    %376 = vector.shape_cast %375 : vector<1x56x10xf32> to vector<56x10xf32>
    %377 = vector.broadcast %374 : vector<56x1xf32> to vector<56x10xf32>
    %378 = arith.mulf %377, %376 : vector<56x10xf32>
    %379 = arith.addf %373, %378 : vector<56x10xf32>
    %380 = vector.extract_strided_slice %252 {offsets = [0, 21], sizes = [56, 1], strides = [1, 1]} : vector<56x32xf32> to vector<56x1xf32>
    %c21 = arith.constant 21 : index
    %c0_311 = arith.constant 0 : index
    %c0_312 = arith.constant 0 : index
    %381 = vector.load %arg6[%c21, %c0_311, %c0_312] : memref<32x56x10xf32, #tpu.memory_space<vmem>>, vector<1x56x10xf32>
    %382 = vector.shape_cast %381 : vector<1x56x10xf32> to vector<56x10xf32>
    %383 = vector.broadcast %380 : vector<56x1xf32> to vector<56x10xf32>
    %384 = arith.mulf %383, %382 : vector<56x10xf32>
    %385 = arith.addf %379, %384 : vector<56x10xf32>
    %386 = vector.extract_strided_slice %252 {offsets = [0, 22], sizes = [56, 1], strides = [1, 1]} : vector<56x32xf32> to vector<56x1xf32>
    %c22 = arith.constant 22 : index
    %c0_313 = arith.constant 0 : index
    %c0_314 = arith.constant 0 : index
    %387 = vector.load %arg6[%c22, %c0_313, %c0_314] : memref<32x56x10xf32, #tpu.memory_space<vmem>>, vector<1x56x10xf32>
    %388 = vector.shape_cast %387 : vector<1x56x10xf32> to vector<56x10xf32>
    %389 = vector.broadcast %386 : vector<56x1xf32> to vector<56x10xf32>
    %390 = arith.mulf %389, %388 : vector<56x10xf32>
    %391 = arith.addf %385, %390 : vector<56x10xf32>
    %392 = vector.extract_strided_slice %252 {offsets = [0, 23], sizes = [56, 1], strides = [1, 1]} : vector<56x32xf32> to vector<56x1xf32>
    %c23 = arith.constant 23 : index
    %c0_315 = arith.constant 0 : index
    %c0_316 = arith.constant 0 : index
    %393 = vector.load %arg6[%c23, %c0_315, %c0_316] : memref<32x56x10xf32, #tpu.memory_space<vmem>>, vector<1x56x10xf32>
    %394 = vector.shape_cast %393 : vector<1x56x10xf32> to vector<56x10xf32>
    %395 = vector.broadcast %392 : vector<56x1xf32> to vector<56x10xf32>
    %396 = arith.mulf %395, %394 : vector<56x10xf32>
    %397 = arith.addf %391, %396 : vector<56x10xf32>
    %398 = vector.extract_strided_slice %252 {offsets = [0, 24], sizes = [56, 1], strides = [1, 1]} : vector<56x32xf32> to vector<56x1xf32>
    %c24_317 = arith.constant 24 : index
    %c0_318 = arith.constant 0 : index
    %c0_319 = arith.constant 0 : index
    %399 = vector.load %arg6[%c24_317, %c0_318, %c0_319] : memref<32x56x10xf32, #tpu.memory_space<vmem>>, vector<1x56x10xf32>
    %400 = vector.shape_cast %399 : vector<1x56x10xf32> to vector<56x10xf32>
    %401 = vector.broadcast %398 : vector<56x1xf32> to vector<56x10xf32>
    %402 = arith.mulf %401, %400 : vector<56x10xf32>
    %403 = arith.addf %397, %402 : vector<56x10xf32>
    %404 = vector.extract_strided_slice %252 {offsets = [0, 25], sizes = [56, 1], strides = [1, 1]} : vector<56x32xf32> to vector<56x1xf32>
    %c25_320 = arith.constant 25 : index
    %c0_321 = arith.constant 0 : index
    %c0_322 = arith.constant 0 : index
    %405 = vector.load %arg6[%c25_320, %c0_321, %c0_322] : memref<32x56x10xf32, #tpu.memory_space<vmem>>, vector<1x56x10xf32>
    %406 = vector.shape_cast %405 : vector<1x56x10xf32> to vector<56x10xf32>
    %407 = vector.broadcast %404 : vector<56x1xf32> to vector<56x10xf32>
    %408 = arith.mulf %407, %406 : vector<56x10xf32>
    %409 = arith.addf %403, %408 : vector<56x10xf32>
    %410 = vector.extract_strided_slice %252 {offsets = [0, 26], sizes = [56, 1], strides = [1, 1]} : vector<56x32xf32> to vector<56x1xf32>
    %c26 = arith.constant 26 : index
    %c0_323 = arith.constant 0 : index
    %c0_324 = arith.constant 0 : index
    %411 = vector.load %arg6[%c26, %c0_323, %c0_324] : memref<32x56x10xf32, #tpu.memory_space<vmem>>, vector<1x56x10xf32>
    %412 = vector.shape_cast %411 : vector<1x56x10xf32> to vector<56x10xf32>
    %413 = vector.broadcast %410 : vector<56x1xf32> to vector<56x10xf32>
    %414 = arith.mulf %413, %412 : vector<56x10xf32>
    %415 = arith.addf %409, %414 : vector<56x10xf32>
    %416 = vector.extract_strided_slice %252 {offsets = [0, 27], sizes = [56, 1], strides = [1, 1]} : vector<56x32xf32> to vector<56x1xf32>
    %c27 = arith.constant 27 : index
    %c0_325 = arith.constant 0 : index
    %c0_326 = arith.constant 0 : index
    %417 = vector.load %arg6[%c27, %c0_325, %c0_326] : memref<32x56x10xf32, #tpu.memory_space<vmem>>, vector<1x56x10xf32>
    %418 = vector.shape_cast %417 : vector<1x56x10xf32> to vector<56x10xf32>
    %419 = vector.broadcast %416 : vector<56x1xf32> to vector<56x10xf32>
    %420 = arith.mulf %419, %418 : vector<56x10xf32>
    %421 = arith.addf %415, %420 : vector<56x10xf32>
    %422 = vector.extract_strided_slice %252 {offsets = [0, 28], sizes = [56, 1], strides = [1, 1]} : vector<56x32xf32> to vector<56x1xf32>
    %c28 = arith.constant 28 : index
    %c0_327 = arith.constant 0 : index
    %c0_328 = arith.constant 0 : index
    %423 = vector.load %arg6[%c28, %c0_327, %c0_328] : memref<32x56x10xf32, #tpu.memory_space<vmem>>, vector<1x56x10xf32>
    %424 = vector.shape_cast %423 : vector<1x56x10xf32> to vector<56x10xf32>
    %425 = vector.broadcast %422 : vector<56x1xf32> to vector<56x10xf32>
    %426 = arith.mulf %425, %424 : vector<56x10xf32>
    %427 = arith.addf %421, %426 : vector<56x10xf32>
    %428 = vector.extract_strided_slice %252 {offsets = [0, 29], sizes = [56, 1], strides = [1, 1]} : vector<56x32xf32> to vector<56x1xf32>
    %c29 = arith.constant 29 : index
    %c0_329 = arith.constant 0 : index
    %c0_330 = arith.constant 0 : index
    %429 = vector.load %arg6[%c29, %c0_329, %c0_330] : memref<32x56x10xf32, #tpu.memory_space<vmem>>, vector<1x56x10xf32>
    %430 = vector.shape_cast %429 : vector<1x56x10xf32> to vector<56x10xf32>
    %431 = vector.broadcast %428 : vector<56x1xf32> to vector<56x10xf32>
    %432 = arith.mulf %431, %430 : vector<56x10xf32>
    %433 = arith.addf %427, %432 : vector<56x10xf32>
    %434 = vector.extract_strided_slice %252 {offsets = [0, 30], sizes = [56, 1], strides = [1, 1]} : vector<56x32xf32> to vector<56x1xf32>
    %c30 = arith.constant 30 : index
    %c0_331 = arith.constant 0 : index
    %c0_332 = arith.constant 0 : index
    %435 = vector.load %arg6[%c30, %c0_331, %c0_332] : memref<32x56x10xf32, #tpu.memory_space<vmem>>, vector<1x56x10xf32>
    %436 = vector.shape_cast %435 : vector<1x56x10xf32> to vector<56x10xf32>
    %437 = vector.broadcast %434 : vector<56x1xf32> to vector<56x10xf32>
    %438 = arith.mulf %437, %436 : vector<56x10xf32>
    %439 = arith.addf %433, %438 : vector<56x10xf32>
    %440 = vector.extract_strided_slice %252 {offsets = [0, 31], sizes = [56, 1], strides = [1, 1]} : vector<56x32xf32> to vector<56x1xf32>
    %c31 = arith.constant 31 : index
    %c0_333 = arith.constant 0 : index
    %c0_334 = arith.constant 0 : index
    %441 = vector.load %arg6[%c31, %c0_333, %c0_334] : memref<32x56x10xf32, #tpu.memory_space<vmem>>, vector<1x56x10xf32>
    %442 = vector.shape_cast %441 : vector<1x56x10xf32> to vector<56x10xf32>
    %443 = vector.broadcast %440 : vector<56x1xf32> to vector<56x10xf32>
    %444 = arith.mulf %443, %442 : vector<56x10xf32>
    %445 = arith.addf %439, %444 : vector<56x10xf32>
    %cst_335 = arith.constant dense<0.000000e+00> : vector<10xf32>
    %446 = vector.multi_reduction <add>, %445, %cst_335 [0] : vector<56x10xf32> to vector<10xf32>
    %447 = vector.shape_cast %446 : vector<10xf32> to vector<1x10xf32>
    %c0_336 = arith.constant 0 : index
    %c0_337 = arith.constant 0 : index
    %448 = vector.load %arg7[%c0_336, %c0_337] : memref<1x10xf32, #tpu.memory_space<vmem>>, vector<1x10xf32>
    %449 = arith.addf %447, %448 : vector<1x10xf32>
    %c0_338 = arith.constant 0 : index
    %c0_339 = arith.constant 0 : index
    %c0_340 = arith.constant 0 : index
    %450 = vector.load %arg8[%c0_338, %c0_339, %c0_340] : memref<1x1x10xf32, #tpu.memory_space<vmem>>, vector<1x1x10xf32>
    %451 = vector.shape_cast %450 : vector<1x1x10xf32> to vector<1x10xf32>
    %452 = vector.shape_cast %449 : vector<1x10xf32> to vector<1x1x10xf32>
    tpu.vector_store %arg8[%c0_338, %c0_339, %c0_340], %452 {strides = array<i32>} : memref<1x1x10xf32, #tpu.memory_space<vmem>>, vector<1x1x10xf32>,
    return
  }
  func.func @transform_0(%arg0: i32) -> (i32, i32, i32) {
    %c0_i32 = arith.constant 0 : i32
    %c0_i32_0 = arith.constant 0 : i32
    %c0_i32_1 = arith.constant 0 : i32
    return %arg0, %c0_i32, %c0_i32_0 : i32, i32, i32
  }
  func.func @transform_1(%arg0: i32) -> (i32, i32) {
    %c0_i32 = arith.constant 0 : i32
    %c0_i32_0 = arith.constant 0 : i32
    %c0_i32_1 = arith.constant 0 : i32
    return %c0_i32, %c0_i32_0 : i32, i32
  }
  func.func @transform_2(%arg0: i32) -> (i32, i32) {
    %c0_i32 = arith.constant 0 : i32
    %c0_i32_0 = arith.constant 0 : i32
    %c0_i32_1 = arith.constant 0 : i32
    return %c0_i32, %c0_i32_0 : i32, i32
  }
  func.func @transform_3(%arg0: i32) -> (i32, i32) {
    %c0_i32 = arith.constant 0 : i32
    %c0_i32_0 = arith.constant 0 : i32
    %c0_i32_1 = arith.constant 0 : i32
    return %c0_i32, %c0_i32_0 : i32, i32
  }
  func.func @transform_4(%arg0: i32) -> (i32, i32) {
    %c0_i32 = arith.constant 0 : i32
    %c0_i32_0 = arith.constant 0 : i32
    %c0_i32_1 = arith.constant 0 : i32
    return %c0_i32, %c0_i32_0 : i32, i32
  }
  func.func @transform_5(%arg0: i32) -> (i32, i32, i32) {
    %c0_i32 = arith.constant 0 : i32
    %c0_i32_0 = arith.constant 0 : i32
    %c0_i32_1 = arith.constant 0 : i32
    %c0_i32_2 = arith.constant 0 : i32
    return %c0_i32, %c0_i32_0, %c0_i32_1 : i32, i32, i32
  }
  func.func @transform_6(%arg0: i32) -> (i32, i32) {
    %c0_i32 = arith.constant 0 : i32
    %c0_i32_0 = arith.constant 0 : i32
    %c0_i32_1 = arith.constant 0 : i32
    return %c0_i32, %c0_i32_0 : i32, i32
  }
  func.func @transform_7(%arg0: i32) -> (i32, i32, i32) {
    %c0_i32 = arith.constant 0 : i32
    %c0_i32_0 = arith.constant 0 : i32
    %c0_i32_1 = arith.constant 0 : i32
    return %arg0, %c0_i32, %c0_i32_0 : i32, i32, i32
  }
}

</mosaic_0001>

<bundles_post_ra>
// kernel: simple_cnn_forward.1
= control target key start
LH: loop header
LB: loop body
LE: loop exit
PB: predicated region body
PF: predicated region fallthrough
CT: control target
= control target key end

     0   :  { %12 = vsyncpa [#allocation5], 0  ;;  %s9034_s0 = inlined_call_operand.vmem [shape: f32[2,784,9], index: 0, kind: input, shape index: {}]   ;;  %s9035_s1 = inlined_call_operand.vmem [shape: f32[9,16], index: 1, kind: input, shape index: {}]   ;;  %s9036_s2 = inlined_call_operand.vmem [shape: f32[1,16], index: 2, kind: input, shape index: {}]   ;;  %s9037_s3 = inlined_call_operand.vmem [shape: f32[144,32], index: 3, kind: input, shape index: {}]   ;;  %s9038_s4 = inlined_call_operand.vmem [shape: f32[1,32], index: 4, kind: input, shape index: {}]   ;;  %s9039_s5 = inlined_call_operand.vmem [shape: f32[32,56,10], index: 5, kind: input, shape index: {}]   ;;  %s9040_s6 = inlined_call_operand.vmem [shape: f32[1,10], index: 6, kind: input, shape index: {}]   ;;  %s9041_s7 = inlined_call_operand.hbm [shape: f32[2,1,10], index: 7, kind: output, shape index: {}]  }
   0x1   :  { %14 = vsyncpa [#allocation5 + $0x1], 0  ;;  %s5637_s24 = smov 0   ;;  %s5639_s25 = smov 0  }
   0x2   :  { %s5641_s26 = smov 0   ;;  %s5643_s27 = smov 0  }
   0x3 LB: > { %s5658_s28 = sadd.s32 4294967295, %s5555_s27   ;;  %s4871_s29 = sadd.s32 4294967294, %s5555_s27   ;;  %s5555_s27 = sphi %s5643_s27, %s9219_s27   ;;  %s5551_s26 = sphi %s5641_s26, %s9218_s26   ;;  %s5547_s25 = sphi %s5639_s25, %s9217_s25   ;;  %s5543_s24 = sphi %s5637_s24, %s9216_s24  }
   0x4   : > { %s5662_s30 = sadd.s32 1, %s5555_s27   ;;  %s179_s8 = sadd.s32 1, %s5551_s26 }
   0x5   : > { %s176_s9 = ssub.s32 %s5555_s27, %s5662_s30  ;;  %p189_p0 = scmp.ne.s32.totalorder %s5551_s26, %s5547_s25 }
   0x6   : > { %p177_p1 = scmp.eq.s32.totalorder %s176_s9, 0  ;;  %p190_p2 = scmp.eq.s32.totalorder %s5658_s28, 1 }
   0x7   : > { %p195_p3 = scmp.ne.s32.totalorder %s5547_s25, %s5543_s24  ;;  %p196_p4 = scmp.eq.s32.totalorder %s4871_s29, 1 }
   0x8   : > { %s5673_s10 = scalar_select %p177_p1, %s5551_s26, %s179_s8  }
   0x9   : > { %p5675_p5 = por %p190_p2, %p189_p0  ;;  %p5679_p6 = por %p196_p4, %p195_p3 }
   0xa   : > { %p4874_p7 = scmp.ge.s32.totalorder %s5555_s27, 1  ;;  %p240_p8 = scmp.lt.s32.totalorder %s5555_s27, 3 }
   0xc   : > { %p241_p9 = pnand %p4874_p7, %p240_p8 }
   0xe   : > { %244 = sbr.rel (%p241_p9) target bundleno = 2105 (0x839), region = 48 }
  0x13   : > { %v375_v0 = vld [vmem:[%s9035_s1 + $0x8] sm:$0x1]  ;;  %vm675_vm0 = vcmask 1040384   ;;  %v374_v1 = vld [vmem:[%s9035_s1] sm:$0xff]  ;;  %p271_p10 = scmp.lt.s32.totalorder %s5658_s28, 1  ;;  %vm380_vm1 = vcmask 72704  }
  0x14   : > { %4876 = vmatpush.msk.msra.mxu0 %vm675_vm0, %v375_v0  ;;  %5224 = vmatpush.msk.msra.mxu3 %vm675_vm0, %v375_v0  ;;  %vm1362_vm2 = vcmask 130048   ;;  %s9044_s29 = smov 32   ;;  %s5559_s8 = smov 16   ;;  %vm1113_vm3 = vcmask 1043456   ;;  %vm1399_vm4 = vcmask 129024   ;;  %vm1401_vm5 = vcmask 130055  }
  0x15   : > { %s272_s17 = scalar_select %p271_p10, %s5658_s28, 1  ;;  %5222 = vmatpush.msk.msra.mxu1 %vm675_vm0, %v375_v0  ;;  %5223 = vmatpush.msk.msra.mxu2 %vm675_vm0, %v375_v0  ;;  %vm1403_vm6 = vcmask 128000   ;;  %vm1405_vm7 = vcmask 130054   ;;  %vm1407_vm8 = vcmask 126976   ;;  %vm1409_vm9 = vcmask 130053  }
  0x16   : > { %694 = vmatpush.msra.mxu0 %v374_v1  ;;  %5227 = vmatpush.msra.mxu3 %v374_v1  ;;  %s5560_s9 = smov 96   ;;  %s5563_s19 = smov 64   ;;  %vm1411_vm10 = vcmask 125952   ;;  %vm1413_vm11 = vcmask 130052   ;;  %vm1415_vm12 = vcmask 124928   ;;  %vm1417_vm13 = vcmask 130051  }
  0x17   : > { %s5228_s18 = smul.u32 784, %s272_s17  ;;  %5225 = vmatpush.msra.mxu1 %v374_v1  ;;  %5226 = vmatpush.msra.mxu2 %v374_v1  ;;  %s5561_s17 = smov 112   ;;  %vm1419_vm14 = vcmask 123904   ;;  %vm1421_vm15 = vcmask 130050   ;;  %vm1423_vm0 = vcmask 122880  }
  0x18   : > { %s5564_s20 = smov 48  }
  0x19   : > { %s5696_s21 = scalar_lea.vmem %s9034_s0, %s5228_s18  ;;  %s5562_s18 = smov 80  }
  0x1a   : > { %v276_v2 = vld [vmem:[%s5696_s21] sm:$0xff]  ;;  %v334_v3 = vld [vmem:[%s5696_s21 + $0x1d0] sm:$0xff]  ;;  %v277_v4 = vld [vmem:[%s5696_s21 + $0x8] sm:$0xff] }
  0x1b   : > { %4877 = vmatmul.msk.f32.vlgmr.msra.gmra.mxu0 %vm380_vm1, %v276_v2  ;;  %4935 = vmatmul.msk.f32.vlgmr.msra.gmra.mxu3 %vm380_vm1, %v334_v3  ;;  %v335_v5 = vld [vmem:[%s5696_s21 + $0x1d8] sm:$0xff]  ;;  %v278_v6 = vld [vmem:[%s5696_s21 + $0x10] sm:$0xff]  ;;  %v336_v7 = vld [vmem:[%s5696_s21 + $0x1e0] sm:$0xff] }
  0x1c   : > { %v279_v8 = vld [vmem:[%s5696_s21 + $0x18] sm:$0xff]  ;;  %v337_v9 = vld [vmem:[%s5696_s21 + $0x1e8] sm:$0xff]  ;;  %v280_v10 = vld [vmem:[%s5696_s21 + $0x20] sm:$0xff] }
  0x1d   : > { %v338_v11 = vld [vmem:[%s5696_s21 + $0x1f0] sm:$0xff]  ;;  %v281_v12 = vld [vmem:[%s5696_s21 + $0x28] sm:$0xff]  ;;  %v339_v13 = vld [vmem:[%s5696_s21 + $0x1f8] sm:$0xff] }
  0x1e   : > { %v282_v14 = vld [vmem:[%s5696_s21 + $0x30] sm:$0xff]  ;;  %v340_v15 = vld [vmem:[%s5696_s21 + $0x200] sm:$0xff]  ;;  %v283_v16 = vld [vmem:[%s5696_s21 + $0x38] sm:$0xff] }
  0x1f   : > { %v341_v17 = vld [vmem:[%s5696_s21 + $0x208] sm:$0xff]  ;;  %v284_v18 = vld [vmem:[%s5696_s21 + $0x40] sm:$0xff]  ;;  %v342_v19 = vld [vmem:[%s5696_s21 + $0x210] sm:$0xff] }
  0x20   : > { %v285_v20 = vld [vmem:[%s5696_s21 + $0x48] sm:$0xff]  ;;  %v343_v21 = vld [vmem:[%s5696_s21 + $0x218] sm:$0xff]  ;;  %v286_v22 = vld [vmem:[%s5696_s21 + $0x50] sm:$0xff] }
  0x21   : > { %v344_v23 = vld [vmem:[%s5696_s21 + $0x220] sm:$0xff]  ;;  %v287_v25 = vld [vmem:[%s5696_s21 + $0x58] sm:$0xff]  ;;  %v345_v26 = vld [vmem:[%s5696_s21 + $0x228] sm:$0xff] }
  0x22   : > { %v316_v24 = vld [vmem:[%s5696_s21 + $0x140] sm:$0xff]  ;;  %v317_v27 = vld [vmem:[%s5696_s21 + $0x148] sm:$0xff]  ;;  %v346_v29 = vld [vmem:[%s5696_s21 + $0x230] sm:$0xff] }
  0x23   : > { %4878 = vmatmul.msk.f32.gmra.mxu0 %vm380_vm1, %v277_v4  ;;  %4936 = vmatmul.msk.f32.gmra.mxu3 %vm380_vm1, %v335_v5  ;;  %v288_v28 = vld [vmem:[%s5696_s21 + $0x60] sm:$0xff]  ;;  %v318_v30 = vld [vmem:[%s5696_s21 + $0x150] sm:$0xff]  ;;  %v289_v31 = vld [vmem:[%s5696_s21 + $0x68] sm:$0xff] }
  0x24   : > { %4917 = vmatmul.msk.f32.vlgmr.msra.gmra.mxu1 %vm380_vm1, %v316_v24  ;;  %v347_v32 = vld [vmem:[%s5696_s21 + $0x238] sm:$0xff]  ;;  %v290_v34 = vld [vmem:[%s5696_s21 + $0x70] sm:$0xff]  ;;  %v348_v35 = vld [vmem:[%s5696_s21 + $0x240] sm:$0xff] }
  0x25   : > { %v319_v33 = vld [vmem:[%s5696_s21 + $0x158] sm:$0xff]  ;;  %v320_v36 = vld [vmem:[%s5696_s21 + $0x160] sm:$0xff]  ;;  %v349_v38 = vld [vmem:[%s5696_s21 + $0x248] sm:$0xff] }
  0x26   : > { %v291_v37 = vld [vmem:[%s5696_s21 + $0x78] sm:$0xff]  ;;  %v321_v39 = vld [vmem:[%s5696_s21 + $0x168] sm:$0xff]  ;;  %v292_v41 = vld [vmem:[%s5696_s21 + $0x80] sm:$0xff] }
  0x27   : > { %v350_v42 = vld [vmem:[%s5696_s21 + $0x250] sm:$0xff]  ;;  %v293_v46 = vld [vmem:[%s5696_s21 + $0x88] sm:$0xff]  ;;  %v351_v47 = vld [vmem:[%s5696_s21 + $0x258] sm:$0xff] }
  0x28   : > { %v322_v44 = vld [vmem:[%s5696_s21 + $0x170] sm:$0xff]  ;;  %v323_v48 = vld [vmem:[%s5696_s21 + $0x178] sm:$0xff]  ;;  %v352_v52 = vld [vmem:[%s5696_s21 + $0x260] sm:$0xff] }
  0x29   : > { %4924 = vmatmul.msk.f32.vlgmr.msra.gmra.mxu2 %vm380_vm1, %v323_v48  ;;  %v294_v51 = vld [vmem:[%s5696_s21 + $0x90] sm:$0xff]  ;;  %v324_v53 = vld [vmem:[%s5696_s21 + $0x180] sm:$0xff]  ;;  %v295_v56 = vld [vmem:[%s5696_s21 + $0x98] sm:$0xff] }
  0x2a   : > { %v353_v57 = vld [vmem:[%s5696_s21 + $0x268] sm:$0xff]  ;;  %v296_v61 = vld [vmem:[%s5696_s21 + $0xa0] sm:$0xff]  ;;  %v354_v62 = vld [vmem:[%s5696_s21 + $0x270] sm:$0xff] }
  0x2b   : > { %4879 = vmatmul.msk.f32.gmra.mxu0 %vm380_vm1, %v278_v6  ;;  %4937 = vmatmul.msk.f32.gmra.mxu3 %vm380_vm1, %v336_v7  ;;  %v325_v59 = vld [vmem:[%s5696_s21 + $0x188] sm:$0xff]  ;;  %v326_v0 = vld [vmem:[%s5696_s21 + $0x190] sm:$0xff]  ;;  %v355_v3 = vld [vmem:[%s5696_s21 + $0x278] sm:$0xff] }
  0x2c   : > { %4918 = vmatmul.msk.f32.gmra.mxu1 %vm380_vm1, %v317_v27  ;;  %v297_v2 = vld [vmem:[%s5696_s21 + $0xa8] sm:$0xff]  ;;  %v298_v6 = vld [vmem:[%s5696_s21 + $0xb0] sm:$0xff]  ;;  %v356_v7 = vld [vmem:[%s5696_s21 + $0x280] sm:$0xff] }
  0x2d   : > { %v330_v24 = vld [vmem:[%s5696_s21 + $0x1b0] sm:$0xff]  ;;  %v360_v27 = vld [vmem:[%s5696_s21 + $0x2a0] sm:$0xff] }
  0x2e   : > { %v306_v48 = vld [vmem:[%s5696_s21 + $0xf0] sm:$0xff] }
  0x31   : > { %4925 = vmatmul.msk.f32.gmra.mxu2 %vm380_vm1, %v324_v53 }
  0x33   : > { %4880 = vmatmul.msk.f32.gmra.mxu0 %vm380_vm1, %v279_v8  ;;  %4938 = vmatmul.msk.f32.gmra.mxu3 %vm380_vm1, %v337_v9  ;;  %v327_v9 = vld [vmem:[%s5696_s21 + $0x198] sm:$0xff] }
  0x34   : > { %4919 = vmatmul.msk.f32.gmra.mxu1 %vm380_vm1, %v318_v30 }
  0x39   : > { %4926 = vmatmul.msk.f32.gmra.mxu2 %vm380_vm1, %v325_v59 }
  0x3b   : > { %4881 = vmatmul.msk.f32.gmra.mxu0 %vm380_vm1, %v280_v10  ;;  %4939 = vmatmul.msk.f32.gmra.mxu3 %vm380_vm1, %v338_v11  ;;  %v299_v11 = vld [vmem:[%s5696_s21 + $0xb8] sm:$0xff] }
  0x3c   : > { %4920 = vmatmul.msk.f32.gmra.mxu1 %vm380_vm1, %v319_v33 }
  0x41   : > { %4927 = vmatmul.msk.f32.gmra.mxu2 %vm380_vm1, %v326_v0  ;;  %v366_v0 = vld [vmem:[%s5696_s21 + $0x2d0] sm:$0xff] }
  0x43   : > { %4882 = vmatmul.msk.f32.gmra.mxu0 %vm380_vm1, %v281_v12  ;;  %4940 = vmatmul.msk.f32.gmra.mxu3 %vm380_vm1, %v339_v13  ;;  %v357_v12 = vld [vmem:[%s5696_s21 + $0x288] sm:$0xff] }
  0x44   : > { %4921 = vmatmul.msk.f32.gmra.mxu1 %vm380_vm1, %v320_v36  ;;  %v304_v36 = vld [vmem:[%s5696_s21 + $0xe0] sm:$0xff] }
  0x49   : > { %4928 = vmatmul.msk.f32.gmra.mxu2 %vm380_vm1, %v327_v9 }
  0x4b   : > { %4883 = vmatmul.msk.f32.gmra.mxu0 %vm380_vm1, %v282_v14  ;;  %4941 = vmatmul.msk.f32.gmra.mxu3 %vm380_vm1, %v340_v15  ;;  %v328_v14 = vld [vmem:[%s5696_s21 + $0x1a0] sm:$0xff] }
  0x4c   : > { %4922 = vmatmul.msk.f32.gmra.mxu1 %vm380_vm1, %v321_v39  ;;  %v333_v39 = vld [vmem:[%s5696_s21 + $0x1c8] sm:$0xff] }
  0x51   : > { %4929 = vmatmul.msk.f32.gmra.mxu2 %vm380_vm1, %v328_v14  ;;  %v368_v14 = vld [vmem:[%s5696_s21 + $0x2e0] sm:$0xff] }
  0x53   : > { %4884 = vmatmul.msk.f32.gmra.mxu0 %vm380_vm1, %v283_v16  ;;  %4942 = vmatmul.msk.f32.gmra.mxu3 %vm380_vm1, %v341_v17  ;;  %v300_v16 = vld [vmem:[%s5696_s21 + $0xc0] sm:$0xff]  ;;  %v358_v17 = vld [vmem:[%s5696_s21 + $0x290] sm:$0xff] }
  0x54   : > { %4923 = vmatmul.msk.f32.gmra.mxu1 %vm380_vm1, %v322_v44  ;;  %v363_v44 = vld [vmem:[%s5696_s21 + $0x2b8] sm:$0xff] }
  0x5b   : > { %4885 = vmatmul.msk.f32.gmra.mxu0 %vm380_vm1, %v284_v18  ;;  %4943 = vmatmul.msk.f32.gmra.mxu3 %vm380_vm1, %v342_v19  ;;  %v329_v19 = vld [vmem:[%s5696_s21 + $0x1a8] sm:$0xff] }
  0x5c   : > { %4930 = vmatmul.msk.f32.gmra.mxu2 %vm380_vm1, %v329_v19  ;;  %v311_v19 = vld [vmem:[%s5696_s21 + $0x118] sm:$0xff] }
  0x63   : > { %4886 = vmatmul.msk.f32.gmra.mxu0 %vm380_vm1, %v285_v20  ;;  %4944 = vmatmul.msk.f32.gmra.mxu3 %vm380_vm1, %v343_v21  ;;  %v301_v21 = vld [vmem:[%s5696_s21 + $0xc8] sm:$0xff] }
  0x64   : > { %4931 = vmatmul.msk.f32.gmra.mxu2 %vm380_vm1, %v330_v24 }
  0x6b   : > { %4887 = vmatmul.msk.f32.gmra.mxu0 %vm380_vm1, %v286_v22  ;;  %4945 = vmatmul.msk.f32.gmra.mxu3 %vm380_vm1, %v344_v23  ;;  %v359_v22 = vld [vmem:[%s5696_s21 + $0x298] sm:$0xff] }
  0x73   : > { %4888 = vmatmul.msk.f32.gmra.mxu0 %vm380_vm1, %v287_v25  ;;  %4946 = vmatmul.msk.f32.gmra.mxu3 %vm380_vm1, %v345_v26  ;;  %v302_v26 = vld [vmem:[%s5696_s21 + $0xd0] sm:$0xff] }
  0x7b   : > { %4889 = vmatmul.msk.f32.gmra.mxu0 %vm380_vm1, %v288_v28  ;;  %4947 = vmatmul.msk.f32.gmra.mxu3 %vm380_vm1, %v346_v29  ;;  %v331_v29 = vld [vmem:[%s5696_s21 + $0x1b8] sm:$0xff] }
  0x7c   : > { %4932 = vmatmul.msk.f32.gmra.mxu2 %vm380_vm1, %v331_v29  ;;  %v370_v29 = vld [vmem:[%s5696_s21 + $0x2f0] sm:$0xff] }
  0x83   : > { %4890 = vmatmul.msk.f32.gmra.mxu0 %vm380_vm1, %v289_v31  ;;  %4948 = vmatmul.msk.f32.gmra.mxu3 %vm380_vm1, %v347_v32  ;;  %v303_v31 = vld [vmem:[%s5696_s21 + $0xd8] sm:$0xff]  ;;  %v361_v32 = vld [vmem:[%s5696_s21 + $0x2a8] sm:$0xff] }
  0x8b   : > { %4891 = vmatmul.msk.f32.gmra.mxu0 %vm380_vm1, %v290_v34  ;;  %4949 = vmatmul.msk.f32.gmra.mxu3 %vm380_vm1, %v348_v35  ;;  %v332_v34 = vld [vmem:[%s5696_s21 + $0x1c0] sm:$0xff] }
  0x8c   : > { %4933 = vmatmul.msk.f32.gmra.mxu2 %vm380_vm1, %v332_v34 }
  0x93   : > { %4892 = vmatmul.msk.f32.gmra.mxu0 %vm380_vm1, %v291_v37  ;;  %4950 = vmatmul.msk.f32.gmra.mxu3 %vm380_vm1, %v349_v38  ;;  %v362_v37 = vld [vmem:[%s5696_s21 + $0x2b0] sm:$0xff] }
  0x94   : > { %4934 = vmatmul.msk.f32.gmra.mxu2 %vm380_vm1, %v333_v39 }
  0x98   : > { %v5773_v40 = vpop.f32.mrf.mxu0 }
  0x9b   : > { %4893 = vmatmul.msk.f32.gmra.mxu0 %vm380_vm1, %v292_v41  ;;  %4951 = vmatmul.msk.f32.gmra.mxu3 %vm380_vm1, %v350_v42  ;;  %v305_v42 = vld [vmem:[%s5696_s21 + $0xe8] sm:$0xff] }
  0x9e   : > { %v5780_v43 = vpop.f32.mrf.mxu3 }
  0xa0   : > { %v5783_v45 = vpop.f32.mrf.mxu0 }
  0xa3   : > { %4894 = vmatmul.msk.f32.gmra.mxu0 %vm380_vm1, %v293_v46  ;;  %4952 = vmatmul.msk.f32.gmra.mxu3 %vm380_vm1, %v351_v47 }
  0xa6   : > { %v5792_v49 = vpop.f32.mrf.mxu3 }
  0xa8   : > { %v5794_v50 = vpop.f32.mrf.mxu0 }
  0xab   : > { %4895 = vmatmul.msk.f32.gmra.mxu0 %vm380_vm1, %v294_v51  ;;  %4953 = vmatmul.msk.f32.gmra.mxu3 %vm380_vm1, %v352_v52  ;;  %v364_v51 = vld [vmem:[%s5696_s21 + $0x2c0] sm:$0xff] }
  0xae   : > { %v5802_v54 = vpop.f32.mrf.mxu3 }
  0xb0   : > { %v5804_v55 = vpop.f32.mrf.mxu0 }
  0xb3   : > { %4896 = vmatmul.msk.f32.gmra.mxu0 %vm380_vm1, %v295_v56  ;;  %4954 = vmatmul.msk.f32.gmra.mxu3 %vm380_vm1, %v353_v57  ;;  %v307_v56 = vld [vmem:[%s5696_s21 + $0xf8] sm:$0xff]  ;;  %v365_v57 = vld [vmem:[%s5696_s21 + $0x2c8] sm:$0xff] }
  0xb6   : > { %v5810_v58 = vpop.f32.mrf.mxu3 }
  0xb8   : > { %v5813_v60 = vpop.f32.mrf.mxu0 }
  0xbb   : > { %4897 = vmatmul.msk.f32.gmra.mxu0 %vm380_vm1, %v296_v61  ;;  %4955 = vmatmul.msk.f32.gmra.mxu3 %vm380_vm1, %v354_v62  ;;  %v308_v62 = vld [vmem:[%s5696_s21 + $0x100] sm:$0xff] }
  0xbe   : > { %v5820_v63 = vpop.f32.mrf.mxu3 }
  0xc0   : > { %v5823_v1 = vpop.f32.mrf.mxu0 }
  0xc3   : > { %4898 = vmatmul.msk.f32.gmra.mxu0 %vm380_vm1, %v297_v2  ;;  %4956 = vmatmul.msk.f32.gmra.mxu3 %vm380_vm1, %v355_v3 }
  0xc6   : > { %v5830_v4 = vpop.f32.mrf.mxu3 }
  0xc8   : > { %v5832_v5 = vpop.f32.mrf.mxu0 }
  0xcb   : > { %4899 = vmatmul.msk.f32.gmra.mxu0 %vm380_vm1, %v298_v6  ;;  %4957 = vmatmul.msk.f32.gmra.mxu3 %vm380_vm1, %v356_v7  ;;  %v309_v6 = vld [vmem:[%s5696_s21 + $0x108] sm:$0xff]  ;;  %v367_v7 = vld [vmem:[%s5696_s21 + $0x2d8] sm:$0xff] }
  0xce   : > { %v5838_v8 = vpop.f32.mrf.mxu3 }
  0xd0   : > { %v5841_v10 = vpop.f32.mrf.mxu0 }
  0xd3   : > { %4900 = vmatmul.msk.f32.gmra.mxu0 %vm380_vm1, %v299_v11  ;;  %4958 = vmatmul.msk.f32.gmra.mxu3 %vm380_vm1, %v357_v12  ;;  %v310_v12 = vld [vmem:[%s5696_s21 + $0x110] sm:$0xff] }
  0xd6   : > { %v5848_v13 = vpop.f32.mrf.mxu3 }
  0xd8   : > { %v5851_v15 = vpop.f32.mrf.mxu0 }
  0xdb   : > { %4901 = vmatmul.msk.f32.gmra.mxu0 %vm380_vm1, %v300_v16  ;;  %4959 = vmatmul.msk.f32.gmra.mxu3 %vm380_vm1, %v358_v17 }
  0xde   : > { %v5858_v18 = vpop.f32.mrf.mxu3 }
  0xe0   : > { %v5861_v20 = vpop.f32.mrf.mxu0 }
  0xe3   : > { %4902 = vmatmul.msk.f32.gmra.mxu0 %vm380_vm1, %v301_v21  ;;  %4960 = vmatmul.msk.f32.gmra.mxu3 %vm380_vm1, %v359_v22  ;;  %v369_v21 = vld [vmem:[%s5696_s21 + $0x2e8] sm:$0xff]  ;;  %v5557_v22 = vmov 0.0  }
  0xe4   : > { %1363 = vst.msk [vmem:[#allocation2] sm:$0xff] %vm1362_vm2, %v5557_v22 }
  0xe5   : > { %1364 = vst.msk [vmem:[#allocation2 + $0x8] sm:$0xff] %vm1362_vm2, %v5557_v22 }
  0xe6   : > { %v5868_v23 = vpop.f32.mrf.mxu3  ;;  %1365 = vst.msk [vmem:[#allocation2 + $0x10] sm:$0xff] %vm1362_vm2, %v5557_v22 }
  0xe7   : > { %1366 = vst.msk [vmem:[#allocation2 + $0x18] sm:$0xff] %vm1362_vm2, %v5557_v22 }
  0xe8   : > { %v5871_v25 = vpop.f32.mrf.mxu0  ;;  %1367 = vst.msk [vmem:[#allocation2 + $0x20] sm:$0xff] %vm1362_vm2, %v5557_v22 }
  0xe9   : > { %1368 = vst.msk [vmem:[#allocation2 + $0x28] sm:$0xff] %vm1362_vm2, %v5557_v22 }
  0xea   : > { %1369 = vst.msk [vmem:[#allocation2 + $0x30] sm:$0xff] %vm1362_vm2, %v5557_v22 }
  0xeb   : > { %4903 = vmatmul.msk.f32.gmra.mxu0 %vm380_vm1, %v302_v26  ;;  %4961 = vmatmul.msk.f32.gmra.mxu3 %vm380_vm1, %v360_v27  ;;  %v312_v27 = vld [vmem:[%s5696_s21 + $0x120] sm:$0xff]  ;;  %1370 = vst.msk [vmem:[#allocation2 + $0x38] sm:$0xff] %vm1362_vm2, %v5557_v22 }
  0xec   : > { %1371 = vst.msk [vmem:[#allocation2 + $0x40] sm:$0xff] %vm1362_vm2, %v5557_v22 }
  0xed   : > { %1372 = vst.msk [vmem:[#allocation2 + $0x48] sm:$0xff] %vm1362_vm2, %v5557_v22 }
  0xee   : > { %v5878_v28 = vpop.f32.mrf.mxu3  ;;  %1373 = vst.msk [vmem:[#allocation2 + $0x50] sm:$0xff] %vm1362_vm2, %v5557_v22 }
  0xef   : > { %1374 = vst.msk [vmem:[#allocation2 + $0x58] sm:$0xff] %vm1362_vm2, %v5557_v22 }
  0xf0   : > { %v5881_v30 = vpop.f32.mrf.mxu0  ;;  %1375 = vst.msk [vmem:[#allocation2 + $0x60] sm:$0xff] %vm1362_vm2, %v5557_v22 }
  0xf1   : > { %1376 = vst.msk [vmem:[#allocation2 + $0x68] sm:$0xff] %vm1362_vm2, %v5557_v22 }
  0xf2   : > { %1377 = vst.msk [vmem:[#allocation2 + $0x70] sm:$0xff] %vm1362_vm2, %v5557_v22 }
  0xf3   : > { %4904 = vmatmul.msk.f32.gmra.mxu0 %vm380_vm1, %v303_v31  ;;  %4962 = vmatmul.msk.f32.gmra.mxu3 %vm380_vm1, %v361_v32  ;;  %v5973_v31 = vld [vmem:[%s9036_s2] ss:$0 sm:$0xff]  ;;  %v5979_v32 = vpop.f32.mrf.mxu2  ;;  %1378 = vst.msk [vmem:[#allocation2 + $0x78] sm:$0xff] %vm1362_vm2, %v5557_v22 }
  0xf4   : > { %1379 = vst.msk [vmem:[#allocation2 + $0x80] sm:$0xff] %vm1362_vm2, %v5557_v22 }
  0xf5   : > { %1380 = vst.msk [vmem:[#allocation2 + $0x88] sm:$0xff] %vm1362_vm2, %v5557_v22 }
  0xf6   : > { %v5888_v33 = vpop.f32.mrf.mxu3  ;;  %1381 = vst.msk [vmem:[#allocation2 + $0x90] sm:$0xff] %vm1362_vm2, %v5557_v22 }
  0xf7   : > { %1382 = vst.msk [vmem:[#allocation2 + $0x98] sm:$0xff] %vm1362_vm2, %v5557_v22 }
  0xf8   : > { %v5891_v35 = vpop.f32.mrf.mxu0  ;;  %1383 = vst.msk [vmem:[#allocation2 + $0xa0] sm:$0xff] %vm1362_vm2, %v5557_v22 }
  0xf9   : > { %1384 = vst.msk [vmem:[#allocation2 + $0xa8] sm:$0xff] %vm1362_vm2, %v5557_v22 }
  0xfa   : > { %1385 = vst.msk [vmem:[#allocation2 + $0xb0] sm:$0xff] %vm1362_vm2, %v5557_v22 }
  0xfb   : > { %4905 = vmatmul.msk.f32.gmra.mxu0 %vm380_vm1, %v304_v36  ;;  %4963 = vmatmul.msk.f32.gmra.mxu3 %vm380_vm1, %v362_v37  ;;  %v1522_v36 = vld [vmem:[#allocation2 + $0x1] sm:$0xff]  ;;  %1386 = vst.msk [vmem:[#allocation2 + $0xb8] sm:$0xff] %vm1362_vm2, %v5557_v22 }
  0xfc   : > { %1536 = vrot.lane.b32.xlu1 %v1522_v36, %s9044_s29  ;;  %1387 = vst.msk [vmem:[#allocation2 + $0xc0] sm:$0xff] %vm1362_vm2, %v5557_v22 }
  0xfd   : > { %1388 = vst.msk [vmem:[#allocation2 + $0xc8] sm:$0xff] %vm1362_vm2, %v5557_v22 }
  0xfe   : > { %v5898_v38 = vpop.f32.mrf.mxu3  ;;  %1389 = vst.msk [vmem:[#allocation2 + $0xd0] sm:$0xff] %vm1362_vm2, %v5557_v22 }
  0xff   : > { %1390 = vst.msk [vmem:[#allocation2 + $0xd8] sm:$0xff] %vm1362_vm2, %v5557_v22 }
 0x100   : > { %v5901_v41 = vpop.f32.mrf.mxu0  ;;  %1391 = vst.msk [vmem:[#allocation2 + $0xe0] sm:$0xff] %vm1362_vm2, %v5557_v22 }
 0x101   : > { %9081 = vst [vmem:[#allocation7_spill] sm:$0xff] %v5901_v41 }
 0x102   : > { %1392 = vst.msk [vmem:[#allocation2 + $0xe8] sm:$0xff] %vm1362_vm2, %v5557_v22 }
 0x103   : > { %4906 = vmatmul.msk.f32.gmra.mxu0 %vm380_vm1, %v305_v42  ;;  %4964 = vmatmul.msk.f32.gmra.mxu3 %vm380_vm1, %v363_v44  ;;  %1393 = vst.msk [vmem:[#allocation2 + $0xf0] sm:$0xff] %vm1362_vm2, %v5557_v22 }
 0x104   : > { %1822 = vrot.lane.b32.xlu1 %v1522_v36, %s5559_s8  ;;  %v373_v36 = vld [vmem:[%s5696_s21 + $0x308] sm:$0xff]  ;;  %1394 = vst.msk [vmem:[#allocation2 + $0xf8] sm:$0xff] %vm1362_vm2, %v5557_v22 }
 0x105   : > { %1395 = vst.msk [vmem:[#allocation2 + $0x100] sm:$0xff] %vm1362_vm2, %v5557_v22 }
 0x106   : > { %v5908_v46 = vpop.f32.mrf.mxu3  ;;  %1396 = vst.msk [vmem:[#allocation2 + $0x108] sm:$0xff] %vm1362_vm2, %v5557_v22 }
 0x107   : > { %9082 = vst [vmem:[#allocation8_spill] sm:$0xff] %v5908_v46 }
 0x108   : > { %v5910_v47 = vpop.f32.mrf.mxu0  ;;  %1397 = vst.msk [vmem:[#allocation2 + $0x110] sm:$0xff] %vm1362_vm2, %v5557_v22 }
 0x109   : > { %9083 = vst [vmem:[#allocation9_spill] sm:$0xff] %v5910_v47 }
 0x10a   : > { %1398 = vst.msk [vmem:[#allocation2 + $0x118] sm:$0xff] %vm1362_vm2, %v5557_v22  ;;  %v2832_v22 = vld [vmem:[%s9037_s3 + $0x80] sm:$0xff] }
 0x10b   : > { %4907 = vmatmul.msk.f32.gmra.mxu0 %vm380_vm1, %v306_v48  ;;  %4965 = vmatmul.msk.f32.gmra.mxu3 %vm380_vm1, %v364_v51  ;;  %v313_v48 = vld [vmem:[%s5696_s21 + $0x128] sm:$0xff]  ;;  %v371_v51 = vld [vmem:[%s5696_s21 + $0x2f8] sm:$0xff] }
 0x10e   : > { %v5916_v52 = vpop.f32.mrf.mxu3 }
 0x10f   : > { %9084 = vst [vmem:[#allocation10_spill] sm:$0xff] %v5916_v52 }
 0x110   : > { %v5918_v53 = vpop.f32.mrf.mxu0 }
 0x111   : > { %9085 = vst [vmem:[#allocation11_spill] sm:$0xff] %v5918_v53 }
 0x113   : > { %4908 = vmatmul.msk.f32.gmra.mxu0 %vm380_vm1, %v307_v56  ;;  %4966 = vmatmul.msk.f32.gmra.mxu3 %vm380_vm1, %v365_v57 }
 0x116   : > { %v5924_v59 = vpop.f32.mrf.mxu3 }
 0x118   : > { %v5926_v61 = vpop.f32.mrf.mxu0 }
 0x11b   : > { %4909 = vmatmul.msk.f32.gmra.mxu0 %vm380_vm1, %v308_v62  ;;  %4967 = vmatmul.msk.f32.gmra.mxu3 %vm380_vm1, %v366_v0  ;;  %v6012_v62 = vpop.f32.mrf.mxu2 }
 0x11c   : > { %9086 = vst [vmem:[#allocation12_spill] sm:$0xff] %v6012_v62 }
 0x11e   : > { %v918_v2 = vpop.f32.mrf.mxu3 }
 0x11f   : > { %v919_v37 = vadd.f32 %v5973_v31, %v918_v2 }
 0x120   : > { %v5932_v3 = vpop.f32.mrf.mxu0 }
 0x121   : > { %v1064_v56 = vmax.f32 %v919_v37, 0.0 }
 0x123   : > { %4910 = vmatmul.msk.f32.gmra.mxu0 %vm380_vm1, %v309_v6  ;;  %4968 = vmatmul.msk.f32.gmra.mxu3 %vm380_vm1, %v367_v7  ;;  %v6017_v0 = vrot.slane %v1064_v56, 4  ;;  %v314_v7 = vld [vmem:[%s5696_s21 + $0x130] sm:$0xff] }
 0x126   : > { %v921_v9 = vpop.f32.mrf.mxu3 }
 0x127   : > { %v922_v34 = vadd.f32 %v5973_v31, %v921_v9  ;;  %v372_v9 = vld [vmem:[%s5696_s21 + $0x300] sm:$0xff] }
 0x128   : > { %v5938_v11 = vpop.f32.mrf.mxu0 }
 0x129   : > { %v1065_v42 = vmax.f32 %v922_v34, 0.0  ;;  %v315_v34 = vld [vmem:[%s5696_s21 + $0x138] sm:$0xff] }
 0x12b   : > { %4911 = vmatmul.msk.f32.gmra.mxu0 %vm380_vm1, %v310_v12  ;;  %4969 = vmatmul.msk.f32.gmra.mxu3 %vm380_vm1, %v368_v14  ;;  %v1241_v57 = vrot.slane %v1065_v42, 4 }
 0x12d   : > { %v6033_v12 = vsel %vm1113_vm3, %v6017_v0, %v1241_v57 }
 0x12e   : > { %v5944_v16 = vpop.f32.mrf.mxu3 }
 0x12f   : > { %v925_v14 = vadd.f32 %v5973_v31, %v5944_v16 }
 0x130   : > { %v5946_v17 = vpop.f32.mrf.mxu0 }
 0x133   : > { %4912 = vmatmul.msk.f32.gmra.mxu0 %vm380_vm1, %v311_v19  ;;  %4970 = vmatmul.msk.f32.gmra.mxu3 %vm380_vm1, %v369_v21  ;;  %v1479_v19 = vld [vmem:[#allocation2 + $0x48] sm:$0xff]  ;;  %v843_v21 = vpop.f32.mrf.mxu2 }
 0x134   : > { %1493 = vrot.lane.b32.xlu0 %v1479_v19, %s5559_s8  ;;  %1801 = vst.msk [vmem:[#allocation3 + $0x70] sm:$0xff] %vm1362_vm2, %v1479_v19  ;;  %v2388_v19 = vld [vmem:[#allocation2 + $0x110] sm:$0xff] }
 0x135   : > { %2408 = vrot.lane.b32.xlu2 %v2388_v19, %s5561_s17  ;;  %v697_v19 = vadd.f32 %v5973_v31, %v5773_v40 }
 0x136   : > { %v5956_v24 = vpop.f32.mrf.mxu3 }
 0x137   : > { %v928_v42 = vadd.f32 %v5973_v31, %v5956_v24  ;;  %v6085_v24 = vadd.f32 %v5973_v31, %v5924_v59 }
 0x138   : > { %v5962_v26 = vpop.f32.mrf.mxu0 }
 0x139   : > { %9089 = vst [vmem:[#allocation15_spill] sm:$0xff] %v6085_v24 }
 0x13b   : > { %4913 = vmatmul.msk.f32.gmra.mxu0 %vm380_vm1, %v312_v27  ;;  %4971 = vmatmul.msk.f32.gmra.mxu3 %vm380_vm1, %v370_v29  ;;  %v1066_v29 = vmax.f32 %v925_v14, 0.0  ;;  %v846_v56 = vpop.f32.mrf.mxu2 }
 0x13c   : > { %v847_v41 = vadd.f32 %v5973_v31, %v846_v56 }
 0x13d   : > { %v1243_v37 = vrot.slane %v1066_v29, 4  ;;  %v2833_v29 = vld [vmem:[%s9037_s3 + $0x88] sm:$0xff] }
 0x13e   : > { %v5990_v39 = vpop.f32.mrf.mxu3  ;;  %3037 = vmatpush.msrb.mxu2 %v2833_v29 }
 0x13f   : > { %v6088_v14 = vsel %vm1113_vm3, %v1241_v57, %v1243_v37 }
 0x140   : > { %v5996_v44 = vpop.f32.mrf.mxu0  ;;  %3038 = vmatpush.msrb.mxu2 %v2832_v22 }
 0x143   : > { %4914 = vmatmul.msk.f32.gmra.mxu0 %vm380_vm1, %v313_v48  ;;  %4972 = vmatmul.msk.f32.gmra.mxu3 %vm380_vm1, %v371_v51  ;;  %v2346_v48 = vld [vmem:[#allocation2 + $0xc8] sm:$0xff]  ;;  %v849_v29 = vpop.f32.mrf.mxu2 }
 0x144   : > { %2366 = vrot.lane.b32.xlu1 %v2346_v48, %s5560_s9  ;;  %v844_v48 = vadd.f32 %v5973_v31, %v843_v21 }
 0x146   : > { %v6019_v2 = vpop.f32.mrf.mxu3  ;;  %v1039_v47 = vmax.f32 %v844_v48, 0.0 }
 0x148   : > { %v6025_v6 = vpop.f32.mrf.mxu0 }
 0x149   : > { %9087 = vst [vmem:[#allocation13_spill] sm:$0xff] %v6025_v6 }
 0x14b   : > { %4915 = vmatmul.msk.f32.gmra.mxu0 %vm380_vm1, %v314_v7  ;;  %4973 = vmatmul.msk.f32.gmra.mxu3 %vm380_vm1, %v372_v9  ;;  %v1067_v7 = vmax.f32 %v928_v42, 0.0 }
 0x14d   : > { %v1245_v59 = vrot.slane %v1067_v7, 4 }
 0x14e   : > { %v6050_v27 = vpop.f32.mrf.mxu3 }
 0x14f   : > { %v6108_v53 = vsel %vm1113_vm3, %v1243_v37, %v1245_v59 }
 0x150   : > { %v6056_v16 = vpop.f32.mrf.mxu0 }
 0x151   : > { %9088 = vst [vmem:[#allocation14_spill] sm:$0xff] %v6056_v16 }
 0x153   : > { %4916 = vmatmul.msk.f32.gmra.mxu0 %vm380_vm1, %v315_v34  ;;  %4974 = vmatmul.msk.f32.gmra.mxu3 %vm380_vm1, %v373_v36  ;;  %v9042_v34 = vmax.f32 %v6085_v24, 0.0  ;;  %v931_v36 = vadd.f32 %v5973_v31, %v5990_v39  ;;  %vm1426_vm1 = vcmask 130049  }
 0x155   : > { %v1238_v52 = vrot.slane %v9042_v34, 4  ;;  %v1068_v16 = vmax.f32 %v931_v36, 0.0  ;;  %v934_v34 = vadd.f32 %v5973_v31, %v6019_v2 }
 0x156   : > { %v6077_v51 = vpop.f32.mrf.mxu3 }
 0x157   : > { %v1247_v46 = vrot.slane %v1068_v16, 4  ;;  %v1240_v36 = vsel %vm1113_vm3, %v1238_v52, %v6017_v0 }
 0x158   : > { %v768_v9 = vpop.f32.mrf.mxu0  ;;  %v1312_v40 = vmax.f32 %v1039_v47, %v1240_v36  ;;  %v700_v47 = vadd.f32 %v5973_v31, %v5783_v45 }
 0x159   : > { %v6101_v57 = vadd.f32 %v5973_v31, %v768_v9  ;;  %v6127_v0 = vsel %vm1113_vm3, %v1245_v59, %v1247_v46  ;;  %v937_v59 = vadd.f32 %v5973_v31, %v6050_v27 }
 0x15b   : > { %v1014_v39 = vmax.f32 %v6101_v57, 0.0 }
 0x15d   : > { %v1114_v37 = vrot.slane %v1014_v39, 4 }
 0x15e   : > { %v942_v42 = vpop.f32.mrf.mxu3 }
 0x15f   : > { %v943_v9 = vadd.f32 %v5973_v31, %v942_v42  ;;  %v990_v42 = vmax.f32 %v697_v19, 0.0 }
 0x160   : > { %v771_v7 = vpop.f32.mrf.mxu0 }
 0x161   : > { %v772_v22 = vadd.f32 %v5973_v31, %v771_v7  ;;  %v1072_v24 = vmax.f32 %v943_v9, 0.0  ;;  %v871_v7 = vadd.f32 %v5973_v31, %v5780_v43  ;;  %v852_v43 = vpop.f32.mrf.mxu2 }
 0x163   : > { %v1015_v21 = vmax.f32 %v772_v22, 0.0  ;;  %v1069_v22 = vmax.f32 %v934_v34, 0.0  ;;  %v6129_v9 = vrot.slane %v1072_v24, 4  ;;  %v1040_v24 = vmax.f32 %v847_v41, 0.0 }
 0x164   : > { %v1070_v41 = vmax.f32 %v937_v59, 0.0 }
 0x165   : > { %v1115_v62 = vrot.slane %v1015_v21, 4  ;;  %v1249_v56 = vrot.slane %v1069_v22, 4 }
 0x166   : > { %v945_v6 = vpop.f32.mrf.mxu3 }
 0x167   : > { %v1116_v48 = vsel %vm1113_vm3, %v1114_v37, %v1115_v62  ;;  %v946_v16 = vadd.f32 %v5973_v31, %v945_v6  ;;  %v1048_v37 = vmax.f32 %v871_v7, 0.0  ;;  %v874_v7 = vadd.f32 %v5973_v31, %v5792_v49 }
 0x168   : > { %v1188_v2 = vmax.f32 %v990_v42, %v1116_v48  ;;  %v774_v52 = vpop.f32.mrf.mxu0 }
 0x169   : > { %v1073_v19 = vmax.f32 %v946_v16, 0.0  ;;  %v775_v21 = vadd.f32 %v5973_v31, %v774_v52  ;;  %v991_v16 = vmax.f32 %v700_v47, 0.0  ;;  %v1313_v52 = vmax.f32 %v1040_v24, %v6033_v12  ;;  %v855_v12 = vpop.f32.mrf.mxu2 }
 0x16a   : > { %v1337_v36 = vmax.f32 %v1188_v2, %v1312_v40  ;;  %v850_v2 = vadd.f32 %v5973_v31, %v849_v29  ;;  %v703_v29 = vadd.f32 %v5973_v31, %v5794_v50  ;;  %v1049_v24 = vmax.f32 %v874_v7, 0.0 }
 0x16b   : > { %v1257_v6 = vrot.slane %v1073_v19, 4  ;;  %v1016_v34 = vmax.f32 %v775_v21, 0.0 }
 0x16c   : > { %1400 = vst.msk [vmem:[#allocation2 + $0x9] sm:$0x7f] %vm1399_vm4, %v1337_v36  ;;  %v992_v7 = vmax.f32 %v703_v29, 0.0 }
 0x16d   : > { %1402 = vst.msk [vmem:[#allocation2 + $0xa] sm:$0x80] %vm1401_vm5, %v1337_v36  ;;  %v1258_v42 = vsel %vm1113_vm3, %v6129_v9, %v1257_v6  ;;  %v1117_v48 = vrot.slane %v1016_v34, 4  ;;  %v6149_v36 = vsel %vm1113_vm3, %v1247_v46, %v1249_v56  ;;  %v940_v46 = vadd.f32 %v5973_v31, %v6077_v51 }
 0x16e   : > { %v6140_v45 = vmax.f32 %v1048_v37, %v1258_v42  ;;  %v948_v40 = vpop.f32.mrf.mxu3 }
 0x16f   : > { %v1118_v27 = vsel %vm1113_vm3, %v1115_v62, %v1117_v48  ;;  %v949_v22 = vadd.f32 %v5973_v31, %v948_v40  ;;  %v1041_v62 = vmax.f32 %v850_v2, 0.0 }
 0x170   : > { %v1189_v19 = vmax.f32 %v991_v16, %v1118_v27  ;;  %v777_v21 = vpop.f32.mrf.mxu0  ;;  %v6156_v16 = vrot.slane %v1070_v41, 4  ;;  %v853_v41 = vadd.f32 %v5973_v31, %v852_v43 }
 0x171   : > { %v1074_v47 = vmax.f32 %v949_v22, 0.0  ;;  %v778_v34 = vadd.f32 %v5973_v31, %v777_v21  ;;  %v1314_v27 = vmax.f32 %v1041_v62, %v6088_v14  ;;  %v1071_v21 = vmax.f32 %v940_v46, 0.0 }
 0x172   : > { %v1338_v49 = vmax.f32 %v1189_v19, %v1313_v52  ;;  %v6182_v14 = vsel %vm1113_vm3, %v1249_v56, %v6156_v16  ;;  %v1042_v62 = vmax.f32 %v853_v41, 0.0 }
 0x173   : > { %v1259_v37 = vrot.slane %v1074_v47, 4  ;;  %v1017_v42 = vmax.f32 %v778_v34, 0.0  ;;  %v6154_v59 = vld [vmem:[#allocation2 + $0x9] sm:$0xff] }
 0x174   : > { %1404 = vst.msk [vmem:[#allocation2 + $0x12] sm:$0x3f] %vm1403_vm6, %v1338_v49  ;;  %2312 = vrot.lane.b32.xlu0 %v6154_v59, %s5562_s18  ;;  %2074 = vrot.lane.b32.xlu1 %v6154_v59, %s5561_s17  ;;  %v1466_v50 = vld [vmem:[#allocation2 + $0x8] sm:$0xff] }
 0x175   : > { %1406 = vst.msk [vmem:[#allocation2 + $0x13] sm:$0xc0] %vm1405_vm7, %v1338_v49  ;;  %v1260_v40 = vsel %vm1113_vm3, %v1257_v6, %v1259_v37  ;;  %v1119_v2 = vrot.slane %v1017_v42, 4  ;;  %1538 = vrot.lane.b32.xlu2 %v6154_v59, %s9044_s29  ;;  %v877_v6 = vadd.f32 %v5973_v31, %v5802_v54  ;;  %v2214_v54 = vld [vmem:[#allocation2 + $0x8] sm:$0xff] }
 0x176   : > { %v6169_v51 = vmax.f32 %v1049_v24, %v1260_v40  ;;  %v951_v22 = vpop.f32.mrf.mxu3  ;;  %1787 = vst.msk [vmem:[#allocation3 + $0x8] sm:$0xff] %vm1362_vm2, %v6154_v59  ;;  %v6189_v40 = vrot.slane %v1071_v21, 4  ;;  %v856_v21 = vadd.f32 %v5973_v31, %v855_v12 }
 0x177   : > { %v1120_v52 = vsel %vm1113_vm3, %v1117_v48, %v1119_v2  ;;  %v952_v19 = vadd.f32 %v5973_v31, %v951_v22  ;;  %1473 = vst.msk [vmem:[#allocation3 + $0x10] sm:$0xff] %vm1362_vm2, %v1466_v50  ;;  %v706_v48 = vadd.f32 %v5973_v31, %v5804_v55  ;;  %v1050_v50 = vmax.f32 %v877_v6, 0.0  ;;  %v858_v22 = vpop.f32.mrf.mxu2 }
 0x178   : > { %v1190_v47 = vmax.f32 %v992_v7, %v1120_v52  ;;  %v780_v34 = vpop.f32.mrf.mxu0  ;;  %v6215_v12 = vsel %vm1113_vm3, %v6156_v16, %v6189_v40 }
 0x179   : > { %v1075_v43 = vmax.f32 %v952_v19, 0.0  ;;  %v781_v29 = vadd.f32 %v5973_v31, %v780_v34  ;;  %v993_v41 = vmax.f32 %v706_v48, 0.0  ;;  %v1315_v19 = vmax.f32 %v1042_v62, %v6108_v53 }
 0x17a   : > { %v1339_v49 = vmax.f32 %v1190_v47, %v1314_v27  ;;  %v880_v34 = vadd.f32 %v5973_v31, %v5810_v58 }
 0x17b   : > { %v1261_v42 = vrot.slane %v1075_v43, 4  ;;  %v1018_v24 = vmax.f32 %v781_v29, 0.0  ;;  %v6187_v46 = vld [vmem:[#allocation2 + $0x11] sm:$0xff]  ;;  %v6210_v43 = vpop.f32.mrf.mxu1 }
 0x17c   : > { %1408 = vst.msk [vmem:[#allocation2 + $0x1b] sm:$0x1f] %vm1407_vm8, %v1339_v49  ;;  %2592 = vrot.lane.b32.xlu0 %v6154_v59, %s5563_s19  ;;  %2228 = vrot.lane.b32.xlu1 %v2214_v54, %s5564_s20  ;;  %v1467_v55 = vld [vmem:[#allocation2 + $0x10] sm:$0xff] }
 0x17d   : > { %1410 = vst.msk [vmem:[#allocation2 + $0x1c] sm:$0xe0] %vm1409_vm9, %v1339_v49  ;;  %v1262_v56 = vsel %vm1113_vm3, %v1259_v37, %v1261_v42  ;;  %v1121_v7 = vrot.slane %v1018_v24, 4  ;;  %v2761_v27 = vld [vmem:[#allocation3 + $0x8] sm:$0xff]  ;;  %1708 = vrot.lane.b32.xlu2 %v2214_v54, %s5560_s9  ;;  %v709_v49 = vadd.f32 %v5973_v31, %v5813_v60  ;;  %v1043_v24 = vmax.f32 %v856_v21, 0.0 }
 0x17e   : > { %v6198_v52 = vmax.f32 %v1050_v50, %v1262_v56  ;;  %4975 = vmatmul.msk.f32.vlgmr.msrb.gmra.mxu2 %vm1362_vm2, %v2761_v27  ;;  %v954_v6 = vpop.f32.mrf.mxu3  ;;  %1788 = vst.msk [vmem:[#allocation3 + $0x18] sm:$0xff] %vm1362_vm2, %v6187_v46 }
 0x17f   : > { %v1122_v37 = vsel %vm1113_vm3, %v1119_v2, %v1121_v7  ;;  %v955_v47 = vadd.f32 %v5973_v31, %v954_v6  ;;  %1474 = vst.msk [vmem:[#allocation3 + $0x20] sm:$0xff] %vm1362_vm2, %v1467_v55  ;;  %v1051_v55 = vmax.f32 %v880_v34, 0.0  ;;  %v1316_v6 = vmax.f32 %v1043_v24, %v6127_v0  ;;  %v861_v34 = vpop.f32.mrf.mxu2 }
 0x180   : > { %v1191_v53 = vmax.f32 %v993_v41, %v1122_v37  ;;  %v783_v29 = vpop.f32.mrf.mxu0  ;;  %v994_v41 = vmax.f32 %v709_v49, 0.0  ;;  %v859_v37 = vadd.f32 %v5973_v31, %v858_v22  ;;  %v6247_v22 = vsel %vm1113_vm3, %v6189_v40, %v6129_v9 }
 0x181   : > { %v1076_v48 = vmax.f32 %v955_v47, 0.0  ;;  %v784_v2 = vadd.f32 %v5973_v31, %v783_v29 }
 0x182   : > { %v1340_v62 = vmax.f32 %v1191_v53, %v1315_v19 }
 0x183   : > { %v1263_v58 = vrot.slane %v1076_v48, 4  ;;  %v1019_v54 = vmax.f32 %v784_v2, 0.0  ;;  %v6220_v50 = vld [vmem:[#allocation2 + $0x19] sm:$0xff]  ;;  %v819_v2 = vpop.f32.mrf.mxu1 }
 0x184   : > { %1412 = vst.msk [vmem:[#allocation2 + $0x24] sm:$0xf] %vm1411_vm10, %v1340_v62  ;;  %1540 = vrot.lane.b32.xlu0 %v6187_v46, %s9044_s29  ;;  %2314 = vrot.lane.b32.xlu1 %v6187_v46, %s5562_s18  ;;  %v1468_v16 = vld [vmem:[#allocation2 + $0x18] sm:$0xff] }
 0x185   : > { %1414 = vst.msk [vmem:[#allocation2 + $0x25] sm:$0xf0] %vm1413_vm11, %v1340_v62  ;;  %v1264_v60 = vsel %vm1113_vm3, %v1261_v42, %v1263_v58  ;;  %v1123_v56 = vrot.slane %v1019_v54, 4  ;;  %v2763_v27 = vld [vmem:[#allocation3 + $0x18] sm:$0xff]  ;;  %1824 = vrot.lane.b32.xlu2 %v6154_v59, %s5559_s8  ;;  %v883_v59 = vadd.f32 %v5973_v31, %v5820_v63  ;;  %v1044_v62 = vmax.f32 %v859_v37, 0.0  ;;  %v1695_v54 = vld [vmem:[#allocation2 + $0x10] sm:$0xff] }
 0x186   : > { %v6231_v19 = vmax.f32 %v1051_v55, %v1264_v60  ;;  %4976 = vmatmul.msk.f32.gmra.mxu2 %vm1362_vm2, %v2763_v27  ;;  %v957_v21 = vpop.f32.mrf.mxu3  ;;  %1789 = vst.msk [vmem:[#allocation3 + $0x28] sm:$0xff] %vm1362_vm2, %v6220_v50  ;;  %v862_v37 = vadd.f32 %v5973_v31, %v861_v34 }
 0x187   : > { %v1124_v42 = vsel %vm1113_vm3, %v1121_v7, %v1123_v56  ;;  %v958_v47 = vadd.f32 %v5973_v31, %v957_v21  ;;  %1475 = vst.msk [vmem:[#allocation3 + $0x30] sm:$0xff] %vm1362_vm2, %v1468_v16  ;;  %v712_v7 = vadd.f32 %v5973_v31, %v5823_v1  ;;  %v1052_v16 = vmax.f32 %v883_v59, 0.0  ;;  %v864_v34 = vpop.f32.mrf.mxu2 }
 0x188   : > { %v1192_v53 = vmax.f32 %v994_v41, %v1124_v42  ;;  %v786_v0 = vpop.f32.mrf.mxu0 }
 0x189   : > { %v1077_v29 = vmax.f32 %v958_v47, 0.0  ;;  %v787_v48 = vadd.f32 %v5973_v31, %v786_v0  ;;  %v995_v27 = vmax.f32 %v712_v7, 0.0  ;;  %v886_v47 = vadd.f32 %v5973_v31, %v5830_v4 }
 0x18a   : > { %v1341_v49 = vmax.f32 %v1192_v53, %v1316_v6  ;;  %v1317_v6 = vmax.f32 %v1044_v62, %v6149_v36 }
 0x18b   : > { %v1265_v24 = vrot.slane %v1077_v29, 4  ;;  %v1020_v63 = vmax.f32 %v787_v48, 0.0  ;;  %v6251_v55 = vld [vmem:[#allocation2 + $0x21] sm:$0xff]  ;;  %v715_v29 = vadd.f32 %v5973_v31, %v5832_v5  ;;  %v817_v5 = vadd.f32 %v5973_v31, %v6210_v43 }
 0x18c   : > { %1416 = vst.msk [vmem:[#allocation2 + $0x2d] sm:$0x7] %vm1415_vm12, %v1341_v49  ;;  %1710 = vrot.lane.b32.xlu0 %v1695_v54, %s5560_s9  ;;  %2594 = vrot.lane.b32.xlu1 %v6187_v46, %s5563_s19  ;;  %v6257_v9 = vld [vmem:[#allocation2 + $0x20] sm:$0xff]  ;;  %v865_v43 = vadd.f32 %v5973_v31, %v864_v34 }
 0x18d   : > { %1418 = vst.msk [vmem:[#allocation2 + $0x2e] sm:$0xf8] %vm1417_vm13, %v1341_v49  ;;  %v1266_v1 = vsel %vm1113_vm3, %v1263_v58, %v1265_v24  ;;  %v1125_v40 = vrot.slane %v1020_v63, 4  ;;  %v2765_v60 = vld [vmem:[#allocation3 + $0x28] sm:$0xff]  ;;  %2076 = vrot.lane.b32.xlu2 %v6187_v46, %s5561_s17  ;;  %v1053_v63 = vmax.f32 %v886_v47, 0.0 }
 0x18e   : > { %v6263_v41 = vmax.f32 %v1052_v16, %v1266_v1  ;;  %4977 = vmatmul.msk.f32.gmra.mxu2 %vm1362_vm2, %v2765_v60  ;;  %v960_v21 = vpop.f32.mrf.mxu3  ;;  %1790 = vst.msk [vmem:[#allocation3 + $0x38] sm:$0xff] %vm1362_vm2, %v6251_v55  ;;  %v822_v16 = vpop.f32.mrf.mxu1  ;;  %v820_v1 = vadd.f32 %v5973_v31, %v819_v2  ;;  %v1046_v34 = vmax.f32 %v865_v43, 0.0 }
 0x18f   : > { %v1126_v58 = vsel %vm1113_vm3, %v1123_v56, %v1125_v40  ;;  %v961_v42 = vadd.f32 %v5973_v31, %v960_v21  ;;  %1476 = vst.msk [vmem:[#allocation3 + $0x40] sm:$0xff] %vm1362_vm2, %v6257_v9  ;;  %v1045_v56 = vmax.f32 %v862_v37, 0.0  ;;  %v996_v21 = vmax.f32 %v715_v29, 0.0 }
 0x190   : > { %v1193_v59 = vmax.f32 %v995_v27, %v1126_v58  ;;  %v789_v36 = vpop.f32.mrf.mxu0 }
 0x191   : > { %v1078_v53 = vmax.f32 %v961_v42, 0.0  ;;  %v790_v0 = vadd.f32 %v5973_v31, %v789_v36  ;;  %v1318_v37 = vmax.f32 %v1045_v56, %v6182_v14  ;;  %v718_v14 = vadd.f32 %v5973_v31, %v5841_v10  ;;  %v1696_v56 = vld [vmem:[#allocation2 + $0x18] sm:$0xff] }
 0x192   : > { %v1342_v48 = vmax.f32 %v1193_v59, %v1317_v6  ;;  %v1030_v59 = vmax.f32 %v817_v5, 0.0 }
 0x193   : > { %v1267_v7 = vrot.slane %v1078_v53, 4  ;;  %v1021_v49 = vmax.f32 %v790_v0, 0.0  ;;  %v6279_v62 = vld [vmem:[#allocation2 + $0x29] sm:$0xff]  ;;  %v1031_v0 = vmax.f32 %v820_v1, 0.0  ;;  %v745_v1 = vadd.f32 %v5973_v31, %v5926_v61 }
 0x194   : > { %1420 = vst.msk [vmem:[#allocation2 + $0x36] sm:$0x3] %vm1419_vm14, %v1342_v48  ;;  %1826 = vrot.lane.b32.xlu0 %v6187_v46, %s5559_s8  ;;  %1542 = vrot.lane.b32.xlu1 %v6220_v50, %s9044_s29  ;;  %v6286_v4 = vld [vmem:[#allocation2 + $0x28] sm:$0xff]  ;;  %v6318_v5 = vrot.slane %v1030_v59, 4 }
 0x195   : > { %1422 = vst.msk [vmem:[#allocation2 + $0x37] sm:$0xfc] %vm1421_vm15, %v1342_v48  ;;  %v1268_v60 = vsel %vm1113_vm3, %v1265_v24, %v1267_v7  ;;  %v1127_v27 = vrot.slane %v1021_v49, 4  ;;  %v2767_v6 = vld [vmem:[#allocation3 + $0x38] sm:$0xff]  ;;  %2230 = vrot.lane.b32.xlu2 %v1695_v54, %s5564_s20  ;;  %v889_v54 = vadd.f32 %v5973_v31, %v5838_v8  ;;  %v867_v49 = vpop.f32.mrf.mxu2 }
 0x196   : > { %v6294_v46 = vmax.f32 %v1053_v63, %v1268_v60  ;;  %4978 = vmatmul.msk.f32.gmra.mxu2 %vm1362_vm2, %v2767_v6  ;;  %v963_v58 = vpop.f32.mrf.mxu3  ;;  %1791 = vst.msk [vmem:[#allocation3 + $0x48] sm:$0xff] %vm1362_vm2, %v6279_v62  ;;  %v997_v60 = vmax.f32 %v718_v14, 0.0  ;;  %v825_v43 = vpop.f32.mrf.mxu1  ;;  %v868_v61 = vadd.f32 %v5973_v31, %v867_v49 }
 0x197   : > { %v1128_v2 = vsel %vm1113_vm3, %v1125_v40, %v1127_v27  ;;  %v964_v24 = vadd.f32 %v5973_v31, %v963_v58  ;;  %1477 = vst.msk [vmem:[#allocation3 + $0x50] sm:$0xff] %vm1362_vm2, %v6286_v4  ;;  %v1054_v8 = vmax.f32 %v889_v54, 0.0  ;;  %v1147_v58 = vrot.slane %v1031_v0, 4 }
 0x198   : > { %v1194_v42 = vmax.f32 %v996_v21, %v1128_v2  ;;  %v792_v47 = vpop.f32.mrf.mxu0 }
 0x199   : > { %v1079_v36 = vmax.f32 %v964_v24, 0.0  ;;  %v793_v53 = vadd.f32 %v5973_v31, %v792_v47  ;;  %v1319_v24 = vmax.f32 %v1046_v34, %v6215_v12  ;;  %v892_v12 = vadd.f32 %v5973_v31, %v5848_v13 }
 0x19a   : > { %v1343_v40 = vmax.f32 %v1194_v42, %v1318_v37  ;;  %v1047_v34 = vmax.f32 %v868_v61, 0.0  ;;  %v748_v61 = vadd.f32 %v5973_v31, %v5932_v3  ;;  %v895_v3 = vadd.f32 %v5973_v31, %v5858_v18 }
 0x19b   : > { %v1269_v29 = vrot.slane %v1079_v36, 4  ;;  %v1022_v48 = vmax.f32 %v793_v53, 0.0  ;;  %v6310_v63 = vld [vmem:[#allocation2 + $0x31] sm:$0xff]  ;;  %v1006_v36 = vmax.f32 %v745_v1, 0.0  ;;  %v1055_v13 = vmax.f32 %v892_v12, 0.0 }
 0x19c   : > { %1424 = vst.msk [vmem:[#allocation2 + $0x3f] sm:$0x1] %vm1423_vm0, %v1343_v40  ;;  %2078 = vrot.lane.b32.xlu0 %v6220_v50, %s5561_s17  ;;  %1712 = vrot.lane.b32.xlu1 %v1696_v56, %s5560_s9  ;;  %v6316_v10 = vld [vmem:[#allocation2 + $0x30] sm:$0xff] }
 0x19d   : > { %1427 = vst.msk [vmem:[#allocation2 + $0x4f] sm:$0xfe] %vm1426_vm1, %v1343_v40  ;;  %v1270_v6 = vsel %vm1113_vm3, %v1267_v7, %v1269_v29  ;;  %v1129_v21 = vrot.slane %v1022_v48, 4  ;;  %v2769_v37 = vld [vmem:[#allocation3 + $0x48] sm:$0xff]  ;;  %2316 = vrot.lane.b32.xlu2 %v6220_v50, %s5562_s18  ;;  %v823_v7 = vadd.f32 %v5973_v31, %v822_v16  ;;  %v721_v40 = vadd.f32 %v5973_v31, %v5851_v15 }
 0x19e   : > { %v6326_v2 = vmax.f32 %v1054_v8, %v1270_v6  ;;  %4979 = vmatmul.msk.f32.gmra.mxu2 %vm1362_vm2, %v2769_v37  ;;  %v966_v54 = vpop.f32.mrf.mxu3  ;;  %1792 = vst.msk [vmem:[#allocation3 + $0x58] sm:$0xff] %vm1362_vm2, %v6310_v63  ;;  %v1148_v16 = vsel %vm1113_vm3, %v6318_v5, %v1147_v58 }
 0x19f   : > { %v1130_v14 = vsel %vm1113_vm3, %v1127_v27, %v1129_v21  ;;  %v967_v42 = vadd.f32 %v5973_v31, %v966_v54  ;;  %1478 = vst.msk [vmem:[#allocation3 + $0x60] sm:$0xff] %vm1362_vm2, %v6316_v10  ;;  %v1032_v48 = vmax.f32 %v823_v7, 0.0  ;;  %v1204_v15 = vmax.f32 %v1006_v36, %v1148_v16 }
 0x1a0   : > { %v1195_v47 = vmax.f32 %v997_v60, %v1130_v14  ;;  %v795_v59 = vpop.f32.mrf.mxu0  ;;  %v998_v54 = vmax.f32 %v721_v40, 0.0  ;;  %v1320_v7 = vmax.f32 %v1047_v34, %v6247_v22  ;;  %v828_v22 = vpop.f32.mrf.mxu1  ;;  %v1007_v40 = vmax.f32 %v748_v61, 0.0 }
 0x1a1   : > { %v1080_v53 = vmax.f32 %v967_v42, 0.0  ;;  %v796_v0 = vadd.f32 %v5973_v31, %v795_v59  ;;  %v1149_v42 = vrot.slane %v1032_v48, 4  ;;  %v751_v61 = vadd.f32 %v5973_v31, %v5938_v11 }
 0x1a2   : > { %v1344_v27 = vmax.f32 %v1195_v47, %v1319_v24  ;;  %v898_v11 = vadd.f32 %v5973_v31, %v5868_v23 }
 0x1a3   : > { %v1271_v49 = vrot.slane %v1080_v53, 4  ;;  %v1023_v8 = vmax.f32 %v796_v0, 0.0  ;;  %v6345_v6 = vld [vmem:[#allocation2 + $0x39] sm:$0xff]  ;;  %v1150_v16 = vsel %vm1113_vm3, %v1147_v58, %v1149_v42 }
 0x1a4   : > { %1428 = vst.msk [vmem:[#allocation2 + $0x58] sm:$0x7f] %vm1399_vm4, %v1344_v27  ;;  %2232 = vrot.lane.b32.xlu0 %v1696_v56, %s5564_s20  ;;  %1828 = vrot.lane.b32.xlu1 %v6220_v50, %s5559_s8  ;;  %v6351_v60 = vld [vmem:[#allocation2 + $0x50] sm:$0xff] }
 0x1a5   : > { %1429 = vst.msk [vmem:[#allocation2 + $0x59] sm:$0x80] %vm1401_vm5, %v1344_v27  ;;  %v1272_v1 = vsel %vm1113_vm3, %v1269_v29, %v1271_v49  ;;  %v1131_v37 = vrot.slane %v1023_v8, 4  ;;  %v2771_v24 = vld [vmem:[#allocation3 + $0x58] sm:$0xff]  ;;  %2596 = vrot.lane.b32.xlu2 %v6220_v50, %s5563_s19  ;;  %v826_v29 = vadd.f32 %v5973_v31, %v825_v43  ;;  %v724_v43 = vadd.f32 %v5973_v31, %v5861_v20 }
 0x1a6   : > { %v1328_v56 = vmax.f32 %v1055_v13, %v1272_v1  ;;  %4980 = vmatmul.msk.f32.gmra.mxu2 %vm1362_vm2, %v2771_v24  ;;  %v969_v14 = vpop.f32.mrf.mxu3  ;;  %1793 = vst.msk [vmem:[#allocation3 + $0x68] sm:$0xff] %vm1362_vm2, %v6345_v6  ;;  %v1056_v8 = vmax.f32 %v895_v3, 0.0 }
 0x1a7   : > { %v1132_v12 = vsel %vm1113_vm3, %v1129_v21, %v1131_v37  ;;  %v970_v50 = vadd.f32 %v5973_v31, %v969_v14  ;;  %1802 = vst.msk [vmem:[#allocation3 + $0x80] sm:$0xff] %vm1362_vm2, %v6351_v60  ;;  %v1033_v27 = vmax.f32 %v826_v29, 0.0  ;;  %v999_v24 = vmax.f32 %v724_v43, 0.0 }
 0x1a8   : > { %v1353_v47 = vmax.f32 %v1204_v15, %v1328_v56  ;;  %v1196_v59 = vmax.f32 %v998_v54, %v1132_v12  ;;  %v798_v36 = vpop.f32.mrf.mxu0  ;;  %v1205_v54 = vmax.f32 %v1007_v40, %v1150_v16  ;;  %v829_v14 = vadd.f32 %v5973_v31, %v828_v22 }
 0x1a9   : > { %v1081_v53 = vmax.f32 %v970_v50, 0.0  ;;  %v799_v0 = vadd.f32 %v5973_v31, %v798_v36  ;;  %v1008_v22 = vmax.f32 %v751_v61, 0.0  ;;  %v1057_v16 = vmax.f32 %v898_v11, 0.0 }
 0x1aa   : > { %1447 = vst.msk [vmem:[#allocation2 + $0xb3] sm:$0x1f] %vm1407_vm8, %v1353_v47  ;;  %v1345_v21 = vmax.f32 %v1196_v59, %v1320_v7  ;;  %v1034_v43 = vmax.f32 %v829_v14, 0.0  ;;  %v730_v11 = vadd.f32 %v5973_v31, %v5881_v30 }
 0x1ab   : > { %1448 = vst.msk [vmem:[#allocation2 + $0xb4] sm:$0xe0] %vm1409_vm9, %v1353_v47  ;;  %v1273_v18 = vrot.slane %v1081_v53, 4  ;;  %v1024_v34 = vmax.f32 %v799_v0, 0.0  ;;  %v6376_v48 = vld [vmem:[#allocation2 + $0x51] sm:$0xff]  ;;  %v831_v53 = vpop.f32.mrf.mxu1 }
 0x1ac   : > { %1430 = vst.msk [vmem:[#allocation2 + $0x61] sm:$0x3f] %vm1403_vm6, %v1345_v21  ;;  %2318 = vrot.lane.b32.xlu0 %v6251_v55, %s5562_s18  ;;  %2080 = vrot.lane.b32.xlu1 %v6251_v55, %s5561_s17  ;;  %v6383_v20 = vld [vmem:[#allocation2 + $0x59] sm:$0xff] }
 0x1ad   : > { %1431 = vst.msk [vmem:[#allocation2 + $0x62] sm:$0xc0] %vm1405_vm7, %v1345_v21  ;;  %v1274_v58 = vsel %vm1113_vm3, %v1271_v49, %v1273_v18  ;;  %v1133_v13 = vrot.slane %v1024_v34, 4  ;;  %v2773_v15 = vld [vmem:[#allocation3 + $0x68] sm:$0xff]  ;;  %1544 = vrot.lane.b32.xlu2 %v6251_v55, %s9044_s29  ;;  %v6389_v1 = vld [vmem:[#allocation2 + $0x58] sm:$0xff]  ;;  %v1151_v49 = vrot.slane %v1033_v27, 4 }
 0x1ae   : > { %v1329_v56 = vmax.f32 %v1056_v8, %v1274_v58  ;;  %4981 = vmatmul.msk.f32.gmra.mxu2 %vm1362_vm2, %v2773_v15  ;;  %v972_v7 = vpop.f32.mrf.mxu3  ;;  %2109 = vst.msk [vmem:[#allocation3 + $0x78] sm:$0xff] %vm1362_vm2, %v6376_v48  ;;  %v6426_v58 = vpop.permute.xlu1 %1536 }
 0x1af   : > { %v1134_v29 = vsel %vm1113_vm3, %v1131_v37, %v1133_v13  ;;  %v973_v12 = vadd.f32 %v5973_v31, %v972_v7  ;;  %2110 = vst.msk [vmem:[#allocation3 + $0x88] sm:$0xff] %vm1362_vm2, %v6383_v20  ;;  %v727_v37 = vadd.f32 %v5973_v31, %v5871_v25  ;;  %v1152_v23 = vsel %vm1113_vm3, %v1149_v42, %v1151_v49 }
 0x1b0   : > { %v1354_v50 = vmax.f32 %v1205_v54, %v1329_v56  ;;  %v1197_v3 = vmax.f32 %v999_v24, %v1134_v29  ;;  %v801_v47 = vpop.f32.mrf.mxu0  ;;  %1803 = vst.msk [vmem:[#allocation3 + $0x90] sm:$0xff] %vm1362_vm2, %v6389_v1  ;;  %v1206_v24 = vmax.f32 %v1008_v22, %v1152_v23  ;;  %v754_v54 = vadd.f32 %v5973_v31, %v5946_v17 }
 0x1b1   : > { %v1082_v59 = vmax.f32 %v973_v12, 0.0  ;;  %v802_v36 = vadd.f32 %v5973_v31, %v801_v47  ;;  %v1000_v15 = vmax.f32 %v727_v37, 0.0 }
 0x1b2   : > { %1449 = vst.msk [vmem:[#allocation2 + $0xbc] sm:$0xf] %vm1411_vm10, %v1354_v50  ;;  %v1346_v0 = vmax.f32 %v1197_v3, %v6140_v45  ;;  %v832_v45 = vadd.f32 %v5973_v31, %v831_v53  ;;  %v1009_v47 = vmax.f32 %v754_v54, 0.0 }
 0x1b3   : > { %1450 = vst.msk [vmem:[#allocation2 + $0xbd] sm:$0xf0] %vm1413_vm11, %v1354_v50  ;;  %v1275_v40 = vrot.slane %v1082_v59, 4  ;;  %v1025_v21 = vmax.f32 %v802_v36, 0.0  ;;  %v6419_v27 = vld [vmem:[#allocation2 + $0x60] sm:$0xff]  ;;  %v834_v53 = vpop.f32.mrf.mxu1 }
 0x1b4   : > { %1432 = vst.msk [vmem:[#allocation2 + $0x6a] sm:$0x1f] %vm1407_vm8, %v1346_v0  ;;  %2598 = vrot.lane.b32.xlu0 %v6251_v55, %s5563_s19  ;;  %2234 = vrot.lane.b32.xlu1 %v6257_v9, %s5564_s20  ;;  %v6417_v25 = vld [vmem:[#allocation2 + $0x61] sm:$0xff]  ;;  %v1035_v59 = vmax.f32 %v832_v45, 0.0 }
 0x1b5   : > { %1433 = vst.msk [vmem:[#allocation2 + $0x6b] sm:$0xe0] %vm1409_vm9, %v1346_v0  ;;  %v1276_v42 = vsel %vm1113_vm3, %v1273_v18, %v1275_v40  ;;  %v1135_v34 = vrot.slane %v1025_v21, 4  ;;  %v2775_v8 = vld [vmem:[#allocation3 + $0x78] sm:$0xff]  ;;  %1714 = vrot.lane.b32.xlu2 %v6257_v9, %s5560_s9  ;;  %v1153_v18 = vrot.slane %v1034_v43, 4  ;;  %v901_v9 = vadd.f32 %v5973_v31, %v5878_v28 }
 0x1b6   : > { %v1330_v61 = vmax.f32 %v1057_v16, %v1276_v42  ;;  %4982 = vmatmul.msk.f32.gmra.mxu2 %vm1362_vm2, %v2775_v8  ;;  %v975_v56 = vpop.f32.mrf.mxu3  ;;  %2111 = vst.msk [vmem:[#allocation3 + $0x98] sm:$0xff] %vm1362_vm2, %v6417_v25  ;;  %v2777_v23 = vld [vmem:[#allocation3 + $0x88] sm:$0xff]  ;;  %v6459_v21 = vrot.slane %v1035_v59, 4  ;;  %v6464_v16 = vld [vmem:[%s9036_s2] ss:$0 sm:$0xff] }
 0x1b7   : > { %v1136_v7 = vsel %vm1113_vm3, %v1133_v13, %v1135_v34  ;;  %v976_v14 = vadd.f32 %v5973_v31, %v975_v56  ;;  %1804 = vst.msk [vmem:[#allocation3 + $0xa0] sm:$0xff] %vm1362_vm2, %v6419_v27  ;;  %v1154_v36 = vsel %vm1113_vm3, %v1151_v49, %v1153_v18  ;;  %v1058_v22 = vmax.f32 %v901_v9, 0.0 }
 0x1b8   : > { %v1355_v29 = vmax.f32 %v1206_v24, %v1330_v61  ;;  %v1198_v17 = vmax.f32 %v1000_v15, %v1136_v7  ;;  %v804_v12 = vpop.f32.mrf.mxu0  ;;  %v1207_v43 = vmax.f32 %v1009_v47, %v1154_v36  ;;  %v757_v45 = vadd.f32 %v6464_v16, %v5962_v26  ;;  %v1823_v24 = vpop.permute.xlu1 %1822  ;;  %v1465_v7 = vld [vmem:[#allocation2] sm:$0xff] }
 0x1b9   : > { %v1083_v50 = vmax.f32 %v976_v14, 0.0  ;;  %v805_v3 = vadd.f32 %v5973_v31, %v804_v12  ;;  %v6453_v31 = vld [vmem:[#allocation2 + $0xb9] sm:$0xff]  ;;  %v904_v26 = vadd.f32 %v6464_v16, %v5888_v33  ;;  %1472 = vst.msk [vmem:[#allocation3] sm:$0xff] %vm1362_vm2, %v1465_v7  ;;  %v1156_v33 = vsel %vm1113_vm3, %v1153_v18, %v6459_v21 }
 0x1ba   : > { %1451 = vst.msk [vmem:[#allocation2 + $0xc5] sm:$0x7] %vm1415_vm12, %v1355_v29  ;;  %v1347_v13 = vmax.f32 %v1198_v17, %v6169_v51  ;;  %v1001_v51 = vmax.f32 %v730_v11, 0.0 }
 0x1bb   : > { %1453 = vst.msk [vmem:[#allocation2 + $0xd5] sm:$0xf8] %vm1417_vm13, %v1355_v29  ;;  %v1277_v28 = vrot.slane %v1083_v50, 4  ;;  %v1026_v37 = vmax.f32 %v805_v3, 0.0  ;;  %v1010_v29 = vmax.f32 %v757_v45, 0.0  ;;  %v1059_v3 = vmax.f32 %v904_v26, 0.0 }
 0x1bc   : > { %1434 = vst.msk [vmem:[#allocation2 + $0x73] sm:$0xf] %vm1411_vm10, %v1347_v13  ;;  %1546 = vrot.lane.b32.xlu0 %v6279_v62, %s9044_s29  ;;  %2320 = vrot.lane.b32.xlu1 %v6279_v62, %s5562_s18  ;;  %v6451_v30 = vld [vmem:[#allocation2 + $0x69] sm:$0xff] }
 0x1bd   : > { %1435 = vst.msk [vmem:[#allocation2 + $0x74] sm:$0xf0] %vm1413_vm11, %v1347_v13  ;;  %v1278_v49 = vsel %vm1113_vm3, %v1275_v40, %v1277_v28  ;;  %v1137_v0 = vrot.slane %v1026_v37, 4  ;;  %1830 = vrot.lane.b32.xlu2 %v6251_v55, %s5559_s8  ;;  %v835_v55 = vadd.f32 %v6464_v16, %v834_v53  ;;  %vm1514_vm11 = vcmask 261248   ;;  %v2779_v59 = vld [vmem:[#allocation3 + $0x98] sm:$0xff]  ;;  %v6499_v13 = vpop.permute.xlu2 %2408 }
 0x1be   : > { %v1331_v42 = vmax.f32 %v1058_v22, %v1278_v49  ;;  %4983 = vmatmul.msk.f32.gmra.mxu2 %vm1362_vm2, %v2777_v23  ;;  %v978_v40 = vpop.f32.mrf.mxu3  ;;  %2112 = vst.msk [vmem:[#allocation3 + $0xa8] sm:$0xff] %vm1362_vm2, %v6451_v30  ;;  %v1208_v22 = vmax.f32 %v1010_v29, %v1156_v33  ;;  %v760_v53 = vadd.f32 %v6464_v16, %v5996_v44 }
 0x1bf   : > { %v1138_v8 = vsel %vm1113_vm3, %v1135_v34, %v1137_v0  ;;  %v979_v15 = vadd.f32 %v6464_v16, %v978_v40  ;;  %2435 = vst.msk [vmem:[#allocation3 + $0x128] sm:$0xff] %vm1362_vm2, %v6453_v31  ;;  %v733_v34 = vadd.f32 %v6464_v16, %v5891_v35  ;;  %v1036_v12 = vmax.f32 %v835_v55, 0.0 }
 0x1c0   : > { %v1356_v54 = vmax.f32 %v1207_v43, %v1331_v42  ;;  %v1199_v61 = vmax.f32 %v1001_v51, %v1138_v8  ;;  %v807_v56 = vpop.f32.mrf.mxu0  ;;  %1843 = vst.msk [vmem:[#allocation3 + $0x70] sm:$0xff] %vm1514_vm11, %v1823_v24  ;;  %v838_v43 = vadd.f32 %v6464_v16, %v5979_v32  ;;  %v907_v44 = vadd.f32 %v6464_v16, %v5898_v38  ;;  %v9091_v32 = vld [vmem:[#allocation7_spill] sm:$0xff] }
 0x1c1   : > { %v1084_v14 = vmax.f32 %v979_v15, 0.0  ;;  %v808_v9 = vadd.f32 %v6464_v16, %v807_v56  ;;  %9090 = vst [vmem:[#allocation16_spill] sm:$0xff] %v6499_v13  ;;  %v6501_v36 = vld [vmem:[#allocation2 + $0xc1] sm:$0xff]  ;;  %v1002_v37 = vmax.f32 %v733_v34, 0.0  ;;  %v1157_v23 = vrot.slane %v1036_v12, 4  ;;  %v9092_v12 = vld [vmem:[#allocation13_spill] sm:$0xff] }
 0x1c2   : > { %1454 = vst.msk [vmem:[#allocation2 + $0xdd] sm:$0x3] %vm1419_vm14, %v1356_v54  ;;  %v1348_v17 = vmax.f32 %v1199_v61, %v6198_v52  ;;  %v1494_v52 = vpop.permute.xlu0 %1493  ;;  %v1011_v26 = vmax.f32 %v760_v53, 0.0  ;;  %v1037_v61 = vmax.f32 %v838_v43, 0.0 }
 0x1c3   : > { %1455 = vst.msk [vmem:[#allocation2 + $0xde] sm:$0xfc] %vm1421_vm15, %v1356_v54  ;;  %v1279_v11 = vrot.slane %v1084_v14, 4  ;;  %v1027_v50 = vmax.f32 %v808_v9, 0.0  ;;  %v1158_v54 = vsel %vm1113_vm3, %v6459_v21, %v1157_v23  ;;  %v1060_v14 = vmax.f32 %v907_v44, 0.0  ;;  %v9095_v44 = vld [vmem:[#allocation9_spill] sm:$0xff] }
 0x1c4   : > { %1436 = vst.msk [vmem:[#allocation2 + $0x7c] sm:$0x7] %vm1415_vm12, %v1348_v17  ;;  %1716 = vrot.lane.b32.xlu0 %v6286_v4, %s5560_s9  ;;  %2600 = vrot.lane.b32.xlu1 %v6279_v62, %s5563_s19  ;;  %v6493_v35 = vld [vmem:[#allocation2 + $0x71] sm:$0xff] }
 0x1c5   : > { %1437 = vst.msk [vmem:[#allocation2 + $0x7d] sm:$0xf8] %vm1417_vm13, %v1348_v17  ;;  %v1280_v18 = vsel %vm1113_vm3, %v1277_v28, %v1279_v11  ;;  %v1139_v47 = vrot.slane %v1027_v50, 4  ;;  %2082 = vrot.lane.b32.xlu2 %v6279_v62, %s5561_s17  ;;  %v6508_v28 = vld [vmem:[#allocation2 + $0x68] sm:$0xff]  ;;  %v763_v50 = vadd.f32 %v6464_v16, %v9092_v12 }
 0x1c6   : > { %v1332_v51 = vmax.f32 %v1059_v3, %v1280_v18  ;;  %4984 = vmatmul.msk.f32.gmra.mxu2 %vm1362_vm2, %v2779_v59  ;;  %v981_v49 = vpop.f32.mrf.mxu3  ;;  %2113 = vst.msk [vmem:[#allocation3 + $0xb8] sm:$0xff] %vm1362_vm2, %v6493_v35  ;;  %v2781_v29 = vld [vmem:[#allocation3 + $0xa8] sm:$0xff]  ;;  %v6551_v18 = vrot.slane %v1037_v61, 4 }
 0x1c7   : > { %v1140_v45 = vsel %vm1113_vm3, %v1137_v0, %v1139_v47  ;;  %v982_v42 = vadd.f32 %v6464_v16, %v981_v49  ;;  %1515 = vst.msk [vmem:[#allocation3] sm:$0xff] %vm1514_vm11, %v1494_v52  ;;  %v736_v0 = vadd.f32 %v6464_v16, %v9091_v32  ;;  %v9093_v59 = vld [vmem:[#allocation12_spill] sm:$0xff] }
 0x1c8   : > { %v1357_v40 = vmax.f32 %v1208_v22, %v1332_v51  ;;  %v1200_v55 = vmax.f32 %v1002_v37, %v1140_v45  ;;  %v810_v8 = vpop.f32.mrf.mxu0  ;;  %2436 = vst.msk [vmem:[#allocation3 + $0x138] sm:$0xff] %vm1362_vm2, %v6501_v36  ;;  %v9094_v51 = vld [vmem:[#allocation8_spill] sm:$0xff] }
 0x1c9   : > { %v1085_v15 = vmax.f32 %v982_v42, 0.0  ;;  %v811_v24 = vadd.f32 %v6464_v16, %v810_v8  ;;  %1805 = vst.msk [vmem:[#allocation3 + $0xb0] sm:$0xff] %vm1362_vm2, %v6508_v28  ;;  %v1003_v33 = vmax.f32 %v736_v0, 0.0  ;;  %v910_v49 = vadd.f32 %v6464_v16, %v9094_v51  ;;  %v9096_v8 = vld [vmem:[#allocation11_spill] sm:$0xff] }
 0x1ca   : > { %1456 = vst.msk [vmem:[#allocation2 + $0xe6] sm:$0x1] %vm1423_vm0, %v1357_v40  ;;  %v1349_v38 = vmax.f32 %v1200_v55, %v6231_v19  ;;  %v6536_v19 = vld [vmem:[#allocation2 + $0x70] sm:$0xff]  ;;  %v1160_v0 = vsel %vm1113_vm3, %v1157_v23, %v6551_v18 }
 0x1cb   : > { %1457 = vst.msk [vmem:[#allocation2 + $0xe7] sm:$0xfe] %vm1426_vm1, %v1357_v40  ;;  %v1281_v56 = vrot.slane %v1085_v15, 4  ;;  %v1028_v7 = vmax.f32 %v811_v24, 0.0  ;;  %v6542_v17 = vld [vmem:[#allocation2 + $0x78] sm:$0xff]  ;;  %v739_v40 = vadd.f32 %v6464_v16, %v9095_v44  ;;  %v742_v15 = vadd.f32 %v6464_v16, %v9096_v8 }
 0x1cc   : > { %1438 = vst.msk [vmem:[#allocation2 + $0x85] sm:$0x3] %vm1419_vm14, %v1349_v38  ;;  %1832 = vrot.lane.b32.xlu0 %v6279_v62, %s5559_s8  ;;  %1548 = vrot.lane.b32.xlu1 %v6310_v63, %s9044_s29  ;;  %v6534_v9 = vld [vmem:[#allocation2 + $0x79] sm:$0xff]  ;;  %v1209_v62 = vmax.f32 %v1011_v26, %v1158_v54  ;;  %v1012_v24 = vmax.f32 %v763_v50, 0.0 }
 0x1cd   : > { %1440 = vst.msk [vmem:[#allocation2 + $0x8f] sm:$0xfc] %vm1421_vm15, %v1349_v38  ;;  %v1282_v21 = vsel %vm1113_vm3, %v1279_v11, %v1281_v56  ;;  %v1141_v34 = vrot.slane %v1028_v7, 4  ;;  %2236 = vrot.lane.b32.xlu2 %v6286_v4, %s5564_s20  ;;  %v6549_v11 = vld [vmem:[#allocation2 + $0xd8] sm:$0xff]  ;;  %v841_v4 = vadd.f32 %v6464_v16, %v9093_v59  ;;  %v1061_v7 = vmax.f32 %v910_v49, 0.0 }
 0x1ce   : > { %v1333_v3 = vmax.f32 %v1060_v14, %v1282_v21  ;;  %4985 = vmatmul.msk.f32.gmra.mxu2 %vm1362_vm2, %v2781_v29  ;;  %v984_v52 = vpop.f32.mrf.mxu3  ;;  %2114 = vst.msk [vmem:[#allocation3 + $0xc8] sm:$0xff] %vm1362_vm2, %v6534_v9  ;;  %v2783_v29 = vld [vmem:[#allocation3 + $0xb8] sm:$0xff]  ;;  %v1210_v12 = vmax.f32 %v1012_v24, %v1160_v0  ;;  %v6621_v24 = vpop.permute.xlu1 %2366 }
 0x1cf   : > { %v1142_v37 = vsel %vm1113_vm3, %v1139_v47, %v1141_v34  ;;  %v985_v22 = vadd.f32 %v6464_v16, %v984_v52  ;;  %v6557_v53 = vpop.permute.xlu2 %1538  ;;  %1806 = vst.msk [vmem:[#allocation3 + $0xc0] sm:$0xff] %vm1362_vm2, %v6536_v19  ;;  %v1038_v26 = vmax.f32 %v841_v4, 0.0  ;;  %v9097_v50 = vld [vmem:[#allocation14_spill] sm:$0xff] }
 0x1d0   : > { %v1358_v43 = vmax.f32 %v1209_v62, %v1333_v3  ;;  %v1201_v45 = vmax.f32 %v1003_v33, %v1142_v37  ;;  %v813_v42 = vpop.f32.mrf.mxu0  ;;  %1807 = vst.msk [vmem:[#allocation3 + $0xd0] sm:$0xff] %vm1362_vm2, %v6542_v17  ;;  %v1005_v62 = vmax.f32 %v742_v15, 0.0  ;;  %v766_v3 = vadd.f32 %v6464_v16, %v9097_v50 }
 0x1d1   : > { %v1086_v47 = vmax.f32 %v985_v22, 0.0  ;;  %v814_v55 = vadd.f32 %v6464_v16, %v813_v42  ;;  %2445 = vst.msk [vmem:[#allocation3 + $0x150] sm:$0xff] %vm1362_vm2, %v6549_v11  ;;  %v6588_v33 = vld [vmem:[#allocation2 + $0xe0] sm:$0xff] }
 0x1d2   : > { %1458 = vst.msk [vmem:[#allocation2 + $0xf0] sm:$0x7f] %vm1399_vm4, %v1358_v43  ;;  %v1350_v32 = vmax.f32 %v1201_v45, %v6263_v41  ;;  %v6582_v14 = vld [vmem:[#allocation2 + $0xe1] sm:$0xff]  ;;  %v1004_v41 = vmax.f32 %v739_v40, 0.0 }
 0x1d3   : > { %1459 = vst.msk [vmem:[#allocation2 + $0xf1] sm:$0x80] %vm1401_vm5, %v1358_v43  ;;  %v1283_v38 = vrot.slane %v1086_v47, 4  ;;  %v1029_v54 = vmax.f32 %v814_v55, 0.0  ;;  %v2108_v61 = vld [vmem:[#allocation2 + $0x81] sm:$0xff] }
 0x1d4   : > { %1441 = vst.msk [vmem:[#allocation2 + $0x97] sm:$0x1] %vm1423_vm0, %v1350_v32  ;;  %2084 = vrot.lane.b32.xlu0 %v6310_v63, %s5561_s17  ;;  %1718 = vrot.lane.b32.xlu1 %v6316_v10, %s5560_s9  ;;  %v6594_v4 = vld [vmem:[#allocation2 + $0xe8] sm:$0xff]  ;;  %v9098_v43 = vld [vmem:[#allocation10_spill] sm:$0xff] }
 0x1d5   : > { %1442 = vst.msk [vmem:[#allocation2 + $0x98] sm:$0xfe] %vm1426_vm1, %v1350_v32  ;;  %v1284_v23 = vsel %vm1113_vm3, %v1281_v56, %v1283_v38  ;;  %v1143_v21 = vrot.slane %v1029_v54, 4  ;;  %2322 = vrot.lane.b32.xlu2 %v6310_v63, %s5562_s18  ;;  %v1161_v56 = vrot.slane %v1038_v26, 4  ;;  %v913_v45 = vadd.f32 %v6464_v16, %v9098_v43  ;;  %v2785_v26 = vld [vmem:[#allocation3 + $0xc8] sm:$0xff] }
 0x1d6   : > { %v1334_v52 = vmax.f32 %v1061_v7, %v1284_v23  ;;  %4986 = vmatmul.msk.f32.gmra.mxu2 %vm1362_vm2, %v2783_v29  ;;  %v987_v59 = vpop.f32.mrf.mxu3  ;;  %2115 = vst.msk [vmem:[#allocation3 + $0xd8] sm:$0xff] %vm1362_vm2, %v2108_v61  ;;  %v1700_v7 = vld [vmem:[#allocation2 + $0x38] sm:$0xff] }
 0x1d7   : > { %v1144_v37 = vsel %vm1113_vm3, %v1141_v34, %v1143_v21  ;;  %v1146_v22 = vsel %vm1113_vm3, %v1143_v21, %v6318_v5  ;;  %v988_v51 = vadd.f32 %v6464_v16, %v987_v59  ;;  %v6600_v49 = vpop.permute.xlu2 %1708  ;;  %2753 = vst.msk [vmem:[#allocation3 + $0x158] sm:$0xff] %vm1362_vm2, %v6582_v14  ;;  %v1013_v5 = vmax.f32 %v766_v3, 0.0 }
 0x1d8   : > { %v1359_v42 = vmax.f32 %v1210_v12, %v1334_v52  ;;  %v1202_v44 = vmax.f32 %v1004_v41, %v1144_v37  ;;  %v1203_v40 = vmax.f32 %v1005_v62, %v1146_v22  ;;  %2446 = vst.msk [vmem:[#allocation3 + $0x160] sm:$0xff] %vm1362_vm2, %v6588_v33  ;;  %v1162_v16 = vsel %vm1113_vm3, %v6551_v18, %v1161_v56  ;;  %v9100_v18 = vld [vmem:[#allocation15_spill] sm:$0xff] }
 0x1d9   : > { %v1087_v34 = vmax.f32 %v988_v51, 0.0  ;;  %2447 = vst.msk [vmem:[#allocation3 + $0x170] sm:$0xff] %vm1362_vm2, %v6594_v4  ;;  %v1062_v15 = vmax.f32 %v913_v45, 0.0  ;;  %v9101_v32 = vmax.f32 %v9100_v18, 0.0  ;;  %v6653_v21 = vld [vmem:[#allocation2 + $0xe9] sm:$0xff] }
 0x1da   : > { %1460 = vst.msk [vmem:[#allocation2 + $0xf9] sm:$0x3f] %vm1403_vm6, %v1359_v42  ;;  %v1351_v47 = vmax.f32 %v1202_v44, %v6294_v46  ;;  %v1352_v55 = vmax.f32 %v1203_v40, %v6326_v2  ;;  %v1212_v46 = vmax.f32 %v1014_v39, %v1161_v56  ;;  %v6664_v50 = vld [vmem:[#allocation2 + $0xf1] sm:$0xff]  ;;  %v1850_v22 = vld [vmem:[#allocation2 + $0x49] sm:$0xff] }
 0x1db   : > { %1461 = vst.msk [vmem:[#allocation2 + $0xfa] sm:$0xc0] %vm1405_vm7, %v1359_v42  ;;  %v1285_v8 = vrot.slane %v1087_v34, 4  ;;  %v6691_v51 = vld [vmem:[#allocation2 + $0x90] sm:$0xff] }
 0x1dc   : > { %1443 = vst.msk [vmem:[#allocation2 + $0xa1] sm:$0x7f] %vm1399_vm4, %v1351_v47  ;;  %2238 = vrot.lane.b32.xlu0 %v6316_v10, %s5564_s20  ;;  %1834 = vrot.lane.b32.xlu1 %v6310_v63, %s5559_s8  ;;  %v1211_v10 = vmax.f32 %v1013_v5, %v1162_v16  ;;  %v6709_v34 = vld [vmem:[#allocation2 + $0x98] sm:$0xff]  ;;  %v6725_v16 = vld [vmem:[#allocation2 + $0xf0] sm:$0xff]  ;;  %vm1600_vm4 = vcmask 523648  }
 0x1dd   : > { %9099 = vst [vmem:[#allocation7_spill] sm:$0xff] %v6621_v24  ;;  %v1286_v2 = vsel %vm1113_vm3, %v1283_v38, %v1285_v8  ;;  %v1336_v0 = vmax.f32 %v9101_v32, %v1285_v8  ;;  %2602 = vrot.lane.b32.xlu2 %v6310_v63, %s5563_s19  ;;  %v6636_v38 = vld [vmem:[#allocation2 + $0x99] sm:$0xff]  ;;  %vm1557_vm3 = vcmask 392448  }
 0x1de   : > { %1444 = vst.msk [vmem:[#allocation2 + $0xa2] sm:$0x80] %vm1401_vm5, %v1351_v47  ;;  %v1335_v54 = vmax.f32 %v1062_v15, %v1286_v2  ;;  %4987 = vmatmul.msk.f32.gmra.mxu2 %vm1362_vm2, %v2785_v26  ;;  %v2787_v41 = vld [vmem:[#allocation3 + $0xd8] sm:$0xff]  ;;  %vm1643_vm5 = vcmask 654848  }
 0x1df   : > { %1445 = vst.msk [vmem:[#allocation2 + $0xaa] sm:$0x3f] %vm1403_vm6, %v1352_v55  ;;  %v1361_v57 = vmax.f32 %v1212_v46, %v1336_v0  ;;  %v1825_v39 = vpop.permute.xlu2 %1824  ;;  %v2121_v8 = vld [vmem:[#allocation2 + $0xb8] sm:$0xff]  ;;  %v2122_v46 = vld [vmem:[#allocation2 + $0xc0] sm:$0xff]  ;;  %v2430_v0 = vld [vmem:[#allocation2 + $0xc9] sm:$0xff]  ;;  %vm1686_vm6 = vcmask 786048  }
 0x1e0   : > { %1446 = vst.msk [vmem:[#allocation2 + $0xab] sm:$0xc0] %vm1405_vm7, %v1352_v55  ;;  %v1360_v61 = vmax.f32 %v1211_v10, %v1335_v54  ;;  %vm1729_vm7 = vcmask 917248  }
 0x1e1   : > { %1844 = vst.msk [vmem:[#allocation3 + $0x80] sm:$0xff] %vm1514_vm11, %v1825_v39  ;;  %v6721_v55 = vld [vmem:[#allocation2 + $0xf8] sm:$0xff] }
 0x1e2   : > { %1464 = vst.msk [vmem:[#allocation2 + $0x10b] sm:$0xf] %vm1411_vm10, %v1361_v57  ;;  %v6670_v52 = vld [vmem:[#allocation2 + $0xf9] sm:$0xff] }
 0x1e3   : > { %1462 = vst.msk [vmem:[#allocation2 + $0x102] sm:$0x1f] %vm1407_vm8, %v1360_v61  ;;  %v6640_v63 = vld [vmem:[#allocation2 + $0xa1] sm:$0xff]  ;;  %vm1772_vm8 = vcmask 1048448  }
 0x1e4   : > { %1463 = vst.msk [vmem:[#allocation2 + $0x103] sm:$0xe0] %vm1409_vm9, %v1360_v61  ;;  %1495 = vrot.lane.b32.xlu0 %v6351_v60, %s5559_s8  ;;  %2086 = vrot.lane.b32.xlu1 %v6345_v6, %s5561_s17  ;;  %vm4801_vm9 = vcmask 73728  }
 0x1e5   : > { %2431 = vst.msk [vmem:[#allocation3 + $0xe8] sm:$0xff] %vm1362_vm2, %v6636_v38  ;;  %1720 = vrot.lane.b32.xlu2 %v1700_v7, %s5560_s9 }
 0x1e6   : > { %2432 = vst.msk [vmem:[#allocation3 + $0xf8] sm:$0xff] %vm1362_vm2, %v6640_v63  ;;  %v6651_v23 = vld [vmem:[#allocation2 + $0xa9] sm:$0xff]  ;;  %4988 = vmatmul.msk.f32.gmra.mxu2 %vm1362_vm2, %v2787_v41  ;;  %v6656_v29 = vpop.permute.xlu0 %2312  ;;  %v6658_v62 = vpop.permute.xlu1 %2074 }
 0x1e7   : > { %2433 = vst.msk [vmem:[#allocation3 + $0x108] sm:$0xff] %vm1362_vm2, %v6651_v23  ;;  %v6662_v12 = vld [vmem:[#allocation2 + $0xb1] sm:$0xff]  ;;  %v6666_v3 = vpop.permute.xlu2 %2076  ;;  %v6715_v5 = vld [vmem:[#allocation2 + $0xa8] sm:$0xff] }
 0x1e8   : > { %2434 = vst.msk [vmem:[#allocation3 + $0x118] sm:$0xff] %vm1362_vm2, %v6662_v12  ;;  %v6717_v47 = vld [vmem:[#allocation2 + $0xb0] sm:$0xff] }
 0x1e9   : > { %2754 = vst.msk [vmem:[#allocation3 + $0x168] sm:$0xff] %vm1362_vm2, %v6653_v21 }
 0x1ea   : > { %2755 = vst.msk [vmem:[#allocation3 + $0x178] sm:$0xff] %vm1362_vm2, %v6664_v50  ;;  %v6684_v37 = vld [vmem:[#allocation2 + $0x100] sm:$0xff] }
 0x1eb   : > { %2756 = vst.msk [vmem:[#allocation3 + $0x188] sm:$0xff] %vm1362_vm2, %v6670_v52  ;;  %v6678_v59 = vld [vmem:[#allocation2 + $0x101] sm:$0xff]  ;;  %v6680_v56 = vld [vmem:[#allocation2 + $0x109] sm:$0xff] }
 0x1ec   : > { %2757 = vst.msk [vmem:[#allocation3 + $0x198] sm:$0xff] %vm1362_vm2, %v6678_v59  ;;  %1751 = vrot.lane.b32.xlu0 %v6351_v60, %s5561_s17  ;;  %2240 = vrot.lane.b32.xlu1 %v1700_v7, %s5564_s20  ;;  %v2789_v43 = vld [vmem:[#allocation3 + $0xe8] sm:$0xff] }
 0x1ed   : > { %1558 = vst.msk [vmem:[#allocation3] sm:$0xff] %vm1557_vm3, %v6426_v58  ;;  %1864 = vrot.lane.b32.xlu2 %v1850_v22, %s9044_s29  ;;  %v6696_v45 = vld [vmem:[#allocation2 + $0x108] sm:$0xff]  ;;  %v6705_v58 = vld [vmem:[#allocation2 + $0xa0] sm:$0xff]  ;;  %v2791_v15 = vld [vmem:[#allocation3 + $0xf8] sm:$0xff] }
 0x1ee   : > { %2758 = vst.msk [vmem:[#allocation3 + $0x1a8] sm:$0xff] %vm1362_vm2, %v6680_v56  ;;  %4989 = vmatmul.msk.f32.gmra.mxu2 %vm1362_vm2, %v2789_v43  ;;  %v6699_v42 = vpop.permute.xlu0 %2592  ;;  %v6701_v44 = vpop.permute.xlu1 %2228  ;;  %v2793_v26 = vld [vmem:[#allocation3 + $0x108] sm:$0xff]  ;;  %v2799_v43 = vld [vmem:[#allocation3 + $0x138] sm:$0xff] }
 0x1ef   : > { %2450 = vst.msk [vmem:[#allocation3 + $0x1a0] sm:$0xff] %vm1362_vm2, %v6684_v37  ;;  %v6707_v40 = vpop.permute.xlu2 %2230  ;;  %v2795_v39 = vld [vmem:[#allocation3 + $0x118] sm:$0xff] }
 0x1f0   : > { %2123 = vst.msk [vmem:[#allocation3 + $0xe0] sm:$0xff] %vm1362_vm2, %v6691_v51 }
 0x1f1   : > { %2451 = vst.msk [vmem:[#allocation3 + $0x1b0] sm:$0xff] %vm1362_vm2, %v6696_v45  ;;  %v2807_v13 = vld [vmem:[#allocation3 + $0x178] sm:$0xff] }
 0x1f2   : > { %2125 = vst.msk [vmem:[#allocation3 + $0x100] sm:$0xff] %vm1362_vm2, %v6705_v58 }
 0x1f3   : > { %2124 = vst.msk [vmem:[#allocation3 + $0xf0] sm:$0xff] %vm1362_vm2, %v6709_v34 }
 0x1f4   : > { %2126 = vst.msk [vmem:[#allocation3 + $0x110] sm:$0xff] %vm1362_vm2, %v6715_v5  ;;  %2032 = vrot.lane.b32.xlu0 %v6351_v60, %s5560_s9  ;;  %1497 = vrot.lane.b32.xlu1 %v6389_v1, %s5559_s8 }
 0x1f5   : > { %2127 = vst.msk [vmem:[#allocation3 + $0x120] sm:$0xff] %vm1362_vm2, %v6717_v47  ;;  %2270 = vrot.lane.b32.xlu2 %v6351_v60, %s5563_s19 }
 0x1f6   : > { %2449 = vst.msk [vmem:[#allocation3 + $0x190] sm:$0xff] %vm1362_vm2, %v6721_v55  ;;  %4990 = vmatmul.msk.f32.gmra.mxu2 %vm1362_vm2, %v2791_v15  ;;  %v6740_v2 = vpop.permute.xlu0 %1540  ;;  %v6742_v18 = vpop.permute.xlu1 %2314 }
 0x1f7   : > { %2448 = vst.msk [vmem:[#allocation3 + $0x180] sm:$0xff] %vm1362_vm2, %v6725_v16  ;;  %v6746_v32 = vpop.permute.xlu2 %2316 }
 0x1f8   : > { %2128 = vst.msk [vmem:[#allocation3 + $0x130] sm:$0xff] %vm1362_vm2, %v2121_v8 }
 0x1f9   : > { %2129 = vst.msk [vmem:[#allocation3 + $0x140] sm:$0xff] %vm1362_vm2, %v2122_v46 }
 0x1fa   : > { %2437 = vst.msk [vmem:[#allocation3 + $0x148] sm:$0xff] %vm1362_vm2, %v2430_v0 }
 0x1fc   : > { %2324 = vrot.lane.b32.xlu0 %v6345_v6, %s5562_s18  ;;  %1753 = vrot.lane.b32.xlu1 %v6389_v1, %s5561_s17 }
 0x1fd   : > { %2550 = vrot.lane.b32.xlu2 %v6351_v60, %s5564_s20 }
 0x1fe   : > { %4991 = vmatmul.msk.f32.gmra.mxu2 %vm1362_vm2, %v2793_v26  ;;  %v6758_v10 = vpop.permute.xlu0 %1710  ;;  %v6760_v54 = vpop.permute.xlu1 %2594 }
 0x1ff   : > { %v6762_v57 = vpop.permute.xlu2 %2596 }
 0x200   : > { %9102 = vst [vmem:[#allocation13_spill] sm:$0xff] %v6762_v57 }
 0x201   : > { %v2801_v0 = vld [vmem:[#allocation3 + $0x148] sm:$0xff] }
 0x204   : > { %2604 = vrot.lane.b32.xlu0 %v6345_v6, %s5563_s19  ;;  %1868 = vrot.lane.b32.xlu1 %v6383_v20, %s9044_s29  ;;  %v2797_v6 = vld [vmem:[#allocation3 + $0x128] sm:$0xff] }
 0x205   : > { %2636 = vrot.lane.b32.xlu2 %v6383_v20, %s5562_s18 }
 0x206   : > { %4992 = vmatmul.msk.f32.gmra.mxu2 %vm1362_vm2, %v2795_v39  ;;  %v1827_v60 = vpop.permute.xlu0 %1826  ;;  %v6771_v61 = vpop.permute.xlu1 %1542 }
 0x207   : > { %1845 = vst.msk [vmem:[#allocation3 + $0x90] sm:$0xff] %vm1514_vm11, %v1827_v60  ;;  %v6774_v7 = vpop.permute.xlu2 %1544 }
 0x20c   : > { %1866 = vrot.lane.b32.xlu0 %v6376_v48, %s9044_s29  ;;  %2034 = vrot.lane.b32.xlu1 %v6389_v1, %s5560_s9 }
 0x20d   : > { %1755 = vrot.lane.b32.xlu2 %v6419_v27, %s5561_s17 }
 0x20e   : > { %4993 = vmatmul.msk.f32.gmra.mxu2 %vm1362_vm2, %v2797_v6  ;;  %v6783_v20 = vpop.permute.xlu0 %2078  ;;  %v6785_v41 = vpop.permute.xlu1 %1712 }
 0x20f   : > { %9103 = vst [vmem:[#allocation12_spill] sm:$0xff] %v6783_v20  ;;  %v6787_v22 = vpop.permute.xlu2 %1714  ;;  %v1651_v20 = vld [vmem:[#allocation2 + $0x91] sm:$0xff] }
 0x214   : > { %2272 = vrot.lane.b32.xlu0 %v6389_v1, %s5563_s19  ;;  %2634 = vrot.lane.b32.xlu1 %v6376_v48, %s5562_s18 }
 0x215   : > { %1870 = vrot.lane.b32.xlu2 %v6417_v25, %s9044_s29 }
 0x216   : > { %4994 = vmatmul.msk.f32.gmra.mxu2 %vm1362_vm2, %v2799_v43  ;;  %v6796_v8 = vpop.permute.xlu0 %2232  ;;  %v1829_v15 = vpop.permute.xlu1 %1828  ;;  %v2344_v43 = vld [vmem:[#allocation2 + $0xb8] sm:$0xff] }
 0x217   : > { %1846 = vst.msk [vmem:[#allocation3 + $0xa0] sm:$0xff] %vm1514_vm11, %v1829_v15  ;;  %v1831_v46 = vpop.permute.xlu2 %1830  ;;  %v2805_v15 = vld [vmem:[#allocation3 + $0x168] sm:$0xff] }
 0x218   : > { %1847 = vst.msk [vmem:[#allocation3 + $0xb0] sm:$0xff] %vm1514_vm11, %v1831_v46 }
 0x21c   : > { %2552 = vrot.lane.b32.xlu0 %v6389_v1, %s5564_s20  ;;  %1499 = vrot.lane.b32.xlu1 %v6419_v27, %s5559_s8  ;;  %v2803_v1 = vld [vmem:[#allocation3 + $0x158] sm:$0xff] }
 0x21d   : > { %2036 = vrot.lane.b32.xlu2 %v6419_v27, %s5560_s9 }
 0x21e   : > { %4995 = vmatmul.msk.f32.gmra.mxu2 %vm1362_vm2, %v2801_v0  ;;  %v6807_v48 = vpop.permute.xlu0 %2318  ;;  %v6809_v25 = vpop.permute.xlu1 %2080 }
 0x21f   : > { %9104 = vst [vmem:[#allocation8_spill] sm:$0xff] %v6807_v48  ;;  %v6811_v26 = vpop.permute.xlu2 %2082 }
 0x224   : > { %1675 = vrot.lane.b32.xlu0 %v6453_v31, %s5562_s18  ;;  %2274 = vrot.lane.b32.xlu1 %v6419_v27, %s5563_s19 }
 0x225   : > { %2196 = vrot.lane.b32.xlu2 %v6453_v31, %s9044_s29 }
 0x226   : > { %4996 = vmatmul.msk.f32.gmra.mxu2 %vm1362_vm2, %v2803_v1  ;;  %v6820_v39 = vpop.permute.xlu0 %2598  ;;  %v6822_v60 = vpop.permute.xlu1 %2234 }
 0x227   : > { %9105 = vst [vmem:[#allocation9_spill] sm:$0xff] %v6820_v39  ;;  %v6824_v6 = vpop.permute.xlu2 %2236  ;;  %v6850_v39 = vpop.f32.mrf.mxu2 }
 0x228   : > { %9106 = vst [vmem:[#allocation11_spill] sm:$0xff] %v6822_v60  ;;  %v1743_v60 = vld [vmem:[#allocation2 + $0x80] sm:$0xff] }
 0x229   : > { %9110 = vst [vmem:[#allocation17_spill] sm:$0xff] %v6850_v39 }
 0x22c   : > { %1958 = vrot.lane.b32.xlu0 %v6453_v31, %s5563_s19  ;;  %2554 = vrot.lane.b32.xlu1 %v6419_v27, %s5564_s20 }
 0x22d   : > { %2362 = vrot.lane.b32.xlu2 %v2344_v43, %s5560_s9 }
 0x22e   : > { %4997 = vmatmul.msk.f32.gmra.mxu2 %vm1362_vm2, %v2805_v15  ;;  %v6832_v46 = vpop.permute.xlu0 %1546  ;;  %v6834_v0 = vpop.permute.xlu1 %2320 }
 0x22f   : > { %v6836_v1 = vpop.permute.xlu2 %2322  ;;  %v6864_v39 = vpop.f32.mrf.mxu2 }
 0x230   : > { %9107 = vst [vmem:[#allocation14_spill] sm:$0xff] %v6836_v1 }
 0x231   : > { %9112 = vst [vmem:[#allocation19_spill] sm:$0xff] %v6864_v39 }
 0x234   : > { %1757 = vrot.lane.b32.xlu0 %v6508_v28, %s5561_s17  ;;  %1589 = vrot.lane.b32.xlu1 %v2344_v43, %s5564_s20  ;;  %v2809_v43 = vld [vmem:[#allocation3 + $0x188] sm:$0xff] }
 0x235   : > { %2476 = vrot.lane.b32.xlu2 %v6453_v31, %s5559_s8 }
 0x236   : > { %4998 = vmatmul.msk.f32.gmra.mxu2 %vm1362_vm2, %v2807_v13  ;;  %v6844_v27 = vpop.permute.xlu0 %1716  ;;  %v6846_v15 = vpop.permute.xlu1 %2600 }
 0x237   : > { %9108 = vst [vmem:[#allocation10_spill] sm:$0xff] %v6846_v15  ;;  %v6848_v24 = vpop.permute.xlu2 %2602  ;;  %v6882_v39 = vpop.f32.mrf.mxu2  ;;  %v2345_v15 = vld [vmem:[#allocation2 + $0xc0] sm:$0xff] }
 0x238   : > { %9109 = vst [vmem:[#allocation15_spill] sm:$0xff] %v6848_v24 }
 0x239   : > { %9115 = vst [vmem:[#allocation22_spill] sm:$0xff] %v6882_v39 }
 0x23c   : > { %1872 = vrot.lane.b32.xlu0 %v6451_v30, %s9044_s29  ;;  %1677 = vrot.lane.b32.xlu1 %v6501_v36, %s5562_s18  ;;  %v2811_v30 = vld [vmem:[#allocation3 + $0x198] sm:$0xff] }
 0x23d   : > { %1501 = vrot.lane.b32.xlu2 %v6508_v28, %s5559_s8 }
 0x23e   : > { %4999 = vmatmul.msk.f32.gmra.mxu2 %vm1362_vm2, %v2809_v43  ;;  %v1833_v31 = vpop.permute.xlu0 %1832  ;;  %v6859_v13 = vpop.permute.xlu1 %1548 }
 0x23f   : > { %1848 = vst.msk [vmem:[#allocation3 + $0xc0] sm:$0xff] %vm1514_vm11, %v1833_v31  ;;  %v6862_v24 = vpop.permute.xlu2 %1720 }
 0x240   : > { %9111 = vst [vmem:[#allocation18_spill] sm:$0xff] %v6862_v24  ;;  %v2813_v24 = vld [vmem:[#allocation3 + $0x1a8] sm:$0xff] }
 0x244   : > { %2038 = vrot.lane.b32.xlu0 %v6508_v28, %s5560_s9  ;;  %1960 = vrot.lane.b32.xlu1 %v6501_v36, %s5563_s19 }
 0x245   : > { %2276 = vrot.lane.b32.xlu2 %v6508_v28, %s5563_s19 }
 0x246   : > { %5000 = vmatmul.msk.f32.gmra.mxu2 %vm1362_vm2, %v2811_v30  ;;  %v6873_v43 = vpop.permute.xlu0 %2084  ;;  %v6875_v1 = vpop.permute.xlu1 %1718 }
 0x247   : > { %9113 = vst [vmem:[#allocation20_spill] sm:$0xff] %v6873_v43  ;;  %v1865_v31 = vpop.permute.xlu2 %1864 }
 0x248   : > { %9114 = vst [vmem:[#allocation21_spill] sm:$0xff] %v6875_v1 }
 0x249   : > { %1885 = vst.msk [vmem:[#allocation3 + $0x70] sm:$0xff] %vm1557_vm3, %v1865_v31 }
 0x24c   : > { %2198 = vrot.lane.b32.xlu0 %v6501_v36, %s9044_s29  ;;  %1759 = vrot.lane.b32.xlu1 %v6536_v19, %s5561_s17 }
 0x24d   : > { %2556 = vrot.lane.b32.xlu2 %v6508_v28, %s5564_s20 }
 0x24e   : > { %5001 = vmatmul.msk.f32.gmra.mxu2 %vm1362_vm2, %v2813_v24  ;;  %v6887_v30 = vpop.permute.xlu0 %2238  ;;  %v1835_v43 = vpop.permute.xlu1 %1834 }
 0x24f   : > { %9116 = vst [vmem:[#allocation23_spill] sm:$0xff] %v6887_v30  ;;  %v6890_v31 = vpop.permute.xlu2 %2270 }
 0x250   : > { %1849 = vst.msk [vmem:[#allocation3 + $0xd0] sm:$0xff] %vm1514_vm11, %v1835_v43 }
 0x254   : > { %2364 = vrot.lane.b32.xlu0 %v2345_v15, %s5560_s9  ;;  %1874 = vrot.lane.b32.xlu1 %v6493_v35, %s9044_s29 }
 0x255   : > { %1591 = vrot.lane.b32.xlu2 %v2345_v15, %s5564_s20 }
 0x256   : > { %v1496_v39 = vpop.permute.xlu0 %1495  ;;  %v6896_v1 = vpop.permute.xlu1 %2086 }
 0x257   : > { %9117 = vst [vmem:[#allocation24_spill] sm:$0xff] %v6896_v1  ;;  %v6899_v28 = vpop.permute.xlu2 %2550 }
 0x258   : > { %1516 = vst.msk [vmem:[#allocation3 + $0x10] sm:$0xff] %vm1514_vm11, %v1496_v39  ;;  %v2494_v39 = vld [vmem:[#allocation2 + $0xd9] sm:$0xff] }
 0x259   : > { %1559 = vst.msk [vmem:[#allocation3 + $0x10] sm:$0xff] %vm1557_vm3, %v6557_v53 }
 0x25c   : > { %2478 = vrot.lane.b32.xlu0 %v6501_v36, %s5559_s8  ;;  %2040 = vrot.lane.b32.xlu1 %v6536_v19, %s5560_s9 }
 0x25d   : > { %1503 = vrot.lane.b32.xlu2 %v6536_v19, %s5559_s8 }
 0x25e   : > { %v6909_v35 = vpop.permute.xlu0 %1751  ;;  %v6911_v24 = vpop.permute.xlu1 %2240 }
 0x25f   : > { %9118 = vst [vmem:[#allocation25_spill] sm:$0xff] %v6911_v24  ;;  %v6913_v15 = vpop.permute.xlu2 %2636 }
 0x264   : > { %2278 = vrot.lane.b32.xlu0 %v6536_v19, %s5563_s19  ;;  %2508 = vrot.lane.b32.xlu1 %v2494_v39, %s9044_s29 }
 0x265   : > { %1990 = vrot.lane.b32.xlu2 %v2494_v39, %s5562_s18 }
 0x266   : > { %v6919_v36 = vpop.permute.xlu0 %2032  ;;  %v1498_v53 = vpop.permute.xlu1 %1497 }
 0x267   : > { %1517 = vst.msk [vmem:[#allocation3 + $0x20] sm:$0xff] %vm1514_vm11, %v1498_v53  ;;  %v6922_v43 = vpop.permute.xlu2 %1755 }
 0x268   : > { %1560 = vst.msk [vmem:[#allocation3 + $0x20] sm:$0xff] %vm1557_vm3, %v6740_v2 }
 0x26c   : > { %2558 = vrot.lane.b32.xlu0 %v6536_v19, %s5564_s20  ;;  %2280 = vrot.lane.b32.xlu1 %v6542_v17, %s5563_s19 }
 0x26d   : > { %2144 = vrot.lane.b32.xlu2 %v6549_v11, %s5559_s8 }
 0x26e   : > { %v6932_v39 = vpop.permute.xlu0 %2324  ;;  %v6934_v1 = vpop.permute.xlu1 %1753 }
 0x26f   : > { %9119 = vst [vmem:[#allocation26_spill] sm:$0xff] %v6932_v39  ;;  %v1871_v24 = vpop.permute.xlu2 %1870 }
 0x270   : > { %1888 = vst.msk [vmem:[#allocation3 + $0xa0] sm:$0xff] %vm1557_vm3, %v1871_v24 }
 0x274   : > { %1622 = vrot.lane.b32.xlu0 %v6549_v11, %s5563_s19  ;;  %2560 = vrot.lane.b32.xlu1 %v6542_v17, %s5564_s20 }
 0x275   : > { %1761 = vrot.lane.b32.xlu2 %v6542_v17, %s5561_s17 }
 0x276   : > { %v6943_v19 = vpop.permute.xlu0 %2604  ;;  %v1869_v2 = vpop.permute.xlu1 %1868 }
 0x277   : > { %9120 = vst [vmem:[#allocation27_spill] sm:$0xff] %v6943_v19  ;;  %v6946_v53 = vpop.permute.xlu2 %2036 }
 0x278   : > { %1887 = vst.msk [vmem:[#allocation3 + $0x90] sm:$0xff] %vm1557_vm3, %v1869_v2 }
 0x279   : > { %9121 = vst [vmem:[#allocation28_spill] sm:$0xff] %v6946_v53 }
 0x27c   : > { %1906 = vrot.lane.b32.xlu0 %v6549_v11, %s5564_s20  ;;  %1624 = vrot.lane.b32.xlu1 %v6588_v33, %s5563_s19 }
 0x27d   : > { %1876 = vrot.lane.b32.xlu2 %v6534_v9, %s9044_s29 }
 0x27e   : > { %v1867_v24 = vpop.permute.xlu0 %1866  ;;  %v6954_v39 = vpop.permute.xlu1 %2034 }
 0x27f   : > { %1886 = vst.msk [vmem:[#allocation3 + $0x80] sm:$0xff] %vm1557_vm3, %v1867_v24  ;;  %v6957_v19 = vpop.permute.xlu2 %2196 }
 0x280   : > { %9122 = vst [vmem:[#allocation29_spill] sm:$0xff] %v6957_v19 }
 0x284   : > { %1505 = vrot.lane.b32.xlu0 %v6542_v17, %s5559_s8  ;;  %1908 = vrot.lane.b32.xlu1 %v6588_v33, %s5564_s20 }
 0x285   : > { %2042 = vrot.lane.b32.xlu2 %v6542_v17, %s5560_s9 }
 0x286   : > { %v6965_v11 = vpop.permute.xlu0 %2272  ;;  %v6967_v2 = vpop.permute.xlu1 %2634 }
 0x287   : > { %v6969_v9 = vpop.permute.xlu2 %2362 }
 0x288   : > { %9123 = vst [vmem:[#allocation30_spill] sm:$0xff] %v6969_v9 }
 0x28c   : > { %1992 = vrot.lane.b32.xlu0 %v6582_v14, %s5562_s18  ;;  %2148 = vrot.lane.b32.xlu1 %v6594_v4, %s5559_s8 }
 0x28d   : > { %1626 = vrot.lane.b32.xlu2 %v6594_v4, %s5563_s19 }
 0x28e   : > { %v6977_v24 = vpop.permute.xlu0 %2552  ;;  %v1500_v30 = vpop.permute.xlu1 %1499 }
 0x28f   : > { %1518 = vst.msk [vmem:[#allocation3 + $0x30] sm:$0xff] %vm1514_vm11, %v1500_v30  ;;  %v2477_v17 = vpop.permute.xlu2 %2476 }
 0x290   : > { %1561 = vst.msk [vmem:[#allocation3 + $0x30] sm:$0xff] %vm1557_vm3, %v6771_v61 }
 0x291   : > { %2492 = vst.msk [vmem:[#allocation3 + $0x1a0] sm:$0xff] %vm1514_vm11, %v2477_v17 }
 0x294   : > { %2146 = vrot.lane.b32.xlu0 %v6588_v33, %s5559_s8  ;;  %1994 = vrot.lane.b32.xlu1 %v6653_v21, %s5562_s18 }
 0x295   : > { %1910 = vrot.lane.b32.xlu2 %v6594_v4, %s5564_s20 }
 0x296   : > { %v6989_v19 = vpop.permute.xlu0 %1675  ;;  %v6991_v48 = vpop.permute.xlu1 %2274 }
 0x297   : > { %9124 = vst [vmem:[#allocation31_spill] sm:$0xff] %v6989_v19  ;;  %v1502_v30 = vpop.permute.xlu2 %1501 }
 0x298   : > { %1519 = vst.msk [vmem:[#allocation3 + $0x40] sm:$0xff] %vm1514_vm11, %v1502_v30 }
 0x299   : > { %1562 = vst.msk [vmem:[#allocation3 + $0x40] sm:$0xff] %vm1557_vm3, %v6774_v7 }
 0x29c   : > { %2398 = vrot.lane.b32.xlu0 %v6594_v4, %s5561_s17  ;;  %2400 = vrot.lane.b32.xlu1 %v6725_v16, %s5561_s17 }
 0x29d   : > { %2396 = vrot.lane.b32.xlu2 %v6588_v33, %s5561_s17 }
 0x29e   : > { %v7002_v61 = vpop.permute.xlu0 %1958  ;;  %v7004_v17 = vpop.permute.xlu1 %2554 }
 0x29f   : > { %9125 = vst [vmem:[#allocation32_spill] sm:$0xff] %v7002_v61  ;;  %v7006_v19 = vpop.permute.xlu2 %2276 }
 0x2a0   : > { %9126 = vst [vmem:[#allocation33_spill] sm:$0xff] %v7004_v17 }
 0x2a1   : > { %9127 = vst [vmem:[#allocation34_spill] sm:$0xff] %v7006_v19 }
 0x2a4   : > { %1763 = vrot.lane.b32.xlu0 %v1743_v60, %s5561_s17  ;;  %2514 = vrot.lane.b32.xlu1 %v6664_v50, %s9044_s29 }
 0x2a5   : > { %2510 = vrot.lane.b32.xlu2 %v6582_v14, %s9044_s29 }
 0x2a6   : > { %v7013_v7 = vpop.permute.xlu0 %1757  ;;  %v1590_v30 = vpop.permute.xlu1 %1589 }
 0x2a7   : > { %v7015_v57 = vpop.permute.xlu2 %2556 }
 0x2a8   : > { %9128 = vst [vmem:[#allocation35_spill] sm:$0xff] %v7015_v57 }
 0x2ac   : > { %2044 = vrot.lane.b32.xlu0 %v1743_v60, %s5560_s9  ;;  %1665 = vrot.lane.b32.xlu1 %v1651_v20, %s5562_s18 }
 0x2ad   : > { %2282 = vrot.lane.b32.xlu2 %v1743_v60, %s5563_s19 }
 0x2ae   : > { %v1873_v61 = vpop.permute.xlu0 %1872  ;;  %v7020_v19 = vpop.permute.xlu1 %1677 }
 0x2af   : > { %9129 = vst [vmem:[#allocation36_spill] sm:$0xff] %v7020_v19  ;;  %v7023_v17 = vpop.permute.xlu2 %1591 }
 0x2b0   : > { %1889 = vst.msk [vmem:[#allocation3 + $0xb0] sm:$0xff] %vm1557_vm3, %v1873_v61 }
 0x2b4   : > { %1628 = vrot.lane.b32.xlu0 %v6725_v16, %s5563_s19  ;;  %1948 = vrot.lane.b32.xlu1 %v1651_v20, %s5563_s19 }
 0x2b5   : > { %2562 = vrot.lane.b32.xlu2 %v1743_v60, %s5564_s20 }
 0x2b6   : > { %v7029_v14 = vpop.permute.xlu0 %2038  ;;  %v7031_v57 = vpop.permute.xlu1 %1960 }
 0x2b7   : > { %9130 = vst [vmem:[#allocation37_spill] sm:$0xff] %v7031_v57  ;;  %v1504_v53 = vpop.permute.xlu2 %1503 }
 0x2b8   : > { %1520 = vst.msk [vmem:[#allocation3 + $0x50] sm:$0xff] %vm1514_vm11, %v1504_v53 }
 0x2b9   : > { %1563 = vst.msk [vmem:[#allocation3 + $0x50] sm:$0xff] %vm1557_vm3, %v6832_v46 }
 0x2ba   : > { %1606 = vst.msk [vmem:[#allocation3 + $0x50] sm:$0xff] %vm1600_vm4, %v1590_v30 }
 0x2bc   : > { %1912 = vrot.lane.b32.xlu0 %v6725_v16, %s5564_s20  ;;  %2188 = vrot.lane.b32.xlu1 %v6636_v38, %s9044_s29 }
 0x2bd   : > { %1996 = vrot.lane.b32.xlu2 %v6664_v50, %s5562_s18 }
 0x2be   : > { %v7043_v60 = vpop.permute.xlu0 %2198  ;;  %v7045_v61 = vpop.permute.xlu1 %1759 }
 0x2bf   : > { %9131 = vst [vmem:[#allocation38_spill] sm:$0xff] %v7043_v60  ;;  %v7047_v57 = vpop.permute.xlu2 %1990 }
 0x2c4   : > { %2512 = vrot.lane.b32.xlu0 %v6653_v21, %s9044_s29  ;;  %2354 = vrot.lane.b32.xlu1 %v6709_v34, %s5560_s9 }
 0x2c5   : > { %2150 = vrot.lane.b32.xlu2 %v6725_v16, %s5559_s8 }
 0x2c6   : > { %v7055_v46 = vpop.permute.xlu0 %2364  ;;  %v1875_v53 = vpop.permute.xlu1 %1874 }
 0x2c7   : > { %9132 = vst [vmem:[#allocation39_spill] sm:$0xff] %v7055_v46  ;;  %v2145_v50 = vpop.permute.xlu2 %2144 }
 0x2c8   : > { %1890 = vst.msk [vmem:[#allocation3 + $0xc0] sm:$0xff] %vm1557_vm3, %v1875_v53 }
 0x2c9   : > { %2165 = vst.msk [vmem:[#allocation3 + $0xe0] sm:$0xff] %vm1514_vm11, %v2145_v50 }
 0x2cc   : > { %1581 = vrot.lane.b32.xlu0 %v6709_v34, %s5564_s20  ;;  %2468 = vrot.lane.b32.xlu1 %v6636_v38, %s5559_s8 }
 0x2cd   : > { %1579 = vrot.lane.b32.xlu2 %v6691_v51, %s5564_s20 }
 0x2ce   : > { %v2479_v21 = vpop.permute.xlu0 %2478  ;;  %v7065_v30 = vpop.permute.xlu1 %2040 }
 0x2cf   : > { %2493 = vst.msk [vmem:[#allocation3 + $0x1b0] sm:$0xff] %vm1514_vm11, %v2479_v21  ;;  %v7068_v60 = vpop.permute.xlu2 %1761 }
 0x2d0   : > { %9133 = vst [vmem:[#allocation40_spill] sm:$0xff] %v7068_v60 }
 0x2d4   : > { %2186 = vrot.lane.b32.xlu0 %v1651_v20, %s9044_s29  ;;  %1630 = vrot.lane.b32.xlu1 %v6721_v55, %s5563_s19 }
 0x2d5   : > { %1667 = vrot.lane.b32.xlu2 %v6636_v38, %s5562_s18 }
 0x2d6   : > { %v7075_v34 = vpop.permute.xlu0 %2278  ;;  %v7077_v53 = vpop.permute.xlu1 %2508 }
 0x2d7   : > { %v1877_v51 = vpop.permute.xlu2 %1876 }
 0x2d8   : > { %1891 = vst.msk [vmem:[#allocation3 + $0xd0] sm:$0xff] %vm1557_vm3, %v1877_v51 }
 0x2dc   : > { %2466 = vrot.lane.b32.xlu0 %v1651_v20, %s5559_s8  ;;  %1914 = vrot.lane.b32.xlu1 %v6721_v55, %s5564_s20 }
 0x2dd   : > { %1950 = vrot.lane.b32.xlu2 %v6636_v38, %s5563_s19 }
 0x2de   : > { %v7085_v50 = vpop.permute.xlu0 %2558  ;;  %v7087_v21 = vpop.permute.xlu1 %2280 }
 0x2df   : > { %9134 = vst [vmem:[#allocation41_spill] sm:$0xff] %v7085_v50  ;;  %v7089_v19 = vpop.permute.xlu2 %2042  ;;  %v2828_v50 = vld [vmem:[%s9037_s3 + $0x60] sm:$0xff] }
 0x2e0   : > { %9135 = vst [vmem:[#allocation42_spill] sm:$0xff] %v7087_v21 }
 0x2e1   : > { %9136 = vst [vmem:[#allocation43_spill] sm:$0xff] %v7089_v19 }
 0x2e4   : > { %1998 = vrot.lane.b32.xlu0 %v6670_v52, %s5562_s18  ;;  %1583 = vrot.lane.b32.xlu1 %v6705_v58, %s5564_s20 }
 0x2e5   : > { %2402 = vrot.lane.b32.xlu2 %v6721_v55, %s5561_s17 }
 0x2e6   : > { %v7097_v20 = vpop.permute.xlu0 %1622  ;;  %v7099_v51 = vpop.permute.xlu1 %2560 }
 0x2e7   : > { %9137 = vst [vmem:[#allocation44_spill] sm:$0xff] %v7099_v51  ;;  %v7101_v38 = vpop.permute.xlu2 %1626  ;;  %v2831_v51 = vld [vmem:[%s9037_s3 + $0x78] sm:$0xff] }
 0x2e8   : > { %2922 = vmatpush.msrb.mxu1 %v2831_v51  ;;  %v2829_v51 = vld [vmem:[%s9037_s3 + $0x68] sm:$0xff] }
 0x2ec   : > { %2152 = vrot.lane.b32.xlu0 %v6721_v55, %s5559_s8  ;;  %1671 = vrot.lane.b32.xlu1 %v6651_v23, %s5562_s18 }
 0x2ed   : > { %2516 = vrot.lane.b32.xlu2 %v6670_v52, %s9044_s29  ;;  %v2830_v52 = vld [vmem:[%s9037_s3 + $0x70] sm:$0xff] }
 0x2ee   : > { %v1907_v46 = vpop.permute.xlu0 %1906  ;;  %v7109_v21 = vpop.permute.xlu1 %1624  ;;  %2923 = vmatpush.msrb.mxu1 %v2830_v52  ;;  %v2827_v52 = vld [vmem:[%s9037_s3 + $0x58] sm:$0xff] }
 0x2ef   : > { %1927 = vst.msk [vmem:[#allocation3 + $0x70] sm:$0xff] %vm1600_vm4, %v1907_v46  ;;  %v1911_v19 = vpop.permute.xlu2 %1910 }
 0x2f0   : > { %1929 = vst.msk [vmem:[#allocation3 + $0x90] sm:$0xff] %vm1600_vm4, %v1911_v19  ;;  %2924 = vmatpush.msrb.mxu1 %v2829_v51  ;;  %v2824_v51 = vld [vmem:[%s9037_s3 + $0x40] sm:$0xff] }
 0x2f2   : > { %2925 = vmatpush.msrb.mxu1 %v2828_v50 }
 0x2f4   : > { %1587 = vrot.lane.b32.xlu0 %v6717_v47, %s5564_s20  ;;  %1954 = vrot.lane.b32.xlu1 %v6651_v23, %s5563_s19 }
 0x2f5   : > { %1585 = vrot.lane.b32.xlu2 %v6715_v5, %s5564_s20  ;;  %2926 = vmatpush.msrb.mxu1 %v2827_v52  ;;  %v2823_v52 = vld [vmem:[%s9037_s3 + $0x38] sm:$0xff] }
 0x2f6   : > { %v1506_v46 = vpop.permute.xlu0 %1505  ;;  %v1909_v60 = vpop.permute.xlu1 %1908 }
 0x2f7   : > { %1521 = vst.msk [vmem:[#allocation3 + $0x60] sm:$0xff] %vm1514_vm11, %v1506_v46  ;;  %v7126_v19 = vpop.permute.xlu2 %2396  ;;  %v2825_v46 = vld [vmem:[%s9037_s3 + $0x48] sm:$0xff] }
 0x2f8   : > { %1564 = vst.msk [vmem:[#allocation3 + $0x60] sm:$0xff] %vm1557_vm3, %v6859_v13  ;;  %v2826_v13 = vld [vmem:[%s9037_s3 + $0x50] sm:$0xff] }
 0x2f9   : > { %1607 = vst.msk [vmem:[#allocation3 + $0x60] sm:$0xff] %vm1600_vm4, %v7023_v17  ;;  %2927 = vmatpush.msrb.mxu1 %v2826_v13  ;;  %v2822_v13 = vld [vmem:[%s9037_s3 + $0x30] sm:$0xff] }
 0x2fa   : > { %1928 = vst.msk [vmem:[#allocation3 + $0x80] sm:$0xff] %vm1600_vm4, %v1909_v60 }
 0x2fb   : > { %2928 = vmatpush.msrb.mxu1 %v2825_v46 }
 0x2fc   : > { %1669 = vrot.lane.b32.xlu0 %v6640_v63, %s5562_s18  ;;  %2194 = vrot.lane.b32.xlu1 %v6662_v12, %s9044_s29 }
 0x2fd   : > { %1673 = vrot.lane.b32.xlu2 %v6662_v12, %s5562_s18  ;;  %2929 = vmatpush.msrb.mxu1 %v2824_v51 }
 0x2fe   : > { %v7151_v17 = vpop.permute.xlu0 %1992  ;;  %v2149_v60 = vpop.permute.xlu1 %2148 }
 0x2ff   : > { %2167 = vst.msk [vmem:[#allocation3 + $0x100] sm:$0xff] %vm1514_vm11, %v2149_v60  ;;  %v7154_v50 = vpop.permute.xlu2 %2510  ;;  %2930 = vmatpush.msrb.mxu1 %v2823_v52 }
 0x301   : > { %2931 = vmatpush.msrb.mxu1 %v2822_v13  ;;  %v2820_v13 = vld [vmem:[%s9037_s3 + $0x20] sm:$0xff] }
 0x304   : > { %1952 = vrot.lane.b32.xlu0 %v6640_v63, %s5563_s19  ;;  %2360 = vrot.lane.b32.xlu1 %v6717_v47, %s5560_s9 }
 0x305   : > { %1956 = vrot.lane.b32.xlu2 %v6662_v12, %s5563_s19 }
 0x306   : > { %v2147_v60 = vpop.permute.xlu0 %2146  ;;  %v7174_v46 = vpop.permute.xlu1 %1994 }
 0x307   : > { %2166 = vst.msk [vmem:[#allocation3 + $0xf0] sm:$0xff] %vm1514_vm11, %v2147_v60  ;;  %v7177_v51 = vpop.permute.xlu2 %2282  ;;  %v2821_v60 = vld [vmem:[%s9037_s3 + $0x28] sm:$0xff] }
 0x308   : > { %9138 = vst [vmem:[#allocation45_spill] sm:$0xff] %v7177_v51  ;;  %2932 = vmatpush.msrb.mxu1 %v2821_v60  ;;  %v2817_v51 = vld [vmem:[%s9037_s3 + $0x8] sm:$0xff] }
 0x30a   : > { %2933 = vmatpush.msrb.mxu1 %v2820_v13 }
 0x30c   : > { %2192 = vrot.lane.b32.xlu0 %v6651_v23, %s9044_s29  ;;  %2474 = vrot.lane.b32.xlu1 %v6662_v12, %s5559_s8  ;;  %v2819_v12 = vld [vmem:[%s9037_s3 + $0x18] sm:$0xff] }
 0x30d   : > { %2190 = vrot.lane.b32.xlu2 %v6640_v63, %s9044_s29  ;;  %2934 = vmatpush.msrb.mxu1 %v2819_v12  ;;  %s9142_s29 = smov 32  }
 0x30e   : > { %v7185_v47 = vpop.permute.xlu0 %2398  ;;  %v7187_v52 = vpop.permute.xlu1 %2400 }
 0x30f   : > { %9139 = vst [vmem:[#allocation46_spill] sm:$0xff] %v7187_v52  ;;  %v7189_v9 = vpop.permute.xlu2 %2562  ;;  %v2816_v52 = vld [vmem:[%s9037_s3] sm:$0xff] }
 0x310   : > { %9140 = vst [vmem:[#allocation47_spill] sm:$0xff] %v7189_v9  ;;  %v2818_v9 = vld [vmem:[%s9037_s3 + $0x10] sm:$0xff] }
 0x311   : > { %2935 = vmatpush.msrb.mxu1 %v2818_v9 }
 0x313   : > { %2936 = vmatpush.msrb.mxu1 %v2817_v51 }
 0x314   : > { %2358 = vrot.lane.b32.xlu0 %v6715_v5, %s5560_s9  ;;  %2000 = vrot.lane.b32.xlu1 %v6678_v59, %s5562_s18 }
 0x315   : > { %2356 = vrot.lane.b32.xlu2 %v6705_v58, %s5560_s9  ;;  %2937 = vmatpush.msrb.mxu1 %v2816_v52 }
 0x316   : > { %v7209_v60 = vpop.permute.xlu0 %1763  ;;  %v7211_v13 = vpop.permute.xlu1 %2514 }
 0x317   : > { %9141 = vst [vmem:[#allocation48_spill] sm:$0xff] %v7209_v60  ;;  %v7216_v5 = vpop.permute.xlu2 %1996 }
 0x31c   : > { %2472 = vrot.lane.b32.xlu0 %v6651_v23, %s5559_s8  ;;  %2154 = vrot.lane.b32.xlu1 %v6684_v37, %s5559_s8 }
 0x31d   : > { %2470 = vrot.lane.b32.xlu2 %v6640_v63, %s5559_s8 }
 0x31e   : > { %v7227_v58 = vpop.permute.xlu0 %2044  ;;  %v1666_v12 = vpop.permute.xlu1 %1665 }
 0x31f   : > { %v2151_v60 = vpop.permute.xlu2 %2150 }
 0x320   : > { %2168 = vst.msk [vmem:[#allocation3 + $0x110] sm:$0xff] %vm1514_vm11, %v2151_v60  ;;  %v9148_v60 = vld [vmem:[#allocation11_spill] sm:$0xff] }
 0x324   : > { %1634 = vrot.lane.b32.xlu0 %v6696_v45, %s5563_s19  ;;  %2406 = vrot.lane.b32.xlu1 %v6696_v45, %s5561_s17 }
 0x325   : > { %1632 = vrot.lane.b32.xlu2 %v6684_v37, %s5563_s19 }
 0x326   : > { %v7236_v23 = vpop.permute.xlu0 %1628  ;;  %v1949_v63 = vpop.permute.xlu1 %1948 }
 0x327   : > { %1969 = vst.msk [vmem:[#allocation3 + $0x70] sm:$0xff] %vm1643_vm5, %v1949_v63  ;;  %v1580_v9 = vpop.permute.xlu2 %1579 }
 0x328   : > { %2011 = vst.msk [vmem:[#allocation3 + $0x70] sm:$0xff] %vm1686_vm6, %v7047_v57 }
 0x329   : > { %2053 = vst.msk [vmem:[#allocation3 + $0x70] sm:$0xff] %vm1729_vm7, %v6919_v36 }
 0x32a   : > { %2095 = vst.msk [vmem:[#allocation3 + $0x70] sm:$0xff] %vm1772_vm8, %v6658_v62 }
 0x32b   : > { %1601 = vst.msk [vmem:[#allocation3] sm:$0xff] %vm1600_vm4, %v1580_v9  ;;  %v9151_v9 = vld [vmem:[#allocation41_spill] sm:$0xff] }
 0x32c   : > { %1644 = vst.msk [vmem:[#allocation3] sm:$0xff] %vm1643_vm5, %v7097_v20  ;;  %1918 = vrot.lane.b32.xlu0 %v6696_v45, %s5564_s20  ;;  %2520 = vrot.lane.b32.xlu1 %v6680_v56, %s9142_s29  ;;  %v2623_v20 = vld [vmem:[#allocation2 + $0x69] sm:$0xff] }
 0x32d   : > { %1687 = vst.msk [vmem:[#allocation3] sm:$0xff] %vm1686_vm6, %v1666_v12  ;;  %1916 = vrot.lane.b32.xlu2 %v6684_v37, %s5564_s20  ;;  %v9149_v12 = vld [vmem:[#allocation34_spill] sm:$0xff]  ;;  %s4812_s20 = scalar_lea.hbm %s9041_s7, %s5658_s28 }
 0x32e   : > { %1730 = vst.msk [vmem:[#allocation3] sm:$0xff] %vm1729_vm7, %v6600_v49  ;;  %v1913_v62 = vpop.permute.xlu0 %1912  ;;  %v2189_v57 = vpop.permute.xlu1 %2188  ;;  %s4816_s23 = sshll.u32 %s4812_s20, 4  ;;  %s4817_s23 = int_to_ptr.hbm [resolvable:$true] %s4816_s23 }
 0x32f   : > { %1773 = vst.msk [vmem:[#allocation3] sm:$0xff] %vm1772_vm8, %v6909_v35  ;;  %v1668_v36 = vpop.permute.xlu2 %1667  ;;  %s5507_s14 = sshra.s32 %s4817_s23, 4  ;;  %s5508_s14 = int_to_ptr.hbm [resolvable:$true] %s5507_s14 }
 0x330   : > { %1930 = vst.msk [vmem:[#allocation3 + $0xa0] sm:$0xff] %vm1600_vm4, %v1913_v62  ;;  %p5514_p0 = scmp.lt.s32.totalorder %s5508_s14, %s9041_s7 }
 0x331   : > { %2208 = vst.msk [vmem:[#allocation3 + $0xf0] sm:$0xff] %vm1557_vm3, %v2189_v57 }
 0x332   : > { %2250 = vst.msk [vmem:[#allocation3 + $0xf0] sm:$0xff] %vm1600_vm4, %v6707_v40 }
 0x333   : > { %2292 = vst.msk [vmem:[#allocation3 + $0xf0] sm:$0xff] %vm1643_vm5, %v6965_v11 }
 0x334   : > { %2334 = vst.msk [vmem:[#allocation3 + $0xf0] sm:$0xff] %vm1686_vm6, %v6742_v18  ;;  %2404 = vrot.lane.b32.xlu0 %v6684_v37, %s5561_s17  ;;  %2640 = vrot.lane.b32.xlu1 %v2623_v20, %s5562_s18  ;;  %v2626_v18 = vld [vmem:[#allocation2 + $0x81] sm:$0xff] }
 0x335   : > { %2002 = vrot.lane.b32.xlu2 %v6680_v56, %s5562_s18  ;;  %v9152_v20 = vld [vmem:[#allocation31_spill] sm:$0xff] }
 0x336   : > { %v2760_v49 = vld [vmem:[#allocation3] sm:$0xff]  ;;  %v7272_v35 = vpop.permute.xlu0 %2512  ;;  %v2355_v51 = vpop.permute.xlu1 %2354 }
 0x337   : > { %2938 = vmatmul.f32.vlgmr.msrb.gmra.mxu1 %v2760_v49  ;;  %v1951_v40 = vpop.permute.xlu2 %1950  ;;  %v9153_v49 = vld [vmem:[#allocation21_spill] sm:$0xff] }
 0x338   : > { %1970 = vst.msk [vmem:[#allocation3 + $0x80] sm:$0xff] %vm1643_vm5, %v1951_v40  ;;  %v9156_v40 = vld [vmem:[#allocation46_spill] sm:$0xff] }
 0x339   : > { %2012 = vst.msk [vmem:[#allocation3 + $0x80] sm:$0xff] %vm1686_vm6, %v7151_v17 }
 0x33a   : > { %2054 = vst.msk [vmem:[#allocation3 + $0x80] sm:$0xff] %vm1729_vm7, %v6954_v39 }
 0x33b   : > { %2096 = vst.msk [vmem:[#allocation3 + $0x80] sm:$0xff] %vm1772_vm8, %v6666_v3  ;;  %v2622_v3 = vld [vmem:[#allocation2 + $0x61] sm:$0xff] }
 0x33c   : > { %2518 = vrot.lane.b32.xlu0 %v6678_v59, %s9142_s29  ;;  %2646 = vrot.lane.b32.xlu1 %v2626_v18, %s5562_s18  ;;  %v2624_v59 = vld [vmem:[#allocation2 + $0x71] sm:$0xff]  ;;  %s5509_s29 = scalar_lea.hbm %s5508_s14, 1 }
 0x33d   : > { %2156 = vrot.lane.b32.xlu2 %v6696_v45, %s5559_s8  ;;  %p5510_p11 = scmp.ne.s32.totalorder %s5508_s14, %s5509_s29 }
 0x33e   : > { %v1582_v56 = vpop.permute.xlu0 %1581  ;;  %v2469_v11 = vpop.permute.xlu1 %2468 }
 0x33f   : > { %1602 = vst.msk [vmem:[#allocation3 + $0x10] sm:$0xff] %vm1600_vm4, %v1582_v56  ;;  %v7287_v17 = vpop.permute.xlu2 %2402  ;;  %p5511_p12 = pnand %p5510_p11, %p5675_p5 }
 0x340   : > { %1645 = vst.msk [vmem:[#allocation3 + $0x10] sm:$0xff] %vm1643_vm5, %v7109_v21 }
 0x341   : > { %1688 = vst.msk [vmem:[#allocation3 + $0x10] sm:$0xff] %vm1686_vm6, %v1668_v36  ;;  %p5512_p13 = pneg %p5511_p12 }
 0x342   : > { %1731 = vst.msk [vmem:[#allocation3 + $0x10] sm:$0xff] %vm1729_vm7, %v6758_v10 }
 0x343   : > { %1774 = vst.msk [vmem:[#allocation3 + $0x10] sm:$0xff] %vm1772_vm8, %v6934_v1 }
 0x344   : > { %2488 = vst.msk [vmem:[#allocation3 + $0x160] sm:$0xff] %vm1514_vm11, %v2469_v11  ;;  %2638 = vrot.lane.b32.xlu0 %v2622_v3, %s5562_s18  ;;  %2680 = vrot.lane.b32.xlu1 %v6725_v16, %s5560_s9  ;;  %v9157_v11 = vld [vmem:[#allocation32_spill] sm:$0xff]  ;;  %v9158_v3 = vld [vmem:[#allocation43_spill] sm:$0xff] }
 0x345   : > { %2530 = vst.msk [vmem:[#allocation3 + $0x160] sm:$0xff] %vm1557_vm3, %v7154_v50  ;;  %2642 = vrot.lane.b32.xlu2 %v2624_v59, %s5562_s18  ;;  %v9147_v50 = vld [vmem:[#allocation13_spill] sm:$0xff] }
 0x346   : > { %2572 = vst.msk [vmem:[#allocation3 + $0x160] sm:$0xff] %vm1600_vm4, %v6977_v24  ;;  %v2187_v10 = vpop.permute.xlu0 %2186  ;;  %v1631_v39 = vpop.permute.xlu1 %1630  ;;  %v2625_v24 = vld [vmem:[#allocation2 + $0x79] sm:$0xff] }
 0x347   : > { %2614 = vst.msk [vmem:[#allocation3 + $0x160] sm:$0xff] %vm1643_vm5, %v6760_v54  ;;  %v7307_v1 = vpop.permute.xlu2 %2516 }
 0x348   : > { %2656 = vst.msk [vmem:[#allocation3 + $0x160] sm:$0xff] %vm1686_vm6, %v6913_v15 }
 0x349   : > { %2207 = vst.msk [vmem:[#allocation3 + $0xe0] sm:$0xff] %vm1557_vm3, %v2187_v10  ;;  %v9159_v10 = vld [vmem:[#allocation20_spill] sm:$0xff] }
 0x34a   : > { %2249 = vst.msk [vmem:[#allocation3 + $0xe0] sm:$0xff] %vm1600_vm4, %v6701_v44  ;;  %v2762_v16 = vld [vmem:[#allocation3 + $0x10] sm:$0xff] }
 0x34b   : > { %2291 = vst.msk [vmem:[#allocation3 + $0xe0] sm:$0xff] %vm1643_vm5, %v6890_v31  ;;  %2941 = vmatmul.f32.gmra.mxu1 %v2762_v16 }
 0x34c   : > { %2333 = vst.msk [vmem:[#allocation3 + $0xe0] sm:$0xff] %vm1686_vm6, %v6656_v29  ;;  %2644 = vrot.lane.b32.xlu0 %v2625_v24, %s5562_s18  ;;  %2686 = vrot.lane.b32.xlu1 %v6696_v45, %s5560_s9  ;;  %v9161_v24 = vld [vmem:[#allocation29_spill] sm:$0xff] }
 0x34d   : > { %2375 = vst.msk [vmem:[#allocation3 + $0xe0] sm:$0xff] %vm1729_vm7, %v2355_v51  ;;  %2676 = vrot.lane.b32.xlu2 %v6588_v33, %s5560_s9  ;;  %v2705_v33 = vld [vmem:[#allocation2 + $0xa1] sm:$0xff] }
 0x34e   : > { %2417 = vst.msk [vmem:[#allocation3 + $0xe0] sm:$0xff] %vm1772_vm8, %v7126_v19  ;;  %v2467_v44 = vpop.permute.xlu0 %2466  ;;  %v1915_v54 = vpop.permute.xlu1 %1914  ;;  %v9155_v51 = vld [vmem:[#allocation10_spill] sm:$0xff] }
 0x34f   : > { %2487 = vst.msk [vmem:[#allocation3 + $0x150] sm:$0xff] %vm1514_vm11, %v2467_v44  ;;  %v1586_v31 = vpop.permute.xlu2 %1585 }
 0x350   : > { %2529 = vst.msk [vmem:[#allocation3 + $0x150] sm:$0xff] %vm1557_vm3, %v7077_v53  ;;  %v2706_v53 = vld [vmem:[#allocation2 + $0xa9] sm:$0xff] }
 0x351   : > { %2571 = vst.msk [vmem:[#allocation3 + $0x150] sm:$0xff] %vm1600_vm4, %v6899_v28  ;;  %v2668_v28 = vld [vmem:[#allocation2 + $0x110] sm:$0xff] }
 0x352   : > { %2613 = vst.msk [vmem:[#allocation3 + $0x150] sm:$0xff] %vm1643_vm5, %v6699_v42 }
 0x353   : > { %1931 = vst.msk [vmem:[#allocation3 + $0xb0] sm:$0xff] %vm1600_vm4, %v1915_v54  ;;  %v9162_v54 = vld [vmem:[#allocation23_spill] sm:$0xff] }
 0x354   : > { %2655 = vst.msk [vmem:[#allocation3 + $0x150] sm:$0xff] %vm1686_vm6, %v6967_v2  ;;  %2678 = vrot.lane.b32.xlu0 %v6594_v4, %s5560_s9  ;;  %2720 = vrot.lane.b32.xlu1 %v2705_v33, %s5561_s17  ;;  %v2708_v4 = vld [vmem:[#allocation2 + $0xb9] sm:$0xff] }
 0x355   : > { %1604 = vst.msk [vmem:[#allocation3 + $0x30] sm:$0xff] %vm1600_vm4, %v1586_v31  ;;  %2682 = vrot.lane.b32.xlu2 %v6721_v55, %s5560_s9  ;;  %v9163_v31 = vld [vmem:[#allocation42_spill] sm:$0xff]  ;;  %v9164_v33 = vld [vmem:[#allocation9_spill] sm:$0xff] }
 0x356   : > { %1647 = vst.msk [vmem:[#allocation3 + $0x30] sm:$0xff] %vm1643_vm5, %v7236_v23  ;;  %v1999_v29 = vpop.permute.xlu0 %1998  ;;  %v1584_v45 = vpop.permute.xlu1 %1583  ;;  %v9150_v23 = vld [vmem:[#allocation8_spill] sm:$0xff] }
 0x357   : > { %1603 = vst.msk [vmem:[#allocation3 + $0x20] sm:$0xff] %vm1600_vm4, %v1584_v45  ;;  %v1674_v42 = vpop.permute.xlu2 %1673  ;;  %v9167_v45 = vld [vmem:[#allocation36_spill] sm:$0xff] }
 0x358   : > { %1646 = vst.msk [vmem:[#allocation3 + $0x20] sm:$0xff] %vm1643_vm5, %v7101_v38 }
 0x35c   : > { %2684 = vrot.lane.b32.xlu0 %v6684_v37, %s5560_s9  ;;  %2726 = vrot.lane.b32.xlu1 %v2708_v4, %s5561_s17  ;;  %v2704_v37 = vld [vmem:[#allocation2 + $0x99] sm:$0xff] }
 0x35d   : > { %2688 = vrot.lane.b32.xlu2 %v2668_v28, %s5560_s9  ;;  %v9168_v4 = vld [vmem:[#allocation18_spill] sm:$0xff]  ;;  %s5513_s9 = scalar_lea.hbm %s9041_s7, 2 }
 0x35e   : > { %v2153_v55 = vpop.permute.xlu0 %2152  ;;  %v1672_v15 = vpop.permute.xlu1 %1671  ;;  %p5515_p1 = scmp.lt.s32.totalorder %s5513_s9, %s5509_s29 }
 0x35f   : > { %2169 = vst.msk [vmem:[#allocation3 + $0x120] sm:$0xff] %vm1514_vm11, %v2153_v55  ;;  %v1957_v2 = vpop.permute.xlu2 %1956 }
 0x360   : > { %1690 = vst.msk [vmem:[#allocation3 + $0x30] sm:$0xff] %vm1686_vm6, %v1672_v15  ;;  %v9169_v15 = vld [vmem:[#allocation48_spill] sm:$0xff]  ;;  %p5516_p2 = por %p5515_p1, %p5514_p0 }
 0x361   : > { %1733 = vst.msk [vmem:[#allocation3 + $0x30] sm:$0xff] %vm1729_vm7, %v6787_v22 }
 0x362   : > { %1776 = vst.msk [vmem:[#allocation3 + $0x30] sm:$0xff] %vm1772_vm8, %v7013_v7  ;;  %p5517_p3 = pnand %p5516_p2, %p5512_p13 }
 0x363   : > { %1973 = vst.msk [vmem:[#allocation3 + $0xb0] sm:$0xff] %vm1643_vm5, %v1957_v2  ;;  %v9170_v2 = vld [vmem:[#allocation38_spill] sm:$0xff] }
 0x364   : > { %2015 = vst.msk [vmem:[#allocation3 + $0xb0] sm:$0xff] %vm1686_vm6, %v1999_v29  ;;  %2718 = vrot.lane.b32.xlu0 %v2704_v37, %s5561_s17  ;;  %v9166_v29 = vld [vmem:[#allocation39_spill] sm:$0xff]  ;;  %v9171_v37 = vld [vmem:[#allocation25_spill] sm:$0xff] }
 0x365   : > { %2057 = vst.msk [vmem:[#allocation3 + $0xb0] sm:$0xff] %vm1729_vm7, %v7065_v30  ;;  %2722 = vrot.lane.b32.xlu2 %v2706_v53, %s5561_s17  ;;  %v2707_v30 = vld [vmem:[#allocation2 + $0xb1] sm:$0xff] }
 0x366   : > { %2099 = vst.msk [vmem:[#allocation3 + $0xb0] sm:$0xff] %vm1772_vm8, %v6811_v26  ;;  %v1588_v22 = vpop.permute.xlu0 %1587  ;;  %v1955_v21 = vpop.permute.xlu1 %1954  ;;  %v2709_v26 = vld [vmem:[#allocation2 + $0xc1] sm:$0xff]  ;;  %v9172_v53 = vld [vmem:[#allocation45_spill] sm:$0xff] }
 0x367   : > { %1605 = vst.msk [vmem:[#allocation3 + $0x40] sm:$0xff] %vm1600_vm4, %v1588_v22  ;;  %v2191_v7 = vpop.permute.xlu2 %2190  ;;  %v9173_v22 = vld [vmem:[#allocation26_spill] sm:$0xff] }
 0x368   : > { %1648 = vst.msk [vmem:[#allocation3 + $0x40] sm:$0xff] %vm1643_vm5, %v1631_v39  ;;  %v9160_v39 = vld [vmem:[#allocation35_spill] sm:$0xff] }
 0x369   : > { %1691 = vst.msk [vmem:[#allocation3 + $0x40] sm:$0xff] %vm1686_vm6, %v1674_v42 }
 0x36a   : > { %1734 = vst.msk [vmem:[#allocation3 + $0x40] sm:$0xff] %vm1729_vm7, %v6844_v27 }
 0x36b   : > { %1777 = vst.msk [vmem:[#allocation3 + $0x40] sm:$0xff] %vm1772_vm8, %v7045_v61 }
 0x36c   : > { %1972 = vst.msk [vmem:[#allocation3 + $0xa0] sm:$0xff] %vm1643_vm5, %v1955_v21  ;;  %2724 = vrot.lane.b32.xlu0 %v2707_v30, %s5561_s17  ;;  %v9174_v30 = vld [vmem:[#allocation7_spill] sm:$0xff] }
 0x36d   : > { %2014 = vst.msk [vmem:[#allocation3 + $0xa0] sm:$0xff] %vm1686_vm6, %v7216_v5  ;;  %2728 = vrot.lane.b32.xlu2 %v2709_v26, %s5561_s17 }
 0x36e   : > { %2056 = vst.msk [vmem:[#allocation3 + $0xa0] sm:$0xff] %vm1729_vm7, %v7029_v14  ;;  %v1670_v38 = vpop.permute.xlu0 %1669  ;;  %v2195_v19 = vpop.permute.xlu1 %2194 }
 0x36f   : > { %2098 = vst.msk [vmem:[#allocation3 + $0xa0] sm:$0xff] %vm1772_vm8, %v6809_v25  ;;  %v2357_v27 = vpop.permute.xlu2 %2356 }
 0x370   : > { %2209 = vst.msk [vmem:[#allocation3 + $0x100] sm:$0xff] %vm1557_vm3, %v2191_v7 }
 0x371   : > { %2251 = vst.msk [vmem:[#allocation3 + $0x100] sm:$0xff] %vm1600_vm4, %v6796_v8 }
 0x372   : > { %2293 = vst.msk [vmem:[#allocation3 + $0x100] sm:$0xff] %vm1643_vm5, %v6991_v48  ;;  %v2768_v63 = vld [vmem:[#allocation3 + $0x40] sm:$0xff] }
 0x373   : > { %2335 = vst.msk [vmem:[#allocation3 + $0x100] sm:$0xff] %vm1686_vm6, %v6746_v32  ;;  %v9143_v32 = vld [vmem:[#allocation30_spill] sm:$0xff] }
 0x374   : > { %1689 = vst.msk [vmem:[#allocation3 + $0x20] sm:$0xff] %vm1686_vm6, %v1670_v38 }
 0x375   : > { %1732 = vst.msk [vmem:[#allocation3 + $0x20] sm:$0xff] %vm1729_vm7, %v6785_v41 }
 0x376   : > { %1775 = vst.msk [vmem:[#allocation3 + $0x20] sm:$0xff] %vm1772_vm8, %v6922_v43  ;;  %v1953_v25 = vpop.permute.xlu0 %1952  ;;  %v2361_v14 = vpop.permute.xlu1 %2360  ;;  %v9144_v43 = vld [vmem:[#allocation28_spill] sm:$0xff] }
 0x377   : > { %2211 = vst.msk [vmem:[#allocation3 + $0x120] sm:$0xff] %vm1557_vm3, %v2195_v19  ;;  %v2471_v61 = vpop.permute.xlu2 %2470  ;;  %v9175_v19 = vld [vmem:[#allocation16_spill] sm:$0xff] }
 0x378   : > { %2253 = vst.msk [vmem:[#allocation3 + $0x120] sm:$0xff] %vm1600_vm4, %v6824_v6 }
 0x379   : > { %2295 = vst.msk [vmem:[#allocation3 + $0x120] sm:$0xff] %vm1643_vm5, %v7075_v34  ;;  %v9146_v34 = vld [vmem:[#allocation33_spill] sm:$0xff] }
 0x37a   : > { %2337 = vst.msk [vmem:[#allocation3 + $0x120] sm:$0xff] %vm1686_vm6, %v6834_v0  ;;  %v9145_v0 = vld [vmem:[#allocation12_spill] sm:$0xff] }
 0x37b   : > { %2376 = vst.msk [vmem:[#allocation3 + $0xf0] sm:$0xff] %vm1729_vm7, %v2357_v27  ;;  %v9176_v27 = vld [vmem:[#allocation37_spill] sm:$0xff] }
 0x37c   : > { %2418 = vst.msk [vmem:[#allocation3 + $0xf0] sm:$0xff] %vm1772_vm8, %v7185_v47  ;;  %v2766_v47 = vld [vmem:[#allocation3 + $0x30] sm:$0xff] }
 0x37d   : > { %2379 = vst.msk [vmem:[#allocation3 + $0x120] sm:$0xff] %vm1729_vm7, %v9143_v32  ;;  %v2764_v41 = vld [vmem:[#allocation3 + $0x20] sm:$0xff] }
 0x37e   : > { %1971 = vst.msk [vmem:[#allocation3 + $0x90] sm:$0xff] %vm1643_vm5, %v1953_v25  ;;  %2944 = vmatmul.f32.gmra.mxu1 %v2764_v41  ;;  %v2193_v8 = vpop.permute.xlu0 %2192  ;;  %v2475_v48 = vpop.permute.xlu1 %2474  ;;  %v9177_v25 = vld [vmem:[#allocation24_spill] sm:$0xff]  ;;  %v9178_v32 = vld [vmem:[#allocation47_spill] sm:$0xff] }
 0x37f   : > { %2013 = vst.msk [vmem:[#allocation3 + $0x90] sm:$0xff] %vm1686_vm6, %v7174_v46  ;;  %v1633_v6 = vpop.permute.xlu2 %1632  ;;  %v2774_v41 = vld [vmem:[#allocation3 + $0x70] sm:$0xff] }
 0x380   : > { %2055 = vst.msk [vmem:[#allocation3 + $0x90] sm:$0xff] %vm1729_vm7, %v9144_v43 }
 0x381   : > { %2097 = vst.msk [vmem:[#allocation3 + $0x90] sm:$0xff] %vm1772_vm8, %v9145_v0 }
 0x382   : > { %2489 = vst.msk [vmem:[#allocation3 + $0x170] sm:$0xff] %vm1514_vm11, %v2471_v61 }
 0x383   : > { %2531 = vst.msk [vmem:[#allocation3 + $0x170] sm:$0xff] %vm1557_vm3, %v7272_v35  ;;  %v9154_v35 = vld [vmem:[#allocation40_spill] sm:$0xff] }
 0x384   : > { %2573 = vst.msk [vmem:[#allocation3 + $0x170] sm:$0xff] %vm1600_vm4, %v9146_v34  ;;  %v9181_v34 = vld [vmem:[#allocation15_spill] sm:$0xff] }
 0x385   : > { %2615 = vst.msk [vmem:[#allocation3 + $0x170] sm:$0xff] %vm1643_vm5, %v9147_v50  ;;  %v2776_v50 = vld [vmem:[#allocation3 + $0x80] sm:$0xff] }
 0x386   : > { %2210 = vst.msk [vmem:[#allocation3 + $0x110] sm:$0xff] %vm1557_vm3, %v2193_v8  ;;  %2947 = vmatmul.f32.gmra.mxu1 %v2766_v47  ;;  %v2359_v46 = vpop.permute.xlu0 %2358  ;;  %v2001_v52 = vpop.permute.xlu1 %2000 }
 0x387   : > { %2252 = vst.msk [vmem:[#allocation3 + $0x110] sm:$0xff] %vm1600_vm4, %v9148_v60  ;;  %v1917_v5 = vpop.permute.xlu2 %1916 }
 0x388   : > { %2294 = vst.msk [vmem:[#allocation3 + $0x110] sm:$0xff] %vm1643_vm5, %v9149_v12  ;;  %v2778_v60 = vld [vmem:[#allocation3 + $0x90] sm:$0xff] }
 0x389   : > { %2336 = vst.msk [vmem:[#allocation3 + $0x110] sm:$0xff] %vm1686_vm6, %v9150_v23 }
 0x38a   : > { %2378 = vst.msk [vmem:[#allocation3 + $0x110] sm:$0xff] %vm1729_vm7, %v2361_v14 }
 0x38b   : > { %2420 = vst.msk [vmem:[#allocation3 + $0x110] sm:$0xff] %vm1772_vm8, %v7287_v17 }
 0x38c   : > { %2491 = vst.msk [vmem:[#allocation3 + $0x190] sm:$0xff] %vm1514_vm11, %v2475_v48  ;;  %v9179_v48 = vld [vmem:[#allocation27_spill] sm:$0xff] }
 0x38d   : > { %2533 = vst.msk [vmem:[#allocation3 + $0x190] sm:$0xff] %vm1557_vm3, %v7307_v1 }
 0x38e   : > { %2575 = vst.msk [vmem:[#allocation3 + $0x190] sm:$0xff] %vm1600_vm4, %v9151_v9  ;;  %2950 = vmatmul.f32.gmra.mxu1 %v2768_v63  ;;  %v2473_v62 = vpop.permute.xlu0 %2472  ;;  %v2155_v57 = vpop.permute.xlu1 %2154  ;;  %v2780_v63 = vld [vmem:[#allocation3 + $0xa0] sm:$0xff] }
 0x38f   : > { %1649 = vst.msk [vmem:[#allocation3 + $0x50] sm:$0xff] %vm1643_vm5, %v1633_v6  ;;  %v2003_v36 = vpop.permute.xlu2 %2002  ;;  %v2710_v6 = vld [vmem:[#allocation2 + $0xc9] sm:$0xff] }
 0x390   : > { %1692 = vst.msk [vmem:[#allocation3 + $0x50] sm:$0xff] %vm1686_vm6, %v9152_v20  ;;  %2730 = vrot.lane.b32.xlu0 %v2710_v6, %s5561_s17  ;;  %v7531_v20 = vpop.f32.mrf.mxu2  ;;  %s269_s17 = sand.u32 1, %s5547_s25  }
 0x391   : > { %1735 = vst.msk [vmem:[#allocation3 + $0x50] sm:$0xff] %vm1729_vm7, %v9153_v49  ;;  %s270_s21 = scalar_lea.vmem [#allocation4], %s269_s17  ;;  %s4804_s13 = scalar_lea.sflag [#allocation5], %s269_s17 }
 0x392   : > { %1778 = vst.msk [vmem:[#allocation3 + $0x50] sm:$0xff] %vm1772_vm8, %v9154_v35  ;;  %v2788_v35 = vld [vmem:[#allocation3 + $0xe0] sm:$0xff]  ;;  %s4814_s22 = sshll.u32 %s270_s21, 4  ;;  %s4815_s22 = int_to_ptr.vmem [resolvable:$true] %s4814_s22 }
 0x393   : > { %2617 = vst.msk [vmem:[#allocation3 + $0x190] sm:$0xff] %vm1643_vm5, %v9155_v51 }
 0x394   : > { %2377 = vst.msk [vmem:[#allocation3 + $0x100] sm:$0xff] %vm1729_vm7, %v2359_v46 }
 0x395   : > { %2419 = vst.msk [vmem:[#allocation3 + $0x100] sm:$0xff] %vm1772_vm8, %v9156_v40 }
 0x396   : > { %1932 = vst.msk [vmem:[#allocation3 + $0xc0] sm:$0xff] %vm1600_vm4, %v1917_v5  ;;  %v1635_v18 = vpop.permute.xlu0 %1634  ;;  %v2407_v56 = vpop.permute.xlu1 %2406 }
 0x397   : > { %1974 = vst.msk [vmem:[#allocation3 + $0xc0] sm:$0xff] %vm1643_vm5, %v9157_v11  ;;  %v2157_v17 = vpop.permute.xlu2 %2156 }
 0x398   : > { %2016 = vst.msk [vmem:[#allocation3 + $0xc0] sm:$0xff] %vm1686_vm6, %v2001_v52  ;;  %v3052_v51 = vpop.f32.mrf.mxu2 }
 0x399   : > { %2058 = vst.msk [vmem:[#allocation3 + $0xc0] sm:$0xff] %vm1729_vm7, %v9158_v3  ;;  %v2770_v59 = vld [vmem:[#allocation3 + $0x50] sm:$0xff] }
 0x39a   : > { %2100 = vst.msk [vmem:[#allocation3 + $0xc0] sm:$0xff] %vm1772_vm8, %v9159_v10  ;;  %2953 = vmatmul.f32.gmra.mxu1 %v2770_v59  ;;  %v2794_v10 = vld [vmem:[#allocation3 + $0x110] sm:$0xff] }
 0x39b   : > { %2490 = vst.msk [vmem:[#allocation3 + $0x180] sm:$0xff] %vm1514_vm11, %v2473_v62  ;;  %v2782_v62 = vld [vmem:[#allocation3 + $0xb0] sm:$0xff] }
 0x39c   : > { %2532 = vst.msk [vmem:[#allocation3 + $0x180] sm:$0xff] %vm1557_vm3, %v7211_v13  ;;  %v9165_v13 = vld [vmem:[#allocation14_spill] sm:$0xff] }
 0x39d   : > { %2574 = vst.msk [vmem:[#allocation3 + $0x180] sm:$0xff] %vm1600_vm4, %v9160_v39 }
 0x39e   : > { %2170 = vst.msk [vmem:[#allocation3 + $0x130] sm:$0xff] %vm1514_vm11, %v2155_v57  ;;  %v1919_v1 = vpop.permute.xlu0 %1918  ;;  %v2521_v16 = vpop.permute.xlu1 %2520 }
 0x39f   : > { %2212 = vst.msk [vmem:[#allocation3 + $0x130] sm:$0xff] %vm1557_vm3, %v9161_v24  ;;  %v2643_v44 = vpop.permute.xlu2 %2642 }
 0x3a0   : > { %2254 = vst.msk [vmem:[#allocation3 + $0x130] sm:$0xff] %vm1600_vm4, %v9162_v54 }
 0x3a1   : > { %2296 = vst.msk [vmem:[#allocation3 + $0x130] sm:$0xff] %vm1643_vm5, %v9163_v31 }
 0x3a2   : > { %2616 = vst.msk [vmem:[#allocation3 + $0x180] sm:$0xff] %vm1643_vm5, %v9164_v33 }
 0x3a3   : > { %2338 = vst.msk [vmem:[#allocation3 + $0x130] sm:$0xff] %vm1686_vm6, %v9165_v13 }
 0x3a4   : > { %2380 = vst.msk [vmem:[#allocation3 + $0x130] sm:$0xff] %vm1729_vm7, %v9166_v29 }
 0x3a5   : > { %1650 = vst.msk [vmem:[#allocation3 + $0x60] sm:$0xff] %vm1643_vm5, %v1635_v18  ;;  %v2790_v18 = vld [vmem:[#allocation3 + $0xf0] sm:$0xff] }
 0x3a6   : > { %1693 = vst.msk [vmem:[#allocation3 + $0x60] sm:$0xff] %vm1686_vm6, %v9167_v45  ;;  %v2405_v42 = vpop.permute.xlu0 %2404  ;;  %v2641_v28 = vpop.permute.xlu1 %2640 }
 0x3a7   : > { %1736 = vst.msk [vmem:[#allocation3 + $0x60] sm:$0xff] %vm1729_vm7, %v9168_v4  ;;  %v2677_v55 = vpop.permute.xlu2 %2676 }
 0x3a8   : > { %1779 = vst.msk [vmem:[#allocation3 + $0x60] sm:$0xff] %vm1772_vm8, %v9169_v15 }
 0x3a9   : > { %2422 = vst.msk [vmem:[#allocation3 + $0x130] sm:$0xff] %vm1772_vm8, %v2407_v56  ;;  %v3055_v56 = vpop.f32.mrf.mxu2 }
 0x3aa   : > { %2171 = vst.msk [vmem:[#allocation3 + $0x140] sm:$0xff] %vm1514_vm11, %v2157_v17  ;;  %v2792_v17 = vld [vmem:[#allocation3 + $0x100] sm:$0xff] }
 0x3ab   : > { %2213 = vst.msk [vmem:[#allocation3 + $0x140] sm:$0xff] %vm1557_vm3, %v9170_v2 }
 0x3ac   : > { %2255 = vst.msk [vmem:[#allocation3 + $0x140] sm:$0xff] %vm1600_vm4, %v9171_v37 }
 0x3ad   : > { %2297 = vst.msk [vmem:[#allocation3 + $0x140] sm:$0xff] %vm1643_vm5, %v9172_v53 }
 0x3ae   : > { %2339 = vst.msk [vmem:[#allocation3 + $0x140] sm:$0xff] %vm1686_vm6, %v9173_v22  ;;  %v2519_v21 = vpop.permute.xlu0 %2518  ;;  %v2647_v7 = vpop.permute.xlu1 %2646 }
 0x3af   : > { %2381 = vst.msk [vmem:[#allocation3 + $0x140] sm:$0xff] %vm1729_vm7, %v9174_v30  ;;  %v2772_v26 = vld [vmem:[#allocation3 + $0x60] sm:$0xff]  ;;  %v2683_v38 = vpop.permute.xlu2 %2682 }
 0x3b0   : > { %2423 = vst.msk [vmem:[#allocation3 + $0x140] sm:$0xff] %vm1772_vm8, %v9175_v19  ;;  %2956 = vmatmul.f32.gmra.mxu1 %v2772_v26  ;;  %v2798_v24 = vld [vmem:[#allocation3 + $0x130] sm:$0xff] }
 0x3b1   : > { %1933 = vst.msk [vmem:[#allocation3 + $0xd0] sm:$0xff] %vm1600_vm4, %v1919_v1  ;;  %v7537_v3 = vpop.f32.mrf.mxu2 }
 0x3b2   : > { %1975 = vst.msk [vmem:[#allocation3 + $0xd0] sm:$0xff] %vm1643_vm5, %v9176_v27 }
 0x3b3   : > { %2017 = vst.msk [vmem:[#allocation3 + $0xd0] sm:$0xff] %vm1686_vm6, %v2003_v36  ;;  %v2784_v36 = vld [vmem:[#allocation3 + $0xc0] sm:$0xff] }
 0x3b4   : > { %2059 = vst.msk [vmem:[#allocation3 + $0xd0] sm:$0xff] %vm1729_vm7, %v7227_v58  ;;  %v9180_v58 = vld [vmem:[#allocation44_spill] sm:$0xff]  ;;  %v7533_v40 = vpop.f32.mrf.mxu1 }
 0x3b5   : > { %2101 = vst.msk [vmem:[#allocation3 + $0xd0] sm:$0xff] %vm1772_vm8, %v9177_v25  ;;  %v7565_v25 = vld [vmem:[%s9038_s4] ss:$0 sm:$0xff] }
 0x3b6   : > { %2535 = vst.msk [vmem:[#allocation3 + $0x1b0] sm:$0xff] %vm1557_vm3, %v2521_v16  ;;  %v2639_v14 = vpop.permute.xlu0 %2638  ;;  %v2681_v61 = vpop.permute.xlu1 %2680 }
 0x3b7   : > { %2577 = vst.msk [vmem:[#allocation3 + $0x1b0] sm:$0xff] %vm1600_vm4, %v9178_v32  ;;  %v2689_v8 = vpop.permute.xlu2 %2688  ;;  %v2800_v31 = vld [vmem:[#allocation3 + $0x140] sm:$0xff] }
 0x3b8   : > { %2619 = vst.msk [vmem:[#allocation3 + $0x1b0] sm:$0xff] %vm1643_vm5, %v9179_v48  ;;  %2959 = vmatmul.f32.gmra.mxu1 %v2774_v41 }
 0x3b9   : > { %2659 = vst.msk [vmem:[#allocation3 + $0x190] sm:$0xff] %vm1686_vm6, %v2643_v44  ;;  %v7541_v39 = vpop.f32.mrf.mxu2 }
 0x3ba   : > { %2421 = vst.msk [vmem:[#allocation3 + $0x120] sm:$0xff] %vm1772_vm8, %v2405_v42 }
 0x3bb   : > { %2658 = vst.msk [vmem:[#allocation3 + $0x180] sm:$0xff] %vm1686_vm6, %v2641_v28 }
 0x3bc   : > { %2697 = vst.msk [vmem:[#allocation3 + $0x150] sm:$0xff] %vm1729_vm7, %v2677_v55  ;;  %v2786_v49 = vld [vmem:[#allocation3 + $0xd0] sm:$0xff] }
 0x3bd   : > { %2534 = vst.msk [vmem:[#allocation3 + $0x1a0] sm:$0xff] %vm1557_vm3, %v2519_v21  ;;  %v2752_v55 = vld [vmem:[#allocation2 + $0x111] sm:$0xff] }
 0x3be   : > { %2576 = vst.msk [vmem:[#allocation3 + $0x1a0] sm:$0xff] %vm1600_vm4, %v9180_v58  ;;  %v2645_v43 = vpop.permute.xlu0 %2644  ;;  %v2687_v0 = vpop.permute.xlu1 %2686 }
 0x3bf   : > { %2618 = vst.msk [vmem:[#allocation3 + $0x1a0] sm:$0xff] %vm1643_vm5, %v9181_v34  ;;  %v2723_v47 = vpop.permute.xlu2 %2722 }
 0x3c0   : > { %2661 = vst.msk [vmem:[#allocation3 + $0x1b0] sm:$0xff] %vm1686_vm6, %v2647_v7  ;;  %2962 = vmatmul.f32.gmra.mxu1 %v2776_v50 }
 0x3c1   : > { %2700 = vst.msk [vmem:[#allocation3 + $0x180] sm:$0xff] %vm1729_vm7, %v2683_v38  ;;  %v2796_v1 = vld [vmem:[#allocation3 + $0x120] sm:$0xff]  ;;  %v7545_v44 = vpop.f32.mrf.mxu2 }
 0x3c2   : > { %2657 = vst.msk [vmem:[#allocation3 + $0x170] sm:$0xff] %vm1686_vm6, %v2639_v14 }
 0x3c3   : > { %2699 = vst.msk [vmem:[#allocation3 + $0x170] sm:$0xff] %vm1729_vm7, %v2681_v61 }
 0x3c4   : > { %2703 = vst.msk [vmem:[#allocation3 + $0x1b0] sm:$0xff] %vm1729_vm7, %v2689_v8 }
 0x3c5   : > { %2660 = vst.msk [vmem:[#allocation3 + $0x1a0] sm:$0xff] %vm1686_vm6, %v2645_v43 }
 0x3c6   : > { %2702 = vst.msk [vmem:[#allocation3 + $0x1a0] sm:$0xff] %vm1729_vm7, %v2687_v0  ;;  %v2679_v46 = vpop.permute.xlu0 %2678  ;;  %v2721_v52 = vpop.permute.xlu1 %2720 }
 0x3c7   : > { %2741 = vst.msk [vmem:[#allocation3 + $0x170] sm:$0xff] %vm1772_vm8, %v2723_v47  ;;  %v2729_v5 = vpop.permute.xlu2 %2728 }
 0x3c8   : > { %2965 = vmatmul.f32.gmra.mxu1 %v2778_v60  ;;  %2698 = vst.msk [vmem:[#allocation3 + $0x160] sm:$0xff] %vm1729_vm7, %v2679_v46  ;;  %v7535_v11 = vpop.f32.mrf.mxu1 }
 0x3c9   : > { %2740 = vst.msk [vmem:[#allocation3 + $0x160] sm:$0xff] %vm1772_vm8, %v2721_v52  ;;  %v7547_v33 = vpop.f32.mrf.mxu2 }
 0x3ca   : > { %2744 = vst.msk [vmem:[#allocation3 + $0x1a0] sm:$0xff] %vm1772_vm8, %v2729_v5 }
 0x3cb   : > { %2759 = vst.msk [vmem:[#allocation3 + $0x1b8] sm:$0xff] %vm1362_vm2, %v2752_v55 }
 0x3ce   : > { %v2685_v12 = vpop.permute.xlu0 %2684  ;;  %v2727_v23 = vpop.permute.xlu1 %2726  ;;  %v2806_v37 = vld [vmem:[#allocation3 + $0x170] sm:$0xff] }
 0x3cf   : > { %2701 = vst.msk [vmem:[#allocation3 + $0x190] sm:$0xff] %vm1729_vm7, %v2685_v12 }
 0x3d0   : > { %2968 = vmatmul.f32.gmra.mxu1 %v2780_v63  ;;  %2743 = vst.msk [vmem:[#allocation3 + $0x190] sm:$0xff] %vm1772_vm8, %v2727_v23  ;;  %v2804_v28 = vld [vmem:[#allocation3 + $0x160] sm:$0xff] }
 0x3d1   : > { %v7549_v45 = vpop.f32.mrf.mxu2  ;;  %v2812_v27 = vld [vmem:[#allocation3 + $0x1a0] sm:$0xff] }
 0x3d2   : > { %v2815_v22 = vld [vmem:[#allocation3 + $0x1b8] sm:$0xff] }
 0x3d3   : > { %5002 = vmatmul.msk.f32.gmra.mxu2 %vm1362_vm2, %v2815_v22  ;;  %v2940_v22 = vadd.f32 %v7565_v25, %v7533_v40  ;;  %v2943_v40 = vadd.f32 %v7565_v25, %v7535_v11  ;;  %vm4779_vm2 = vcmask 80896  }
 0x3d6   : > { %v2719_v9 = vpop.permute.xlu0 %2718 }
 0x3d7   : > { %2739 = vst.msk [vmem:[#allocation3 + $0x150] sm:$0xff] %vm1772_vm8, %v2719_v9  ;;  %v2810_v26 = vld [vmem:[#allocation3 + $0x190] sm:$0xff] }
 0x3d8   : > { %2971 = vmatmul.f32.gmra.mxu1 %v2782_v62 }
 0x3d9   : > { %v3073_v2 = vpop.f32.mrf.mxu2 }
 0x3de   : > { %v2725_v57 = vpop.permute.xlu0 %2724  ;;  %v2802_v29 = vld [vmem:[#allocation3 + $0x150] sm:$0xff] }
 0x3df   : > { %2742 = vst.msk [vmem:[#allocation3 + $0x180] sm:$0xff] %vm1772_vm8, %v2725_v57 }
 0x3e0   : > { %2974 = vmatmul.f32.gmra.mxu1 %v2784_v36 }
 0x3e1   : > { %v3076_v7 = vpop.f32.mrf.mxu2 }
 0x3e6   : > { %v2808_v21 = vld [vmem:[#allocation3 + $0x180] sm:$0xff] }
 0x3e8   : > { %2977 = vmatmul.f32.gmra.mxu1 %v2786_v49 }
 0x3e9   : > { %v3079_v38 = vpop.f32.mrf.mxu2 }
 0x3f0   : > { %2980 = vmatmul.f32.gmra.mxu1 %v2788_v35 }
 0x3f1   : > { %v3082_v61 = vpop.f32.mrf.mxu2 }
 0x3f8   : > { %2983 = vmatmul.f32.gmra.mxu1 %v2790_v18 }
 0x3f9   : > { %v3085_v52 = vpop.f32.mrf.mxu2 }
 0x3fb   : > { %v7539_v59 = vpop.f32.mrf.mxu1 }
 0x400   : > { %2986 = vmatmul.f32.gmra.mxu1 %v2792_v17 }
 0x401   : > { %v7578_v49 = vpop.f32.mrf.mxu2 }
 0x402   : > { %v2731_v4 = vpop.permute.xlu0 %2730 }
 0x403   : > { %v7543_v16 = vpop.f32.mrf.mxu1  ;;  %2745 = vst.msk [vmem:[#allocation3 + $0x1b0] sm:$0xff] %vm1772_vm8, %v2731_v4  ;;  %v9074_v4 = vmov 0  }
 0x404   : > { %5308 = vset.pattern.permute.xlu1 %v9074_v4 }
 0x408   : > { %2989 = vmatmul.f32.gmra.mxu1 %v2794_v10 }
 0x409   : > { %v7582_v17 = vpop.f32.mrf.mxu2 }
 0x40a   : > { %v2814_v41 = vld [vmem:[#allocation3 + $0x1b0] sm:$0xff] }
 0x40b   : > { %v2951_v54 = vpop.f32.mrf.mxu1 }
 0x40c   : > { %v2952_v14 = vadd.f32 %v7565_v25, %v2951_v54 }
 0x40e   : > { %v3053_v8 = vadd.f32 %v3052_v51, %v2952_v14 }
 0x410   : > { %2992 = vmatmul.f32.gmra.mxu1 %v2796_v1  ;;  %v3128_v58 = vmax.f32 %v3053_v8, 0.0 }
 0x411   : > { %v7584_v1 = vpop.f32.mrf.mxu2 }
 0x417   : > { %v2954_v13 = vpop.f32.mrf.mxu1 }
 0x418   : > { %2995 = vmatmul.f32.gmra.mxu1 %v2798_v24  ;;  %v2955_v43 = vadd.f32 %v7565_v25, %v2954_v13 }
 0x41a   : > { %v3056_v47 = vadd.f32 %v3055_v56, %v2955_v43 }
 0x41c   : > { %v3129_v5 = vmax.f32 %v3056_v47, 0.0 }
 0x420   : > { %2998 = vmatmul.f32.gmra.mxu1 %v2800_v31  ;;  %v7588_v31 = vpop.f32.mrf.mxu2 }
 0x428   : > { %3001 = vmatmul.f32.gmra.mxu1 %v2802_v29  ;;  %v7592_v13 = vpop.f32.mrf.mxu2 }
 0x42d   : > { %v2957_v42 = vpop.f32.mrf.mxu1 }
 0x42e   : > { %v2958_v12 = vadd.f32 %v7565_v25, %v2957_v42  ;;  %v5565_v42 = vmov 2  }
 0x42f   : > { %5310 = vset.pattern.permute.xlu2 %v5565_v42 }
 0x430   : > { %3004 = vmatmul.f32.gmra.mxu1 %v2804_v28  ;;  %v3059_v62 = vadd.f32 %v7537_v3, %v2958_v12  ;;  %v9072_v28 = vmov 1   ;;  %v3103_v55 = vpop.f32.mrf.mxu2 }
 0x431   : > { %5309 = vset.pattern.permute.xlu0 %v9072_v28 }
 0x432   : > { %v3130_v35 = vmax.f32 %v3059_v62, 0.0 }
 0x435   : > { %v7551_v15 = vpop.f32.mrf.mxu1 }
 0x438   : > { %3007 = vmatmul.f32.gmra.mxu1 %v2806_v37  ;;  %v2961_v37 = vadd.f32 %v7565_v25, %v7551_v15 }
 0x43d   : > { %v7555_v53 = vpop.f32.mrf.mxu1 }
 0x440   : > { %3010 = vmatmul.f32.gmra.mxu1 %v2808_v21 }
 0x445   : > { %v7558_v30 = vpop.f32.mrf.mxu1 }
 0x446   : > { %v2967_v11 = vadd.f32 %v7565_v25, %v7558_v30  ;;  %v9184_v30 = vld [vmem:[#allocation22_spill] sm:$0xff] }
 0x448   : > { %3013 = vmatmul.f32.gmra.mxu1 %v2810_v26  ;;  %v3106_v26 = vpop.f32.mrf.mxu2 }
 0x44d   : > { %v7560_v19 = vpop.f32.mrf.mxu1 }
 0x450   : > { %3016 = vmatmul.f32.gmra.mxu1 %v2812_v27 }
 0x455   : > { %v2972_v32 = vpop.f32.mrf.mxu1 }
 0x456   : > { %v2973_v48 = vadd.f32 %v7565_v25, %v2972_v32 }
 0x458   : > { %v3074_v6 = vadd.f32 %v3073_v2, %v2973_v48  ;;  %3019 = vmatmul.f32.gmra.mxu1 %v2814_v41  ;;  %v2964_v48 = vadd.f32 %v7565_v25, %v7555_v53 }
 0x45a   : > { %v3135_v0 = vmax.f32 %v3074_v6, 0.0 }
 0x45c   : > { %v7570_v34 = vmax.f32 %v3128_v58, %v3135_v0 }
 0x45d   : > { %v2975_v50 = vpop.f32.mrf.mxu1 }
 0x45e   : > { %v2976_v46 = vadd.f32 %v7565_v25, %v2975_v50  ;;  %v3065_v50 = vadd.f32 %v7545_v44, %v2964_v48  ;;  %v2946_v44 = vadd.f32 %v7565_v25, %v7539_v59 }
 0x460   : > { %v3077_v60 = vadd.f32 %v3076_v7, %v2976_v46  ;;  %v3062_v7 = vadd.f32 %v7541_v39, %v2961_v37  ;;  %v9183_v46 = vld [vmem:[#allocation19_spill] sm:$0xff] }
 0x462   : > { %v3136_v23 = vmax.f32 %v3077_v60, 0.0  ;;  %v3131_v8 = vmax.f32 %v3062_v7, 0.0  ;;  %v3044_v60 = vadd.f32 %v9183_v46, %v2943_v40 }
 0x464   : > { %v7574_v63 = vmax.f32 %v3129_v5, %v3136_v23  ;;  %v3109_v23 = vpop.f32.mrf.mxu2 }
 0x465   : > { %v2978_v9 = vpop.f32.mrf.mxu1 }
 0x466   : > { %v2979_v57 = vadd.f32 %v7565_v25, %v2978_v9  ;;  %v3132_v9 = vmax.f32 %v3065_v50, 0.0  ;;  %v5571_v50 = vmov 8  }
 0x468   : > { %v3080_v36 = vadd.f32 %v3079_v38, %v2979_v57  ;;  %v9182_v38 = vld [vmem:[#allocation17_spill] sm:$0xff] }
 0x469   : > { %v3041_v27 = vadd.f32 %v9182_v38, %v2940_v22 }
 0x46a   : > { %v3137_v51 = vmax.f32 %v3080_v36, 0.0 }
 0x46b   : > { %v3124_v15 = vmax.f32 %v3041_v27, 0.0  ;;  %v9070_v27 = vmov 4  }
 0x46c   : > { %v7580_v18 = vmax.f32 %v3130_v35, %v3137_v51 }
 0x46d   : > { %v2981_v56 = vpop.f32.mrf.mxu1  ;;  %v3152_v0 = vmax.f32 %v3124_v15, %v3131_v8 }
 0x46e   : > { %v2982_v21 = vadd.f32 %v7565_v25, %v2981_v56  ;;  %v3068_v56 = vadd.f32 %v7547_v33, %v2967_v11  ;;  %v3112_v33 = vpop.f32.mrf.mxu2 }
 0x470   : > { %v3083_v32 = vadd.f32 %v3082_v61, %v2982_v21  ;;  %v3133_v7 = vmax.f32 %v3068_v56, 0.0  ;;  %v9064_v56 = vmov 9  }
 0x472   : > { %v3138_v58 = vmax.f32 %v3083_v32, 0.0 }
 0x475   : > { %v2984_v10 = vpop.f32.mrf.mxu1 }
 0x476   : > { %v2985_v43 = vadd.f32 %v7565_v25, %v2984_v10 }
 0x478   : > { %v3086_v5 = vadd.f32 %v3085_v52, %v2985_v43  ;;  %v3125_v52 = vmax.f32 %v3044_v60, 0.0  ;;  %v9065_v60 = vmov 7  }
 0x47a   : > { %v3139_v57 = vmax.f32 %v3086_v5, 0.0  ;;  %v3153_v51 = vmax.f32 %v3125_v52, %v3132_v9 }
 0x47d   : > { %v2987_v24 = vpop.f32.mrf.mxu1 }
 0x47e   : > { %v2988_v36 = vadd.f32 %v7565_v25, %v2987_v24  ;;  %v5568_v24 = vmov 5  }
 0x480   : > { %v3089_v22 = vadd.f32 %v7578_v49, %v2988_v36  ;;  %v9071_v49 = vmov 3   ;;  %v5574_v36 = vmov 11  }
 0x485   : > { %v7586_v54 = vpop.f32.mrf.mxu1 }
 0x48d   : > { %v7590_v3 = vpop.f32.mrf.mxu1 }
 0x495   : > { %v7594_v29 = vpop.f32.mrf.mxu1 }
 0x49d   : > { %v7599_v2 = vpop.f32.mrf.mxu1 }
 0x4a5   : > { %v3002_v14 = vpop.f32.mrf.mxu1 }
 0x4a6   : > { %v3003_v41 = vadd.f32 %v7565_v25, %v3002_v14  ;;  %v2949_v14 = vadd.f32 %v7565_v25, %v7543_v16 }
 0x4a8   : > { %v3104_v6 = vadd.f32 %v3103_v55, %v3003_v41  ;;  %v3047_v55 = vadd.f32 %v9184_v30, %v2946_v44  ;;  %v3140_v41 = vmax.f32 %v3089_v22, 0.0  ;;  %v3050_v16 = vadd.f32 %v7531_v20, %v2949_v14 }
 0x4a9   : > { %v9066_v20 = vmov 6   ;;  %v2997_v44 = vadd.f32 %v7565_v25, %v7594_v29 }
 0x4aa   : > { %v3145_v39 = vmax.f32 %v3104_v6, 0.0  ;;  %v3126_v32 = vmax.f32 %v3047_v55, 0.0 }
 0x4ac   : > { %v3159_v47 = vmax.f32 %v3138_v58, %v3145_v39  ;;  %v3154_v48 = vmax.f32 %v3126_v32, %v3133_v7 }
 0x4ad   : > { %v3005_v61 = vpop.f32.mrf.mxu1 }
 0x4ae   : > { %v7616_v12 = vmax.f32 %v3152_v0, %v3159_v47  ;;  %v3006_v53 = vadd.f32 %v7565_v25, %v3005_v61  ;;  %v3127_v47 = vmax.f32 %v3050_v16, 0.0  ;;  %v5580_v16 = vmov 17  }
 0x4b0   : > { %v3107_v62 = vadd.f32 %v3106_v26, %v3006_v53  ;;  %3288 = vperm.xlu2 %5310, %v7616_v12   ;;  %3238 = vperm.xlu0 %5309, %v7616_v12   ;;  %v2970_v26 = vadd.f32 %v7565_v25, %v7560_v19  ;;  %v2991_v19 = vadd.f32 %v7565_v25, %v7586_v54 }
 0x4b1   : > { %3182 = vperm.xlu1 %5308, %v7616_v12  }
 0x4b2   : > { %v3146_v35 = vmax.f32 %v3107_v62, 0.0  ;;  %v3071_v6 = vadd.f32 %v7549_v45, %v2970_v26  ;;  %v3092_v58 = vadd.f32 %v7582_v17, %v2991_v19  ;;  %v2994_v45 = vadd.f32 %v7565_v25, %v7590_v3  ;;  %v3115_v17 = vpop.f32.mrf.mxu2 }
 0x4b4   : > { %v3160_v10 = vmax.f32 %v3139_v57, %v3146_v35  ;;  %v3134_v0 = vmax.f32 %v3071_v6, 0.0  ;;  %v3141_v61 = vmax.f32 %v3092_v58, 0.0  ;;  %v3095_v9 = vadd.f32 %v7584_v1, %v2994_v45 }
 0x4b5   : > { %v3008_v37 = vpop.f32.mrf.mxu1  ;;  %v9061_v35 = vmov 10  }
 0x4b6   : > { %v7630_v21 = vmax.f32 %v3153_v51, %v3160_v10  ;;  %v3009_v59 = vadd.f32 %v7565_v25, %v3008_v37  ;;  %v3155_v5 = vmax.f32 %v3127_v47, %v3134_v0  ;;  %v3142_v52 = vmax.f32 %v3095_v9, 0.0  ;;  %v5003_v0 = vld [vmem:[%s9039_s5 + $0x38] sm:$0xff]  ;;  %v3173_v47 = vld [vmem:[%s9039_s5] sm:$0xff] }
 0x4b7   : > { %v3098_v10 = vadd.f32 %v7588_v31, %v2997_v44  ;;  %v9060_v31 = vmov 13  }
 0x4b8   : > { %v3110_v38 = vadd.f32 %v3109_v23, %v3009_v59  ;;  %5313 = vset.pattern.permute.xlu2 %v5568_v24  ;;  %5312 = vset.pattern.permute.xlu0 %v9070_v27  ;;  %v3000_v59 = vadd.f32 %v7565_v25, %v7599_v2 }
 0x4b9   : > { %5311 = vset.pattern.permute.xlu1 %v9071_v49  ;;  %3438 = vperm.xlu2 %5313, %v7616_v12   ;;  %v3143_v22 = vmax.f32 %v3098_v10, 0.0 }
 0x4ba   : > { %v3147_v8 = vmax.f32 %v3110_v38, 0.0  ;;  %3388 = vperm.xlu0 %5312, %v7616_v12   ;;  %3338 = vperm.xlu1 %5311, %v7616_v12   ;;  %v3118_v1 = vpop.f32.mrf.mxu2  ;;  %v5577_v38 = vmov 14   ;;  %v3101_v32 = vadd.f32 %v7592_v13, %v3000_v59  ;;  %v9073_v13 = vmov 15  }
 0x4bc   : > { %v3161_v15 = vmax.f32 %v3140_v41, %v3147_v8  ;;  %v3144_v8 = vmax.f32 %v3101_v32, 0.0 }
 0x4bd   : > { %v3011_v40 = vpop.f32.mrf.mxu1 }
 0x4be   : > { %v7648_v43 = vmax.f32 %v3154_v48, %v3161_v15  ;;  %v3012_v39 = vadd.f32 %v7565_v25, %v3011_v40 }
 0x4c0   : > { %v3113_v54 = vadd.f32 %v3112_v33, %v3012_v39  ;;  %v9067_v33 = vmov 12  }
 0x4c1   : > { %5316 = vset.pattern.permute.xlu2 %v5571_v50 }
 0x4c2   : > { %v3148_v46 = vmax.f32 %v3113_v54, 0.0  ;;  %5315 = vset.pattern.permute.xlu0 %v9065_v60  ;;  %5314 = vset.pattern.permute.xlu1 %v9066_v20  ;;  %v3121_v14 = vpop.f32.mrf.mxu2 }
 0x4c3   : > { %3588 = vperm.xlu2 %5316, %v7616_v12   ;;  %3538 = vperm.xlu0 %5315, %v7616_v12  }
 0x4c4   : > { %v3162_v53 = vmax.f32 %v3141_v61, %v3148_v46  ;;  %3488 = vperm.xlu1 %5314, %v7616_v12  }
 0x4c5   : > { %v3014_v23 = vpop.f32.mrf.mxu1 }
 0x4c6   : > { %v7660_v3 = vmax.f32 %v3155_v5, %v3162_v53  ;;  %v3015_v11 = vadd.f32 %v7565_v25, %v3014_v23  ;;  %v5010_v5 = vld [vmem:[%s9039_s5 + $0x70] sm:$0xff]  ;;  %v5017_v23 = vld [vmem:[%s9039_s5 + $0xa8] sm:$0xff] }
 0x4c8   : > { %v3116_v62 = vadd.f32 %v3115_v17, %v3015_v11 }
 0x4ca   : > { %v3149_v57 = vmax.f32 %v3116_v62, 0.0 }
 0x4cb   : > { %5319 = vset.pattern.permute.xlu2 %v5574_v36  ;;  %5318 = vset.pattern.permute.xlu0 %v9061_v35 }
 0x4cc   : > { %v3163_v51 = vmax.f32 %v3142_v52, %v3149_v57  ;;  %5317 = vset.pattern.permute.xlu1 %v9064_v56  ;;  %3738 = vperm.xlu2 %5319, %v7616_v12   ;;  %v5024_v57 = vld [vmem:[%s9039_s5 + $0xe0] sm:$0xff] }
 0x4cd   : > { %3688 = vperm.xlu0 %5318, %v7616_v12   ;;  %3638 = vperm.xlu1 %5317, %v7616_v12   ;;  %v3017_v29 = vpop.f32.mrf.mxu1 }
 0x4ce   : > { %v7673_v30 = vmax.f32 %v7570_v34, %v3163_v51  ;;  %v3018_v55 = vadd.f32 %v7565_v25, %v3017_v29  ;;  %v5031_v29 = vld [vmem:[%s9039_s5 + $0x118] sm:$0xff] }
 0x4d0   : > { %v3119_v37 = vadd.f32 %v3118_v1, %v3018_v55 }
 0x4d2   : > { %v3150_v7 = vmax.f32 %v3119_v37, 0.0  ;;  %v5038_v37 = vld [vmem:[%s9039_s5 + $0x150] sm:$0xff] }
 0x4d4   : > { %v3164_v26 = vmax.f32 %v3143_v22, %v3150_v7  ;;  %5322 = vset.pattern.permute.xlu2 %v5577_v38 }
 0x4d5   : > { %5321 = vset.pattern.permute.xlu0 %v9060_v31  ;;  %5320 = vset.pattern.permute.xlu1 %v9067_v33  ;;  %v3020_v34 = vpop.f32.mrf.mxu1 }
 0x4d6   : > { %v7683_v41 = vmax.f32 %v7574_v63, %v3164_v26  ;;  %3888 = vperm.xlu2 %5322, %v7616_v12   ;;  %3838 = vperm.xlu0 %5321, %v7616_v12   ;;  %v3021_v2 = vadd.f32 %v7565_v25, %v3020_v34  ;;  %v9059_v63 = vmov 16   ;;  %v9056_v25 = vmov 19   ;;  %v5045_v26 = vld [vmem:[%s9039_s5 + $0x188] sm:$0xff] }
 0x4d7   : > { %3788 = vperm.xlu1 %5320, %v7616_v12  }
 0x4d8   : > { %v3122_v19 = vadd.f32 %v3121_v14, %v3021_v2 }
 0x4da   : > { %v3151_v48 = vmax.f32 %v3122_v19, 0.0 }
 0x4dc   : > { %v3165_v6 = vmax.f32 %v3144_v8, %v3151_v48  ;;  %v5052_v8 = vld [vmem:[%s9039_s5 + $0x1c0] sm:$0xff] }
 0x4de   : > { %v7690_v15 = vmax.f32 %v7580_v18, %v3165_v6  ;;  %5325 = vset.pattern.permute.xlu2 %v5580_v16  ;;  %5324 = vset.pattern.permute.xlu0 %v9059_v63  ;;  %v9075_v18 = vmov 18   ;;  %v5059_v6 = vld [vmem:[%s9039_s5 + $0x1f8] sm:$0xff] }
 0x4df   : > { %5323 = vset.pattern.permute.xlu1 %v9073_v13  ;;  %4038 = vperm.xlu2 %5325, %v7616_v12  }
 0x4e0   : > { %3988 = vperm.xlu0 %5324, %v7616_v12   ;;  %3938 = vperm.xlu1 %5323, %v7616_v12  }
 0x4e7   : > { %5328 = vset.pattern.permute.xlu2 %v9074_v4 }
 0x4e8   : > { %5327 = vset.pattern.permute.xlu0 %v9056_v25  ;;  %5326 = vset.pattern.permute.xlu1 %v9075_v18 }
 0x4e9   : > { %4138 = vperm.xlu0 %5327, %v7616_v12   ;;  %4088 = vperm.xlu1 %5326, %v7616_v12  }
 0x4ea   : > { %3187 = vperm.xlu2 %5328, %v7630_v21  }
 0x4f1   : > { %5330 = vset.pattern.permute.xlu0 %v5565_v42  ;;  %5329 = vset.pattern.permute.xlu1 %v9072_v28 }
 0x4f2   : > { %5331 = vset.pattern.permute.xlu2 %v9071_v49  ;;  %3292 = vperm.xlu0 %5330, %v7630_v21  }
 0x4f3   : > { %3242 = vperm.xlu1 %5329, %v7630_v21   ;;  %3342 = vperm.xlu2 %5331, %v7630_v21  }
 0x4fa   : > { %5333 = vset.pattern.permute.xlu0 %v5568_v24 }
 0x4fb   : > { %5332 = vset.pattern.permute.xlu1 %v9070_v27  ;;  %5334 = vset.pattern.permute.xlu2 %v9066_v20 }
 0x4fc   : > { %3442 = vperm.xlu0 %5333, %v7630_v21   ;;  %3392 = vperm.xlu1 %5332, %v7630_v21  }
 0x4fd   : > { %3492 = vperm.xlu2 %5334, %v7630_v21  }
 0x504   : > { %5336 = vset.pattern.permute.xlu0 %v5571_v50  ;;  %5335 = vset.pattern.permute.xlu1 %v9065_v60 }
 0x505   : > { %5337 = vset.pattern.permute.xlu2 %v9064_v56  ;;  %3592 = vperm.xlu0 %5336, %v7630_v21  }
 0x506   : > { %3542 = vperm.xlu1 %5335, %v7630_v21   ;;  %3642 = vperm.xlu2 %5337, %v7630_v21  }
 0x50a   : > { %v3289_v40 = vpop.permute.xlu2 %3288 }
 0x50b   : > { %v3315_v9 = vmul.f32 %v5010_v5, %v3289_v40 }
 0x50d   : > { %5339 = vset.pattern.permute.xlu0 %v5574_v36 }
 0x50e   : > { %5338 = vset.pattern.permute.xlu1 %v9061_v35  ;;  %5340 = vset.pattern.permute.xlu2 %v9067_v33 }
 0x50f   : > { %3742 = vperm.xlu0 %5339, %v7630_v21   ;;  %3692 = vperm.xlu1 %5338, %v7630_v21  }
 0x510   : > { %3792 = vperm.xlu2 %5340, %v7630_v21  }
 0x513   : > { %v3439_v58 = vpop.permute.xlu2 %3438 }
 0x514   : > { %v3465_v22 = vmul.f32 %v5031_v29, %v3439_v58 }
 0x517   : > { %5342 = vset.pattern.permute.xlu0 %v5577_v38  ;;  %5341 = vset.pattern.permute.xlu1 %v9060_v31 }
 0x518   : > { %5343 = vset.pattern.permute.xlu2 %v9073_v13  ;;  %3892 = vperm.xlu0 %5342, %v7630_v21  }
 0x519   : > { %3842 = vperm.xlu1 %5341, %v7630_v21   ;;  %3942 = vperm.xlu2 %5343, %v7630_v21  }
 0x51d   : > { %v3589_v39 = vpop.permute.xlu2 %3588 }
 0x51e   : > { %v3615_v40 = vmul.f32 %v5052_v8, %v3589_v39  ;;  %v5073_v39 = vld [vmem:[%s9039_s5 + $0x268] sm:$0xff] }
 0x520   : > { %5345 = vset.pattern.permute.xlu0 %v5580_v16 }
 0x521   : > { %5344 = vset.pattern.permute.xlu1 %v9059_v63  ;;  %5346 = vset.pattern.permute.xlu2 %v9075_v18 }
 0x522   : > { %4042 = vperm.xlu0 %5345, %v7630_v21   ;;  %3992 = vperm.xlu1 %5344, %v7630_v21   ;;  %v3239_v54 = vpop.permute.xlu0 %3238 }
 0x523   : > { %4092 = vperm.xlu2 %5346, %v7630_v21   ;;  %v3183_v61 = vpop.permute.xlu1 %3182  ;;  %v3265_v45 = vmul.f32 %v5003_v0, %v3239_v54 }
 0x524   : > { %v3215_v46 = vmul.f32 %v3183_v61, %v3173_v47  ;;  %v5066_v61 = vld [vmem:[%s9039_s5 + $0x230] sm:$0xff] }
 0x526   : > { %v3739_v17 = vpop.permute.xlu2 %3738  ;;  %v3272_v53 = vadd.f32 %v3265_v45, %v3215_v46 }
 0x528   : > { %v3322_v44 = vadd.f32 %v3315_v9, %v3272_v53  ;;  %v3765_v9 = vmul.f32 %v5073_v39, %v3739_v17  ;;  %v5094_v17 = vld [vmem:[%s9039_s5 + $0x310] sm:$0xff] }
 0x52a   : > { %5348 = vset.pattern.permute.xlu0 %v9074_v4  ;;  %5347 = vset.pattern.permute.xlu1 %v9056_v25 }
 0x52b   : > { %5349 = vset.pattern.permute.xlu2 %v9072_v28  ;;  %3192 = vperm.xlu0 %5348, %v7648_v43  }
 0x52c   : > { %4142 = vperm.xlu1 %5347, %v7630_v21   ;;  %3246 = vperm.xlu2 %5349, %v7648_v43   ;;  %v3389_v11 = vpop.permute.xlu0 %3388  ;;  %v3339_v62 = vpop.permute.xlu1 %3338 }
 0x52d   : > { %v3365_v52 = vmul.f32 %v5017_v23, %v3339_v62  ;;  %v3415_v10 = vmul.f32 %v5024_v57, %v3389_v11  ;;  %v5080_v23 = vld [vmem:[%s9039_s5 + $0x2a0] sm:$0xff] }
 0x52f   : > { %v3372_v51 = vadd.f32 %v3365_v52, %v3322_v44  ;;  %v5087_v44 = vld [vmem:[%s9039_s5 + $0x2d8] sm:$0xff] }
 0x530   : > { %v3889_v1 = vpop.permute.xlu2 %3888 }
 0x531   : > { %v3422_v55 = vadd.f32 %v3415_v10, %v3372_v51 }
 0x533   : > { %5351 = vset.pattern.permute.xlu0 %v9071_v49  ;;  %v3472_v34 = vadd.f32 %v3465_v22, %v3422_v55  ;;  %v3915_v22 = vmul.f32 %v5094_v17, %v3889_v1  ;;  %v5025_v17 = vld [vmem:[%s9039_s5 + $0xe8] sm:$0xff] }
 0x534   : > { %5350 = vset.pattern.permute.xlu1 %v5565_v42  ;;  %5352 = vset.pattern.permute.xlu2 %v9070_v27 }
 0x535   : > { %3346 = vperm.xlu0 %5351, %v7648_v43   ;;  %3296 = vperm.xlu1 %5350, %v7648_v43   ;;  %v3539_v59 = vpop.permute.xlu0 %3538 }
 0x536   : > { %3396 = vperm.xlu2 %5352, %v7648_v43   ;;  %v3489_v7 = vpop.permute.xlu1 %3488  ;;  %v3565_v2 = vmul.f32 %v5045_v26, %v3539_v59  ;;  %v5108_v59 = vld [vmem:[%s9039_s5 + $0x380] sm:$0xff] }
 0x537   : > { %v3515_v14 = vmul.f32 %v5038_v37, %v3489_v7  ;;  %v5101_v37 = vld [vmem:[%s9039_s5 + $0x348] sm:$0xff] }
 0x539   : > { %v3522_v32 = vadd.f32 %v3515_v14, %v3472_v34  ;;  %v7776_v19 = vpop.permute.xlu2 %4038 }
 0x53b   : > { %v3572_v48 = vadd.f32 %v3565_v2, %v3522_v32 }
 0x53d   : > { %5354 = vset.pattern.permute.xlu0 %v9066_v20  ;;  %5353 = vset.pattern.permute.xlu1 %v5568_v24  ;;  %v3622_v54 = vadd.f32 %v3615_v40, %v3572_v48 }
 0x53e   : > { %5355 = vset.pattern.permute.xlu2 %v9065_v60  ;;  %3496 = vperm.xlu0 %5354, %v7648_v43  }
 0x53f   : > { %3446 = vperm.xlu1 %5353, %v7648_v43   ;;  %3546 = vperm.xlu2 %5355, %v7648_v43   ;;  %v3689_v58 = vpop.permute.xlu0 %3688  ;;  %v3639_v0 = vpop.permute.xlu1 %3638 }
 0x540   : > { %v3665_v47 = vmul.f32 %v5059_v6, %v3639_v0  ;;  %v3715_v46 = vmul.f32 %v5066_v61, %v3689_v58  ;;  %v5115_v58 = vld [vmem:[%s9039_s5 + $0x3b8] sm:$0xff]  ;;  %v5122_v0 = vld [vmem:[%s9039_s5 + $0x3f0] sm:$0xff] }
 0x541   : > { %v4065_v61 = vmul.f32 %v5115_v58, %v7776_v19  ;;  %v5129_v19 = vld [vmem:[%s9039_s5 + $0x428] sm:$0xff] }
 0x542   : > { %v3672_v45 = vadd.f32 %v3665_v47, %v3622_v54  ;;  %v3174_v54 = vld [vmem:[%s9039_s5 + $0x8] sm:$0xff]  ;;  %v5004_v47 = vld [vmem:[%s9039_s5 + $0x40] sm:$0xff] }
 0x544   : > { %v3188_v5 = vpop.permute.xlu2 %3187  ;;  %v3722_v53 = vadd.f32 %v3715_v46, %v3672_v45 }
 0x546   : > { %5357 = vset.pattern.permute.xlu0 %v9064_v56  ;;  %v3772_v52 = vadd.f32 %v3765_v9, %v3722_v53  ;;  %v3216_v53 = vmul.f32 %v3188_v5, %v3174_v54  ;;  %v5011_v9 = vld [vmem:[%s9039_s5 + $0x78] sm:$0xff] }
 0x547   : > { %5356 = vset.pattern.permute.xlu1 %v5571_v50  ;;  %5358 = vset.pattern.permute.xlu2 %v9061_v35 }
 0x548   : > { %3646 = vperm.xlu0 %5357, %v7648_v43   ;;  %3596 = vperm.xlu1 %5356, %v7648_v43   ;;  %v3839_v11 = vpop.permute.xlu0 %3838 }
 0x549   : > { %3696 = vperm.xlu2 %5358, %v7648_v43   ;;  %v3789_v62 = vpop.permute.xlu1 %3788  ;;  %v3865_v10 = vmul.f32 %v5087_v44, %v3839_v11 }
 0x54a   : > { %v3815_v57 = vmul.f32 %v5080_v23, %v3789_v62 }
 0x54c   : > { %v3822_v51 = vadd.f32 %v3815_v57, %v3772_v52  ;;  %v5018_v57 = vld [vmem:[%s9039_s5 + $0xb0] sm:$0xff] }
 0x54d   : > { %v3343_v29 = vpop.permute.xlu2 %3342 }
 0x54e   : > { %v3872_v55 = vadd.f32 %v3865_v10, %v3822_v51 }
 0x550   : > { %5360 = vset.pattern.permute.xlu0 %v9067_v33  ;;  %5359 = vset.pattern.permute.xlu1 %v5574_v36  ;;  %v3922_v34 = vadd.f32 %v3915_v22, %v3872_v55  ;;  %v5032_v22 = vld [vmem:[%s9039_s5 + $0x120] sm:$0xff] }
 0x551   : > { %5361 = vset.pattern.permute.xlu2 %v9060_v31  ;;  %3796 = vperm.xlu0 %5360, %v7648_v43  }
 0x552   : > { %3746 = vperm.xlu1 %5359, %v7648_v43   ;;  %3846 = vperm.xlu2 %5361, %v7648_v43   ;;  %v3989_v7 = vpop.permute.xlu0 %3988  ;;  %v3939_v26 = vpop.permute.xlu1 %3938 }
 0x553   : > { %v3965_v14 = vmul.f32 %v5101_v37, %v3939_v26  ;;  %v4015_v32 = vmul.f32 %v5108_v59, %v3989_v7  ;;  %v3366_v37 = vmul.f32 %v5018_v57, %v3343_v29 }
 0x555   : > { %v3972_v2 = vadd.f32 %v3965_v14, %v3922_v34 }
 0x557   : > { %v4022_v8 = vadd.f32 %v4015_v32, %v3972_v2  ;;  %v3493_v1 = vpop.permute.xlu2 %3492 }
 0x559   : > { %5363 = vset.pattern.permute.xlu0 %v9073_v13  ;;  %v4072_v23 = vadd.f32 %v4065_v61, %v4022_v8  ;;  %v5039_v8 = vld [vmem:[%s9039_s5 + $0x158] sm:$0xff] }
 0x55a   : > { %5362 = vset.pattern.permute.xlu1 %v5577_v38  ;;  %5364 = vset.pattern.permute.xlu2 %v9059_v63 }
 0x55b   : > { %3946 = vperm.xlu0 %5363, %v7648_v43   ;;  %3896 = vperm.xlu1 %5362, %v7648_v43   ;;  %v4139_v48 = vpop.permute.xlu0 %4138  ;;  %v4089_v6 = vpop.permute.xlu1 %4088 }
 0x55c   : > { %3996 = vperm.xlu2 %5364, %v7648_v43   ;;  %v4115_v45 = vmul.f32 %v5122_v0, %v4089_v6  ;;  %v4165_v51 = vmul.f32 %v5129_v19, %v4139_v48  ;;  %v5046_v48 = vld [vmem:[%s9039_s5 + $0x190] sm:$0xff]  ;;  %v3516_v6 = vmul.f32 %v5039_v8, %v3493_v1  ;;  %v5053_v0 = vld [vmem:[%s9039_s5 + $0x1c8] sm:$0xff]  ;;  %v5060_v1 = vld [vmem:[%s9039_s5 + $0x200] sm:$0xff] }
 0x55e   : > { %v4122_v62 = vadd.f32 %v4115_v45, %v4072_v23  ;;  %v5067_v23 = vld [vmem:[%s9039_s5 + $0x238] sm:$0xff] }
 0x560   : > { %v7829_v40 = vpop.permute.xlu2 %3642  ;;  %v7863_v55 = vadd.f32 %v4165_v51, %v4122_v62 }
 0x563   : > { %5366 = vset.pattern.permute.xlu0 %v9075_v18  ;;  %5365 = vset.pattern.permute.xlu1 %v5580_v16 }
 0x564   : > { %5367 = vset.pattern.permute.xlu2 %v9056_v25  ;;  %4096 = vperm.xlu0 %5366, %v7648_v43   ;;  %v3293_v46 = vpop.permute.xlu0 %3292 }
 0x565   : > { %4046 = vperm.xlu1 %5365, %v7648_v43   ;;  %4146 = vperm.xlu2 %5367, %v7648_v43   ;;  %v3243_v39 = vpop.permute.xlu1 %3242  ;;  %v3316_v52 = vmul.f32 %v5011_v9, %v3293_v46  ;;  %v3666_v9 = vmul.f32 %v5060_v1, %v7829_v40 }
 0x566   : > { %v3266_v11 = vmul.f32 %v5004_v47, %v3243_v39 }
 0x568   : > { %v3273_v44 = vadd.f32 %v3266_v11, %v3216_v53  ;;  %v5074_v11 = vld [vmem:[%s9039_s5 + $0x270] sm:$0xff] }
 0x56a   : > { %v3793_v10 = vpop.permute.xlu2 %3792  ;;  %v3323_v5 = vadd.f32 %v3316_v52, %v3273_v44 }
 0x56c   : > { %5409 = vset.pattern.permute.xlu0 %v9072_v28  ;;  %v3373_v26 = vadd.f32 %v3366_v37, %v3323_v5  ;;  %v5088_v37 = vld [vmem:[%s9039_s5 + $0x2e0] sm:$0xff] }
 0x56d   : > { %5368 = vset.pattern.permute.xlu1 %v9074_v4  ;;  %5370 = vset.pattern.permute.xlu2 %v5565_v42 }
 0x56e   : > { %3258 = vperm.xlu0 %5409, %v7683_v41   ;;  %3197 = vperm.xlu1 %5368, %v7660_v3   ;;  %v3443_v59 = vpop.permute.xlu0 %3442  ;;  %v3393_v7 = vpop.permute.xlu1 %3392 }
 0x56f   : > { %3300 = vperm.xlu2 %5370, %v7660_v3   ;;  %v3416_v34 = vmul.f32 %v5025_v17, %v3393_v7  ;;  %v3466_v14 = vmul.f32 %v5032_v22, %v3443_v59  ;;  %v5081_v17 = vld [vmem:[%s9039_s5 + $0x2a8] sm:$0xff]  ;;  %v5095_v7 = vld [vmem:[%s9039_s5 + $0x318] sm:$0xff] }
 0x570   : > { %v3816_v22 = vmul.f32 %v5081_v17, %v3793_v10  ;;  %v5102_v10 = vld [vmem:[%s9039_s5 + $0x350] sm:$0xff] }
 0x571   : > { %v3423_v29 = vadd.f32 %v3416_v34, %v3373_v26 }
 0x573   : > { %v3473_v32 = vadd.f32 %v3466_v14, %v3423_v29  ;;  %v3943_v2 = vpop.permute.xlu2 %3942 }
 0x575   : > { %v3523_v47 = vadd.f32 %v3516_v6, %v3473_v32  ;;  %v5109_v6 = vld [vmem:[%s9039_s5 + $0x388] sm:$0xff] }
 0x576   : > { %5412 = vset.pattern.permute.xlu0 %v9070_v27  ;;  %5369 = vset.pattern.permute.xlu1 %v9072_v28 }
 0x577   : > { %5373 = vset.pattern.permute.xlu2 %v5568_v24  ;;  %3408 = vperm.xlu0 %5412, %v7683_v41   ;;  %v3593_v58 = vpop.permute.xlu0 %3592 }
 0x578   : > { %3250 = vperm.xlu1 %5369, %v7660_v3   ;;  %3450 = vperm.xlu2 %5373, %v7660_v3   ;;  %v3543_v54 = vpop.permute.xlu1 %3542  ;;  %v3616_v45 = vmul.f32 %v5053_v0, %v3593_v58  ;;  %v3966_v58 = vmul.f32 %v5102_v10, %v3943_v2  ;;  %v5116_v0 = vld [vmem:[%s9039_s5 + $0x3c0] sm:$0xff] }
 0x579   : > { %v3566_v61 = vmul.f32 %v5046_v48, %v3543_v54  ;;  %v5040_v10 = vld [vmem:[%s9039_s5 + $0x160] sm:$0xff] }
 0x57b   : > { %v3573_v46 = vadd.f32 %v3566_v61, %v3523_v47 }
 0x57d   : > { %v3623_v39 = vadd.f32 %v3616_v45, %v3573_v46  ;;  %v7891_v53 = vpop.permute.xlu2 %4092 }
 0x57f   : > { %5415 = vset.pattern.permute.xlu0 %v9065_v60  ;;  %v3673_v44 = vadd.f32 %v3666_v9, %v3623_v39 }
 0x580   : > { %5371 = vset.pattern.permute.xlu1 %v9071_v49  ;;  %5376 = vset.pattern.permute.xlu2 %v5571_v50 }
 0x581   : > { %3558 = vperm.xlu0 %5415, %v7683_v41   ;;  %3350 = vperm.xlu1 %5371, %v7660_v3   ;;  %v3743_v19 = vpop.permute.xlu0 %3742  ;;  %v3693_v62 = vpop.permute.xlu1 %3692 }
 0x582   : > { %3600 = vperm.xlu2 %5376, %v7660_v3   ;;  %v3716_v52 = vmul.f32 %v5067_v23, %v3693_v62  ;;  %v3766_v57 = vmul.f32 %v5074_v11, %v3743_v19  ;;  %v3175_v11 = vld [vmem:[%s9039_s5 + $0x10] sm:$0xff]  ;;  %v5005_v19 = vld [vmem:[%s9039_s5 + $0x48] sm:$0xff] }
 0x584   : > { %v3723_v40 = vadd.f32 %v3716_v52, %v3673_v44  ;;  %v5012_v52 = vld [vmem:[%s9039_s5 + $0x80] sm:$0xff] }
 0x586   : > { %v3773_v51 = vadd.f32 %v3766_v57, %v3723_v40  ;;  %v3247_v5 = vpop.permute.xlu2 %3246  ;;  %v5019_v40 = vld [vmem:[%s9039_s5 + $0xb8] sm:$0xff] }
 0x587   : > { %v3267_v57 = vmul.f32 %v5005_v19, %v3247_v5 }
 0x588   : > { %v3823_v34 = vadd.f32 %v3816_v22, %v3773_v51 }
 0x589   : > { %5418 = vset.pattern.permute.xlu0 %v9061_v35  ;;  %5372 = vset.pattern.permute.xlu1 %v9070_v27 }
 0x58a   : > { %5379 = vset.pattern.permute.xlu2 %v5574_v36  ;;  %3708 = vperm.xlu0 %5418, %v7683_v41   ;;  %v3893_v59 = vpop.permute.xlu0 %3892 }
 0x58b   : > { %3400 = vperm.xlu1 %5372, %v7660_v3   ;;  %3750 = vperm.xlu2 %5379, %v7660_v3   ;;  %v3843_v26 = vpop.permute.xlu1 %3842  ;;  %v3916_v29 = vmul.f32 %v5095_v7, %v3893_v59 }
 0x58c   : > { %v3866_v14 = vmul.f32 %v5088_v37, %v3843_v26 }
 0x58e   : > { %v3873_v32 = vadd.f32 %v3866_v14, %v3823_v34  ;;  %v5026_v34 = vld [vmem:[%s9039_s5 + $0xf0] sm:$0xff]  ;;  %v5033_v14 = vld [vmem:[%s9039_s5 + $0x128] sm:$0xff] }
 0x590   : > { %v3923_v8 = vadd.f32 %v3916_v29, %v3873_v32  ;;  %v3397_v48 = vpop.permute.xlu2 %3396 }
 0x591   : > { %v3417_v29 = vmul.f32 %v5026_v34, %v3397_v48  ;;  %v5047_v48 = vld [vmem:[%s9039_s5 + $0x198] sm:$0xff] }
 0x592   : > { %5421 = vset.pattern.permute.xlu0 %v9060_v31  ;;  %v3973_v61 = vadd.f32 %v3966_v58, %v3923_v8 }
 0x593   : > { %5374 = vset.pattern.permute.xlu1 %v9066_v20  ;;  %5382 = vset.pattern.permute.xlu2 %v5577_v38 }
 0x594   : > { %3858 = vperm.xlu0 %5421, %v7683_v41   ;;  %3500 = vperm.xlu1 %5374, %v7660_v3   ;;  %v4043_v54 = vpop.permute.xlu0 %4042  ;;  %v3993_v47 = vpop.permute.xlu1 %3992 }
 0x595   : > { %3900 = vperm.xlu2 %5382, %v7660_v3   ;;  %v4016_v45 = vmul.f32 %v5109_v6, %v3993_v47  ;;  %v4066_v46 = vmul.f32 %v5116_v0, %v4043_v54 }
 0x597   : > { %v4023_v2 = vadd.f32 %v4016_v45, %v3973_v61  ;;  %v5054_v45 = vld [vmem:[%s9039_s5 + $0x1d0] sm:$0xff] }
 0x599   : > { %v7936_v1 = vadd.f32 %v4066_v46, %v4023_v2  ;;  %v3547_v39 = vpop.permute.xlu2 %3546  ;;  %v5061_v2 = vld [vmem:[%s9039_s5 + $0x208] sm:$0xff] }
 0x59a   : > { %v3567_v46 = vmul.f32 %v5047_v48, %v3547_v39 }
 0x59c   : > { %5424 = vset.pattern.permute.xlu0 %v9059_v63  ;;  %5375 = vset.pattern.permute.xlu1 %v9065_v60 }
 0x59d   : > { %5385 = vset.pattern.permute.xlu2 %v5580_v16  ;;  %4008 = vperm.xlu0 %5424, %v7683_v41   ;;  %v3193_v23 = vpop.permute.xlu0 %3192 }
 0x59e   : > { %3550 = vperm.xlu1 %5375, %v7660_v3   ;;  %4050 = vperm.xlu2 %5385, %v7660_v3   ;;  %v7944_v9 = vpop.permute.xlu1 %4142  ;;  %v3217_v44 = vmul.f32 %v3193_v23, %v3175_v11 }
 0x5a0   : > { %v3274_v37 = vadd.f32 %v3267_v57, %v3217_v44 }
 0x5a3   : > { %v3697_v62 = vpop.permute.xlu2 %3696 }
 0x5a5   : > { %5429 = vset.pattern.permute.xlu0 %v5565_v42 }
 0x5a6   : > { %5377 = vset.pattern.permute.xlu1 %v9064_v56  ;;  %5388 = vset.pattern.permute.xlu2 %v9074_v4 }
 0x5a7   : > { %3312 = vperm.xlu0 %5429, %v7690_v15   ;;  %3650 = vperm.xlu1 %5377, %v7660_v3   ;;  %v3347_v51 = vpop.permute.xlu0 %3346  ;;  %v3297_v17 = vpop.permute.xlu1 %3296 }
 0x5a8   : > { %3202 = vperm.xlu2 %5388, %v7673_v30   ;;  %v3317_v22 = vmul.f32 %v5012_v52, %v3297_v17  ;;  %v3367_v59 = vmul.f32 %v5019_v40, %v3347_v51  ;;  %v5068_v51 = vld [vmem:[%s9039_s5 + $0x240] sm:$0xff]  ;;  %v5075_v17 = vld [vmem:[%s9039_s5 + $0x278] sm:$0xff] }
 0x5aa   : > { %v3324_v5 = vadd.f32 %v3317_v22, %v3274_v37  ;;  %v3717_v37 = vmul.f32 %v5068_v51, %v3697_v62  ;;  %v5089_v62 = vld [vmem:[%s9039_s5 + $0x2e8] sm:$0xff] }
 0x5ac   : > { %v3374_v7 = vadd.f32 %v3367_v59, %v3324_v5  ;;  %v3847_v26 = vpop.permute.xlu2 %3846  ;;  %v5082_v59 = vld [vmem:[%s9039_s5 + $0x2b0] sm:$0xff] }
 0x5ae   : > { %v3424_v6 = vadd.f32 %v3417_v29, %v3374_v7 }
 0x5af   : > { %5432 = vset.pattern.permute.xlu0 %v5568_v24  ;;  %5378 = vset.pattern.permute.xlu1 %v9061_v35 }
 0x5b0   : > { %5389 = vset.pattern.permute.xlu2 %v9072_v28  ;;  %3462 = vperm.xlu0 %5432, %v7690_v15   ;;  %v3497_v32 = vpop.permute.xlu0 %3496  ;;  %v9077_v28 = vmov 28  }
 0x5b1   : > { %3700 = vperm.xlu1 %5378, %v7660_v3   ;;  %3254 = vperm.xlu2 %5389, %v7673_v30   ;;  %v3447_v8 = vpop.permute.xlu1 %3446  ;;  %v3517_v0 = vmul.f32 %v5040_v10, %v3497_v32 }
 0x5b2   : > { %v3467_v58 = vmul.f32 %v5033_v14, %v3447_v8  ;;  %v5096_v8 = vld [vmem:[%s9039_s5 + $0x320] sm:$0xff] }
 0x5b4   : > { %v3474_v54 = vadd.f32 %v3467_v58, %v3424_v6  ;;  %v3867_v6 = vmul.f32 %v5089_v62, %v3847_v26  ;;  %v5103_v58 = vld [vmem:[%s9039_s5 + $0x358] sm:$0xff] }
 0x5b6   : > { %v3524_v47 = vadd.f32 %v3517_v0, %v3474_v54  ;;  %v3997_v61 = vpop.permute.xlu2 %3996 }
 0x5b8   : > { %5435 = vset.pattern.permute.xlu0 %v5571_v50  ;;  %v3574_v19 = vadd.f32 %v3567_v46, %v3524_v47 }
 0x5b9   : > { %5380 = vset.pattern.permute.xlu1 %v9067_v33  ;;  %5391 = vset.pattern.permute.xlu2 %v9071_v49 }
 0x5ba   : > { %3612 = vperm.xlu0 %5435, %v7690_v15   ;;  %3800 = vperm.xlu1 %5380, %v7660_v3   ;;  %v3647_v23 = vpop.permute.xlu0 %3646  ;;  %v3597_v11 = vpop.permute.xlu1 %3596 }
 0x5bb   : > { %3354 = vperm.xlu2 %5391, %v7673_v30   ;;  %v3617_v44 = vmul.f32 %v5054_v45, %v3597_v11  ;;  %v3667_v52 = vmul.f32 %v5061_v2, %v3647_v23  ;;  %v5110_v23 = vld [vmem:[%s9039_s5 + $0x390] sm:$0xff]  ;;  %v5117_v11 = vld [vmem:[%s9039_s5 + $0x3c8] sm:$0xff] }
 0x5bd   : > { %v3624_v39 = vadd.f32 %v3617_v44, %v3574_v19  ;;  %v4017_v19 = vmul.f32 %v5110_v23, %v3997_v61 }
 0x5bf   : > { %v3674_v57 = vadd.f32 %v3667_v52, %v3624_v39  ;;  %v7994_v40 = vpop.permute.xlu2 %4146  ;;  %v5124_v52 = vld [vmem:[%s9039_s5 + $0x400] sm:$0xff] }
 0x5c1   : > { %v3724_v7 = vadd.f32 %v3717_v37, %v3674_v57 }
 0x5c2   : > { %5438 = vset.pattern.permute.xlu0 %v5574_v36  ;;  %5381 = vset.pattern.permute.xlu1 %v9060_v31 }
 0x5c3   : > { %5392 = vset.pattern.permute.xlu2 %v9070_v27  ;;  %3762 = vperm.xlu0 %5438, %v7690_v15   ;;  %v3797_v22 = vpop.permute.xlu0 %3796 }
 0x5c4   : > { %3850 = vperm.xlu1 %5381, %v7660_v3   ;;  %3404 = vperm.xlu2 %5392, %v7673_v30   ;;  %v3747_v5 = vpop.permute.xlu1 %3746  ;;  %v3817_v14 = vmul.f32 %v5082_v59, %v3797_v22 }
 0x5c5   : > { %v3767_v34 = vmul.f32 %v5075_v17, %v3747_v5 }
 0x5c7   : > { %v3774_v29 = vadd.f32 %v3767_v34, %v3724_v7  ;;  %v9052_v34 = vmov 20  }
 0x5c9   : > { %v3824_v32 = vadd.f32 %v3817_v14, %v3774_v29  ;;  %v8014_v10 = vpop.permute.xlu2 %3300 }
 0x5cb   : > { %5441 = vset.pattern.permute.xlu0 %v5577_v38  ;;  %v3874_v48 = vadd.f32 %v3867_v6, %v3824_v32 }
 0x5cc   : > { %5383 = vset.pattern.permute.xlu1 %v9073_v13  ;;  %5394 = vset.pattern.permute.xlu2 %v9066_v20 }
 0x5cd   : > { %3912 = vperm.xlu0 %5441, %v7690_v15   ;;  %3950 = vperm.xlu1 %5383, %v7660_v3   ;;  %v3947_v0 = vpop.permute.xlu0 %3946  ;;  %v3897_v54 = vpop.permute.xlu1 %3896 }
 0x5ce   : > { %3504 = vperm.xlu2 %5394, %v7673_v30   ;;  %v3917_v47 = vmul.f32 %v5096_v8, %v3897_v54  ;;  %v3967_v45 = vmul.f32 %v5103_v58, %v3947_v0  ;;  %v9050_v58 = vmov 21  }
 0x5d0   : > { %v3924_v26 = vadd.f32 %v3917_v47, %v3874_v48  ;;  %v9048_v48 = vmov 22  }
 0x5d2   : > { %v3974_v46 = vadd.f32 %v3967_v45, %v3924_v26  ;;  %v8028_v2 = vpop.permute.xlu2 %3450 }
 0x5d4   : > { %v4024_v57 = vadd.f32 %v4017_v19, %v3974_v46  ;;  %v9046_v19 = vmov 23  }
 0x5d5   : > { %5444 = vset.pattern.permute.xlu0 %v5580_v16  ;;  %5384 = vset.pattern.permute.xlu1 %v9059_v63 }
 0x5d6   : > { %5395 = vset.pattern.permute.xlu2 %v9065_v60  ;;  %4062 = vperm.xlu0 %5444, %v7690_v15   ;;  %v4097_v44 = vpop.permute.xlu0 %4096 }
 0x5d7   : > { %4000 = vperm.xlu1 %5384, %v7660_v3   ;;  %3554 = vperm.xlu2 %5395, %v7673_v30   ;;  %v4047_v39 = vpop.permute.xlu1 %4046  ;;  %v4117_v17 = vmul.f32 %v5124_v52, %v4097_v44 }
 0x5d8   : > { %v4067_v51 = vmul.f32 %v5117_v11, %v4047_v39 }
 0x5da   : > { %v4074_v37 = vadd.f32 %v4067_v51, %v4024_v57 }
 0x5dc   : > { %v8045_v22 = vadd.f32 %v4117_v17, %v4074_v37  ;;  %v8047_v61 = vpop.permute.xlu2 %3600  ;;  %v9054_v37 = vmov 24  }
 0x5de   : > { %5445 = vset.pattern.permute.xlu0 %v9056_v25 }
 0x5df   : > { %5386 = vset.pattern.permute.xlu1 %v9075_v18  ;;  %5397 = vset.pattern.permute.xlu2 %v9064_v56 }
 0x5e0   : > { %4158 = vperm.xlu0 %5445, %v7683_v41   ;;  %4100 = vperm.xlu1 %5386, %v7660_v3   ;;  %v8054_v59 = vpop.permute.xlu0 %3258  ;;  %v8056_v5 = vpop.permute.xlu1 %3197 }
 0x5e1   : > { %3654 = vperm.xlu2 %5397, %v7673_v30  }
 0x5e5   : > { %v8059_v7 = vpop.permute.xlu2 %3750 }
 0x5e8   : > { %5449 = vset.pattern.permute.xlu0 %v9052_v34  ;;  %5387 = vset.pattern.permute.xlu1 %v9056_v25  ;;  %v9057_v34 = vmov 25  }
 0x5e9   : > { %5398 = vset.pattern.permute.xlu2 %v9061_v35  ;;  %4192 = vperm.xlu0 %5449, %v7630_v21   ;;  %v8065_v14 = vpop.permute.xlu0 %3408 }
 0x5ea   : > { %4150 = vperm.xlu1 %5387, %v7660_v3   ;;  %3704 = vperm.xlu2 %5398, %v7673_v30   ;;  %v8069_v29 = vpop.permute.xlu1 %3250 }
 0x5ef   : > { %v8071_v62 = vpop.permute.xlu2 %3900 }
 0x5f1   : > { %4212 = vperm.xlu0 %5449, %v7690_v15  }
 0x5f2   : > { %5390 = vset.pattern.permute.xlu1 %v5565_v42  ;;  %5400 = vset.pattern.permute.xlu2 %v9067_v33 }
 0x5f3   : > { %3304 = vperm.xlu1 %5390, %v7673_v30   ;;  %3804 = vperm.xlu2 %5400, %v7673_v30   ;;  %v8078_v32 = vpop.permute.xlu0 %3558  ;;  %v8080_v8 = vpop.permute.xlu1 %3350 }
 0x5f8   : > { %v8082_v6 = vpop.permute.xlu2 %4050 }
 0x5f9   : > { %9185 = vst [vmem:[#allocation30_spill] sm:$0xff] %v8082_v6  ;;  %5453 = vset.pattern.permute.xlu0 %v9050_v58 }
 0x5fa   : > { %4246 = vperm.xlu0 %5453, %v7648_v43  }
 0x5fb   : > { %5393 = vset.pattern.permute.xlu1 %v5568_v24  ;;  %5401 = vset.pattern.permute.xlu2 %v9060_v31 }
 0x5fc   : > { %3454 = vperm.xlu1 %5393, %v7673_v30   ;;  %3854 = vperm.xlu2 %5401, %v7673_v30   ;;  %v8090_v0 = vpop.permute.xlu0 %3708 }
 0x5fd   : > { %v8092_v54 = vpop.permute.xlu1 %3400 }
 0x602   : > { %5454 = vset.pattern.permute.xlu0 %v9048_v48  ;;  %v8095_v47 = vpop.permute.xlu2 %3202 }
 0x603   : > { %4288 = vperm.xlu0 %5454, %v7616_v12  }
 0x604   : > { %5396 = vset.pattern.permute.xlu1 %v5571_v50  ;;  %5403 = vset.pattern.permute.xlu2 %v9073_v13 }
 0x605   : > { %3604 = vperm.xlu1 %5396, %v7673_v30   ;;  %3954 = vperm.xlu2 %5403, %v7673_v30  }
 0x606   : > { %v8102_v45 = vpop.permute.xlu0 %3858  ;;  %v8104_v26 = vpop.permute.xlu1 %3500 }
 0x60b   : > { %4308 = vperm.xlu0 %5454, %v7683_v41   ;;  %v8107_v46 = vpop.permute.xlu2 %3254 }
 0x60d   : > { %5399 = vset.pattern.permute.xlu1 %v5574_v36  ;;  %5404 = vset.pattern.permute.xlu2 %v9059_v63 }
 0x60e   : > { %3754 = vperm.xlu1 %5399, %v7673_v30   ;;  %4004 = vperm.xlu2 %5404, %v7673_v30  }
 0x60f   : > { %v8113_v23 = vpop.permute.xlu0 %4008 }
 0x610   : > { %v8115_v11 = vpop.permute.xlu1 %3550 }
 0x613   : > { %5458 = vset.pattern.permute.xlu0 %v9046_v19 }
 0x614   : > { %4342 = vperm.xlu0 %5458, %v7630_v21  }
 0x615   : > { %v8119_v44 = vpop.permute.xlu2 %3354 }
 0x616   : > { %5402 = vset.pattern.permute.xlu1 %v5577_v38  ;;  %5406 = vset.pattern.permute.xlu2 %v9075_v18 }
 0x617   : > { %3904 = vperm.xlu1 %5402, %v7673_v30   ;;  %4104 = vperm.xlu2 %5406, %v7673_v30  }
 0x619   : > { %v8125_v52 = vpop.permute.xlu0 %3312  ;;  %v8127_v39 = vpop.permute.xlu1 %3650 }
 0x61c   : > { %4362 = vperm.xlu0 %5458, %v7690_v15  }
 0x61e   : > { %v8130_v57 = vpop.permute.xlu2 %3404 }
 0x61f   : > { %5405 = vset.pattern.permute.xlu1 %v5580_v16  ;;  %5407 = vset.pattern.permute.xlu2 %v9056_v25 }
 0x620   : > { %4054 = vperm.xlu1 %5405, %v7673_v30   ;;  %4154 = vperm.xlu2 %5407, %v7673_v30  }
 0x622   : > { %v8136_v51 = vpop.permute.xlu0 %3462 }
 0x623   : > { %v8138_v17 = vpop.permute.xlu1 %3700 }
 0x624   : > { %5462 = vset.pattern.permute.xlu0 %v9054_v37 }
 0x625   : > { %4396 = vperm.xlu0 %5462, %v7648_v43  }
 0x628   : > { %5408 = vset.pattern.permute.xlu1 %v9074_v4  ;;  %5410 = vset.pattern.permute.xlu2 %v5565_v42  ;;  %v8144_v19 = vpop.permute.xlu2 %3504 }
 0x629   : > { %3207 = vperm.xlu1 %5408, %v7683_v41   ;;  %3308 = vperm.xlu2 %5410, %v7683_v41  }
 0x62c   : > { %v8148_v48 = vpop.permute.xlu0 %3612  ;;  %v8150_v58 = vpop.permute.xlu1 %3800 }
 0x62d   : > { %5463 = vset.pattern.permute.xlu0 %v9057_v34  ;;  %v9062_v34 = vmov 26  }
 0x62e   : > { %4438 = vperm.xlu0 %5463, %v7616_v12  }
 0x631   : > { %5411 = vset.pattern.permute.xlu1 %v9071_v49  ;;  %5413 = vset.pattern.permute.xlu2 %v5568_v24  ;;  %v8156_v42 = vpop.permute.xlu2 %3554 }
 0x632   : > { %3358 = vperm.xlu1 %5411, %v7683_v41   ;;  %3458 = vperm.xlu2 %5413, %v7683_v41  }
 0x635   : > { %v8160_v37 = vpop.permute.xlu0 %3762 }
 0x636   : > { %4458 = vperm.xlu0 %5463, %v7683_v41   ;;  %v8163_v25 = vpop.permute.xlu1 %3850 }
 0x63a   : > { %5414 = vset.pattern.permute.xlu1 %v9066_v20  ;;  %5416 = vset.pattern.permute.xlu2 %v5571_v50 }
 0x63b   : > { %3508 = vperm.xlu1 %5414, %v7683_v41   ;;  %3608 = vperm.xlu2 %5416, %v7683_v41   ;;  %v8169_v24 = vpop.permute.xlu2 %3654 }
 0x63e   : > { %5467 = vset.pattern.permute.xlu0 %v9062_v34 }
 0x63f   : > { %4492 = vperm.xlu0 %5467, %v7630_v21   ;;  %v8173_v63 = vpop.permute.xlu0 %3912  ;;  %v8175_v31 = vpop.permute.xlu1 %3950 }
 0x643   : > { %5417 = vset.pattern.permute.xlu1 %v9064_v56  ;;  %5419 = vset.pattern.permute.xlu2 %v5574_v36  ;;  %v9068_v56 = vmov 27  }
 0x644   : > { %3658 = vperm.xlu1 %5417, %v7683_v41   ;;  %3758 = vperm.xlu2 %5419, %v7683_v41   ;;  %v8181_v50 = vpop.permute.xlu2 %3704 }
 0x647   : > { %4512 = vperm.xlu0 %5467, %v7690_v15  }
 0x648   : > { %v8184_v35 = vpop.permute.xlu0 %4062 }
 0x649   : > { %v8186_v34 = vpop.permute.xlu1 %4000 }
 0x64a   : > { %9186 = vst [vmem:[#allocation28_spill] sm:$0xff] %v8186_v34 }
 0x64c   : > { %5420 = vset.pattern.permute.xlu1 %v9067_v33  ;;  %5422 = vset.pattern.permute.xlu2 %v5577_v38  ;;  %v5123_v33 = vld [vmem:[%s9039_s5 + $0x3f8] sm:$0xff]  ;;  %v5130_v38 = vld [vmem:[%s9039_s5 + $0x430] sm:$0xff] }
 0x64d   : > { %3808 = vperm.xlu1 %5420, %v7683_v41   ;;  %3908 = vperm.xlu2 %5422, %v7683_v41   ;;  %v8192_v36 = vpop.permute.xlu2 %3804  ;;  %v4116_v27 = vmul.f32 %v5123_v33, %v7891_v53  ;;  %v4166_v49 = vmul.f32 %v5130_v38, %v7944_v9  ;;  %v9189_v33 = vmov 18   ;;  %v9190_v53 = vmov 0   ;;  %v5007_v9 = vld [vmem:[%s9039_s5 + $0x58] sm:$0xff]  ;;  %v5021_v38 = vld [vmem:[%s9039_s5 + $0xc8] sm:$0xff] }
 0x64f   : > { %5471 = vset.pattern.permute.xlu0 %v9068_v56 }
 0x650   : > { %4546 = vperm.xlu0 %5471, %v7648_v43  }
 0x652   : > { %v8196_v60 = vpop.permute.xlu0 %4158  ;;  %v8198_v20 = vpop.permute.xlu1 %4100 }
 0x653   : > { %9187 = vst [vmem:[#allocation12_spill] sm:$0xff] %v8198_v20 }
 0x655   : > { %5423 = vset.pattern.permute.xlu1 %v9073_v13  ;;  %5425 = vset.pattern.permute.xlu2 %v5580_v16  ;;  %v5137_v13 = vld [vmem:[%s9039_s5 + $0x468] sm:$0xff]  ;;  %v4123_v16 = vadd.f32 %v4116_v27, %v7936_v1 }
 0x656   : > { %3958 = vperm.xlu1 %5423, %v7683_v41   ;;  %4058 = vperm.xlu2 %5425, %v7683_v41   ;;  %v8210_v56 = vpop.permute.xlu2 %3854 }
 0x657   : > { %v4173_v18 = vadd.f32 %v4166_v49, %v4123_v16  ;;  %v3269_v49 = vmul.f32 %v5007_v9, %v8107_v46  ;;  %v5594_v9 = vmov 29  }
 0x658   : > { %5472 = vset.pattern.permute.xlu0 %v9077_v28  ;;  %v9192_v28 = vmov 3  }
 0x659   : > { %4588 = vperm.xlu0 %5472, %v7616_v12  }
 0x65b   : > { %v4193_v4 = vpop.permute.xlu0 %4192 }
 0x65c   : > { %v4216_v20 = vmul.f32 %v5137_v13, %v4193_v4  ;;  %v8220_v6 = vpop.permute.xlu1 %4150  ;;  %v3177_v4 = vld [vmem:[%s9039_s5 + $0x20] sm:$0xff] }
 0x65d   : > { %9188 = vst [vmem:[#allocation33_spill] sm:$0xff] %v8220_v6  ;;  %v3219_v13 = vmul.f32 %v8095_v47, %v3177_v4  ;;  %v3369_v47 = vmul.f32 %v5021_v38, %v8119_v44  ;;  %v5028_v4 = vld [vmem:[%s9039_s5 + $0x100] sm:$0xff]  ;;  %v5042_v44 = vld [vmem:[%s9039_s5 + $0x170] sm:$0xff]  ;;  %v9193_v38 = vmov 4  }
 0x65e   : > { %v8222_v34 = vadd.f32 %v4216_v20, %v4173_v18  ;;  %5426 = vset.pattern.permute.xlu1 %v9189_v33  ;;  %5427 = vset.pattern.permute.xlu2 %v9190_v53  ;;  %v5014_v20 = vld [vmem:[%s9039_s5 + $0x90] sm:$0xff]  ;;  %v9191_v53 = vmov 1  }
 0x65f   : > { %4108 = vperm.xlu1 %5426, %v7683_v41   ;;  %3212 = vperm.xlu2 %5427, %v7690_v15   ;;  %v8231_v27 = vpop.permute.xlu2 %3954  ;;  %v3276_v1 = vadd.f32 %v3269_v49, %v3219_v13 }
 0x661   : > { %4608 = vperm.xlu0 %5472, %v7683_v41  }
 0x665   : > { %v3305_v18 = vpop.permute.xlu1 %3304 }
 0x666   : > { %v3319_v16 = vmul.f32 %v5014_v20, %v3305_v18  ;;  %v3419_v20 = vmul.f32 %v5028_v4, %v8130_v57  ;;  %v3519_v57 = vmul.f32 %v5042_v44, %v8144_v19  ;;  %v9195_v44 = vmov 7  }
 0x667   : > { %5428 = vset.pattern.permute.xlu1 %v9191_v53  ;;  %5430 = vset.pattern.permute.xlu2 %v9192_v28  ;;  %v5035_v28 = vld [vmem:[%s9039_s5 + $0x138] sm:$0xff] }
 0x668   : > { %v3326_v6 = vadd.f32 %v3319_v16, %v3276_v1  ;;  %3262 = vperm.xlu1 %5428, %v7690_v15   ;;  %3362 = vperm.xlu2 %5430, %v7690_v15   ;;  %v8249_v46 = vpop.permute.xlu2 %4004  ;;  %v9194_v16 = vmov 6  }
 0x669   : > { %5476 = vset.pattern.permute.xlu0 %v5594_v9 }
 0x66a   : > { %4642 = vperm.xlu0 %5476, %v7630_v21   ;;  %v3376_v49 = vadd.f32 %v3369_v47, %v3326_v6  ;;  %v5049_v47 = vld [vmem:[%s9039_s5 + $0x1a8] sm:$0xff] }
 0x66c   : > { %v3426_v18 = vadd.f32 %v3419_v20, %v3376_v49  ;;  %v5056_v49 = vld [vmem:[%s9039_s5 + $0x1e0] sm:$0xff] }
 0x66e   : > { %v3455_v13 = vpop.permute.xlu1 %3454 }
 0x66f   : > { %v3469_v1 = vmul.f32 %v5035_v28, %v3455_v13  ;;  %v3569_v28 = vmul.f32 %v5049_v47, %v8156_v42  ;;  %v5063_v13 = vld [vmem:[%s9039_s5 + $0x218] sm:$0xff]  ;;  %v5595_v42 = vmov 30  }
 0x670   : > { %5431 = vset.pattern.permute.xlu1 %v9193_v38  ;;  %5433 = vset.pattern.permute.xlu2 %v9194_v16 }
 0x671   : > { %v3476_v53 = vadd.f32 %v3469_v1, %v3426_v18  ;;  %3412 = vperm.xlu1 %5431, %v7690_v15   ;;  %3512 = vperm.xlu2 %5433, %v7690_v15   ;;  %v8268_v6 = vpop.permute.xlu2 %4104  ;;  %v9196_v1 = vmov 9  }
 0x672   : > { %4662 = vperm.xlu0 %5476, %v7690_v15  }
 0x673   : > { %v3526_v4 = vadd.f32 %v3519_v57, %v3476_v53  ;;  %v3669_v53 = vmul.f32 %v5063_v13, %v8169_v24  ;;  %v5070_v57 = vld [vmem:[%s9039_s5 + $0x250] sm:$0xff]  ;;  %v5084_v24 = vld [vmem:[%s9039_s5 + $0x2c0] sm:$0xff] }
 0x675   : > { %v3576_v18 = vadd.f32 %v3569_v28, %v3526_v4  ;;  %v5077_v4 = vld [vmem:[%s9039_s5 + $0x288] sm:$0xff] }
 0x677   : > { %v3605_v20 = vpop.permute.xlu1 %3604 }
 0x678   : > { %v3619_v19 = vmul.f32 %v5056_v49, %v3605_v20  ;;  %v3719_v49 = vmul.f32 %v5070_v57, %v8181_v50  ;;  %v5091_v50 = vld [vmem:[%s9039_s5 + $0x2f8] sm:$0xff]  ;;  %v5098_v57 = vld [vmem:[%s9039_s5 + $0x330] sm:$0xff] }
 0x679   : > { %5434 = vset.pattern.permute.xlu1 %v9195_v44  ;;  %5436 = vset.pattern.permute.xlu2 %v9196_v1 }
 0x67a   : > { %v3626_v38 = vadd.f32 %v3619_v19, %v3576_v18  ;;  %3562 = vperm.xlu1 %5434, %v7690_v15   ;;  %3662 = vperm.xlu2 %5436, %v7690_v15   ;;  %v4155_v16 = vpop.permute.xlu2 %4154  ;;  %v9197_v18 = vmov 10   ;;  %v9198_v19 = vmov 12  }
 0x67b   : > { %5480 = vset.pattern.permute.xlu0 %v5595_v42 }
 0x67c   : > { %4696 = vperm.xlu0 %5480, %v7648_v43   ;;  %v3676_v47 = vadd.f32 %v3669_v53, %v3626_v38  ;;  %v3819_v38 = vmul.f32 %v5084_v24, %v8192_v36  ;;  %v5112_v24 = vld [vmem:[%s9039_s5 + $0x3a0] sm:$0xff] }
 0x67e   : > { %v3726_v20 = vadd.f32 %v3719_v49, %v3676_v47  ;;  %v3869_v47 = vmul.f32 %v5091_v50, %v8210_v56 }
 0x680   : > { %v3755_v28 = vpop.permute.xlu1 %3754 }
 0x681   : > { %v3769_v13 = vmul.f32 %v5077_v4, %v3755_v28  ;;  %v5105_v4 = vld [vmem:[%s9039_s5 + $0x368] sm:$0xff] }
 0x682   : > { %5437 = vset.pattern.permute.xlu1 %v9197_v18  ;;  %5439 = vset.pattern.permute.xlu2 %v9198_v19  ;;  %v3969_v18 = vmul.f32 %v5105_v4, %v8231_v27  ;;  %v5126_v27 = vld [vmem:[%s9039_s5 + $0x410] sm:$0xff] }
 0x683   : > { %v3776_v44 = vadd.f32 %v3769_v13, %v3726_v20  ;;  %3712 = vperm.xlu1 %5437, %v7690_v15   ;;  %3812 = vperm.xlu2 %5439, %v7690_v15   ;;  %v3309_v1 = vpop.permute.xlu2 %3308  ;;  %v9199_v20 = vmov 13   ;;  %v9200_v13 = vmov 15  }
 0x684   : > { %4704 = vperm.xlu0 %5480, %v7673_v30  }
 0x685   : > { %v3826_v53 = vadd.f32 %v3819_v38, %v3776_v44  ;;  %v5596_v44 = vmov 31   ;;  %v4019_v38 = vmul.f32 %v5112_v24, %v8249_v46  ;;  %v4119_v46 = vmul.f32 %v5126_v27, %v8268_v6 }
 0x687   : > { %v3876_v28 = vadd.f32 %v3869_v47, %v3826_v53  ;;  %v5119_v53 = vld [vmem:[%s9039_s5 + $0x3d8] sm:$0xff] }
 0x689   : > { %v3905_v49 = vpop.permute.xlu1 %3904 }
 0x68a   : > { %v3919_v36 = vmul.f32 %v5098_v57, %v3905_v49  ;;  %v5133_v49 = vld [vmem:[%s9039_s5 + $0x448] sm:$0xff] }
 0x68b   : > { %5440 = vset.pattern.permute.xlu1 %v9199_v20  ;;  %5442 = vset.pattern.permute.xlu2 %v9200_v13  ;;  %v4169_v20 = vmul.f32 %v5133_v49, %v4155_v16  ;;  %v9202_v16 = vmov 19  }
 0x68c   : > { %v3926_v19 = vadd.f32 %v3919_v36, %v3876_v28  ;;  %5486 = vset.pattern.permute.xlu0 %v5596_v44  ;;  %3862 = vperm.xlu1 %5440, %v7690_v15   ;;  %v3459_v56 = vpop.permute.xlu2 %3458  ;;  %v9201_v28 = vmov 16  }
 0x68d   : > { %3962 = vperm.xlu2 %5442, %v7690_v15   ;;  %4754 = vperm.xlu0 %5486, %v7673_v30  }
 0x68e   : > { %v3976_v50 = vadd.f32 %v3969_v18, %v3926_v19  ;;  %v5008_v18 = vld [vmem:[%s9039_s5 + $0x60] sm:$0xff]  ;;  %v3178_v19 = vld [vmem:[%s9039_s5 + $0x28] sm:$0xff] }
 0x690   : > { %v4026_v57 = vadd.f32 %v4019_v38, %v3976_v50  ;;  %v3270_v50 = vmul.f32 %v5008_v18, %v8054_v59  ;;  %v5029_v59 = vld [vmem:[%s9039_s5 + $0x108] sm:$0xff] }
 0x692   : > { %v4055_v47 = vpop.permute.xlu1 %4054 }
 0x693   : > { %v4069_v4 = vmul.f32 %v5119_v53, %v4055_v47  ;;  %v9203_v47 = vmov 20  }
 0x694   : > { %5443 = vset.pattern.permute.xlu1 %v9201_v28  ;;  %v5022_v28 = vld [vmem:[%s9039_s5 + $0xd0] sm:$0xff] }
 0x695   : > { %v4076_v36 = vadd.f32 %v4069_v4, %v4026_v57  ;;  %5446 = vset.pattern.permute.xlu2 %v9189_v33  ;;  %4012 = vperm.xlu1 %5443, %v7690_v15   ;;  %v3609_v24 = vpop.permute.xlu2 %3608  ;;  %v5015_v33 = vld [vmem:[%s9039_s5 + $0x98] sm:$0xff] }
 0x696   : > { %4112 = vperm.xlu2 %5446, %v7690_v15   ;;  %v3320_v57 = vmul.f32 %v5015_v33, %v3309_v1  ;;  %v5036_v1 = vld [vmem:[%s9039_s5 + $0x140] sm:$0xff] }
 0x697   : > { %v4126_v13 = vadd.f32 %v4119_v46, %v4076_v36 }
 0x699   : > { %v8346_v38 = vadd.f32 %v4169_v20, %v4126_v13  ;;  %v3420_v20 = vmul.f32 %v5029_v59, %v8065_v14  ;;  %v5057_v14 = vld [vmem:[%s9039_s5 + $0x1e8] sm:$0xff]  ;;  %v5064_v59 = vld [vmem:[%s9039_s5 + $0x220] sm:$0xff] }
 0x69b   : > { %v3208_v6 = vpop.permute.xlu1 %3207 }
 0x69c   : > { %v3220_v53 = vmul.f32 %v3208_v6, %v3178_v19  ;;  %v3470_v19 = vmul.f32 %v5036_v1, %v3459_v56  ;;  %v5043_v6 = vld [vmem:[%s9039_s5 + $0x178] sm:$0xff] }
 0x69d   : > { %5447 = vset.pattern.permute.xlu1 %v9202_v16 }
 0x69e   : > { %v3277_v27 = vadd.f32 %v3270_v50, %v3220_v53  ;;  %5448 = vset.pattern.permute.xlu2 %v9203_v47  ;;  %4162 = vperm.xlu1 %5447, %v7690_v15   ;;  %v3759_v4 = vpop.permute.xlu2 %3758  ;;  %v5050_v53 = vld [vmem:[%s9039_s5 + $0x1b0] sm:$0xff] }
 0x69f   : > { %4188 = vperm.xlu2 %5448, %v7616_v12   ;;  %v3570_v56 = vmul.f32 %v5050_v53, %v8078_v32  ;;  %v5078_v32 = vld [vmem:[%s9039_s5 + $0x290] sm:$0xff]  ;;  %v5085_v53 = vld [vmem:[%s9039_s5 + $0x2c8] sm:$0xff] }
 0x6a0   : > { %v3327_v49 = vadd.f32 %v3320_v57, %v3277_v27 }
 0x6a4   : > { %v3359_v46 = vpop.permute.xlu1 %3358 }
 0x6a5   : > { %v3370_v36 = vmul.f32 %v5022_v28, %v3359_v46 }
 0x6a6   : > { %5450 = vset.pattern.permute.xlu1 %v9203_v47 }
 0x6a7   : > { %v3377_v13 = vadd.f32 %v3370_v36, %v3327_v49  ;;  %4200 = vperm.xlu2 %5448, %v7660_v3   ;;  %4196 = vperm.xlu1 %5450, %v7648_v43   ;;  %v3909_v18 = vpop.permute.xlu2 %3908  ;;  %v3620_v49 = vmul.f32 %v5057_v14, %v3609_v24  ;;  %v5071_v36 = vld [vmem:[%s9039_s5 + $0x258] sm:$0xff] }
 0x6a8   : > { %v3720_v24 = vmul.f32 %v5071_v36, %v8090_v0  ;;  %v5099_v0 = vld [vmem:[%s9039_s5 + $0x338] sm:$0xff] }
 0x6a9   : > { %v3427_v33 = vadd.f32 %v3420_v20, %v3377_v13  ;;  %v9204_v13 = vmov 21  }
 0x6ab   : > { %v3477_v50 = vadd.f32 %v3470_v19, %v3427_v33 }
 0x6ad   : > { %v3509_v16 = vpop.permute.xlu1 %3508 }
 0x6ae   : > { %v3520_v57 = vmul.f32 %v5043_v6, %v3509_v16  ;;  %v3770_v6 = vmul.f32 %v5078_v32, %v3759_v4 }
 0x6af   : > { %4208 = vperm.xlu2 %5448, %v7683_v41   ;;  %4204 = vperm.xlu1 %5450, %v7673_v30  }
 0x6b0   : > { %v3527_v27 = vadd.f32 %v3520_v57, %v3477_v50  ;;  %v4059_v47 = vpop.permute.xlu2 %4058  ;;  %v5092_v57 = vld [vmem:[%s9039_s5 + $0x300] sm:$0xff] }
 0x6b1   : > { %v3870_v4 = vmul.f32 %v5092_v57, %v8102_v45  ;;  %v5120_v45 = vld [vmem:[%s9039_s5 + $0x3e0] sm:$0xff]  ;;  %v5134_v57 = vld [vmem:[%s9039_s5 + $0x450] sm:$0xff] }
 0x6b2   : > { %v3577_v28 = vadd.f32 %v3570_v56, %v3527_v27 }
 0x6b4   : > { %v3627_v46 = vadd.f32 %v3620_v49, %v3577_v28  ;;  %v3920_v28 = vmul.f32 %v5099_v0, %v3909_v18 }
 0x6b6   : > { %v3659_v1 = vpop.permute.xlu1 %3658 }
 0x6b7   : > { %v3670_v20 = vmul.f32 %v5064_v59, %v3659_v1  ;;  %5452 = vset.pattern.permute.xlu2 %v9204_v13  ;;  %5451 = vset.pattern.permute.xlu1 %v9204_v13  ;;  %v5113_v1 = vld [vmem:[%s9039_s5 + $0x3a8] sm:$0xff] }
 0x6b8   : > { %4242 = vperm.xlu2 %5452, %v7630_v21   ;;  %4238 = vperm.xlu1 %5451, %v7616_v12   ;;  %v4020_v18 = vmul.f32 %v5113_v1, %v8113_v23  ;;  %v5023_v1 = vld [vmem:[%s9039_s5 + $0xd8] sm:$0xff] }
 0x6b9   : > { %v3677_v19 = vadd.f32 %v3670_v20, %v3627_v46  ;;  %v3213_v33 = vpop.permute.xlu2 %3212  ;;  %v5106_v46 = vld [vmem:[%s9039_s5 + $0x370] sm:$0xff] }
 0x6bb   : > { %v3727_v50 = vadd.f32 %v3720_v24, %v3677_v19  ;;  %v4070_v19 = vmul.f32 %v5120_v45, %v4059_v47 }
 0x6bd   : > { %v3777_v16 = vadd.f32 %v3770_v6, %v3727_v50  ;;  %v5127_v50 = vld [vmem:[%s9039_s5 + $0x418] sm:$0xff] }
 0x6bf   : > { %v3809_v14 = vpop.permute.xlu1 %3808 }
 0x6c0   : > { %v3820_v56 = vmul.f32 %v5085_v53, %v3809_v14  ;;  %4254 = vperm.xlu2 %5452, %v7673_v30   ;;  %4250 = vperm.xlu1 %5451, %v7660_v3   ;;  %v4170_v14 = vmul.f32 %v5134_v57, %v8196_v60  ;;  %v5016_v60 = vld [vmem:[%s9039_s5 + $0xa0] sm:$0xff] }
 0x6c2   : > { %v3827_v27 = vadd.f32 %v3820_v56, %v3777_v16  ;;  %v3363_v49 = vpop.permute.xlu2 %3362  ;;  %v9205_v16 = vmov 22  }
 0x6c4   : > { %v3877_v59 = vadd.f32 %v3870_v4, %v3827_v27  ;;  %v3179_v27 = vld [vmem:[%s9039_s5 + $0x30] sm:$0xff] }
 0x6c6   : > { %v3927_v36 = vadd.f32 %v3920_v28, %v3877_v59  ;;  %v5009_v28 = vld [vmem:[%s9039_s5 + $0x68] sm:$0xff] }
 0x6c8   : > { %4262 = vperm.xlu2 %5452, %v7690_v15   ;;  %4258 = vperm.xlu1 %5451, %v7683_v41   ;;  %v3959_v20 = vpop.permute.xlu1 %3958 }
 0x6c9   : > { %v3970_v13 = vmul.f32 %v5106_v46, %v3959_v20  ;;  %v3221_v46 = vmul.f32 %v3213_v33, %v3179_v27  ;;  %v3321_v20 = vmul.f32 %v5016_v60, %v8125_v52 }
 0x6cb   : > { %v3977_v32 = vadd.f32 %v3970_v13, %v3927_v36  ;;  %v3513_v24 = vpop.permute.xlu2 %3512 }
 0x6cd   : > { %v4027_v6 = vadd.f32 %v4020_v18, %v3977_v32  ;;  %v3371_v18 = vmul.f32 %v5023_v1, %v3363_v49  ;;  %v5044_v49 = vld [vmem:[%s9039_s5 + $0x180] sm:$0xff] }
 0x6cf   : > { %v4077_v53 = vadd.f32 %v4070_v19, %v4027_v6  ;;  %v9206_v19 = vmov 23   ;;  %v5030_v6 = vld [vmem:[%s9039_s5 + $0x110] sm:$0xff] }
 0x6d0   : > { %5456 = vset.pattern.permute.xlu2 %v9205_v16  ;;  %5455 = vset.pattern.permute.xlu1 %v9205_v16 }
 0x6d1   : > { %4296 = vperm.xlu2 %5456, %v7648_v43   ;;  %4292 = vperm.xlu1 %5455, %v7630_v21   ;;  %v4109_v23 = vpop.permute.xlu1 %4108 }
 0x6d2   : > { %v4120_v47 = vmul.f32 %v5127_v50, %v4109_v23  ;;  %v5037_v50 = vld [vmem:[%s9039_s5 + $0x148] sm:$0xff] }
 0x6d3   : > { %v3471_v16 = vmul.f32 %v5037_v50, %v8136_v51  ;;  %v3176_v50 = vld [vmem:[%s9039_s5 + $0x18] sm:$0xff] }
 0x6d4   : > { %v4127_v56 = vadd.f32 %v4120_v47, %v4077_v53  ;;  %v3663_v0 = vpop.permute.xlu2 %3662  ;;  %v3521_v47 = vmul.f32 %v5044_v49, %v3513_v24  ;;  %v5065_v24 = vld [vmem:[%s9039_s5 + $0x228] sm:$0xff] }
 0x6d5   : > { %v3671_v1 = vmul.f32 %v5065_v24, %v3663_v0  ;;  %v5100_v24 = vld [vmem:[%s9039_s5 + $0x340] sm:$0xff] }
 0x6d6   : > { %v8430_v4 = vadd.f32 %v4170_v14, %v4127_v56  ;;  %v5051_v56 = vld [vmem:[%s9039_s5 + $0x1b8] sm:$0xff] }
 0x6d9   : > { %4304 = vperm.xlu2 %5456, %v7673_v30   ;;  %4300 = vperm.xlu1 %5455, %v7660_v3  }
 0x6da   : > { %v3263_v59 = vpop.permute.xlu1 %3262 }
 0x6db   : > { %v3271_v36 = vmul.f32 %v5009_v28, %v3263_v59  ;;  %v5058_v28 = vld [vmem:[%s9039_s5 + $0x1f0] sm:$0xff] }
 0x6dc   : > { %v3621_v59 = vmul.f32 %v5058_v28, %v8148_v48  ;;  %v5006_v48 = vld [vmem:[%s9039_s5 + $0x50] sm:$0xff]  ;;  %v5093_v28 = vld [vmem:[%s9039_s5 + $0x308] sm:$0xff] }
 0x6dd   : > { %v3278_v13 = vadd.f32 %v3271_v36, %v3221_v46  ;;  %v3813_v45 = vpop.permute.xlu2 %3812  ;;  %v3268_v49 = vmul.f32 %v5006_v48, %v8069_v29  ;;  %v5020_v29 = vld [vmem:[%s9039_s5 + $0xc0] sm:$0xff] }
 0x6df   : > { %v3328_v32 = vadd.f32 %v3321_v20, %v3278_v13  ;;  %v5072_v13 = vld [vmem:[%s9039_s5 + $0x260] sm:$0xff] }
 0x6e1   : > { %5457 = vset.pattern.permute.xlu2 %v9206_v19  ;;  %4312 = vperm.xlu1 %5455, %v7690_v15   ;;  %v3378_v33 = vadd.f32 %v3371_v18, %v3328_v32  ;;  %v5079_v32 = vld [vmem:[%s9039_s5 + $0x298] sm:$0xff] }
 0x6e2   : > { %4338 = vperm.xlu2 %5457, %v7616_v12  }
 0x6e3   : > { %v3413_v52 = vpop.permute.xlu1 %3412 }
 0x6e4   : > { %v3421_v53 = vmul.f32 %v5030_v6, %v3413_v52  ;;  %v5086_v6 = vld [vmem:[%s9039_s5 + $0x2d0] sm:$0xff]  ;;  %v3771_v52 = vmul.f32 %v5079_v32, %v8160_v37  ;;  %v5013_v37 = vld [vmem:[%s9039_s5 + $0x88] sm:$0xff]  ;;  %v3921_v32 = vmul.f32 %v5100_v24, %v8173_v63  ;;  %v5055_v24 = vld [vmem:[%s9039_s5 + $0x1d8] sm:$0xff] }
 0x6e5   : > { %v5114_v63 = vld [vmem:[%s9039_s5 + $0x3b0] sm:$0xff] }
 0x6e6   : > { %v3428_v57 = vadd.f32 %v3421_v53, %v3378_v33  ;;  %v5136_v33 = vld [vmem:[%s9039_s5 + $0x460] sm:$0xff] }
 0x6e7   : > { %v3963_v23 = vpop.permute.xlu2 %3962 }
 0x6e8   : > { %v3478_v14 = vadd.f32 %v3471_v16, %v3428_v57  ;;  %v3821_v57 = vmul.f32 %v5086_v6, %v3813_v45 }
 0x6e9   : > { %5459 = vset.pattern.permute.xlu1 %v9206_v19 }
 0x6ea   : > { %4350 = vperm.xlu2 %5457, %v7660_v3   ;;  %4346 = vperm.xlu1 %5459, %v7648_v43   ;;  %v3528_v27 = vadd.f32 %v3521_v47, %v3478_v14 }
 0x6ec   : > { %v3563_v51 = vpop.permute.xlu1 %3562 }
 0x6ed   : > { %v3571_v60 = vmul.f32 %v5051_v56, %v3563_v51  ;;  %v9207_v56 = vmov 24  }
 0x6ef   : > { %v3578_v46 = vadd.f32 %v3571_v60, %v3528_v27  ;;  %v3218_v27 = vmul.f32 %v8056_v5, %v3176_v50  ;;  %v5027_v60 = vld [vmem:[%s9039_s5 + $0xf8] sm:$0xff] }
 0x6f0   : > { %v8473_v36 = vpop.permute.xlu2 %4112 }
 0x6f1   : > { %v3628_v20 = vadd.f32 %v3621_v59, %v3578_v46  ;;  %v3275_v51 = vadd.f32 %v3268_v49, %v3218_v27  ;;  %v3318_v46 = vmul.f32 %v5013_v37, %v8014_v10  ;;  %v5034_v10 = vld [vmem:[%s9039_s5 + $0x130] sm:$0xff] }
 0x6f2   : > { %4358 = vperm.xlu2 %5457, %v7683_v41   ;;  %4354 = vperm.xlu1 %5459, %v7673_v30  }
 0x6f3   : > { %v3678_v18 = vadd.f32 %v3671_v1, %v3628_v20  ;;  %v5107_v20 = vld [vmem:[%s9039_s5 + $0x378] sm:$0xff] }
 0x6f4   : > { %v3971_v6 = vmul.f32 %v5107_v20, %v3963_v23  ;;  %v3468_v23 = vmul.f32 %v5034_v10, %v8028_v2  ;;  %v5128_v2 = vld [vmem:[%s9039_s5 + $0x420] sm:$0xff] }
 0x6f5   : > { %v3713_v19 = vpop.permute.xlu1 %3712 }
 0x6f6   : > { %v3721_v0 = vmul.f32 %v5072_v13, %v3713_v19  ;;  %v3325_v13 = vadd.f32 %v3318_v46, %v3275_v51 }
 0x6f8   : > { %v3728_v53 = vadd.f32 %v3721_v0, %v3678_v18  ;;  %v3418_v18 = vmul.f32 %v5027_v60, %v8092_v54  ;;  %v5041_v54 = vld [vmem:[%s9039_s5 + $0x168] sm:$0xff] }
 0x6f9   : > { %v4189_v16 = vpop.permute.xlu2 %4188 }
 0x6fa   : > { %v3778_v47 = vadd.f32 %v3771_v52, %v3728_v53  ;;  %v4215_v14 = vmul.f32 %v5136_v33, %v4189_v16  ;;  %5461 = vset.pattern.permute.xlu2 %v9207_v56  ;;  %5460 = vset.pattern.permute.xlu1 %v9207_v56  ;;  %v5048_v52 = vld [vmem:[%s9039_s5 + $0x1a0] sm:$0xff]  ;;  %v5121_v53 = vld [vmem:[%s9039_s5 + $0x3e8] sm:$0xff] }
 0x6fb   : > { %4392 = vperm.xlu2 %5461, %v7630_v21   ;;  %4388 = vperm.xlu1 %5460, %v7616_v12   ;;  %v5141_v16 = vld [vmem:[%s9039_s5 + $0x488] sm:$0xff]  ;;  %v3568_v27 = vmul.f32 %v5048_v52, %v8115_v11  ;;  %v4071_v37 = vmul.f32 %v5121_v53, %v8184_v35  ;;  %v5062_v35 = vld [vmem:[%s9039_s5 + $0x210] sm:$0xff] }
 0x6fc   : > { %v8509_v45 = vadd.f32 %v4215_v14, %v7863_v55  ;;  %v3828_v5 = vadd.f32 %v3821_v57, %v3778_v47  ;;  %v3368_v55 = vmul.f32 %v5020_v29, %v8080_v8  ;;  %v3518_v57 = vmul.f32 %v5041_v54, %v8104_v26  ;;  %v5138_v53 = vld [vmem:[%s9039_s5 + $0x470] sm:$0xff] }
 0x6fd   : > { %v4121_v26 = vmul.f32 %v5128_v2, %v8473_v36  ;;  %v5069_v36 = vld [vmem:[%s9039_s5 + $0x248] sm:$0xff] }
 0x6fe   : > { %v3863_v59 = vpop.permute.xlu1 %3862  ;;  %v3375_v0 = vadd.f32 %v3368_v55, %v3325_v13  ;;  %v3618_v55 = vmul.f32 %v5055_v24, %v8047_v61  ;;  %v5144_v13 = vld [vmem:[%s9039_s5 + $0x4a0] sm:$0xff]  ;;  %v9208_v61 = vmov 25   ;;  %v5149_v24 = vld [vmem:[%s9039_s5 + $0x4c8] sm:$0xff] }
 0x6ff   : > { %v3871_v1 = vmul.f32 %v5093_v28, %v3863_v59  ;;  %v5135_v59 = vld [vmem:[%s9039_s5 + $0x458] sm:$0xff] }
 0x700   : > { %v3425_v8 = vadd.f32 %v3418_v18, %v3375_v0  ;;  %v3668_v18 = vmul.f32 %v5062_v35, %v8127_v39  ;;  %v3718_v0 = vmul.f32 %v5069_v36, %v8138_v17  ;;  %v5131_v39 = vld [vmem:[%s9039_s5 + $0x438] sm:$0xff] }
 0x701   : > { %v3878_v19 = vadd.f32 %v3871_v1, %v3828_v5  ;;  %v8527_v48 = vpop.permute.xlu2 %4200  ;;  %v5142_v1 = vld [vmem:[%s9039_s5 + $0x490] sm:$0xff]  ;;  %v5111_v35 = vld [vmem:[%s9039_s5 + $0x398] sm:$0xff] }
 0x702   : > { %v3475_v14 = vadd.f32 %v3468_v23, %v3425_v8  ;;  %v5083_v23 = vld [vmem:[%s9039_s5 + $0x2b8] sm:$0xff] }
 0x703   : > { %v3928_v33 = vadd.f32 %v3921_v32, %v3878_v19  ;;  %4404 = vperm.xlu2 %5461, %v7673_v30   ;;  %4400 = vperm.xlu1 %5460, %v7660_v3  }
 0x704   : > { %v3525_v5 = vadd.f32 %v3518_v57, %v3475_v14  ;;  %v3818_v57 = vmul.f32 %v5083_v23, %v8150_v58  ;;  %v5097_v58 = vld [vmem:[%s9039_s5 + $0x328] sm:$0xff] }
 0x705   : > { %v3978_v50 = vadd.f32 %v3971_v6, %v3928_v33 }
 0x706   : > { %v3575_v11 = vadd.f32 %v3568_v27, %v3525_v5 }
 0x707   : > { %v4013_v49 = vpop.permute.xlu1 %4012 }
 0x708   : > { %v4021_v47 = vmul.f32 %v5114_v63, %v4013_v49  ;;  %v3625_v19 = vadd.f32 %v3618_v55, %v3575_v11  ;;  %v4167_v49 = vmul.f32 %v5131_v39, %v7994_v40  ;;  %v3918_v11 = vmul.f32 %v5097_v58, %v8071_v62  ;;  %v9211_v39 = vld [vmem:[#allocation30_spill] sm:$0xff] }
 0x709   : > { %v4209_v56 = vpop.permute.xlu2 %4208 }
 0x70a   : > { %v4028_v29 = vadd.f32 %v4021_v47, %v3978_v50  ;;  %v4220_v28 = vmul.f32 %v5141_v16, %v4209_v56  ;;  %v3675_v54 = vadd.f32 %v3668_v18, %v3625_v19  ;;  %v5076_v50 = vld [vmem:[%s9039_s5 + $0x280] sm:$0xff]  ;;  %v5145_v47 = vld [vmem:[%s9039_s5 + $0x4a8] sm:$0xff]  ;;  %v4174_v56 = vadd.f32 %v4167_v49, %v8045_v22 }
 0x70b   : > { %4412 = vperm.xlu2 %5461, %v7690_v15   ;;  %4408 = vperm.xlu1 %5460, %v7683_v41   ;;  %v3768_v16 = vmul.f32 %v5076_v50, %v8059_v7  ;;  %v5104_v22 = vld [vmem:[%s9039_s5 + $0x360] sm:$0xff]  ;;  %v9210_v19 = vmov 26   ;;  %v5150_v50 = vld [vmem:[%s9039_s5 + $0x4d0] sm:$0xff] }
 0x70c   : > { %v4078_v51 = vadd.f32 %v4071_v37, %v4028_v29  ;;  %v8560_v60 = vadd.f32 %v4220_v28, %v8430_v4  ;;  %v4213_v4 = vpop.permute.xlu0 %4212  ;;  %v3725_v52 = vadd.f32 %v3718_v0, %v3675_v54  ;;  %v3968_v36 = vmul.f32 %v5104_v22, %v8175_v31  ;;  %v5118_v31 = vld [vmem:[%s9039_s5 + $0x3d0] sm:$0xff] }
 0x70d   : > { %v4221_v33 = vmul.f32 %v5142_v1, %v4213_v4  ;;  %v4068_v54 = vmul.f32 %v5118_v31, %v9211_v39 }
 0x70e   : > { %v4128_v46 = vadd.f32 %v4121_v26, %v4078_v51  ;;  %v3775_v29 = vadd.f32 %v3768_v16, %v3725_v52 }
 0x710   : > { %v4163_v20 = vpop.permute.xlu1 %4162  ;;  %v3825_v7 = vadd.f32 %v3818_v57, %v3775_v29 }
 0x711   : > { %v4171_v32 = vmul.f32 %v5135_v59, %v4163_v20  ;;  %v5147_v59 = vld [vmem:[%s9039_s5 + $0x4b8] sm:$0xff] }
 0x712   : > { %v4243_v6 = vpop.permute.xlu2 %4242 }
 0x713   : > { %v4178_v10 = vadd.f32 %v4171_v32, %v4128_v46  ;;  %v4266_v8 = vmul.f32 %v5144_v13, %v4243_v6  ;;  %5465 = vset.pattern.permute.xlu2 %v9208_v61  ;;  %5464 = vset.pattern.permute.xlu1 %v9208_v61  ;;  %v9209_v13 = vld [vmem:[#allocation28_spill] sm:$0xff]  ;;  %v5152_v61 = vld [vmem:[%s9039_s5 + $0x4e0] sm:$0xff] }
 0x714   : > { %4446 = vperm.xlu2 %5465, %v7648_v43   ;;  %4442 = vperm.xlu1 %5464, %v7630_v21   ;;  %v4247_v14 = vpop.permute.xlu0 %4246  ;;  %v4018_v18 = vmul.f32 %v5111_v35, %v9209_v13  ;;  %v5148_v35 = vld [vmem:[%s9039_s5 + $0x4c0] sm:$0xff] }
 0x715   : > { %v8591_v63 = vadd.f32 %v4266_v8, %v8222_v34  ;;  %v4228_v17 = vadd.f32 %v4221_v33, %v4178_v10  ;;  %v5090_v34 = vld [vmem:[%s9039_s5 + $0x2f0] sm:$0xff]  ;;  %v4267_v28 = vmul.f32 %v5145_v47, %v4247_v14  ;;  %v5125_v8 = vld [vmem:[%s9039_s5 + $0x408] sm:$0xff]  ;;  %v5139_v47 = vld [vmem:[%s9039_s5 + $0x478] sm:$0xff] }
 0x716   : > { %v3868_v40 = vmul.f32 %v5090_v34, %v8163_v25  ;;  %v5140_v25 = vld [vmem:[%s9039_s5 + $0x480] sm:$0xff] }
 0x718   : > { %v3875_v51 = vadd.f32 %v3868_v40, %v3825_v7  ;;  %v5146_v7 = vld [vmem:[%s9039_s5 + $0x4b0] sm:$0xff] }
 0x719   : > { %v4197_v2 = vpop.permute.xlu1 %4196 }
 0x71a   : > { %v4217_v27 = vmul.f32 %v5138_v53, %v4197_v2  ;;  %v4255_v37 = vpop.permute.xlu2 %4254  ;;  %v3925_v1 = vadd.f32 %v3918_v11, %v3875_v51  ;;  %v9212_v53 = vld [vmem:[#allocation12_spill] sm:$0xff]  ;;  %v9213_v2 = vld [vmem:[#allocation33_spill] sm:$0xff] }
 0x71b   : > { %v4269_v32 = vmul.f32 %v5147_v59, %v4255_v37  ;;  %v4118_v49 = vmul.f32 %v5125_v8, %v9212_v53  ;;  %v5154_v51 = vld [vmem:[%s9039_s5 + $0x4f0] sm:$0xff] }
 0x71c   : > { %v4224_v5 = vadd.f32 %v4217_v27, %v4174_v56  ;;  %4454 = vperm.xlu2 %5465, %v7673_v30   ;;  %4450 = vperm.xlu1 %5464, %v7660_v3   ;;  %v3975_v6 = vadd.f32 %v3968_v36, %v3925_v1  ;;  %v4289_v23 = vpop.permute.xlu0 %4288 }
 0x71d   : > { %v4315_v27 = vmul.f32 %v5150_v50, %v4289_v23  ;;  %v5160_v50 = vld [vmem:[%s9039_s5 + $0x520] sm:$0xff] }
 0x71e   : > { %v4274_v26 = vadd.f32 %v4267_v28, %v4224_v5  ;;  %v4025_v10 = vadd.f32 %v4018_v18, %v3975_v6  ;;  %v4218_v28 = vmul.f32 %v5139_v47, %v8527_v48  ;;  %v5151_v6 = vld [vmem:[%s9039_s5 + $0x4d8] sm:$0xff]  ;;  %v5156_v47 = vld [vmem:[%s9039_s5 + $0x500] sm:$0xff] }
 0x720   : > { %v4075_v57 = vadd.f32 %v4068_v54, %v4025_v10  ;;  %v5153_v54 = vld [vmem:[%s9039_s5 + $0x4e8] sm:$0xff] }
 0x721   : > { %v4205_v46 = vpop.permute.xlu1 %4204 }
 0x722   : > { %v4219_v4 = vmul.f32 %v5140_v25, %v4205_v46  ;;  %v4263_v55 = vpop.permute.xlu2 %4262  ;;  %v4125_v40 = vadd.f32 %v4118_v49, %v4075_v57  ;;  %v5155_v46 = vld [vmem:[%s9039_s5 + $0x4f8] sm:$0xff] }
 0x723   : > { %v4271_v20 = vmul.f32 %v5149_v24, %v4263_v55 }
 0x724   : > { %v4226_v62 = vadd.f32 %v4219_v4, %v8346_v38  ;;  %5466 = vset.pattern.permute.xlu2 %v9210_v19  ;;  %4462 = vperm.xlu1 %5464, %v7690_v15   ;;  %v5143_v38 = vld [vmem:[%s9039_s5 + $0x498] sm:$0xff]  ;;  %v4309_v59 = vpop.permute.xlu0 %4308  ;;  %v5157_v4 = vld [vmem:[%s9039_s5 + $0x508] sm:$0xff] }
 0x725   : > { %v8639_v0 = vadd.f32 %v4271_v20, %v4228_v17  ;;  %4488 = vperm.xlu2 %5466, %v7616_v12   ;;  %v5132_v17 = vld [vmem:[%s9039_s5 + $0x440] sm:$0xff]  ;;  %v4320_v20 = vmul.f32 %v5155_v46, %v4309_v59 }
 0x726   : > { %v4276_v33 = vadd.f32 %v4269_v32, %v4226_v62  ;;  %v4168_v56 = vmul.f32 %v5132_v17, %v9213_v2  ;;  %v9214_v32 = vmov 27   ;;  %v5162_v17 = vld [vmem:[%s9039_s5 + $0x530] sm:$0xff]  ;;  %v5163_v2 = vld [vmem:[%s9039_s5 + $0x538] sm:$0xff] }
 0x728   : > { %v4175_v58 = vadd.f32 %v4168_v56, %v4125_v40 }
 0x72a   : > { %v4239_v52 = vpop.permute.xlu1 %4238  ;;  %v4225_v22 = vadd.f32 %v4218_v28, %v4175_v58  ;;  %v9215_v58 = vmov 28  }
 0x72b   : > { %v4265_v34 = vmul.f32 %v5143_v38, %v4239_v52  ;;  %v4297_v16 = vpop.permute.xlu2 %4296 }
 0x72c   : > { %v4317_v14 = vmul.f32 %v5152_v61, %v4297_v16  ;;  %5468 = vset.pattern.permute.xlu1 %v9210_v19 }
 0x72d   : > { %v4272_v37 = vadd.f32 %v4265_v34, %v8509_v45  ;;  %4500 = vperm.xlu2 %5466, %v7660_v3   ;;  %4496 = vperm.xlu1 %5468, %v7648_v43  }
 0x72e   : > { %v8670_v29 = vadd.f32 %v4317_v14, %v4274_v26 }
 0x72f   : > { %v4322_v5 = vadd.f32 %v4315_v27, %v4272_v37  ;;  %v5165_v27 = vld [vmem:[%s9039_s5 + $0x548] sm:$0xff] }
 0x732   : > { %v4251_v45 = vpop.permute.xlu1 %4250 }
 0x733   : > { %v4268_v25 = vmul.f32 %v5146_v7, %v4251_v45  ;;  %v4305_v24 = vpop.permute.xlu2 %4304 }
 0x734   : > { %v4319_v11 = vmul.f32 %v5154_v51, %v4305_v24 }
 0x735   : > { %v4275_v26 = vadd.f32 %v4268_v25, %v4225_v22  ;;  %4508 = vperm.xlu2 %5466, %v7683_v41   ;;  %4504 = vperm.xlu1 %5468, %v7673_v30   ;;  %v5159_v22 = vld [vmem:[%s9039_s5 + $0x518] sm:$0xff] }
 0x736   : > { %v8681_v48 = vadd.f32 %v4319_v11, %v4276_v33  ;;  %v4343_v33 = vpop.permute.xlu0 %4342 }
 0x73a   : > { %v4259_v36 = vpop.permute.xlu1 %4258 }
 0x73b   : > { %v4270_v55 = vmul.f32 %v5148_v35, %v4259_v36  ;;  %v5161_v36 = vld [vmem:[%s9039_s5 + $0x528] sm:$0xff] }
 0x73c   : > { %v4339_v1 = vpop.permute.xlu2 %4338 }
 0x73d   : > { %v4277_v13 = vadd.f32 %v4270_v55, %v8560_v60  ;;  %v4365_v18 = vmul.f32 %v5157_v4, %v4339_v1  ;;  %5470 = vset.pattern.permute.xlu2 %v9214_v32  ;;  %5469 = vset.pattern.permute.xlu1 %v9214_v32  ;;  %v5158_v60 = vld [vmem:[%s9039_s5 + $0x510] sm:$0xff]  ;;  %v5168_v55 = vld [vmem:[%s9039_s5 + $0x560] sm:$0xff] }
 0x73e   : > { %4542 = vperm.xlu2 %5470, %v7630_v21   ;;  %4538 = vperm.xlu1 %5469, %v7616_v12   ;;  %v4366_v38 = vmul.f32 %v5158_v60, %v4343_v33  ;;  %v4363_v14 = vpop.permute.xlu0 %4362  ;;  %v5170_v4 = vld [vmem:[%s9039_s5 + $0x570] sm:$0xff]  ;;  %v5164_v60 = vld [vmem:[%s9039_s5 + $0x540] sm:$0xff]  ;;  %v5173_v33 = vld [vmem:[%s9039_s5 + $0x588] sm:$0xff] }
 0x73f   : > { %v8697_v62 = vadd.f32 %v4365_v18, %v4322_v5  ;;  %v4327_v19 = vadd.f32 %v4320_v20, %v4277_v13  ;;  %v4371_v28 = vmul.f32 %v5163_v2, %v4363_v14  ;;  %v5176_v14 = vld [vmem:[%s9039_s5 + $0x5a0] sm:$0xff] }
 0x743   : > { %v4293_v31 = vpop.permute.xlu1 %4292 }
 0x744   : > { %v4316_v10 = vmul.f32 %v5151_v6, %v4293_v31  ;;  %v4351_v8 = vpop.permute.xlu2 %4350 }
 0x745   : > { %v4368_v49 = vmul.f32 %v5160_v50, %v4351_v8 }
 0x746   : > { %v4323_v61 = vadd.f32 %v4316_v10, %v8591_v63  ;;  %4554 = vperm.xlu2 %5470, %v7673_v30   ;;  %4550 = vperm.xlu1 %5469, %v7660_v3   ;;  %v4397_v25 = vpop.permute.xlu0 %4396 }
 0x748   : > { %v4373_v39 = vadd.f32 %v4366_v38, %v4323_v61 }
 0x74b   : > { %v4301_v23 = vpop.permute.xlu1 %4300 }
 0x74c   : > { %v4318_v52 = vmul.f32 %v5153_v54, %v4301_v23  ;;  %v4359_v63 = vpop.permute.xlu2 %4358  ;;  %v5167_v23 = vld [vmem:[%s9039_s5 + $0x558] sm:$0xff] }
 0x74d   : > { %v4370_v53 = vmul.f32 %v5162_v17, %v4359_v63 }
 0x74e   : > { %v4325_v34 = vadd.f32 %v4318_v52, %v4275_v26  ;;  %4562 = vperm.xlu2 %5470, %v7690_v15   ;;  %4558 = vperm.xlu1 %5469, %v7683_v41   ;;  %v4439_v31 = vpop.permute.xlu0 %4438  ;;  %v5175_v52 = vld [vmem:[%s9039_s5 + $0x598] sm:$0xff] }
 0x74f   : > { %v8719_v16 = vadd.f32 %v4370_v53, %v4327_v19 }
 0x750   : > { %v8721_v57 = vadd.f32 %v4368_v49, %v4325_v34 }
 0x753   : > { %v4313_v56 = vpop.permute.xlu1 %4312 }
 0x754   : > { %v4321_v37 = vmul.f32 %v5156_v47, %v4313_v56  ;;  %v5169_v47 = vld [vmem:[%s9039_s5 + $0x568] sm:$0xff] }
 0x755   : > { %v4393_v40 = vpop.permute.xlu2 %4392 }
 0x756   : > { %v4328_v5 = vadd.f32 %v4321_v37, %v8639_v0  ;;  %v4416_v7 = vmul.f32 %v5165_v27, %v4393_v40  ;;  %5474 = vset.pattern.permute.xlu2 %v9215_v58  ;;  %5473 = vset.pattern.permute.xlu1 %v9215_v58  ;;  %v5166_v0 = vld [vmem:[%s9039_s5 + $0x550] sm:$0xff]  ;;  %v4459_v2 = vpop.permute.xlu0 %4458  ;;  %v5172_v58 = vld [vmem:[%s9039_s5 + $0x580] sm:$0xff] }
 0x757   : > { %4596 = vperm.xlu2 %5474, %v7648_v43   ;;  %4592 = vperm.xlu1 %5473, %v7630_v21   ;;  %v4417_v35 = vmul.f32 %v5166_v0, %v4397_v25  ;;  %v4470_v40 = vmul.f32 %v5176_v14, %v4459_v2  ;;  %v5174_v25 = vld [vmem:[%s9039_s5 + $0x590] sm:$0xff] }
 0x758   : > { %v8737_v51 = vadd.f32 %v4416_v7, %v4373_v39  ;;  %v4378_v45 = vadd.f32 %v4371_v28, %v4328_v5 }
 0x75c   : > { %v4347_v24 = vpop.permute.xlu1 %4346 }
 0x75d   : > { %v4367_v11 = vmul.f32 %v5159_v22, %v4347_v24  ;;  %v4405_v26 = vpop.permute.xlu2 %4404  ;;  %v5183_v24 = vld [vmem:[%s9039_s5 + $0x5d8] sm:$0xff] }
 0x75e   : > { %v4419_v18 = vmul.f32 %v5168_v55, %v4405_v26  ;;  %v4493_v55 = vpop.permute.xlu0 %4492 }
 0x75f   : > { %v4374_v59 = vadd.f32 %v4367_v11, %v8670_v29  ;;  %4604 = vperm.xlu2 %5474, %v7673_v30   ;;  %4600 = vperm.xlu1 %5473, %v7660_v3  }
 0x761   : > { %v4424_v46 = vadd.f32 %v4417_v35, %v4374_v59 }
 0x764   : > { %v4355_v1 = vpop.permute.xlu1 %4354 }
 0x765   : > { %v4369_v20 = vmul.f32 %v5161_v36, %v4355_v1  ;;  %v4413_v29 = vpop.permute.xlu2 %4412  ;;  %v5177_v1 = vld [vmem:[%s9039_s5 + $0x5a8] sm:$0xff] }
 0x766   : > { %v4421_v13 = vmul.f32 %v5170_v4, %v4413_v29  ;;  %v5179_v4 = vld [vmem:[%s9039_s5 + $0x5b8] sm:$0xff]  ;;  %v5186_v29 = vld [vmem:[%s9039_s5 + $0x5f0] sm:$0xff] }
 0x767   : > { %v4376_v32 = vadd.f32 %v4369_v20, %v8681_v48  ;;  %5475 = vset.pattern.permute.xlu2 %v5594_v9  ;;  %4612 = vperm.xlu1 %5473, %v7690_v15   ;;  %v5171_v48 = vld [vmem:[%s9039_s5 + $0x578] sm:$0xff] }
 0x768   : > { %v8760_v19 = vadd.f32 %v4421_v13, %v4378_v45  ;;  %4638 = vperm.xlu2 %5475, %v7616_v12   ;;  %v4465_v39 = vmul.f32 %v5171_v48, %v4439_v31  ;;  %v5180_v48 = vld [vmem:[%s9039_s5 + $0x5c0] sm:$0xff] }
 0x769   : > { %v4426_v6 = vadd.f32 %v4419_v18, %v4376_v32 }
 0x76d   : > { %v4389_v10 = vpop.permute.xlu1 %4388 }
 0x76e   : > { %v4415_v8 = vmul.f32 %v5164_v60, %v4389_v10  ;;  %v4447_v38 = vpop.permute.xlu2 %4446 }
 0x76f   : > { %v4467_v61 = vmul.f32 %v5173_v33, %v4447_v38  ;;  %5477 = vset.pattern.permute.xlu1 %v5594_v9  ;;  %v5184_v38 = vld [vmem:[%s9039_s5 + $0x5e0] sm:$0xff] }
 0x770   : > { %v4422_v54 = vadd.f32 %v4415_v8, %v8697_v62  ;;  %4650 = vperm.xlu2 %5475, %v7660_v3   ;;  %4646 = vperm.xlu1 %5477, %v7648_v43  }
 0x771   : > { %v8776_v17 = vadd.f32 %v4467_v61, %v4424_v46  ;;  %v4513_v61 = vpop.permute.xlu0 %4512 }
 0x772   : > { %v4472_v50 = vadd.f32 %v4465_v39, %v4422_v54  ;;  %v5191_v39 = vld [vmem:[%s9039_s5 + $0x618] sm:$0xff]  ;;  %v4521_v54 = vmul.f32 %v5184_v38, %v4513_v61 }
 0x775   : > { %v4401_v63 = vpop.permute.xlu1 %4400 }
 0x776   : > { %v4418_v9 = vmul.f32 %v5167_v23, %v4401_v63  ;;  %v4455_v53 = vpop.permute.xlu2 %4454 }
 0x777   : > { %v4469_v49 = vmul.f32 %v5175_v52, %v4455_v53 }
 0x778   : > { %v4425_v62 = vadd.f32 %v4418_v9, %v8721_v57  ;;  %4658 = vperm.xlu2 %5475, %v7683_v41   ;;  %4654 = vperm.xlu1 %5477, %v7673_v30   ;;  %v5178_v57 = vld [vmem:[%s9039_s5 + $0x5b0] sm:$0xff] }
 0x779   : > { %v8787_v34 = vadd.f32 %v4469_v49, %v4426_v6 }
 0x77d   : > { %v4409_v56 = vpop.permute.xlu1 %4408 }
 0x77e   : > { %v4420_v27 = vmul.f32 %v5169_v47, %v4409_v56 }
 0x77f   : > { %v4489_v37 = vpop.permute.xlu2 %4488 }
 0x780   : > { %v4427_v30 = vadd.f32 %v4420_v27, %v8719_v16  ;;  %v4515_v28 = vmul.f32 %v5178_v57, %v4489_v37  ;;  %5479 = vset.pattern.permute.xlu2 %v5595_v42  ;;  %5478 = vset.pattern.permute.xlu1 %v5595_v42 }
 0x781   : > { %4692 = vperm.xlu2 %5479, %v7630_v21   ;;  %4688 = vperm.xlu1 %5478, %v7616_v12  }
 0x782   : > { %v8803_v5 = vadd.f32 %v4515_v28, %v4472_v50  ;;  %v4477_v7 = vadd.f32 %v4470_v40, %v4427_v30 }
 0x786   : > { %v4443_v45 = vpop.permute.xlu1 %4442 }
 0x787   : > { %v4466_v22 = vmul.f32 %v5172_v58, %v4443_v45  ;;  %v4501_v0 = vpop.permute.xlu2 %4500  ;;  %v5193_v58 = vld [vmem:[%s9039_s5 + $0x628] sm:$0xff] }
 0x789   : > { %v4473_v16 = vadd.f32 %v4466_v22, %v8737_v51  ;;  %5482 = vset.pattern.permute.xlu2 %v5596_v44  ;;  %5481 = vset.pattern.permute.xlu1 %v5596_v44  ;;  %v5181_v51 = vld [vmem:[%s9039_s5 + $0x5c8] sm:$0xff] }
 0x78a   : > { %4742 = vperm.xlu2 %5482, %v7630_v21   ;;  %4738 = vperm.xlu1 %5481, %v7616_v12   ;;  %v4518_v46 = vmul.f32 %v5181_v51, %v4501_v0 }
 0x78e   : > { %v4451_v11 = vpop.permute.xlu1 %4450 }
 0x78f   : > { %v4468_v26 = vmul.f32 %v5174_v25, %v4451_v11  ;;  %v4509_v35 = vpop.permute.xlu2 %4508 }
 0x790   : > { %v4520_v59 = vmul.f32 %v5183_v24, %v4509_v35 }
 0x791   : > { %v4475_v21 = vadd.f32 %v4468_v26, %v4425_v62  ;;  %v5185_v62 = vld [vmem:[%s9039_s5 + $0x5e8] sm:$0xff] }
 0x792   : > { %v4527_v36 = vadd.f32 %v4520_v59, %v4477_v7  ;;  %4746 = vperm.xlu2 %5482, %v7648_v43   ;;  %5483 = vset.pattern.permute.xlu1 %v5595_v42  ;;  %v4516_v43 = vmul.f32 %v5179_v4, %v4493_v55  ;;  %v4547_v7 = vpop.permute.xlu0 %4546  ;;  %v5187_v4 = vld [vmem:[%s9039_s5 + $0x5f8] sm:$0xff]  ;;  %v5194_v55 = vld [vmem:[%s9039_s5 + $0x630] sm:$0xff] }
 0x793   : > { %4700 = vperm.xlu1 %5483, %v7660_v3   ;;  %v4525_v12 = vadd.f32 %v4518_v46, %v4475_v21 }
 0x794   : > { %v4523_v6 = vadd.f32 %v4516_v43, %v4473_v16 }
 0x796   : > { %v4463_v20 = vpop.permute.xlu1 %4462 }
 0x797   : > { %v4471_v13 = vmul.f32 %v5177_v1, %v4463_v20  ;;  %v5201_v1 = vld [vmem:[%s9039_s5 + $0x668] sm:$0xff]  ;;  %v4567_v20 = vmul.f32 %v5187_v4, %v4547_v7 }
 0x798   : > { %v4543_v18 = vpop.permute.xlu2 %4542 }
 0x799   : > { %v4478_v32 = vadd.f32 %v4471_v13, %v8760_v19  ;;  %v4566_v60 = vmul.f32 %v5186_v29, %v4543_v18  ;;  %v5192_v29 = vld [vmem:[%s9039_s5 + $0x620] sm:$0xff] }
 0x79a   : > { %5485 = vset.pattern.permute.xlu2 %v5595_v42  ;;  %v4589_v16 = vpop.permute.xlu0 %4588  ;;  %v5200_v18 = vld [vmem:[%s9039_s5 + $0x660] sm:$0xff] }
 0x79b   : > { %v4573_v33 = vadd.f32 %v4566_v60, %v4523_v6  ;;  %4708 = vperm.xlu2 %5485, %v7683_v41   ;;  %5484 = vset.pattern.permute.xlu1 %v5596_v44  ;;  %v4528_v52 = vadd.f32 %v4521_v54, %v4478_v32  ;;  %v5199_v32 = vld [vmem:[%s9039_s5 + $0x658] sm:$0xff]  ;;  %v5208_v54 = vld [vmem:[%s9039_s5 + $0x6a0] sm:$0xff] }
 0x79c   : > { %4750 = vperm.xlu1 %5484, %v7660_v3   ;;  %v5182_v3 = vld [vmem:[%s9039_s5 + $0x5d0] sm:$0xff]  ;;  %v5207_v6 = vld [vmem:[%s9039_s5 + $0x698] sm:$0xff] }
 0x79f   : > { %v4497_v31 = vpop.permute.xlu1 %4496 }
 0x7a0   : > { %v4517_v10 = vmul.f32 %v5180_v48, %v4497_v31  ;;  %v4555_v8 = vpop.permute.xlu2 %4554  ;;  %v4615_v48 = vmul.f32 %v5192_v29, %v4589_v16  ;;  %v5214_v31 = vld [vmem:[%s9039_s5 + $0x6d0] sm:$0xff] }
 0x7a2   : > { %v8843_v19 = vadd.f32 %v4517_v10, %v8776_v17  ;;  %v5189_v17 = vld [vmem:[%s9039_s5 + $0x608] sm:$0xff]  ;;  %v8889_v51 = vpop.permute.xlu0 %4608  ;;  %v5206_v10 = vld [vmem:[%s9039_s5 + $0x690] sm:$0xff] }
 0x7a3   : > { %5488 = vset.pattern.permute.xlu2 %v5596_v44  ;;  %v4569_v63 = vmul.f32 %v5189_v17, %v4555_v8  ;;  %v5215_v17 = vld [vmem:[%s9039_s5 + $0x6d8] sm:$0xff] }
 0x7a4   : > { %4758 = vperm.xlu2 %5488, %v7683_v41   ;;  %5487 = vset.pattern.permute.xlu1 %v5595_v42  ;;  %v4574_v60 = vadd.f32 %v4567_v20, %v8843_v19  ;;  %v5210_v20 = vld [vmem:[%s9039_s5 + $0x6b0] sm:$0xff] }
 0x7a5   : > { %4712 = vperm.xlu1 %5487, %v7690_v15  }
 0x7a7   : > { %v4505_v50 = vpop.permute.xlu1 %4504 }
 0x7a8   : > { %v4519_v23 = vmul.f32 %v5182_v3, %v4505_v50  ;;  %v4563_v41 = vpop.permute.xlu2 %4562 }
 0x7a9   : > { %v4571_v42 = vmul.f32 %v5191_v39, %v4563_v41 }
 0x7aa   : > { %v4526_v9 = vadd.f32 %v4519_v23, %v8787_v34  ;;  %v5188_v34 = vld [vmem:[%s9039_s5 + $0x600] sm:$0xff]  ;;  %v4643_v59 = vpop.permute.xlu0 %4642 }
 0x7ab   : > { %v8862_v53 = vadd.f32 %v4571_v42, %v4528_v52  ;;  %v4666_v8 = vmul.f32 %v5200_v18, %v4643_v59 }
 0x7ac   : > { %v8864_v49 = vadd.f32 %v4569_v63, %v4526_v9  ;;  %v5213_v63 = vld [vmem:[%s9039_s5 + $0x6c8] sm:$0xff] }
 0x7ad   : > { %5489 = vset.pattern.permute.xlu1 %v5596_v44 }
 0x7ae   : > { %4762 = vperm.xlu1 %5489, %v7690_v15   ;;  %v5190_v15 = vld [vmem:[%s9039_s5 + $0x610] sm:$0xff] }
 0x7b0   : > { %v4539_v47 = vpop.permute.xlu1 %4538 }
 0x7b1   : > { %v4565_v14 = vmul.f32 %v5185_v62, %v4539_v47  ;;  %v4597_v2 = vpop.permute.xlu2 %4596 }
 0x7b2   : > { %v4617_v43 = vmul.f32 %v5194_v55, %v4597_v2 }
 0x7b3   : > { %v4572_v56 = vadd.f32 %v4565_v14, %v8803_v5 }
 0x7b4   : > { %v4624_v61 = vadd.f32 %v4617_v43, %v4574_v60 }
 0x7b5   : > { %v4622_v19 = vadd.f32 %v4615_v48, %v4572_v56 }
 0x7b8   : > { %v4551_v57 = vpop.permute.xlu1 %4550 }
 0x7b9   : > { %v4568_v27 = vmul.f32 %v5188_v34, %v4551_v57  ;;  %v8877_v44 = vpop.permute.xlu2 %4604 }
 0x7bb   : > { %v8875_v37 = vadd.f32 %v4568_v27, %v4525_v12 }
 0x7c0   : > { %v4559_v40 = vpop.permute.xlu1 %4558 }
 0x7c1   : > { %v4570_v30 = vmul.f32 %v5190_v15, %v4559_v40 }
 0x7c2   : > { %v4639_v5 = vpop.permute.xlu2 %4638 }
 0x7c3   : > { %v8882_v28 = vadd.f32 %v4570_v30, %v4527_v36  ;;  %v8895_v36 = vpop.permute.xlu0 %4662  ;;  %v4665_v3 = vmul.f32 %v5199_v32, %v4639_v5  ;;  %v5196_v30 = vld [vmem:[%s9039_s5 + $0x640] sm:$0xff] }
 0x7c5   : > { %v4672_v62 = vadd.f32 %v4665_v3, %v4622_v19 }
 0x7c9   : > { %v4593_v45 = vpop.permute.xlu1 %4592 }
 0x7ca   : > { %v4616_v22 = vmul.f32 %v5193_v58, %v4593_v45  ;;  %v8887_v25 = vpop.permute.xlu2 %4650  ;;  %v5195_v45 = vld [vmem:[%s9039_s5 + $0x638] sm:$0xff] }
 0x7cb   : > { %v4697_v38 = vpop.permute.xlu0 %4696 }
 0x7cc   : > { %v4623_v0 = vadd.f32 %v4616_v22, %v4573_v33  ;;  %v4717_v9 = vmul.f32 %v5208_v54, %v4697_v38  ;;  %v5203_v22 = vld [vmem:[%s9039_s5 + $0x678] sm:$0xff] }
 0x7ce   : > { %v4673_v23 = vadd.f32 %v4666_v8, %v4623_v0 }
 0x7d1   : > { %v4601_v24 = vpop.permute.xlu1 %4600 }
 0x7d2   : > { %v8893_v26 = vpop.permute.xlu2 %4658 }
 0x7d3   : > { %v4705_v7 = vpop.permute.xlu0 %4704 }
 0x7d4   : > { %v4719_v32 = vmul.f32 %v5210_v20, %v4705_v7 }
 0x7d9   : > { %v8891_v11 = vpop.permute.xlu1 %4612 }
 0x7db   : > { %v4693_v46 = vpop.permute.xlu2 %4692  ;;  %v4755_v60 = vpop.permute.xlu0 %4754 }
 0x7dc   : > { %v4716_v39 = vmul.f32 %v5207_v6, %v4693_v46  ;;  %v5217_v6 = vld [vmem:[%s9039_s5 + $0x6e8] sm:$0xff] }
 0x7de   : > { %v4723_v47 = vadd.f32 %v4716_v39, %v4673_v23  ;;  %v4769_v39 = vmul.f32 %v5217_v6, %v4755_v60 }
 0x7e2   : > { %v4647_v35 = vpop.permute.xlu1 %4646 }
 0x7e3   : > { %v4667_v33 = vmul.f32 %v5201_v1, %v4647_v35  ;;  %v4619_v35 = vmul.f32 %v5196_v30, %v8877_v44  ;;  %v5197_v1 = vld [vmem:[%s9039_s5 + $0x648] sm:$0xff]  ;;  %v5202_v44 = vld [vmem:[%s9039_s5 + $0x670] sm:$0xff] }
 0x7e4   : > { %v4743_v12 = vpop.permute.xlu2 %4742  ;;  %v4620_v18 = vmul.f32 %v5197_v1, %v8889_v51 }
 0x7e5   : > { %v4674_v41 = vadd.f32 %v4667_v33, %v4624_v61  ;;  %v4766_v52 = vmul.f32 %v5214_v31, %v4743_v12  ;;  %v4618_v12 = vmul.f32 %v5195_v45, %v4601_v24  ;;  %v4626_v29 = vadd.f32 %v4619_v35, %v8864_v49  ;;  %v5204_v24 = vld [vmem:[%s9039_s5 + $0x680] sm:$0xff]  ;;  %v5211_v49 = vld [vmem:[%s9039_s5 + $0x6b8] sm:$0xff] }
 0x7e6   : > { %v4668_v33 = vmul.f32 %v5202_v44, %v8887_v25  ;;  %v4670_v48 = vmul.f32 %v5204_v24, %v8893_v26  ;;  %v4627_v8 = vadd.f32 %v4620_v18, %v8882_v28 }
 0x7e7   : > { %v4773_v34 = vadd.f32 %v4766_v52, %v4723_v47  ;;  %v4724_v56 = vadd.f32 %v4717_v9, %v4674_v41  ;;  %v4625_v43 = vadd.f32 %v4618_v12, %v8875_v37  ;;  %v5218_v37 = vld [vmem:[%s9039_s5 + $0x6f0] sm:$0xff] }
 0x7e8   : > { %v4677_v25 = vadd.f32 %v4670_v48, %v4627_v8 }
 0x7e9   : > { %v4781_v5 = vsel %vm4779_vm2, %v4773_v34, 0.0  ;;  %v4675_v3 = vadd.f32 %v4668_v33, %v4625_v43 }
 0x7ea   : > { %v4655_v21 = vpop.permute.xlu1 %4654 }
 0x7eb   : > { %v4669_v4 = vmul.f32 %v5203_v22, %v4655_v21  ;;  %v5209_v21 = vld [vmem:[%s9039_s5 + $0x6a8] sm:$0xff] }
 0x7ec   : > { %v4747_v50 = vpop.permute.xlu2 %4746 }
 0x7ed   : > { %v4767_v14 = vmul.f32 %v5215_v17, %v4747_v50 }
 0x7ef   : > { %v4774_v15 = vadd.f32 %v4767_v14, %v4724_v56  ;;  %v5205_v56 = vld [vmem:[%s9039_s5 + $0x688] sm:$0xff] }
 0x7f1   : > { %v4783_v59 = vsel %vm4779_vm2, %v4774_v15, 0.0  ;;  %v4671_v15 = vmul.f32 %v5205_v56, %v8895_v36 }
 0x7f3   : > { %v4689_v13 = vpop.permute.xlu1 %4688 }
 0x7f4   : > { %v4715_v42 = vmul.f32 %v5206_v10, %v4689_v13  ;;  %v4676_v13 = vadd.f32 %v4669_v4, %v4626_v29  ;;  %v5216_v10 = vld [vmem:[%s9039_s5 + $0x6e0] sm:$0xff] }
 0x7f5   : > { %v4709_v0 = vpop.permute.xlu2 %4708 }
 0x7f6   : > { %v4722_v57 = vadd.f32 %v4715_v42, %v4672_v62  ;;  %v4726_v38 = vadd.f32 %v4719_v32, %v4676_v13  ;;  %v4720_v61 = vmul.f32 %v5211_v49, %v4709_v0 }
 0x7f8   : > { %v4776_v50 = vadd.f32 %v4769_v39, %v4726_v38  ;;  %v4727_v23 = vadd.f32 %v4720_v61, %v4677_v25 }
 0x7fa   : > { %v4787_v9 = vsel %vm4779_vm2, %v4776_v50, 0.0 }
 0x7fc   : > { %v4739_v2 = vpop.permute.xlu1 %4738 }
 0x7fd   : > { %v4765_v27 = vmul.f32 %v5213_v63, %v4739_v2  ;;  %v5198_v63 = vld [vmem:[%s9039_s5 + $0x650] sm:$0xff] }
 0x7fe   : > { %v4759_v51 = vpop.permute.xlu2 %4758  ;;  %v4621_v47 = vmul.f32 %v5198_v63, %v8891_v11  ;;  %v5219_v11 = vld [vmem:[%s9039_s5 + $0x6f8] sm:$0xff] }
 0x7ff   : > { %v4772_v40 = vadd.f32 %v4765_v27, %v4722_v57  ;;  %v4770_v19 = vmul.f32 %v5218_v37, %v4759_v51  ;;  %v5212_v57 = vld [vmem:[%s9039_s5 + $0x6c0] sm:$0xff] }
 0x800   : > { %v4628_v27 = vadd.f32 %v4621_v47, %v8862_v53 }
 0x801   : > { %v4780_v58 = vsel %vm4779_vm2, %v4772_v40, 0.0  ;;  %v4777_v52 = vadd.f32 %v4770_v19, %v4727_v23 }
 0x802   : > { %v4782_v16 = vadd.f32 %v4781_v5, %v4780_v58  ;;  %v4678_v30 = vadd.f32 %v4671_v15, %v4628_v27 }
 0x803   : > { %v4789_v14 = vsel %vm4779_vm2, %v4777_v52, 0.0 }
 0x804   : > { %v4784_v46 = vadd.f32 %v4783_v59, %v4782_v16 }
 0x805   : > { %v4701_v55 = vpop.permute.xlu1 %4700 }
 0x806   : > { %v4718_v31 = vmul.f32 %v5209_v21, %v4701_v55 }
 0x808   : > { %v4725_v26 = vadd.f32 %v4718_v31, %v4675_v3 }
 0x80e   : > { %v4751_v54 = vpop.permute.xlu1 %4750 }
 0x80f   : > { %v4768_v17 = vmul.f32 %v5216_v10, %v4751_v54 }
 0x811   : > { %v4775_v41 = vadd.f32 %v4768_v17, %v4725_v26 }
 0x813   : > { %v4785_v42 = vsel %vm4779_vm2, %v4775_v41, 0.0 }
 0x814   : > { %v4786_v28 = vadd.f32 %v4785_v42, %v4784_v46  ;;  %v4799_v46 = vld [vmem:[%s9040_s6] sm:$0x1] }
 0x816   : > { %v4788_v62 = vadd.f32 %v4787_v9, %v4786_v28 }
 0x817   : > { %v4713_v2 = vpop.permute.xlu1 %4712 }
 0x818   : > { %v4790_v34 = vadd.f32 %v4789_v14, %v4788_v62  ;;  %v4721_v40 = vmul.f32 %v5212_v57, %v4713_v2 }
 0x81a   : > { %v4728_v5 = vadd.f32 %v4721_v40, %v4678_v30 }
 0x820   : > { %v4763_v7 = vpop.permute.xlu1 %4762 }
 0x821   : > { %v4771_v58 = vmul.f32 %v5219_v11, %v4763_v7 }
 0x823   : > { %v4778_v45 = vadd.f32 %v4771_v58, %v4728_v5 }
 0x825   : > { %v4791_v22 = vsel %vm4779_vm2, %v4778_v45, 0.0 }
 0x826   : > { %v4792_v0 = vadd.f32 %v4791_v22, %v4790_v34 }
 0x828   : > { %v4793_v16 = vrot.slane %v4792_v0, 4 }
 0x82a   : > { %v4794_v35 = vadd.f32 %v4793_v16, %v4792_v0 }
 0x82c   : > { %v4795_v53 = vrot.slane %v4794_v35, 2 }
 0x82e   : > { %v4796_v59 = vadd.f32 %v4795_v53, %v4794_v35 }
 0x830   : > { %v4797_v36 = vrot.slane %v4796_v59, 1 }
 0x832   : > { %v4798_v12 = vadd.f32 %v4797_v36, %v4796_v59 }
 0x834   : > { %v4800_v4 = vadd.f32 %v4799_v46, %v4798_v12 }
 0x836   : > { %4802 = vst.msk [vmem:[%s270_s21] sm:$0x1] %vm4801_vm9, %v4800_v4 }
 0x837   : > { %5520 = shalt.err (!%p5517_p3)
}
 0x838   : > { %5229 = dma.vmem_to_hbm [thread:$0]  (%p5675_p5), %s4815_s22, 16, %s4817_s23, %s4804_s13  }
 0x839 PF: > { %p5235_p4 = scmp.ge.s32.totalorder %s5555_s27, 2  ;;  %s4828_s17 = sand.u32 1, %s5543_s24  }
 0x83a   : > { %s4829_s20 = scalar_lea.sflag [#allocation5], %s4828_s17 }
 0x83b   : > { %p5232_p7 = pnand %p5235_p4, %p5679_p6 }
 0x83d   : > { %p5233_p8 = pneg %p5232_p7 }
 0x83f   : > { %5538 = dma.done.wait (%p5233_p8), %s4829_s20, 16  }
 0x840   : > { %5540 = vsyncadd (%p5233_p8), %s4829_s20, 4294967280  ;;  %p17_p9 = scmp.ge.s32.totalorder %s5662_s30, 4   ;;  %s9216_s24 = smov %s5547_s25 }
 0x841   : > { %s9217_s25 = smov %s5551_s26  ;;  %s9218_s26 = smov %s5673_s10 }
 0x842   : > { %s9219_s27 = smov %s5662_s30  ;;  %19 = sbr.rel (!%p17_p9) target bundleno = 3 (0x3), region = 117 }
 0x847   :  { %4834 = vsyncpa [#allocation5], 1 }
 0x848   :  { %4836 = vsyncpa [#allocation5 + $0x1], 1 }

</bundles_post_ra>
